<compile_context>
chip_gen: v7x
topology: tpu7x:2x2x1
jax: 0.10.0
libtpu: 0.0.40
codegen_flags: <defaults>
</compile_context>

<pallas_src>
import math

import jax
import jax.numpy as jnp
from jax.experimental import pallas as pl
from jax.experimental.pallas import tpu as pltpu


def _vmem_block_bytes(shape, itemsize=4, sublane=8):
    """Approximate VMEM footprint of one block after (sublane, 128) padding."""
    s = [int(d) for d in shape]
    if len(s) == 1:
        s = [1] + s
    s[-1] = -(-s[-1] // 128) * 128
    s[-2] = -(-s[-2] // sublane) * sublane
    total = itemsize
    for d in s:
        total *= d
    return total


# ----------------------------- Pallas kernel --------------------------------
def _make_pconv_kernel(kh, kw, stride, dilation, oh, ow, l_pad, nb, c_tile,
                       cout, n_c_blocks):
    """Builds the fused partial-conv kernel body (all shape params static)."""
    window = float(kh * kw)
    l_out = oh * ow
    lp = l_out + l_pad
    ck = c_tile * kh * kw

    def build_slabs(img, msk):
        # img, msk: (c_tile, HP, WP) f32 -> (ck, lp) im2col slabs (in VMEM).
        x = img * msk
        x_parts, m_parts = [], []
        # TODO(synk): for stride/dilation > 1, pre-gather the windows once
        # instead of kh*kw strided lane slices.
        for i in range(kh):
            r0 = i * dilation
            r1 = r0 + (oh - 1) * stride + 1
            for j in range(kw):
                c0 = j * dilation
                c1 = c0 + (ow - 1) * stride + 1
                x_parts.append(
                    x[:, r0:r1:stride, c0:c1:stride].reshape(c_tile, l_out))
                m_parts.append(
                    msk[:, r0:r1:stride, c0:c1:stride].reshape(c_tile, l_out))
        x2d = jnp.concatenate(x_parts, axis=0)            # (ck, l_out)
        m2d = jnp.concatenate(m_parts, axis=0)
        if l_pad:                                          # lane-dense padding
            z = jnp.zeros((ck, l_pad), x2d.dtype)
            x2d = jnp.concatenate([x2d, z], axis=1)
            m2d = jnp.concatenate([m2d, z], axis=1)
        return x2d, m2d

    def step_matmul(img_ref, msk_ref, w_ref):
        # One fat MXU matmul: (cout+1, 2*ck) @ (2*ck, nb*lp).  The last weight
        # row is all-ones over the mask half -> the "mask conv" for free.
        xs, ms = [], []
        for b in range(nb):
            x2d, m2d = build_slabs(img_ref[b], msk_ref[b])
            xs.append(x2d)
            ms.append(m2d)
        x_slab = xs[0] if nb == 1 else jnp.concatenate(xs, axis=1)
        m_slab = ms[0] if nb == 1 else jnp.concatenate(ms, axis=1)
        slab = jnp.concatenate([x_slab, m_slab], axis=0)   # (2*ck, nb*lp)
        return jax.lax.dot_general(
            w_ref[0], slab, (((1,), (0,)), ((), ())),
            preferred_element_type=jnp.float32)            # (cout+1, nb*lp)

    def epilogue(res, bias_ref, img_out_ref, mask_out_ref):
        conv = res[:cout, :] + bias_ref[:, 0:1]            # + input_conv.bias
        msum = res[cout:cout + 1, :]                       # mask "ones conv"
        mclamp = jnp.clip(msum, 0.0, 1.0)
        scale = (window / (msum + 1e-8)) * mclamp          # exact mask ratio
        out = conv * scale + bias_ref[:, 1:2]              # + self.bias
        for b in range(nb):                                # 128-aligned slices
            img_out_ref[b] = out[:, b * lp:(b + 1) * lp].astype(
                img_out_ref.dtype)
            mask_out_ref[b] = mclamp[:, b * lp:(b + 1) * lp].astype(
                mask_out_ref.dtype)

    if n_c_blocks == 1:
        # Fast path: no reduction axis, no scratch round-trips, no pl.when.
        def kernel(img_ref, msk_ref, w_ref, bias_ref, img_out_ref,
                   mask_out_ref):
            res = step_matmul(img_ref, msk_ref, w_ref)
            epilogue(res, bias_ref, img_out_ref, mask_out_ref)
    else:
        # Channel-reduction grid axis (last, "arbitrary"): accumulate in f32.
        def kernel(img_ref, msk_ref, w_ref, bias_ref, img_out_ref,
                   mask_out_ref, acc_ref):
            cc = pl.program_id(1)

            @pl.when(cc == 0)
            def _init():
                acc_ref[...] = jnp.zeros_like(acc_ref)

            acc_ref[...] += step_matmul(img_ref, msk_ref, w_ref)

            @pl.when(cc == n_c_blocks - 1)
            def _finalize():
                epilogue(acc_ref[...], bias_ref, img_out_ref, mask_out_ref)

    return kernel


# ------------------------------ wrapper (JAX) --------------------------------
def pconv2d_forward(image, mask, weight, conv_bias=None, out_bias=None,
                    stride=1, dilation=1, c_tile=None, batch_block=None,
                    broadcast_mask=True):
    """Partial-conv forward.  image/mask: NCHW.  weight: OIHW (Cout,Cin,kh,kw)."""
    n, c, h, w_sp = image.shape
    cout, cin, kh, kw = weight.shape
    assert cin == c

    # 'same'-style explicit zero pad (as in the torch module), then VALID conv.
    pad_h, pad_w = kh - 1, kw - 1
    hp, wp = h + pad_h, w_sp + pad_w
    oh = (hp - dilation * (kh - 1) - 1) // stride + 1
    ow = (wp - dilation * (kw - 1) - 1) // stride + 1
    l_out = oh * ow
    lp = pl.cdiv(l_out, 128) * 128             # lane-dense output width
    l_pad = lp - l_out

    # Generation-aware VMEM budget (v7x has only 64 MiB per TensorCore).
    try:
        vmem_cap = int(pltpu.get_tpu_info().vmem_capacity_bytes)
    except Exception:
        vmem_cap = 64 * 1024 * 1024            # conservative fallback
    vmem_budget = int(0.75 * vmem_cap)         # headroom for compiler scratch

    def step_bytes(nb_, ct_):
        ck_ = ct_ * kh * kw
        b = 2 * 2 * _vmem_block_bytes((nb_, ct_, hp, wp))      # img+mask (x2 buf)
        b += 2 * _vmem_block_bytes((1, cout + 1, 2 * ck_))     # weight block
        b += 2 * _vmem_block_bytes((cout, 2))                  # biases
        b += 2 * (_vmem_block_bytes((nb_, cout, lp))
                  + _vmem_block_bytes((nb_, 1, lp)))           # output blocks
        b += _vmem_block_bytes((cout + 1, nb_ * lp))           # accumulator
        b += 4 * _vmem_block_bytes((2 * ck_, nb_ * lp))        # slab temporaries
        return b

    # Batch folding: amortize per-grid-step overhead / fatten the matmul N dim.
    if batch_block is None:
        nb = max(1, min(n, 1024 // lp))
    else:
        nb = max(1, min(batch_block, n))
    while nb > 1 and step_bytes(nb, 1) > vmem_budget:
        nb = (nb + 1) // 2
    # TODO(synk): when batch folding collapses the parallel grid axis to one
    # block on v7x (2 TensorCores), split a spatial/Cout tile as the parallel
    # axis instead so both cores get work.

    # Channel tiling: default is full C (no reduction axis); tile only when the
    # block does not fit the VMEM budget.
    if c_tile is None:
        c_tile = c
        while c_tile > 1 and step_bytes(nb, c_tile) > vmem_budget:
            c_tile = (c_tile + 1) // 2
    else:
        c_tile = max(1, min(c_tile, c))

    n_cb = pl.cdiv(c, c_tile)
    c_pad = n_cb * c_tile
    n_bb = pl.cdiv(n, nb)
    n_pad = n_bb * nb
    ck = c_tile * kh * kw

    # Pad batch/channels (zeros contribute nothing to either conv) and apply
    # the spatial halo in a single pass.
    # TODO(synk): DMA the interior and zero the halo rows inside the kernel to
    # avoid this extra HBM pad pass for large images.
    full_pad = ((0, n_pad - n), (0, c_pad - c),
                (pad_h // 2, pad_h - pad_h // 2),
                (pad_w // 2, pad_w - pad_w // 2))
    img_p = jnp.pad(image.astype(jnp.float32), full_pad)
    msk_p = jnp.pad(mask.astype(jnp.float32), full_pad)

    # Weights: per channel-block flat (Cout, tap*c_local) matrices matching the
    # in-kernel slab row order, plus an all-ones row for the mask conv.
    w_pad = jnp.pad(weight.astype(jnp.float32),
                    ((0, 0), (0, c_pad - c), (0, 0), (0, 0)))
    w_flat = jnp.transpose(w_pad.reshape(cout, n_cb, c_tile, kh, kw),
                           (1, 0, 3, 4, 2)).reshape(n_cb, cout, ck)
    zeros_c = jnp.zeros((n_cb, cout, ck), jnp.float32)
    ones_row = jnp.concatenate([jnp.zeros((n_cb, 1, ck), jnp.float32),
                                jnp.ones((n_cb, 1, ck), jnp.float32)], axis=2)
    w_big = jnp.concatenate(
        [jnp.concatenate([w_flat, zeros_c], axis=2), ones_row], axis=1)

    cb = jnp.zeros((cout,), jnp.float32) if conv_bias is None else conv_bias
    ob = jnp.zeros((cout,), jnp.float32) if out_bias is None else out_bias
    biases = jnp.stack([cb.astype(jnp.float32), ob.astype(jnp.float32)],
                       axis=1)                                   # (cout, 2)

    kern = _make_pconv_kernel(kh, kw, stride, dilation, oh, ow, l_pad, nb,
                              c_tile, cout, n_cb)

    if n_cb == 1:
        grid = (n_bb,)
        sem = ("parallel",)
        im4 = lambda b: (b, 0, 0, 0)
        imw = lambda b: (0, 0, 0)
        imb = lambda b: (0, 0)
        omap = lambda b: (b, 0, 0)
        scratch = ()
    else:
        grid = (n_bb, n_cb)                       # reduction axis last
        sem = ("parallel", "arbitrary")
        im4 = lambda b, cc: (b, cc, 0, 0)
        imw = lambda b, cc: (cc, 0, 0)
        imb = lambda b, cc: (0, 0)
        omap = lambda b, cc: (b, 0, 0)
        scratch = (pltpu.VMEM((cout + 1, nb * lp), jnp.float32),)

    in_specs = [
        pl.BlockSpec((nb, c_tile, hp, wp), im4),
        pl.BlockSpec((nb, c_tile, hp, wp), im4),
        pl.BlockSpec((1, cout + 1, 2 * ck), imw),
        pl.BlockSpec((cout, 2), imb),
    ]
    out_specs = [
        pl.BlockSpec((nb, cout, lp), omap),        # lane-dense (Lp % 128 == 0)
        pl.BlockSpec((nb, 1, lp), omap),           # mask stored once per pixel
    ]
    out_shape = (jax.ShapeDtypeStruct((n_pad, cout, lp), jnp.float32),
                 jax.ShapeDtypeStruct((n_pad, 1, lp), jnp.float32))

    vmem_limit = int(min(vmem_budget,
                         max(32 * 1024 * 1024, 2 * step_bytes(nb, c_tile))))

    flops = (4 * n_pad * lp * (cout + 1) * c_pad * kh * kw    # stacked matmul
             + 6 * n_pad * lp * cout)                         # epilogue
    bytes_accessed = (2 * n_pad * c_pad * hp * wp * 4
                      + n_cb * (cout + 1) * 2 * ck * 4
                      + n_pad * (cout + 1) * lp * 4)
    cost = pl.CostEstimate(flops=int(flops), transcendentals=int(n_pad * lp),
                           bytes_accessed=int(bytes_accessed))

    img_out, mask_out = pl.pallas_call(
        kern,
        out_shape=out_shape,
        grid_spec=pltpu.PrefetchScalarGridSpec(
            num_scalar_prefetch=0,
            grid=grid,
            in_specs=in_specs,
            out_specs=out_specs,
            scratch_shapes=scratch),
        compiler_params=pltpu.CompilerParams(
            dimension_semantics=sem,
            vmem_limit_bytes=vmem_limit),
        cost_estimate=cost,
    )(img_p, msk_p, w_big, biases)

    img_out = img_out[:n, :, :l_out].reshape(n, cout, oh, ow)
    mask_out = mask_out[:n, :, :l_out].reshape(n, 1, oh, ow)
    if broadcast_mask:
        # Channel-invariant; broadcast is lazy / fuses into the consumer.
        mask_out = jnp.broadcast_to(mask_out, (n, cout, oh, ow))
    return img_out, mask_out


# ---------------------------- pure-JAX reference ------------------------------
def _reference(image, mask, weight, conv_bias, out_bias, stride, dilation):
    cout, cin, kh, kw = weight.shape
    pad_h, pad_w = kh - 1, kw - 1
    pad = ((0, 0), (0, 0),
           (pad_h // 2, pad_h - pad_h // 2),
           (pad_w // 2, pad_w - pad_w // 2))
    img_p = jnp.pad(image, pad)
    mask_p = jnp.pad(mask, pad)
    dn = jax.lax.conv_dimension_numbers(img_p.shape, weight.shape,
                                        ('NCHW', 'OIHW', 'NCHW'))
    conv = jax.lax.conv_general_dilated(
        img_p * mask_p, weight, (stride, stride), 'VALID',
        rhs_dilation=(dilation, dilation), dimension_numbers=dn)
    conv = conv + conv_bias.reshape(1, -1, 1, 1)
    mconv = jax.lax.conv_general_dilated(
        mask_p, jnp.ones_like(weight), (stride, stride), 'VALID',
        rhs_dilation=(dilation, dilation), dimension_numbers=dn)
    ratio = (kh * kw) / (mconv + 1e-8)
    mclamp = jnp.clip(mconv, 0.0, 1.0)
    img = conv * ratio * mclamp
    if out_bias is not None:
        img = img + out_bias.reshape(1, -1, 1, 1)
    return img, mclamp


# ----------------------------------- main -------------------------------------
if __name__ == "__main__":
    key = jax.random.PRNGKey(0)
    k_img, k_mask, k_w = jax.random.split(key, 3)

    N, Cin, H, W = 2, 4, 16, 16
    Cout, K = 8, 3
    stride, dilation = 1, 1

    image = jax.random.normal(k_img, (N, Cin, H, W), dtype=jnp.float32)
    mask = (jax.random.uniform(k_mask, (N, Cin, H, W)) > 0.3).astype(jnp.float32)

    # Deterministic params matching the module __init__: kaiming-normal
    # (fan_out, relu) conv weight, zero input_conv.bias, ones mask_conv weight
    # (folded into the kernel), zero self.bias (out_bias=None skips it).
    fan_out = Cout * K * K
    w_std = math.sqrt(2.0 / fan_out)
    weight = w_std * jax.random.normal(k_w, (Cout, Cin, K, K), dtype=jnp.float32)
    conv_bias = jnp.zeros((Cout,), dtype=jnp.float32)

    ref_img, ref_mask = _reference(image, mask, weight, conv_bias, None,
                                   stride, dilation)
    ref_mask_b = jnp.broadcast_to(ref_mask[:, :1], (N, Cout, H, W))

    # 1) Auto path: c_tile = Cin (no reduction axis), batch folded (Nb=2),
    #    single fat matmul per grid step.
    fwd = jax.jit(lambda im, mk: pconv2d_forward(im, mk, weight, conv_bias,
                                                 out_bias=None, stride=stride,
                                                 dilation=dilation))
    img_out, mask_out = fwd(image, mask)
    jax.block_until_ready((img_out, mask_out))
    assert img_out.shape == (N, Cout, H, W) and mask_out.shape == (N, Cout, H, W)
    assert jnp.allclose(img_out, ref_img, atol=2e-2, rtol=2e-2)
    assert jnp.allclose(mask_out, ref_mask_b, atol=1e-5)

    # 2) Forced channel-reduction path (c_tile < Cin, no batch folding) to
    #    validate the accumulate/finalize branch on-device as well.
    img_out2, mask_out2 = pconv2d_forward(image, mask, weight, conv_bias,
                                          out_bias=None, stride=stride,
                                          dilation=dilation, c_tile=2,
                                          batch_block=1)
    jax.block_until_ready((img_out2, mask_out2))
    assert jnp.allclose(img_out2, ref_img, atol=2e-2, rtol=2e-2)
    assert jnp.allclose(mask_out2, ref_mask_b, atol=1e-5)

    print("KERNEL_OK")
</pallas_src>

<mosaic_0001>
module attributes {stable_mosaic.version = 11 : i64} {
  func.func @kernel(%arg0: i32, %arg1: memref<2x4x18x18xf32, #tpu.memory_space<vmem>>, %arg2: memref<2x4x18x18xf32, #tpu.memory_space<vmem>>, %arg3: memref<1x9x72xf32, #tpu.memory_space<vmem>>, %arg4: memref<8x2xf32, #tpu.memory_space<vmem>>, %arg5: memref<2x8x256xf32, #tpu.memory_space<vmem>>, %arg6: memref<2x1x256xf32, #tpu.memory_space<vmem>>) attributes {dimension_semantics = [#tpu.dimension_semantics<parallel>], iteration_bounds = array<i64: 1>, scalar_prefetch = 0 : i64, scratch_operands = 0 : i64, tpu.core_type = #tpu.core_type<tc>, window_params = [{transform_indices = @transform_0, window_bounds = array<i64: 2, 4, 18, 18>}, {transform_indices = @transform_1, window_bounds = array<i64: 2, 4, 18, 18>}, {pipeline_mode = #tpu.pipeline_mode<synchronous>, transform_indices = @transform_2, window_bounds = array<i64: 1, 9, 72>}, {pipeline_mode = #tpu.pipeline_mode<synchronous>, transform_indices = @transform_3, window_bounds = array<i64: 8, 2>}, {transform_indices = @transform_4, window_bounds = array<i64: 2, 8, 256>}, {transform_indices = @transform_5, window_bounds = array<i64: 2, 1, 256>}]} {
    %c0 = arith.constant 0 : index
    %c0_0 = arith.constant 0 : index
    %c0_1 = arith.constant 0 : index
    %c0_2 = arith.constant 0 : index
    %0 = vector.load %arg1[%c0, %c0_0, %c0_1, %c0_2] : memref<2x4x18x18xf32, #tpu.memory_space<vmem>>, vector<1x4x18x18xf32>
    %1 = vector.shape_cast %0 : vector<1x4x18x18xf32> to vector<4x18x18xf32>
    %c0_3 = arith.constant 0 : index
    %c0_4 = arith.constant 0 : index
    %c0_5 = arith.constant 0 : index
    %c0_6 = arith.constant 0 : index
    %2 = vector.load %arg2[%c0_3, %c0_4, %c0_5, %c0_6] : memref<2x4x18x18xf32, #tpu.memory_space<vmem>>, vector<1x4x18x18xf32>
    %3 = vector.shape_cast %2 : vector<1x4x18x18xf32> to vector<4x18x18xf32>
    %4 = arith.mulf %1, %3 : vector<4x18x18xf32>
    %5 = vector.extract_strided_slice %4 {offsets = [0, 0, 0], sizes = [4, 16, 16], strides = [1, 1, 1]} : vector<4x18x18xf32> to vector<4x16x16xf32>
    %6 = vector.shape_cast %5 : vector<4x16x16xf32> to vector<4x256xf32>
    %7 = vector.extract_strided_slice %3 {offsets = [0, 0, 0], sizes = [4, 16, 16], strides = [1, 1, 1]} : vector<4x18x18xf32> to vector<4x16x16xf32>
    %8 = vector.shape_cast %7 : vector<4x16x16xf32> to vector<4x256xf32>
    %9 = vector.extract_strided_slice %4 {offsets = [0, 0, 1], sizes = [4, 16, 16], strides = [1, 1, 1]} : vector<4x18x18xf32> to vector<4x16x16xf32>
    %10 = vector.shape_cast %9 : vector<4x16x16xf32> to vector<4x256xf32>
    %11 = vector.extract_strided_slice %3 {offsets = [0, 0, 1], sizes = [4, 16, 16], strides = [1, 1, 1]} : vector<4x18x18xf32> to vector<4x16x16xf32>
    %12 = vector.shape_cast %11 : vector<4x16x16xf32> to vector<4x256xf32>
    %13 = vector.extract_strided_slice %4 {offsets = [0, 0, 2], sizes = [4, 16, 16], strides = [1, 1, 1]} : vector<4x18x18xf32> to vector<4x16x16xf32>
    %14 = vector.shape_cast %13 : vector<4x16x16xf32> to vector<4x256xf32>
    %15 = vector.extract_strided_slice %3 {offsets = [0, 0, 2], sizes = [4, 16, 16], strides = [1, 1, 1]} : vector<4x18x18xf32> to vector<4x16x16xf32>
    %16 = vector.shape_cast %15 : vector<4x16x16xf32> to vector<4x256xf32>
    %17 = vector.extract_strided_slice %4 {offsets = [0, 1, 0], sizes = [4, 16, 16], strides = [1, 1, 1]} : vector<4x18x18xf32> to vector<4x16x16xf32>
    %18 = vector.shape_cast %17 : vector<4x16x16xf32> to vector<4x256xf32>
    %19 = vector.extract_strided_slice %3 {offsets = [0, 1, 0], sizes = [4, 16, 16], strides = [1, 1, 1]} : vector<4x18x18xf32> to vector<4x16x16xf32>
    %20 = vector.shape_cast %19 : vector<4x16x16xf32> to vector<4x256xf32>
    %21 = vector.extract_strided_slice %4 {offsets = [0, 1, 1], sizes = [4, 16, 16], strides = [1, 1, 1]} : vector<4x18x18xf32> to vector<4x16x16xf32>
    %22 = vector.shape_cast %21 : vector<4x16x16xf32> to vector<4x256xf32>
    %23 = vector.extract_strided_slice %3 {offsets = [0, 1, 1], sizes = [4, 16, 16], strides = [1, 1, 1]} : vector<4x18x18xf32> to vector<4x16x16xf32>
    %24 = vector.shape_cast %23 : vector<4x16x16xf32> to vector<4x256xf32>
    %25 = vector.extract_strided_slice %4 {offsets = [0, 1, 2], sizes = [4, 16, 16], strides = [1, 1, 1]} : vector<4x18x18xf32> to vector<4x16x16xf32>
    %26 = vector.shape_cast %25 : vector<4x16x16xf32> to vector<4x256xf32>
    %27 = vector.extract_strided_slice %3 {offsets = [0, 1, 2], sizes = [4, 16, 16], strides = [1, 1, 1]} : vector<4x18x18xf32> to vector<4x16x16xf32>
    %28 = vector.shape_cast %27 : vector<4x16x16xf32> to vector<4x256xf32>
    %29 = vector.extract_strided_slice %4 {offsets = [0, 2, 0], sizes = [4, 16, 16], strides = [1, 1, 1]} : vector<4x18x18xf32> to vector<4x16x16xf32>
    %30 = vector.shape_cast %29 : vector<4x16x16xf32> to vector<4x256xf32>
    %31 = vector.extract_strided_slice %3 {offsets = [0, 2, 0], sizes = [4, 16, 16], strides = [1, 1, 1]} : vector<4x18x18xf32> to vector<4x16x16xf32>
    %32 = vector.shape_cast %31 : vector<4x16x16xf32> to vector<4x256xf32>
    %33 = vector.extract_strided_slice %4 {offsets = [0, 2, 1], sizes = [4, 16, 16], strides = [1, 1, 1]} : vector<4x18x18xf32> to vector<4x16x16xf32>
    %34 = vector.shape_cast %33 : vector<4x16x16xf32> to vector<4x256xf32>
    %35 = vector.extract_strided_slice %3 {offsets = [0, 2, 1], sizes = [4, 16, 16], strides = [1, 1, 1]} : vector<4x18x18xf32> to vector<4x16x16xf32>
    %36 = vector.shape_cast %35 : vector<4x16x16xf32> to vector<4x256xf32>
    %37 = vector.extract_strided_slice %4 {offsets = [0, 2, 2], sizes = [4, 16, 16], strides = [1, 1, 1]} : vector<4x18x18xf32> to vector<4x16x16xf32>
    %38 = vector.shape_cast %37 : vector<4x16x16xf32> to vector<4x256xf32>
    %39 = vector.extract_strided_slice %3 {offsets = [0, 2, 2], sizes = [4, 16, 16], strides = [1, 1, 1]} : vector<4x18x18xf32> to vector<4x16x16xf32>
    %40 = vector.shape_cast %39 : vector<4x16x16xf32> to vector<4x256xf32>
    %41 = tpu.concatenate %6, %10, %14, %18, %22, %26, %30, %34, %38 in 0 : vector<4x256xf32>, vector<4x256xf32>, vector<4x256xf32>, vector<4x256xf32>, vector<4x256xf32>, vector<4x256xf32>, vector<4x256xf32>, vector<4x256xf32>, vector<4x256xf32> -> vector<36x256xf32>
    %42 = tpu.concatenate %8, %12, %16, %20, %24, %28, %32, %36, %40 in 0 : vector<4x256xf32>, vector<4x256xf32>, vector<4x256xf32>, vector<4x256xf32>, vector<4x256xf32>, vector<4x256xf32>, vector<4x256xf32>, vector<4x256xf32>, vector<4x256xf32> -> vector<36x256xf32>
    %c1 = arith.constant 1 : index
    %c0_7 = arith.constant 0 : index
    %c0_8 = arith.constant 0 : index
    %c0_9 = arith.constant 0 : index
    %43 = vector.load %arg1[%c1, %c0_7, %c0_8, %c0_9] : memref<2x4x18x18xf32, #tpu.memory_space<vmem>>, vector<1x4x18x18xf32>
    %44 = vector.shape_cast %43 : vector<1x4x18x18xf32> to vector<4x18x18xf32>
    %c1_10 = arith.constant 1 : index
    %c0_11 = arith.constant 0 : index
    %c0_12 = arith.constant 0 : index
    %c0_13 = arith.constant 0 : index
    %45 = vector.load %arg2[%c1_10, %c0_11, %c0_12, %c0_13] : memref<2x4x18x18xf32, #tpu.memory_space<vmem>>, vector<1x4x18x18xf32>
    %46 = vector.shape_cast %45 : vector<1x4x18x18xf32> to vector<4x18x18xf32>
    %47 = arith.mulf %44, %46 : vector<4x18x18xf32>
    %48 = vector.extract_strided_slice %47 {offsets = [0, 0, 0], sizes = [4, 16, 16], strides = [1, 1, 1]} : vector<4x18x18xf32> to vector<4x16x16xf32>
    %49 = vector.shape_cast %48 : vector<4x16x16xf32> to vector<4x256xf32>
    %50 = vector.extract_strided_slice %46 {offsets = [0, 0, 0], sizes = [4, 16, 16], strides = [1, 1, 1]} : vector<4x18x18xf32> to vector<4x16x16xf32>
    %51 = vector.shape_cast %50 : vector<4x16x16xf32> to vector<4x256xf32>
    %52 = vector.extract_strided_slice %47 {offsets = [0, 0, 1], sizes = [4, 16, 16], strides = [1, 1, 1]} : vector<4x18x18xf32> to vector<4x16x16xf32>
    %53 = vector.shape_cast %52 : vector<4x16x16xf32> to vector<4x256xf32>
    %54 = vector.extract_strided_slice %46 {offsets = [0, 0, 1], sizes = [4, 16, 16], strides = [1, 1, 1]} : vector<4x18x18xf32> to vector<4x16x16xf32>
    %55 = vector.shape_cast %54 : vector<4x16x16xf32> to vector<4x256xf32>
    %56 = vector.extract_strided_slice %47 {offsets = [0, 0, 2], sizes = [4, 16, 16], strides = [1, 1, 1]} : vector<4x18x18xf32> to vector<4x16x16xf32>
    %57 = vector.shape_cast %56 : vector<4x16x16xf32> to vector<4x256xf32>
    %58 = vector.extract_strided_slice %46 {offsets = [0, 0, 2], sizes = [4, 16, 16], strides = [1, 1, 1]} : vector<4x18x18xf32> to vector<4x16x16xf32>
    %59 = vector.shape_cast %58 : vector<4x16x16xf32> to vector<4x256xf32>
    %60 = vector.extract_strided_slice %47 {offsets = [0, 1, 0], sizes = [4, 16, 16], strides = [1, 1, 1]} : vector<4x18x18xf32> to vector<4x16x16xf32>
    %61 = vector.shape_cast %60 : vector<4x16x16xf32> to vector<4x256xf32>
    %62 = vector.extract_strided_slice %46 {offsets = [0, 1, 0], sizes = [4, 16, 16], strides = [1, 1, 1]} : vector<4x18x18xf32> to vector<4x16x16xf32>
    %63 = vector.shape_cast %62 : vector<4x16x16xf32> to vector<4x256xf32>
    %64 = vector.extract_strided_slice %47 {offsets = [0, 1, 1], sizes = [4, 16, 16], strides = [1, 1, 1]} : vector<4x18x18xf32> to vector<4x16x16xf32>
    %65 = vector.shape_cast %64 : vector<4x16x16xf32> to vector<4x256xf32>
    %66 = vector.extract_strided_slice %46 {offsets = [0, 1, 1], sizes = [4, 16, 16], strides = [1, 1, 1]} : vector<4x18x18xf32> to vector<4x16x16xf32>
    %67 = vector.shape_cast %66 : vector<4x16x16xf32> to vector<4x256xf32>
    %68 = vector.extract_strided_slice %47 {offsets = [0, 1, 2], sizes = [4, 16, 16], strides = [1, 1, 1]} : vector<4x18x18xf32> to vector<4x16x16xf32>
    %69 = vector.shape_cast %68 : vector<4x16x16xf32> to vector<4x256xf32>
    %70 = vector.extract_strided_slice %46 {offsets = [0, 1, 2], sizes = [4, 16, 16], strides = [1, 1, 1]} : vector<4x18x18xf32> to vector<4x16x16xf32>
    %71 = vector.shape_cast %70 : vector<4x16x16xf32> to vector<4x256xf32>
    %72 = vector.extract_strided_slice %47 {offsets = [0, 2, 0], sizes = [4, 16, 16], strides = [1, 1, 1]} : vector<4x18x18xf32> to vector<4x16x16xf32>
    %73 = vector.shape_cast %72 : vector<4x16x16xf32> to vector<4x256xf32>
    %74 = vector.extract_strided_slice %46 {offsets = [0, 2, 0], sizes = [4, 16, 16], strides = [1, 1, 1]} : vector<4x18x18xf32> to vector<4x16x16xf32>
    %75 = vector.shape_cast %74 : vector<4x16x16xf32> to vector<4x256xf32>
    %76 = vector.extract_strided_slice %47 {offsets = [0, 2, 1], sizes = [4, 16, 16], strides = [1, 1, 1]} : vector<4x18x18xf32> to vector<4x16x16xf32>
    %77 = vector.shape_cast %76 : vector<4x16x16xf32> to vector<4x256xf32>
    %78 = vector.extract_strided_slice %46 {offsets = [0, 2, 1], sizes = [4, 16, 16], strides = [1, 1, 1]} : vector<4x18x18xf32> to vector<4x16x16xf32>
    %79 = vector.shape_cast %78 : vector<4x16x16xf32> to vector<4x256xf32>
    %80 = vector.extract_strided_slice %47 {offsets = [0, 2, 2], sizes = [4, 16, 16], strides = [1, 1, 1]} : vector<4x18x18xf32> to vector<4x16x16xf32>
    %81 = vector.shape_cast %80 : vector<4x16x16xf32> to vector<4x256xf32>
    %82 = vector.extract_strided_slice %46 {offsets = [0, 2, 2], sizes = [4, 16, 16], strides = [1, 1, 1]} : vector<4x18x18xf32> to vector<4x16x16xf32>
    %83 = vector.shape_cast %82 : vector<4x16x16xf32> to vector<4x256xf32>
    %84 = tpu.concatenate %49, %53, %57, %61, %65, %69, %73, %77, %81 in 0 : vector<4x256xf32>, vector<4x256xf32>, vector<4x256xf32>, vector<4x256xf32>, vector<4x256xf32>, vector<4x256xf32>, vector<4x256xf32>, vector<4x256xf32>, vector<4x256xf32> -> vector<36x256xf32>
    %85 = tpu.concatenate %51, %55, %59, %63, %67, %71, %75, %79, %83 in 0 : vector<4x256xf32>, vector<4x256xf32>, vector<4x256xf32>, vector<4x256xf32>, vector<4x256xf32>, vector<4x256xf32>, vector<4x256xf32>, vector<4x256xf32>, vector<4x256xf32> -> vector<36x256xf32>
    %86 = tpu.concatenate %41, %84 in 1 : vector<36x256xf32>, vector<36x256xf32> -> vector<36x512xf32>
    %87 = tpu.concatenate %42, %85 in 1 : vector<36x256xf32>, vector<36x256xf32> -> vector<36x512xf32>
    %88 = tpu.concatenate %86, %87 in 0 : vector<36x512xf32>, vector<36x512xf32> -> vector<72x512xf32>
    %c0_14 = arith.constant 0 : index
    %c0_15 = arith.constant 0 : index
    %c0_16 = arith.constant 0 : index
    %89 = vector.load %arg3[%c0_14, %c0_15, %c0_16] : memref<1x9x72xf32, #tpu.memory_space<vmem>>, vector<1x9x72xf32>
    %90 = vector.shape_cast %89 : vector<1x9x72xf32> to vector<9x72xf32>
    %cst = arith.constant dense<0.000000e+00> : vector<9x512xf32>
    %91 = tpu.matmul %90, %88, %cst {dimension_numbers = #tpu.dot_dimension_numbers<[1], [0], [0], [1], [0, 0, 1, 1], [], []>} : vector<9x72xf32>, vector<72x512xf32>, vector<9x512xf32> -> vector<9x512xf32>
    %92 = vector.extract_strided_slice %91 {offsets = [0, 0], sizes = [8, 512], strides = [1, 1]} : vector<9x512xf32> to vector<8x512xf32>
    %c0_17 = arith.constant 0 : index
    %c0_18 = arith.constant 0 : index
    %93 = vector.load %arg4[%c0_17, %c0_18] : memref<8x2xf32, #tpu.memory_space<vmem>>, vector<8x1xf32>
    %94 = vector.broadcast %93 : vector<8x1xf32> to vector<8x512xf32>
    %95 = arith.addf %92, %94 : vector<8x512xf32>
    %96 = vector.extract_strided_slice %91 {offsets = [8, 0], sizes = [1, 512], strides = [1, 1]} : vector<9x512xf32> to vector<1x512xf32>
    %cst_19 = arith.constant 0.000000e+00 : f32
    %cst_20 = arith.constant 1.000000e+00 : f32
    %97 = vector.broadcast %cst_19 : f32 to vector<1x512xf32>
    %98 = arith.maximumf %97, %96 : vector<1x512xf32>
    %99 = vector.broadcast %cst_20 : f32 to vector<1x512xf32>
    %100 = arith.minimumf %99, %98 : vector<1x512xf32>
    %cst_21 = arith.constant 9.99999993E-9 : f32
    %101 = vector.broadcast %cst_21 : f32 to vector<1x512xf32>
    %102 = arith.addf %96, %101 : vector<1x512xf32>
    %cst_22 = arith.constant 9.000000e+00 : f32
    %103 = vector.broadcast %cst_22 : f32 to vector<1x512xf32>
    %104 = arith.divf %103, %102 : vector<1x512xf32>
    %105 = arith.mulf %104, %100 : vector<1x512xf32>
    %106 = vector.broadcast %105 : vector<1x512xf32> to vector<8x512xf32>
    %107 = arith.mulf %95, %106 : vector<8x512xf32>
    %c0_23 = arith.constant 0 : index
    %c1_24 = arith.constant 1 : index
    %108 = vector.load %arg4[%c0_23, %c1_24] : memref<8x2xf32, #tpu.memory_space<vmem>>, vector<8x1xf32>
    %109 = vector.broadcast %108 : vector<8x1xf32> to vector<8x512xf32>
    %110 = arith.addf %107, %109 : vector<8x512xf32>
    %111 = vector.extract_strided_slice %110 {offsets = [0, 0], sizes = [8, 256], strides = [1, 1]} : vector<8x512xf32> to vector<8x256xf32>
    %c0_25 = arith.constant 0 : index
    %c0_26 = arith.constant 0 : index
    %c0_27 = arith.constant 0 : index
    %112 = vector.load %arg5[%c0_25, %c0_26, %c0_27] : memref<2x8x256xf32, #tpu.memory_space<vmem>>, vector<1x8x256xf32>
    %113 = vector.shape_cast %112 : vector<1x8x256xf32> to vector<8x256xf32>
    %114 = vector.shape_cast %111 : vector<8x256xf32> to vector<1x8x256xf32>
    tpu.vector_store %arg5[%c0_25, %c0_26, %c0_27], %114 {strides = array<i32>} : memref<2x8x256xf32, #tpu.memory_space<vmem>>, vector<1x8x256xf32>,
    %115 = vector.extract_strided_slice %100 {offsets = [0, 0], sizes = [1, 256], strides = [1, 1]} : vector<1x512xf32> to vector<1x256xf32>
    %c0_28 = arith.constant 0 : index
    %c0_29 = arith.constant 0 : index
    %c0_30 = arith.constant 0 : index
    %116 = vector.load %arg6[%c0_28, %c0_29, %c0_30] : memref<2x1x256xf32, #tpu.memory_space<vmem>>, vector<1x1x256xf32>
    %117 = vector.shape_cast %116 : vector<1x1x256xf32> to vector<1x256xf32>
    %118 = vector.shape_cast %115 : vector<1x256xf32> to vector<1x1x256xf32>
    tpu.vector_store %arg6[%c0_28, %c0_29, %c0_30], %118 {strides = array<i32>} : memref<2x1x256xf32, #tpu.memory_space<vmem>>, vector<1x1x256xf32>,
    %119 = vector.extract_strided_slice %110 {offsets = [0, 256], sizes = [8, 256], strides = [1, 1]} : vector<8x512xf32> to vector<8x256xf32>
    %c1_31 = arith.constant 1 : index
    %c0_32 = arith.constant 0 : index
    %c0_33 = arith.constant 0 : index
    %120 = vector.load %arg5[%c1_31, %c0_32, %c0_33] : memref<2x8x256xf32, #tpu.memory_space<vmem>>, vector<1x8x256xf32>
    %121 = vector.shape_cast %120 : vector<1x8x256xf32> to vector<8x256xf32>
    %122 = vector.shape_cast %119 : vector<8x256xf32> to vector<1x8x256xf32>
    tpu.vector_store %arg5[%c1_31, %c0_32, %c0_33], %122 {strides = array<i32>} : memref<2x8x256xf32, #tpu.memory_space<vmem>>, vector<1x8x256xf32>,
    %123 = vector.extract_strided_slice %100 {offsets = [0, 256], sizes = [1, 256], strides = [1, 1]} : vector<1x512xf32> to vector<1x256xf32>
    %c1_34 = arith.constant 1 : index
    %c0_35 = arith.constant 0 : index
    %c0_36 = arith.constant 0 : index
    %124 = vector.load %arg6[%c1_34, %c0_35, %c0_36] : memref<2x1x256xf32, #tpu.memory_space<vmem>>, vector<1x1x256xf32>
    %125 = vector.shape_cast %124 : vector<1x1x256xf32> to vector<1x256xf32>
    %126 = vector.shape_cast %123 : vector<1x256xf32> to vector<1x1x256xf32>
    tpu.vector_store %arg6[%c1_34, %c0_35, %c0_36], %126 {strides = array<i32>} : memref<2x1x256xf32, #tpu.memory_space<vmem>>, vector<1x1x256xf32>,
    return
  }
  func.func @transform_0(%arg0: i32) -> (i32, i32, i32, i32) {
    %c0_i32 = arith.constant 0 : i32
    %c0_i32_0 = arith.constant 0 : i32
    %c0_i32_1 = arith.constant 0 : i32
    %c0_i32_2 = arith.constant 0 : i32
    return %arg0, %c0_i32, %c0_i32_0, %c0_i32_1 : i32, i32, i32, i32
  }
  func.func @transform_1(%arg0: i32) -> (i32, i32, i32, i32) {
    %c0_i32 = arith.constant 0 : i32
    %c0_i32_0 = arith.constant 0 : i32
    %c0_i32_1 = arith.constant 0 : i32
    %c0_i32_2 = arith.constant 0 : i32
    return %arg0, %c0_i32, %c0_i32_0, %c0_i32_1 : i32, i32, i32, i32
  }
  func.func @transform_2(%arg0: i32) -> (i32, i32, i32) {
    %c0_i32 = arith.constant 0 : i32
    %c0_i32_0 = arith.constant 0 : i32
    %c0_i32_1 = arith.constant 0 : i32
    %c0_i32_2 = arith.constant 0 : i32
    return %c0_i32, %c0_i32_0, %c0_i32_1 : i32, i32, i32
  }
  func.func @transform_3(%arg0: i32) -> (i32, i32) {
    %c0_i32 = arith.constant 0 : i32
    %c0_i32_0 = arith.constant 0 : i32
    %c0_i32_1 = arith.constant 0 : i32
    return %c0_i32, %c0_i32_0 : i32, i32
  }
  func.func @transform_4(%arg0: i32) -> (i32, i32, i32) {
    %c0_i32 = arith.constant 0 : i32
    %c0_i32_0 = arith.constant 0 : i32
    %c0_i32_1 = arith.constant 0 : i32
    return %arg0, %c0_i32, %c0_i32_0 : i32, i32, i32
  }
  func.func @transform_5(%arg0: i32) -> (i32, i32, i32) {
    %c0_i32 = arith.constant 0 : i32
    %c0_i32_0 = arith.constant 0 : i32
    %c0_i32_1 = arith.constant 0 : i32
    return %arg0, %c0_i32, %c0_i32_0 : i32, i32, i32
  }
}

</mosaic_0001>

<bundles_post_ra>
// kernel: _lambda_.1
= control target key start
LH: loop header
LB: loop body
LE: loop exit
PB: predicated region body
PF: predicated region fallthrough
CT: control target
= control target key end

     0   :  { %v14991_v0 = vlaneseq  ;;  %v10011_v4 = vmov 1983009808   ;;  %v10012_v6 = vmov 1934713408   ;;  %v14992_v8 = vmov 0.0   ;;  %s10014_s25 = smov 64   ;;  %s14985_s0 = inlined_call_operand.vmem [shape: f32[2,4,18,18], index: 0, kind: input, shape index: {}]   ;;  %s14986_s1 = inlined_call_operand.vmem [shape: f32[2,4,18,18], index: 1, kind: input, shape index: {}]   ;;  %s14987_s2 = inlined_call_operand.vmem [shape: f32[1,9,72], index: 2, kind: input, shape index: {}]   ;;  %s14988_s3 = inlined_call_operand.vmem [shape: f32[8,2], index: 3, kind: input, shape index: {}]   ;;  %s14989_s5 = inlined_call_operand.vmem [shape: f32[2,1,256], index: 5, kind: output, shape index: {1}]   ;;  %s14990_s4 = inlined_call_operand.vmem [shape: f32[2,8,256], index: 4, kind: output, shape index: {0}]  }
   0x1   :  { %v19_v1 = vld [vmem:[%s14985_s0] sm:$0xff]  ;;  %v20_v2 = vld [vmem:[%s14985_s0 + $0x8] sm:$0xff]  ;;  %v22_v3 = vld [vmem:[%s14985_s0 + $0x18] sm:$0xff]  ;;  %v58_v5 = vunpack.c.l.s4 %v10011_v4  ;;  %v90_v7 = vunpack.c.l.s4 %v10012_v6  ;;  %8648 = vmatprep.mubr.f32.mxu0 %v14992_v8  ;;  %8725 = vmatprep.mubr.f32.mxu1 %v14992_v8  ;;  %s10015_s26 = smov 32   ;;  %s10016_s27 = smov 96   ;;  %vm1414_vm0 = vcmask 1046528  }
   0x2   :  { %v23_v9 = vld [vmem:[%s14985_s0 + $0x20] sm:$0xff]  ;;  %v25_v10 = vld [vmem:[%s14985_s0 + $0x30] sm:$0xff]  ;;  %v26_v11 = vld [vmem:[%s14985_s0 + $0x38] sm:$0xff]  ;;  %v10077_v12 = vshrl.u32 %v14991_v0, 7  ;;  %s10017_s28 = smov 16   ;;  %s10018_s29 = smov 48  }
   0x3   :  { %v28_v13 = vld [vmem:[%s14985_s0 + $0x48] sm:$0xff]  ;;  %v29_v14 = vld [vmem:[%s14985_s0 + $0x50] sm:$0xff]  ;;  %v10088_v15 = vld [vmem:[%s14986_s1] sm:$0xff]  ;;  %v59_v16 = vunpack.c.0.s8 %v58_v5  ;;  %v91_v17 = vunpack.c.0.s8 %v90_v7  ;;  %s10019_s30 = smov 80   ;;  %s10020_s6 = smov 112   ;;  %vm247_vm1 = vcmask 130048  }
   0x4   :  { %15189 = vst [vmem:[#allocation2_spill] sm:$0xff] %v10077_v12  ;;  %v10093_v18 = vld [vmem:[%s14986_s1 + $0x8] sm:$0xff]  ;;  %v10098_v19 = vld [vmem:[%s14986_s1 + $0x18] sm:$0xff]  ;;  %v10103_v20 = vld [vmem:[%s14986_s1 + $0x20] sm:$0xff]  ;;  %v10106_v21 = vmul.f32 %v10088_v15, %v19_v1  ;;  %s10021_s7 = smov 127   ;;  %s10022_s8 = smov 126  }
   0x5   :  { %v10111_v22 = vld [vmem:[%s14986_s1 + $0x30] sm:$0xff]  ;;  %v10116_v23 = vld [vmem:[%s14986_s1 + $0x38] sm:$0xff]  ;;  %v10121_v24 = vld [vmem:[%s14986_s1 + $0x48] sm:$0xff]  ;;  %v10124_v25 = vmul.f32 %v10093_v18, %v20_v2  ;;  %v10127_v26 = vmul.f32 %v10098_v19, %v22_v3  ;;  %v10130_v27 = vmul.f32 %v10103_v20, %v23_v9  ;;  %v10133_v28 = vsub.s32 %v59_v16, %v10077_v12 }
   0x6   :  { %15190 = vst [vmem:[#allocation3_spill] sm:$0xff] %v10106_v21  ;;  %v10138_v29 = vld [vmem:[%s14986_s1 + $0x50] sm:$0xff]  ;;  %v10141_v30 = vmul.f32 %v10111_v22, %v25_v10  ;;  %v10144_v31 = vmul.f32 %v10116_v23, %v26_v11  ;;  %v10147_v32 = vmul.f32 %v10121_v24, %v28_v13  ;;  %v10150_v33 = vsub.s32 %v91_v17, %v10077_v12 }
   0x7   :  { %15191 = vst [vmem:[#allocation4_spill] sm:$0xff] %v10124_v25  ;;  %15192 = vst [vmem:[#allocation5_spill] sm:$0xff] %v10127_v26  ;;  %v10153_v34 = vmul.f32 %v10138_v29, %v29_v14  ;;  %v268_v35 = vcombine.low %v10088_v15, %v10111_v22  ;;  %v284_v36 = vcombine.low %v10098_v19, %v10121_v24  ;;  %vm249_vm2 = vcmask 261120  }
   0x8   :  { %15193 = vst [vmem:[#allocation6_spill] sm:$0xff] %v10130_v27  ;;  %15194 = vst [vmem:[#allocation7_spill] sm:$0xff] %v10141_v30  ;;  %v336_v37 = vcombine.low %v10093_v18, %v10116_v23  ;;  %v56_v38 = vcombine.high %v10106_v21, %v10141_v30  ;;  %v72_v39 = vcombine.high %v10127_v26, %v10147_v32  ;;  %vm251_vm3 = vcmask 392192  }
   0x9   :  { %15195 = vst [vmem:[#allocation8_spill] sm:$0xff] %v10144_v31  ;;  %15196 = vst [vmem:[#allocation9_spill] sm:$0xff] %v10147_v32  ;;  %v124_v40 = vcombine.high %v10124_v25, %v10144_v31  ;;  %v55_v41 = vcombine.low %v10106_v21, %v10141_v30  ;;  %v140_v42 = vcombine.high %v10130_v27, %v10153_v34  ;;  %vm253_vm4 = vcmask 523264  }
   0xa   :  { %15197 = vst [vmem:[#allocation10_spill] sm:$0xff] %v10153_v34  ;;  %v71_v43 = vcombine.low %v10127_v26, %v10147_v32  ;;  %v123_v44 = vcombine.low %v10124_v25, %v10144_v31  ;;  %v139_v45 = vcombine.low %v10130_v27, %v10153_v34  ;;  %v70_v46 = vrot.slane %v56_v38, %v10133_v28 }
   0xb   :  { %v86_v47 = vrot.slane %v72_v39, %v10133_v28  ;;  %v138_v48 = vrot.slane %v124_v40, %v10133_v28  ;;  %v63_v49 = vrot.slane %v55_v41, %v10133_v28  ;;  %v154_v50 = vrot.slane %v140_v42, %v10133_v28 }
   0xc   :  { %v79_v51 = vrot.slane %v71_v43, %v10133_v28  ;;  %v131_v52 = vrot.slane %v123_v44, %v10133_v28  ;;  %v147_v53 = vrot.slane %v139_v45, %v10133_v28  ;;  %v276_v56 = vrot.slane %v268_v35, %v10133_v28 }
   0xd   :  { %v103_v54 = vcombine.low %v70_v46, %v86_v47  ;;  %v104_v55 = vcombine.high %v70_v46, %v86_v47  ;;  %v292_v57 = vrot.slane %v284_v36, %v10133_v28  ;;  %v171_v58 = vcombine.low %v138_v48, %v154_v50 }
   0xe   :  { %v88_v59 = vcombine.high %v63_v49, %v79_v51  ;;  %v155_v60 = vcombine.low %v131_v52, %v147_v53  ;;  %v156_v61 = vcombine.high %v131_v52, %v147_v53  ;;  %v87_v63 = vcombine.low %v63_v49, %v79_v51 }
   0xf   :  { %v111_v62 = vrot.slane %v103_v54, %v10150_v33  ;;  %v118_v1 = vrot.slane %v104_v55, %v10150_v33  ;;  %v172_v2 = vcombine.high %v138_v48, %v154_v50  ;;  %v179_v3 = vrot.slane %v171_v58, %v10150_v33 }
  0x10   :  { %v102_v4 = vrot.slane %v88_v59, %v10150_v33  ;;  %v170_v5 = vrot.slane %v156_v61, %v10150_v33  ;;  %v10193_v6 = vrot.slane %v155_v60, %v10150_v33  ;;  %v10198_v10 = vrot.slane %v87_v63, %v10150_v33 }
  0x11   :  { %v121_v7 = vcombine.high %v111_v62, %v14992_v8  ;;  %v186_v9 = vrot.slane %v172_v2, %v10150_v33  ;;  %v300_v11 = vcombine.low %v276_v56, %v292_v57  ;;  %v189_v13 = vcombine.high %v179_v3, %v14992_v8 }
  0x12   :  { %v8939_v14 = vpack.i.bf16 %v179_v3, %v111_v62  ;;  %v8934_v16 = vpack.i.bf16 %v170_v5, %v102_v4  ;;  %v188_v17 = vcombine.high %v170_v5, %v14992_v8  ;;  %v119_v35 = vcombine.high %v10198_v10, %v14992_v8 }
  0x13   :  { %v187_v36 = vcombine.high %v10193_v6, %v14992_v8  ;;  %v120_v38 = vcombine.high %v102_v4, %v14992_v8  ;;  %v8944_v39 = vpack.i.bf16 %v186_v9, %v118_v1  ;;  %v8959_v40 = vpack.i.bf16 %v189_v13, %v121_v7 }
  0x14   :  { %8940 = vrot.lane.b32.xlu1 %v8939_v14, %s10014_s25  ;;  %8935 = vrot.lane.b32.xlu0 %v8934_v16, %s10015_s26  ;;  %v10210_v42 = vrot.slane %v300_v11, %v10150_v33  ;;  %v344_v43 = vrot.slane %v336_v37, %v10133_v28  ;;  %v352_v44 = vcombine.low %v10103_v20, %v10138_v29  ;;  %vm255_vm5 = vcmask 654336  }
  0x15   :  { %v8949_v41 = vpack.i.bf16 %v187_v36, %v119_v35  ;;  %v122_v45 = vcombine.high %v118_v1, %v14992_v8  ;;  %v190_v46 = vcombine.high %v186_v9, %v14992_v8  ;;  %v301_v47 = vcombine.high %v276_v56, %v292_v57 }
  0x16   :  { %15198 = vst [vmem:[#allocation11_spill] sm:$0xff] %v10210_v42  ;;  %v269_v48 = vcombine.high %v10088_v15, %v10111_v22  ;;  %v360_v49 = vrot.slane %v352_v44, %v10133_v28  ;;  %v285_v50 = vcombine.high %v10098_v19, %v10121_v24  ;;  %v337_v51 = vcombine.high %v10093_v18, %v10116_v23 }
  0x17   :  { %v353_v37 = vcombine.high %v10103_v20, %v10138_v29  ;;  %v8954_v52 = vpack.i.bf16 %v188_v17, %v120_v38  ;;  %v315_v53 = vrot.slane %v301_v47, %v10150_v33  ;;  %v332_v59 = vcombine.high %v10210_v42, %v14992_v8 }
  0x18   :  { %8945 = vrot.lane.b32.xlu1 %v8944_v39, %s10016_s27  ;;  %8950 = vrot.lane.b32.xlu0 %v8949_v41, %s10017_s28  ;;  %v283_v54 = vrot.slane %v269_v48, %v10133_v28  ;;  %v368_v55 = vcombine.low %v344_v43, %v360_v49  ;;  %v369_v56 = vcombine.high %v344_v43, %v360_v49  ;;  %v15211_v42 = vmov 0.0  }
  0x19   :  { %v299_v57 = vrot.slane %v285_v50, %v10133_v28  ;;  %v351_v58 = vrot.slane %v337_v51, %v10133_v28  ;;  %v367_v60 = vrot.slane %v353_v37, %v10133_v28  ;;  %v8964_v62 = vpack.i.bf16 %v190_v46, %v122_v45 }
  0x1a   :  { %v10236_v61 = vrot.slane %v368_v55, %v10150_v33  ;;  %v383_v63 = vrot.slane %v369_v56, %v10150_v33  ;;  %v333_v2 = vcombine.high %v315_v53, %v14992_v8  ;;  %vm257_vm6 = vcmask 785408  }
  0x1b   :  { %v316_v1 = vcombine.low %v283_v54, %v299_v57  ;;  %v384_v3 = vcombine.low %v351_v58, %v367_v60  ;;  %v317_v4 = vcombine.high %v283_v54, %v299_v57  ;;  %v385_v11 = vcombine.high %v351_v58, %v367_v60 }
  0x1c   :  { %15199 = vst [vmem:[#allocation12_spill] sm:$0xff] %v10236_v61  ;;  %8955 = vrot.lane.b32.xlu1 %v8954_v52, %s10018_s29  ;;  %8960 = vrot.lane.b32.xlu0 %v8959_v40, %s10019_s30  ;;  %v400_v5 = vcombine.high %v10236_v61, %v14992_v8  ;;  %v401_v7 = vcombine.high %v383_v63, %v14992_v8  ;;  %vm259_vm7 = vcmask 916480   ;;  %vm4220_vm8 = vcmask 1043456  }
  0x1d   :  { %v324_v9 = vrot.slane %v316_v1, %v10150_v33  ;;  %v392_v13 = vrot.slane %v384_v3, %v10150_v33  ;;  %v8969_v16 = vpack.i.bf16 %v383_v63, %v315_v53  ;;  %v331_v17 = vrot.slane %v317_v4, %v10150_v33 }
  0x1e   :  { %v8974_v14 = vpack.i.bf16 %v400_v5, %v332_v59  ;;  %v8979_v35 = vpack.i.bf16 %v401_v7, %v333_v2  ;;  %v399_v39 = vrot.slane %v385_v11, %v10150_v33  ;;  %vm2807_vm9 = vcmask 1045504  }
  0x1f   :  { %v334_v36 = vcombine.high %v324_v9, %v14992_v8  ;;  %v402_v38 = vcombine.high %v392_v13, %v14992_v8  ;;  %v8984_v40 = vpack.i.bf16 %v392_v13, %v324_v9  ;;  %v335_v43 = vcombine.high %v331_v17, %v14992_v8 }
  0x20   :  { %8965 = vrot.lane.b32.xlu0 %v8964_v62, %s10020_s6  ;;  %8975 = vrot.lane.b32.xlu1 %v8974_v14, %s10017_s28  ;;  %v403_v44 = vcombine.high %v399_v39, %v14992_v8  ;;  %v8994_v45 = vpack.i.bf16 %v399_v39, %v331_v17  ;;  %vm8577_vm10 = vcmask 588800  }
  0x21   :  { %v8989_v41 = vpack.i.bf16 %v402_v38, %v334_v36 }
  0x22   :  { %v8999_v46 = vpack.i.bf16 %v403_v44, %v335_v43 }
  0x24   :  { %8970 = vrot.lane.b32.xlu0 %v8969_v16, %s10015_s26  ;;  %8980 = vrot.lane.b32.xlu1 %v8979_v35, %s10018_s29 }
  0x28   :  { %8985 = vrot.lane.b32.xlu0 %v8984_v40, %s10014_s25  ;;  %8990 = vrot.lane.b32.xlu1 %v8989_v41, %s10019_s30 }
  0x2c   :  { %8995 = vrot.lane.b32.xlu0 %v8994_v45, %s10016_s27  ;;  %9000 = vrot.lane.b32.xlu1 %v8999_v46, %s10020_s6 }
  0x30   :  { %482 = vrot.lane.b32.xlu0 %v10106_v21, %s10021_s7  ;;  %484 = vrot.lane.b32.xlu1 %v10124_v25, %s10021_s7 }
  0x34   :  { %486 = vrot.lane.b32.xlu0 %v10127_v26, %s10021_s7  ;;  %488 = vrot.lane.b32.xlu1 %v10130_v27, %s10021_s7 }
  0x38   :  { %490 = vrot.lane.b32.xlu0 %v10141_v30, %s10021_s7  ;;  %492 = vrot.lane.b32.xlu1 %v10144_v31, %s10021_s7 }
  0x3c   :  { %494 = vrot.lane.b32.xlu0 %v10147_v32, %s10021_s7  ;;  %496 = vrot.lane.b32.xlu1 %v10153_v34, %s10021_s7 }
  0x40   :  { %722 = vrot.lane.b32.xlu0 %v10093_v18, %s10021_s7  ;;  %720 = vrot.lane.b32.xlu1 %v10088_v15, %s10021_s7 }
  0x44   :  { %726 = vrot.lane.b32.xlu0 %v10103_v20, %s10021_s7  ;;  %724 = vrot.lane.b32.xlu1 %v10098_v19, %s10021_s7 }
  0x48   :  { %730 = vrot.lane.b32.xlu0 %v10116_v23, %s10021_s7  ;;  %728 = vrot.lane.b32.xlu1 %v10111_v22, %s10021_s7 }
  0x4c   :  { %734 = vrot.lane.b32.xlu0 %v10138_v29, %s10021_s7  ;;  %732 = vrot.lane.b32.xlu1 %v10121_v24, %s10021_s7 }
  0x50   :  { %950 = vrot.lane.b32.xlu0 %v10106_v21, %s10022_s8  ;;  %952 = vrot.lane.b32.xlu1 %v10124_v25, %s10022_s8 }
  0x54   :  { %954 = vrot.lane.b32.xlu0 %v10127_v26, %s10022_s8  ;;  %956 = vrot.lane.b32.xlu1 %v10130_v27, %s10022_s8 }
  0x58   :  { %958 = vrot.lane.b32.xlu0 %v10141_v30, %s10022_s8  ;;  %960 = vrot.lane.b32.xlu1 %v10144_v31, %s10022_s8 }
  0x5c   :  { %962 = vrot.lane.b32.xlu0 %v10147_v32, %s10022_s8  ;;  %964 = vrot.lane.b32.xlu1 %v10153_v34, %s10022_s8 }
  0x60   :  { %1182 = vrot.lane.b32.xlu0 %v10093_v18, %s10022_s8  ;;  %1180 = vrot.lane.b32.xlu1 %v10088_v15, %s10022_s8 }
  0x64   :  { %1186 = vrot.lane.b32.xlu0 %v10103_v20, %s10022_s8  ;;  %1184 = vrot.lane.b32.xlu1 %v10098_v19, %s10022_s8 }
  0x68   :  { %1190 = vrot.lane.b32.xlu0 %v10116_v23, %s10022_s8  ;;  %1188 = vrot.lane.b32.xlu1 %v10111_v22, %s10022_s8 }
  0x86   :  { %v10321_v47 = vpop.permute.xlu1 %8940  ;;  %v10323_v48 = vpop.permute.xlu0 %8935 }
  0x8a   :  { %v10325_v49 = vpop.permute.xlu1 %8945  ;;  %v10327_v50 = vpop.permute.xlu0 %8950 }
  0x8b   :  { %15200 = vst [vmem:[#allocation13_spill] sm:$0xff] %v10325_v49 }
  0x8e   :  { %v10329_v51 = vpop.permute.xlu1 %8955  ;;  %v10331_v37 = vpop.permute.xlu0 %8960 }
  0x92   :  { %v10333_v52 = vpop.permute.xlu0 %8965  ;;  %v10335_v53 = vpop.permute.xlu1 %8975 }
  0x93   :  { %15201 = vst [vmem:[#allocation14_spill] sm:$0xff] %v10333_v52  ;;  %15202 = vst [vmem:[#allocation15_spill] sm:$0xff] %v10335_v53 }
  0x96   :  { %v10337_v54 = vpop.permute.xlu0 %8970  ;;  %v10339_v55 = vpop.permute.xlu1 %8980 }
  0x97   :  { %15203 = vst [vmem:[#allocation16_spill] sm:$0xff] %v10337_v54  ;;  %15204 = vst [vmem:[#allocation17_spill] sm:$0xff] %v10339_v55 }
  0x9a   :  { %v10341_v56 = vpop.permute.xlu0 %8985  ;;  %v10343_v57 = vpop.permute.xlu1 %8990 }
  0x9b   :  { %15205 = vst [vmem:[#allocation18_spill] sm:$0xff] %v10341_v56  ;;  %15206 = vst [vmem:[#allocation19_spill] sm:$0xff] %v10343_v57 }
  0x9e   :  { %v10345_v58 = vpop.permute.xlu0 %8995  ;;  %v10347_v59 = vpop.permute.xlu1 %9000 }
  0x9f   :  { %15207 = vst [vmem:[#allocation20_spill] sm:$0xff] %v10345_v58  ;;  %15208 = vst [vmem:[#allocation21_spill] sm:$0xff] %v10347_v59 }
  0xa2   :  { %v483_v60 = vpop.permute.xlu0 %482  ;;  %v485_v62 = vpop.permute.xlu1 %484 }
  0xa6   :  { %v487_v63 = vpop.permute.xlu0 %486  ;;  %v489_v1 = vpop.permute.xlu1 %488 }
  0xaa   :  { %v491_v2 = vpop.permute.xlu0 %490  ;;  %v493_v3 = vpop.permute.xlu1 %492 }
  0xab   :  { %v506_v4 = vcombine.low %v483_v60, %v491_v2  ;;  %v507_v5 = vcombine.high %v483_v60, %v491_v2  ;;  %v574_v7 = vcombine.low %v485_v62, %v493_v3  ;;  %v575_v9 = vcombine.high %v485_v62, %v493_v3 }
  0xad   :  { %v10350_v36 = vrot.slane %v506_v4, %v10133_v28  ;;  %v521_v38 = vrot.slane %v507_v5, %v10133_v28  ;;  %v10358_v41 = vrot.slane %v574_v7, %v10133_v28  ;;  %v589_v43 = vrot.slane %v575_v9, %v10133_v28 }
  0xae   :  { %v495_v11 = vpop.permute.xlu0 %494  ;;  %v497_v13 = vpop.permute.xlu1 %496 }
  0xaf   :  { %v522_v14 = vcombine.low %v487_v63, %v495_v11  ;;  %v523_v16 = vcombine.high %v487_v63, %v495_v11  ;;  %v590_v17 = vcombine.low %v489_v1, %v497_v13  ;;  %v591_v35 = vcombine.high %v489_v1, %v497_v13 }
  0xb1   :  { %v10354_v39 = vrot.slane %v522_v14, %v10133_v28  ;;  %v537_v40 = vrot.slane %v523_v16, %v10133_v28  ;;  %v10362_v44 = vrot.slane %v590_v17, %v10133_v28  ;;  %v605_v45 = vrot.slane %v591_v35, %v10133_v28 }
  0xb2   :  { %v723_v46 = vpop.permute.xlu0 %722  ;;  %v721_v62 = vpop.permute.xlu1 %720 }
  0xb3   :  { %v539_v60 = vcombine.high %v10350_v36, %v10354_v39  ;;  %v607_v63 = vcombine.high %v10358_v41, %v10362_v44  ;;  %v622_v1 = vcombine.low %v589_v43, %v605_v45  ;;  %v554_v2 = vcombine.low %v521_v38, %v537_v40 }
  0xb4   :  { %v555_v7 = vcombine.high %v521_v38, %v537_v40  ;;  %v623_v11 = vcombine.high %v589_v43, %v605_v45 }
  0xb5   :  { %v10370_v3 = vrot.slane %v539_v60, %v10150_v33  ;;  %v10373_v5 = vrot.slane %v607_v63, %v10150_v33  ;;  %v10378_v14 = vrot.slane %v554_v2, %v10150_v33  ;;  %v10381_v16 = vrot.slane %v622_v1, %v10150_v33 }
  0xb6   :  { %v727_v4 = vpop.permute.xlu0 %726  ;;  %v725_v9 = vpop.permute.xlu1 %724  ;;  %v10387_v38 = vrot.slane %v555_v7, %v10150_v33  ;;  %v10390_v40 = vrot.slane %v623_v11, %v10150_v33 }
  0xb7   :  { %v9019_v13 = vpack.i.bf16 %v10373_v5, %v10370_v3  ;;  %v9024_v60 = vpack.i.bf16 %v10381_v16, %v10378_v14 }
  0xb8   :  { %v9029_v58 = vpack.i.bf16 %v10390_v40, %v10387_v38 }
  0xb9   :  { %9020 = vrot.lane.b32.xlu1 %v9019_v13, %s10015_s26 }
  0xba   :  { %v731_v17 = vpop.permute.xlu0 %730  ;;  %v729_v35 = vpop.permute.xlu1 %728 }
  0xbb   :  { %v812_v43 = vcombine.low %v723_v46, %v731_v17  ;;  %v813_v45 = vcombine.high %v723_v46, %v731_v17  ;;  %v744_v63 = vcombine.low %v721_v62, %v729_v35  ;;  %v745_v2 = vcombine.high %v721_v62, %v729_v35 }
  0xbd   :  { %9025 = vrot.lane.b32.xlu1 %v9024_v60, %s10014_s25  ;;  %v820_v7 = vrot.slane %v812_v43, %v10133_v28  ;;  %v827_v11 = vrot.slane %v813_v45, %v10133_v28  ;;  %v752_v62 = vrot.slane %v744_v63, %v10133_v28  ;;  %v759_v17 = vrot.slane %v745_v2, %v10133_v28 }
  0xbe   :  { %v735_v1 = vpop.permute.xlu0 %734  ;;  %v733_v0 = vpop.permute.xlu1 %732  ;;  %v538_v63 = vcombine.low %v10350_v36, %v10354_v39 }
  0xbf   :  { %v828_v13 = vcombine.low %v727_v4, %v735_v1  ;;  %v829_v8 = vcombine.high %v727_v4, %v735_v1  ;;  %v760_v12 = vcombine.low %v725_v9, %v733_v0  ;;  %v761_v59 = vcombine.high %v725_v9, %v733_v0 }
  0xc1   :  { %v836_v57 = vrot.slane %v828_v13, %v10133_v28  ;;  %v843_v46 = vrot.slane %v829_v8, %v10133_v28  ;;  %v768_v35 = vrot.slane %v760_v12, %v10133_v28  ;;  %v775_v4 = vrot.slane %v761_v59, %v10133_v28  ;;  %9030 = vrot.lane.b32.xlu1 %v9029_v58, %s10016_s27 }
  0xc2   :  { %v10404_v0 = vpop.permute.xlu0 %950  ;;  %v10406_v43 = vpop.permute.xlu1 %952  ;;  %v606_v58 = vcombine.low %v10358_v41, %v10362_v44  ;;  %v10427_v44 = vrot.slane %v538_v63, %v10150_v33 }
  0xc3   :  { %v844_v9 = vcombine.low %v820_v7, %v836_v57  ;;  %v845_v60 = vcombine.high %v820_v7, %v836_v57  ;;  %v776_v45 = vcombine.low %v752_v62, %v768_v35  ;;  %v777_v1 = vcombine.high %v752_v62, %v768_v35 }
  0xc4   :  { %v792_v13 = vcombine.low %v759_v17, %v775_v4  ;;  %v860_v8 = vcombine.low %v827_v11, %v843_v46  ;;  %v793_v62 = vcombine.high %v759_v17, %v775_v4  ;;  %v861_v35 = vcombine.high %v827_v11, %v843_v46 }
  0xc5   :  { %v859_v2 = vrot.slane %v845_v60, %v10150_v33  ;;  %v10412_v12 = vrot.slane %v844_v9, %v10150_v33  ;;  %v791_v57 = vrot.slane %v777_v1, %v10150_v33  ;;  %v10418_v7 = vrot.slane %v776_v45, %v10150_v33 }
  0xc6   :  { %v955_v59 = vpop.permute.xlu0 %954  ;;  %v957_v56 = vpop.permute.xlu1 %956  ;;  %v800_v60 = vrot.slane %v792_v13, %v10150_v33  ;;  %v868_v41 = vrot.slane %v860_v8, %v10150_v33  ;;  %v10433_v4 = vrot.slane %v606_v58, %v10150_v33  ;;  %v875_v13 = vrot.slane %v861_v35, %v10150_v33 }
  0xc7   :  { %15209 = vst [vmem:[#allocation22_spill] sm:$0xff] %v10412_v12  ;;  %15210 = vst [vmem:[#allocation23_spill] sm:$0xff] %v10418_v7  ;;  %v876_v36 = vcombine.high %v10412_v12, %v15211_v42  ;;  %v9004_v39 = vpack.i.bf16 %v859_v2, %v791_v57  ;;  %v808_v9 = vcombine.high %v10418_v7, %v15211_v42 }
  0xc8   :  { %v809_v11 = vcombine.high %v791_v57, %v15211_v42  ;;  %v877_v46 = vcombine.high %v859_v2, %v15211_v42  ;;  %v807_v7 = vrot.slane %v793_v62, %v10150_v33  ;;  %v9009_v8 = vpack.i.bf16 %v868_v41, %v800_v60 }
  0xc9   :  { %9005 = vrot.lane.b32.xlu0 %v9004_v39, %s10015_s26  ;;  %v9034_v17 = vpack.i.bf16 %v876_v36, %v808_v9  ;;  %v810_v39 = vcombine.high %v800_v60, %v15211_v42  ;;  %v878_v36 = vcombine.high %v868_v41, %v15211_v42  ;;  %v570_v62 = vcombine.high %v10427_v44, %v15211_v42 }
  0xca   :  { %v959_v45 = vpop.permute.xlu0 %958  ;;  %v961_v1 = vpop.permute.xlu1 %960  ;;  %v9039_v58 = vpack.i.bf16 %v877_v46, %v809_v11  ;;  %v638_v35 = vcombine.high %v10433_v4, %v15211_v42  ;;  %v9014_v55 = vpack.i.bf16 %v875_v13, %v807_v7  ;;  %v879_v60 = vcombine.high %v875_v13, %v15211_v42 }
  0xcb   :  { %9035 = vrot.lane.b32.xlu1 %v9034_v17, %s10017_s28  ;;  %v974_v63 = vcombine.low %v10404_v0, %v959_v45  ;;  %v1042_v57 = vcombine.low %v10406_v43, %v961_v1  ;;  %v1043_v41 = vcombine.high %v10406_v43, %v961_v1  ;;  %v975_v61 = vcombine.high %v10404_v0, %v959_v45 }
  0xcc   :  { %v9044_v53 = vpack.i.bf16 %v878_v36, %v810_v39  ;;  %v811_v52 = vcombine.high %v807_v7, %v15211_v42  ;;  %v571_v0 = vcombine.high %v10370_v3, %v15211_v42  ;;  %v639_v45 = vcombine.high %v10373_v5, %v15211_v42 }
  0xcd   :  { %9010 = vrot.lane.b32.xlu0 %v9009_v8, %s10014_s25  ;;  %v982_v11 = vrot.slane %v974_v63, %v10133_v28  ;;  %v1057_v1 = vrot.slane %v1043_v41, %v10133_v28  ;;  %v989_v7 = vrot.slane %v975_v61, %v10133_v28  ;;  %v572_v5 = vcombine.high %v10378_v14, %v15211_v42 }
  0xce   :  { %v963_v2 = vpop.permute.xlu0 %962  ;;  %v965_v9 = vpop.permute.xlu1 %964  ;;  %v9049_v39 = vpack.i.bf16 %v879_v60, %v811_v52  ;;  %v9074_v61 = vpack.i.bf16 %v639_v45, %v571_v0  ;;  %v573_v14 = vcombine.high %v10387_v38, %v15211_v42  ;;  %v641_v41 = vcombine.high %v10390_v40, %v15211_v42 }
  0xcf   :  { %v990_v17 = vcombine.low %v955_v59, %v963_v2  ;;  %v991_v12 = vcombine.high %v955_v59, %v963_v2  ;;  %v1058_v54 = vcombine.low %v957_v56, %v965_v9  ;;  %v1059_v8 = vcombine.high %v957_v56, %v965_v9  ;;  %9040 = vrot.lane.b32.xlu1 %v9039_v58, %s10018_s29 }
  0xd0   :  { %v1050_v59 = vrot.slane %v1042_v57, %v10133_v28  ;;  %v9084_v38 = vpack.i.bf16 %v641_v41, %v573_v14 }
  0xd1   :  { %v998_v46 = vrot.slane %v990_v17, %v10133_v28  ;;  %v1066_v2 = vrot.slane %v1058_v54, %v10133_v28  ;;  %v1073_v13 = vrot.slane %v1059_v8, %v10133_v28  ;;  %v1005_v43 = vrot.slane %v991_v12, %v10133_v28  ;;  %9015 = vrot.lane.b32.xlu0 %v9014_v55, %s10016_s27 }
  0xd2   :  { %v9069_v54 = vpack.i.bf16 %v638_v35, %v570_v62 }
  0xd3   :  { %v1007_v56 = vcombine.high %v982_v11, %v998_v46  ;;  %v1075_v63 = vcombine.high %v1050_v59, %v1066_v2  ;;  %9045 = vrot.lane.b32.xlu1 %v9044_v53, %s10019_s30  ;;  %v1090_v36 = vcombine.low %v1057_v1, %v1073_v13  ;;  %v1022_v12 = vcombine.low %v989_v7, %v1005_v43 }
  0xd4   :  { %v1074_v57 = vcombine.low %v1050_v59, %v1066_v2  ;;  %v1006_v58 = vcombine.low %v982_v11, %v998_v46  ;;  %v640_v53 = vcombine.high %v10381_v16, %v15211_v42  ;;  %v1023_v52 = vcombine.high %v989_v7, %v1005_v43 }
  0xd5   :  { %9070 = vrot.lane.b32.xlu0 %v9069_v54, %s10017_s28  ;;  %v1021_v55 = vrot.slane %v1007_v56, %v10150_v33  ;;  %v1089_v3 = vrot.slane %v1075_v63, %v10150_v33  ;;  %v1091_v62 = vcombine.high %v1057_v1, %v1073_v13  ;;  %v1030_v9 = vrot.slane %v1022_v12, %v10150_v33  ;;  %v10512_v12 = vpop.permute.xlu1 %1180 }
  0xd6   :  { %v1098_v17 = vrot.slane %v1090_v36, %v10150_v33  ;;  %v9079_v60 = vpack.i.bf16 %v640_v53, %v572_v5  ;;  %v10483_v16 = vrot.slane %v1006_v58, %v10150_v33  ;;  %v10486_v8 = vrot.slane %v1074_v57, %v10150_v33  ;;  %v10518_v5 = vpop.permute.xlu0 %1182 }
  0xd7   :  { %9050 = vrot.lane.b32.xlu1 %v9049_v39, %s10020_s6  ;;  %v9054_v35 = vpack.i.bf16 %v1089_v3, %v1021_v55  ;;  %v1037_v46 = vrot.slane %v1023_v52, %v10150_v33  ;;  %v1105_v59 = vrot.slane %v1091_v62, %v10150_v33  ;;  %v1039_v56 = vcombine.high %v1021_v55, %v15211_v42 }
  0xd8   :  { %15212 = vst [vmem:[#allocation24_spill] sm:$0xff] %v10483_v16  ;;  %15213 = vst [vmem:[#allocation25_spill] sm:$0xff] %v10486_v8  ;;  %v9059_v11 = vpack.i.bf16 %v1098_v17, %v1030_v9  ;;  %v1038_v2 = vcombine.high %v10483_v16, %v15211_v42  ;;  %v1106_v40 = vcombine.high %v10486_v8, %v15211_v42 }
  0xd9   :  { %9075 = vrot.lane.b32.xlu0 %v9074_v61, %s10018_s29  ;;  %v9064_v13 = vpack.i.bf16 %v1105_v59, %v1037_v46  ;;  %v1107_v0 = vcombine.high %v1089_v3, %v15211_v42  ;;  %v1040_v1 = vcombine.high %v1030_v9, %v15211_v42  ;;  %v1108_v7 = vcombine.high %v1098_v17, %v15211_v42  ;;  %v10514_v55 = vpop.permute.xlu1 %1184 }
  0xda   :  { %v9089_v43 = vpack.i.bf16 %v1106_v40, %v1038_v2  ;;  %v1041_v54 = vcombine.high %v1037_v46, %v15211_v42  ;;  %v1109_v39 = vcombine.high %v1105_v59, %v15211_v42  ;;  %v10522_v58 = vpop.permute.xlu0 %1186  ;;  %v24_v2 = vld [vmem:[%s14985_s0 + $0x28] sm:$0x3]  ;;  %v27_v40 = vld [vmem:[%s14985_s0 + $0x40] sm:$0x3] }
  0xdb   :  { %9055 = vrot.lane.b32.xlu1 %v9054_v35, %s10015_s26  ;;  %v9094_v45 = vpack.i.bf16 %v1107_v0, %v1039_v56  ;;  %v9099_v63 = vpack.i.bf16 %v1108_v7, %v1040_v1  ;;  %v10572_v0 = vld [vmem:[%s14986_s1 + $0x28] sm:$0x3]  ;;  %v10582_v1 = vld [vmem:[%s14986_s1 + $0x58] sm:$0x3] }
  0xdc   :  { %v9104_v36 = vpack.i.bf16 %v1109_v39, %v1041_v54  ;;  %v10590_v54 = vmul.f32 %v10572_v0, %v24_v2  ;;  %v1426_v2 = vrot.slane %v10144_v31, 1 }
  0xdd   :  { %9080 = vrot.lane.b32.xlu0 %v9079_v60, %s10019_s30  ;;  %v10516_v3 = vpop.permute.xlu1 %1188 }
  0xde   :  { %v10526_v53 = vpop.permute.xlu0 %1190  ;;  %15228 = vst [vmem:[#allocation40_spill] sm:$0xff] %v10590_v54 }
  0xdf   :  { %9060 = vrot.lane.b32.xlu1 %v9059_v11, %s10014_s25 }
  0xe1   :  { %9085 = vrot.lane.b32.xlu0 %v9084_v38, %s10020_s6  ;;  %v21_v38 = vld [vmem:[%s14985_s0 + $0x10] sm:$0x3] }
  0xe3   :  { %9065 = vrot.lane.b32.xlu1 %v9064_v13, %s10016_s27  ;;  %v30_v13 = vld [vmem:[%s14985_s0 + $0x58] sm:$0x3] }
  0xe5   :  { %9090 = vrot.lane.b32.xlu0 %v9089_v43, %s10017_s28  ;;  %v10565_v43 = vld [vmem:[%s14986_s1 + $0x10] sm:$0x3] }
  0xe7   :  { %1192 = vrot.lane.b32.xlu1 %v10121_v24, %s10022_s8 }
  0xe9   :  { %9095 = vrot.lane.b32.xlu0 %v9094_v45, %s10018_s29  ;;  %v10577_v45 = vld [vmem:[%s14986_s1 + $0x40] sm:$0x3] }
  0xea   :  { %v10593_v39 = vmul.f32 %v10577_v45, %v27_v40  ;;  %v1430_v40 = vrot.slane %v10147_v32, 1 }
  0xec   :  { %15229 = vst [vmem:[#allocation41_spill] sm:$0xff] %v10593_v39 }
  0xed   :  { %9100 = vrot.lane.b32.xlu0 %v9099_v63, %s10019_s30  ;;  %v10587_v63 = vmul.f32 %v10565_v43, %v21_v38  ;;  %v1421_v38 = vrot.slane %v10130_v27, 1 }
  0xef   :  { %15227 = vst [vmem:[#allocation39_spill] sm:$0xff] %v10587_v63 }
  0xf1   :  { %9105 = vrot.lane.b32.xlu0 %v9104_v36, %s10020_s6  ;;  %v10596_v36 = vmul.f32 %v10582_v1, %v30_v13 }
  0xf3   :  { %15230 = vst [vmem:[#allocation42_spill] sm:$0xff] %v10596_v36 }
  0xf5   :  { %1194 = vrot.lane.b32.xlu0 %v10138_v29, %s10022_s8 }
 0x12b   :  { %v10520_v57 = vpop.permute.xlu1 %9020 }
 0x12c   :  { %15214 = vst [vmem:[#allocation26_spill] sm:$0xff] %v10520_v57  ;;  %v1669_v57 = vrot.slane %v10138_v29, 1 }
 0x12f   :  { %v10524_v61 = vpop.permute.xlu1 %9025 }
 0x130   :  { %15215 = vst [vmem:[#allocation27_spill] sm:$0xff] %v10524_v61 }
 0x133   :  { %v10528_v52 = vpop.permute.xlu1 %9030 }
 0x134   :  { %15216 = vst [vmem:[#allocation28_spill] sm:$0xff] %v10528_v52 }
 0x13b   :  { %v10530_v62 = vpop.permute.xlu0 %9005 }
 0x13c   :  { %15217 = vst [vmem:[#allocation29_spill] sm:$0xff] %v10530_v62  ;;  %v1425_v62 = vrot.slane %v10141_v30, 1 }
 0x13d   :  { %v10532_v35 = vpop.permute.xlu1 %9035 }
 0x13e   :  { %15218 = vst [vmem:[#allocation30_spill] sm:$0xff] %v10532_v35  ;;  %v1418_v35 = vrot.slane %v10587_v63, 1 }
 0x13f   :  { %v10534_v9 = vpop.permute.xlu0 %9010 }
 0x140   :  { %15219 = vst [vmem:[#allocation31_spill] sm:$0xff] %v10534_v9  ;;  %v1416_v9 = vrot.slane %v10124_v25, 1  ;;  %v1428_v25 = vrot.slane %v10593_v39, 1 }
 0x141   :  { %v10536_v17 = vpop.permute.xlu1 %9040 }
 0x142   :  { %15220 = vst [vmem:[#allocation32_spill] sm:$0xff] %v10536_v17  ;;  %v1431_v17 = vrot.slane %v10153_v34, 1  ;;  %v10623_v34 = vsel %vm1414_vm0, %v1425_v62, %v1426_v2 }
 0x143   :  { %v10538_v14 = vpop.permute.xlu0 %9015 }
 0x144   :  { %15221 = vst [vmem:[#allocation33_spill] sm:$0xff] %v10538_v14  ;;  %v1415_v14 = vrot.slane %v10106_v21, 1  ;;  %v1423_v21 = vrot.slane %v10590_v54, 1  ;;  %v10626_v31 = vsel %vm1414_vm0, %v1430_v40, %v1431_v17  ;;  %v10629_v54 = vsel %vm1414_vm0, %v1416_v9, %v1418_v35 }
 0x145   :  { %v10540_v60 = vpop.permute.xlu1 %9045 }
 0x146   :  { %15222 = vst [vmem:[#allocation34_spill] sm:$0xff] %v10540_v60  ;;  %v1420_v60 = vrot.slane %v10127_v26, 1  ;;  %v1433_v26 = vrot.slane %v10596_v36, 1  ;;  %v10617_v30 = vsel %vm1414_vm0, %v1415_v14, %v1416_v9  ;;  %v10632_v39 = vsel %vm1414_vm0, %v1421_v38, %v1423_v21 }
 0x147   :  { %v10542_v41 = vpop.permute.xlu0 %9070  ;;  %v10635_v36 = vsel %vm1414_vm0, %v1426_v2, %v1428_v25  ;;  %v1443_v62 = vcombine.low %v10617_v30, %v10623_v34 }
 0x148   :  { %v10620_v32 = vsel %vm1414_vm0, %v1420_v60, %v1421_v38  ;;  %v10638_v14 = vsel %vm1414_vm0, %v1431_v17, %v1433_v26  ;;  %v1511_v35 = vcombine.low %v10629_v54, %v10635_v36  ;;  %v1204_v38 = vcombine.low %v10512_v12, %v10516_v3 }
 0x149   :  { %v10544_v11 = vpop.permute.xlu1 %9050  ;;  %v1459_v40 = vcombine.low %v10620_v32, %v10626_v31  ;;  %v1527_v21 = vcombine.low %v10632_v39, %v10638_v14  ;;  %v1451_v26 = vrot.slane %v1443_v62, %v10133_v28  ;;  %v1444_v62 = vcombine.high %v10617_v30, %v10623_v34 }
 0x14a   :  { %15223 = vst [vmem:[#allocation35_spill] sm:$0xff] %v10544_v11  ;;  %v1519_v2 = vrot.slane %v1511_v35, %v10133_v28  ;;  %v1212_v35 = vrot.slane %v1204_v38, %v10133_v28 }
 0x14b   :  { %v10546_v46 = vpop.permute.xlu0 %9075  ;;  %v1467_v17 = vrot.slane %v1459_v40, %v10133_v28  ;;  %v1460_v40 = vcombine.high %v10620_v32, %v10626_v31 }
 0x14d   :  { %v10548_v59 = vpop.permute.xlu1 %9055  ;;  %v1475_v16 = vcombine.low %v1451_v26, %v1467_v17 }
 0x14e   :  { %15224 = vst [vmem:[#allocation36_spill] sm:$0xff] %v10548_v59  ;;  %v1476_v59 = vcombine.high %v1451_v26, %v1467_v17 }
 0x14f   :  { %v10567_v56 = vpop.permute.xlu0 %9080 }
 0x150   :  { %15225 = vst [vmem:[#allocation37_spill] sm:$0xff] %v10567_v56 }
 0x151   :  { %v10584_v7 = vpop.permute.xlu1 %9060 }
 0x152   :  { %15226 = vst [vmem:[#allocation38_spill] sm:$0xff] %v10584_v7 }
 0x153   :  { %v10598_v11 = vpop.permute.xlu0 %9085 }
 0x154   :  { %15231 = vst [vmem:[#allocation43_spill] sm:$0xff] %v10598_v11  ;;  %v1272_v11 = vcombine.low %v10518_v5, %v10526_v53 }
 0x155   :  { %v10608_v13 = vpop.permute.xlu1 %9065 }
 0x156   :  { %15232 = vst [vmem:[#allocation44_spill] sm:$0xff] %v10608_v13  ;;  %v1535_v13 = vrot.slane %v1527_v21, %v10133_v28  ;;  %v1273_v21 = vcombine.high %v10518_v5, %v10526_v53  ;;  %v1280_v52 = vrot.slane %v1272_v11, %v10133_v28  ;;  %v10683_v5 = vrot.slane %v1444_v62, %v10133_v28 }
 0x157   :  { %v10614_v27 = vpop.permute.xlu0 %9090  ;;  %v10686_v53 = vrot.slane %v1460_v40, %v10133_v28 }
 0x158   :  { %15233 = vst [vmem:[#allocation45_spill] sm:$0xff] %v10614_v27  ;;  %v1543_v8 = vcombine.low %v1519_v2, %v1535_v13  ;;  %v1528_v27 = vcombine.high %v10632_v39, %v10638_v14  ;;  %v1287_v11 = vrot.slane %v1273_v21, %v10133_v28 }
 0x159   :  { %v1193_v63 = vpop.permute.xlu1 %1192 }
 0x15a   :  { %v1220_v25 = vcombine.low %v10514_v55, %v1193_v63  ;;  %v1221_v61 = vcombine.high %v10514_v55, %v1193_v63  ;;  %v10693_v26 = vrot.slane %v1543_v8, %v10150_v33 }
 0x15b   :  { %v10640_v60 = vpop.permute.xlu0 %9095 }
 0x15c   :  { %15234 = vst [vmem:[#allocation46_spill] sm:$0xff] %v10640_v60  ;;  %v1228_v7 = vrot.slane %v1220_v25, %v10133_v28  ;;  %v1544_v25 = vcombine.high %v1519_v2, %v1535_v13 }
 0x15e   :  { %v1236_v56 = vcombine.low %v1212_v35, %v1228_v7  ;;  %v10699_v17 = vrot.slane %v1544_v25, %v10150_v33  ;;  %v1237_v2 = vcombine.high %v1212_v35, %v1228_v7  ;;  %v1653_v35 = vrot.slane %v10088_v15, 1 }
 0x15f   :  { %v10651_v9 = vpop.permute.xlu0 %9100  ;;  %v1654_v25 = vrot.slane %v10093_v18, 1  ;;  %v1663_v15 = vrot.slane %v10111_v22, 1  ;;  %v1664_v18 = vrot.slane %v10116_v23, 1 }
 0x160   :  { %15235 = vst [vmem:[#allocation47_spill] sm:$0xff] %v10651_v9  ;;  %v1205_v9 = vcombine.high %v10512_v12, %v10516_v3  ;;  %v10680_v3 = vrot.slane %v1475_v16, %v10150_v33  ;;  %v10696_v16 = vrot.slane %v1476_v59, %v10150_v33  ;;  %v1491_v59 = vcombine.low %v10683_v5, %v10686_v53 }
 0x161   :  { %v10753_v29 = vsel %vm1414_vm0, %v1663_v15, %v1664_v18 }
 0x162   :  { %15237 = vst [vmem:[#allocation49_spill] sm:$0xff] %v10680_v3  ;;  %v1219_v13 = vrot.slane %v1205_v9, %v10133_v28  ;;  %v1235_v9 = vrot.slane %v1221_v61, %v10133_v28  ;;  %v10712_v8 = vcombine.high %v10680_v3, %v15211_v42  ;;  %v1251_v3 = vrot.slane %v1237_v2, %v10150_v33 }
 0x163   :  { %v10662_v60 = vpop.permute.xlu0 %9105  ;;  %v1499_v15 = vrot.slane %v1491_v59, %v10150_v33  ;;  %v1508_v59 = vcombine.high %v10696_v16, %v15211_v42 }
 0x164   :  { %15236 = vst [vmem:[#allocation48_spill] sm:$0xff] %v10662_v60  ;;  %v1512_v60 = vcombine.high %v10629_v54, %v10635_v36  ;;  %v1253_v22 = vcombine.high %v1219_v13, %v1235_v9 }
 0x166   :  { %v10702_v38 = vrot.slane %v1512_v60, %v10133_v28  ;;  %v10717_v60 = vrot.slane %v1528_v27, %v10133_v28 }
 0x167   :  { %v1195_v12 = vpop.permute.xlu0 %1194 }
 0x168   :  { %v1288_v55 = vcombine.low %v10522_v58, %v1195_v12  ;;  %v1289_v63 = vcombine.high %v10522_v58, %v1195_v12  ;;  %v10708_v58 = vrot.slane %v1236_v56, %v10150_v33  ;;  %v1656_v56 = vrot.slane %v10565_v43, 1 }
 0x169   :  { %v1658_v12 = vrot.slane %v10098_v19, 1  ;;  %v1666_v43 = vrot.slane %v10577_v45, 1 }
 0x16a   :  { %v1296_v62 = vrot.slane %v1288_v55, %v10133_v28  ;;  %v1303_v40 = vrot.slane %v1289_v63, %v10133_v28  ;;  %15238 = vst [vmem:[#allocation50_spill] sm:$0xff] %v10708_v58  ;;  %v1659_v55 = vrot.slane %v10103_v20, 1  ;;  %v1252_v63 = vcombine.low %v1219_v13, %v1235_v9 }
 0x16c   :  { %v1304_v21 = vcombine.low %v1280_v52, %v1296_v62  ;;  %v1305_v61 = vcombine.high %v1280_v52, %v1296_v62  ;;  %v1320_v7 = vcombine.low %v1287_v11, %v1303_v40  ;;  %v1268_v52 = vcombine.high %v10708_v58, %v15211_v42 }
 0x16d   :  { %v1321_v19 = vcombine.high %v1287_v11, %v1303_v40  ;;  %v1671_v58 = vrot.slane %v10582_v1, 1  ;;  %v1260_v45 = vrot.slane %v1252_v63, %v10150_v33  ;;  %v1559_v40 = vcombine.low %v10702_v38, %v10717_v60 }
 0x16e   :  { %v1319_v49 = vrot.slane %v1305_v61, %v10150_v33  ;;  %v10727_v27 = vrot.slane %v1304_v21, %v10150_v33  ;;  %v1328_v2 = vrot.slane %v1320_v7, %v10150_v33  ;;  %v1661_v61 = vrot.slane %v10572_v0, 1 }
 0x16f   :  { %v1668_v21 = vrot.slane %v10121_v24, 1  ;;  %v10747_v7 = vsel %vm1414_vm0, %v1653_v35, %v1654_v25  ;;  %v10750_v24 = vsel %vm1414_vm0, %v1654_v25, %v1656_v56  ;;  %v1269_v1 = vcombine.high %v1251_v3, %v15211_v42 }
 0x170   :  { %15239 = vst [vmem:[#allocation51_spill] sm:$0xff] %v10727_v27  ;;  %v9114_v62 = vpack.i.bf16 %v1319_v49, %v1251_v3  ;;  %v1336_v20 = vcombine.high %v10727_v27, %v15211_v42  ;;  %v1337_v11 = vcombine.high %v1319_v49, %v15211_v42  ;;  %v9124_v0 = vpack.i.bf16 %v1328_v2, %v1260_v45 }
 0x171   :  { %v1335_v13 = vrot.slane %v1321_v19, %v10150_v33  ;;  %v10759_v49 = vsel %vm1414_vm0, %v1664_v18, %v1666_v43  ;;  %v10762_v9 = vsel %vm1414_vm0, %v1658_v12, %v1659_v55  ;;  %v10765_v35 = vsel %vm1414_vm0, %v1659_v55, %v1661_v61 }
 0x172   :  { %9115 = vrot.lane.b32.xlu0 %v9114_v62, %s10015_s26  ;;  %v9109_v23 = vpack.i.bf16 %v1336_v20, %v1268_v52  ;;  %v10768_v25 = vsel %vm1414_vm0, %v1668_v21, %v1669_v57  ;;  %v10771_v56 = vsel %vm1414_vm0, %v1669_v57, %v1671_v58  ;;  %v9119_v3 = vpack.i.bf16 %v1337_v11, %v1269_v1 }
 0x173   :  { %v1267_v63 = vrot.slane %v1253_v22, %v10150_v33  ;;  %v1338_v52 = vcombine.high %v1328_v2, %v15211_v42  ;;  %v1575_v12 = vcombine.high %v10693_v26, %v15211_v42  ;;  %v1567_v55 = vrot.slane %v1559_v40, %v10150_v33 }
 0x174   :  { %9110 = vrot.lane.b32.xlu1 %v9109_v23, %s10017_s28  ;;  %v1681_v18 = vcombine.low %v10747_v7, %v10753_v29  ;;  %v1749_v57 = vcombine.low %v10750_v24, %v10759_v49  ;;  %v1270_v43 = vcombine.high %v1260_v45, %v15211_v42  ;;  %v1697_v19 = vcombine.low %v10762_v9, %v10768_v25 }
 0x175   :  { %v9134_v58 = vpack.i.bf16 %v1335_v13, %v1267_v63  ;;  %v1765_v62 = vcombine.low %v10765_v35, %v10771_v56  ;;  %v1492_v20 = vcombine.high %v10683_v5, %v10686_v53  ;;  %v1560_v2 = vcombine.high %v10702_v38, %v10717_v60 }
 0x176   :  { %9125 = vrot.lane.b32.xlu0 %v9124_v0, %s10014_s25  ;;  %v9129_v61 = vpack.i.bf16 %v1338_v52, %v1270_v43  ;;  %v9144_v21 = vpack.i.bf16 %v1575_v12, %v10712_v8  ;;  %v1339_v22 = vcombine.high %v1335_v13, %v15211_v42  ;;  %v1576_v23 = vcombine.high %v10699_v17, %v15211_v42 }
 0x177   :  { %v1509_v45 = vcombine.high %v1499_v15, %v15211_v42  ;;  %v1577_v11 = vcombine.high %v1567_v55, %v15211_v42  ;;  %v1689_v40 = vrot.slane %v1681_v18, %v10133_v28  ;;  %v1271_v5 = vcombine.high %v1267_v63, %v15211_v42 }
 0x178   :  { %9120 = vrot.lane.b32.xlu1 %v9119_v3, %s10018_s29  ;;  %v1705_v53 = vrot.slane %v1697_v19, %v10133_v28  ;;  %v1757_v38 = vrot.slane %v1749_v57, %v10133_v28  ;;  %v1773_v8 = vrot.slane %v1765_v62, %v10133_v28  ;;  %v1506_v60 = vrot.slane %v1492_v20, %v10150_v33 }
 0x179   :  { %v1574_v0 = vrot.slane %v1560_v2, %v10150_v33  ;;  %v1682_v1 = vcombine.high %v10747_v7, %v10753_v29  ;;  %v1698_v13 = vcombine.high %v10762_v9, %v10768_v25  ;;  %v9139_v3 = vpack.i.bf16 %v1339_v22, %v1271_v5 }
 0x17a   :  { %9135 = vrot.lane.b32.xlu0 %v9134_v58, %s10016_s27  ;;  %v9154_v63 = vpack.i.bf16 %v1576_v23, %v1508_v59  ;;  %v1750_v52 = vcombine.high %v10750_v24, %v10759_v49  ;;  %v1766_v12 = vcombine.high %v10765_v35, %v10771_v56  ;;  %v9149_v18 = vpack.i.bf16 %v10699_v17, %v10696_v16 }
 0x17b   :  { %v9164_v57 = vpack.i.bf16 %v1577_v11, %v1509_v45  ;;  %v1713_v58 = vcombine.low %v1689_v40, %v1705_v53  ;;  %v1781_v43 = vcombine.low %v1757_v38, %v1773_v8  ;;  %v1510_v19 = vcombine.high %v1506_v60, %v15211_v42 }
 0x17c   :  { %9130 = vrot.lane.b32.xlu1 %v9129_v61, %s10019_s30  ;;  %v1578_v62 = vcombine.high %v1574_v0, %v15211_v42  ;;  %v1696_v59 = vrot.slane %v1682_v1, %v10133_v28  ;;  %v1712_v20 = vrot.slane %v1698_v13, %v10133_v28  ;;  %v1714_v2 = vcombine.high %v1689_v40, %v1705_v53 }
 0x17d   :  { %v1782_v61 = vcombine.high %v1757_v38, %v1773_v8  ;;  %v1780_v22 = vrot.slane %v1766_v12, %v10133_v28  ;;  %v9159_v16 = vpack.i.bf16 %v1567_v55, %v1499_v15  ;;  %v10832_v17 = vrot.slane %v1713_v58, %v10150_v33 }
 0x17e   :  { %9145 = vrot.lane.b32.xlu0 %v9144_v21, %s10017_s28  ;;  %v1764_v21 = vrot.slane %v1750_v52, %v10133_v28  ;;  %v10835_v23 = vrot.slane %v1781_v43, %v10150_v33  ;;  %v1729_v45 = vcombine.low %v1696_v59, %v1712_v20  ;;  %v9174_v11 = vpack.i.bf16 %v1578_v62, %v1510_v19 }
 0x17f   :  { %15240 = vst [vmem:[#allocation52_spill] sm:$0xff] %v10832_v17  ;;  %v1728_v40 = vrot.slane %v1714_v2, %v10150_v33  ;;  %v1796_v5 = vrot.slane %v1782_v61, %v10150_v33  ;;  %v9169_v38 = vpack.i.bf16 %v1574_v0, %v1506_v60  ;;  %v1745_v15 = vcombine.high %v10832_v17, %v15211_v42 }
 0x180   :  { %9140 = vrot.lane.b32.xlu1 %v9139_v3, %s10020_s6  ;;  %15241 = vst [vmem:[#allocation53_spill] sm:$0xff] %v10835_v23  ;;  %v1797_v53 = vcombine.low %v1764_v21, %v1780_v22  ;;  %v1813_v55 = vcombine.high %v10835_v23, %v15211_v42  ;;  %v1737_v8 = vrot.slane %v1729_v45, %v10150_v33  ;;  %v8957_v45 = vunpack.i.l.bf16 %v10329_v51 }
 0x181   :  { %v9184_v1 = vpack.i.bf16 %v1796_v5, %v1728_v40  ;;  %v1730_v3 = vcombine.high %v1696_v59, %v1712_v20  ;;  %v1746_v60 = vcombine.high %v1728_v40, %v15211_v42  ;;  %v1814_v0 = vcombine.high %v1796_v5, %v15211_v42 }
 0x182   :  { %9155 = vrot.lane.b32.xlu0 %v9154_v63, %s10018_s29  ;;  %v1805_v13 = vrot.slane %v1797_v53, %v10150_v33  ;;  %v1798_v63 = vcombine.high %v1764_v21, %v1780_v22  ;;  %v9179_v52 = vpack.i.bf16 %v1813_v55, %v1745_v15  ;;  %v1747_v43 = vcombine.high %v1737_v8, %v15211_v42 }
 0x183   :  { %v9189_v58 = vpack.i.bf16 %v1814_v0, %v1746_v60  ;;  %v8952_v21 = vunpack.i.l.bf16 %v10327_v50  ;;  %v8953_v22 = vunpack.i.h.bf16 %v10327_v50  ;;  %v8937_v40 = vunpack.i.l.bf16 %v10323_v48 }
 0x184   :  { %9150 = vrot.lane.b32.xlu1 %v9149_v18, %s10015_s26  ;;  %v9194_v12 = vpack.i.bf16 %v1805_v13, %v1737_v8  ;;  %v1744_v18 = vrot.slane %v1730_v3, %v10150_v33  ;;  %v1815_v19 = vcombine.high %v1805_v13, %v15211_v42  ;;  %v8958_v53 = vunpack.i.h.bf16 %v10329_v51 }
 0x185   :  { %v261_v5 = vsel %vm247_vm1, %v10193_v6, %v8953_v22  ;;  %v8938_v50 = vunpack.i.h.bf16 %v10323_v48  ;;  %v9073_v55 = vunpack.i.h.bf16 %v10542_v41  ;;  %v9072_v8 = vunpack.i.l.bf16 %v10542_v41 }
 0x186   :  { %9165 = vrot.lane.b32.xlu0 %v9164_v57, %s10019_s30  ;;  %v1812_v57 = vrot.slane %v1798_v63, %v10150_v33  ;;  %v9199_v59 = vpack.i.bf16 %v1815_v19, %v1747_v43  ;;  %v1748_v20 = vcombine.high %v1744_v18, %v15211_v42  ;;  %v8942_v13 = vunpack.i.l.bf16 %v10321_v47  ;;  %v15248_v19 = vld [vmem:[#allocation13_spill] sm:$0xff] }
 0x187   :  { %v262_v6 = vsel %vm249_vm2, %v261_v5, %v8938_v50  ;;  %v8943_v48 = vunpack.i.h.bf16 %v10321_v47  ;;  %v698_v41 = vsel %vm247_vm1, %v10427_v44, %v9072_v8  ;;  %v9078_v60 = vunpack.i.h.bf16 %v10546_v46  ;;  %v15251_v5 = vld [vmem:[#allocation37_spill] sm:$0xff]  ;;  %v15253_v8 = vld [vmem:[#allocation27_spill] sm:$0xff] }
 0x188   :  { %9160 = vrot.lane.b32.xlu1 %v9159_v16, %s10014_s25  ;;  %v9204_v62 = vpack.i.bf16 %v1812_v57, %v1744_v18  ;;  %v1816_v2 = vcombine.high %v1812_v57, %v15211_v42  ;;  %v248_v16 = vsel %vm247_vm1, %v10198_v10, %v8952_v21  ;;  %v263_v51 = vsel %vm251_vm3, %v262_v6, %v8958_v53  ;;  %v15247_v57 = vld [vmem:[#allocation26_spill] sm:$0xff] }
 0x189   :  { %v250_v15 = vsel %vm249_vm2, %v248_v16, %v8937_v40  ;;  %v9077_v0 = vunpack.i.l.bf16 %v10546_v46  ;;  %v8962_v18 = vunpack.i.l.bf16 %v10331_v37  ;;  %v9022_v47 = vunpack.i.l.bf16 %v15247_v57 }
 0x18a   :  { %9175 = vrot.lane.b32.xlu0 %v9174_v11, %s10020_s6  ;;  %v9209_v61 = vpack.i.bf16 %v1816_v2, %v1748_v20  ;;  %v252_v10 = vsel %vm251_vm3, %v250_v15, %v8957_v45  ;;  %v264_v43 = vsel %vm253_vm4, %v263_v51, %v8943_v48  ;;  %v8963_v44 = vunpack.i.h.bf16 %v10331_v37  ;;  %v15250_v20 = vld [vmem:[#allocation14_spill] sm:$0xff]  ;;  %v15252_v15 = vld [vmem:[#allocation45_spill] sm:$0xff] }
 0x18b   :  { %v254_v63 = vsel %vm253_vm4, %v252_v10, %v8942_v13  ;;  %v9083_v53 = vunpack.i.h.bf16 %v15251_v5  ;;  %v9082_v50 = vunpack.i.l.bf16 %v15251_v5  ;;  %v9093_v10 = vunpack.i.h.bf16 %v15252_v15 }
 0x18c   :  { %9170 = vrot.lane.b32.xlu1 %v9169_v38, %s10016_s27  ;;  %v256_v46 = vsel %vm255_vm5, %v254_v63, %v8962_v18  ;;  %v265_v37 = vsel %vm255_vm5, %v264_v43, %v8963_v44  ;;  %v9028_v13 = vunpack.i.h.bf16 %v15253_v8  ;;  %v9027_v6 = vunpack.i.l.bf16 %v15253_v8 }
 0x18e   :  { %9185 = vrot.lane.b32.xlu0 %v9184_v1, %s10015_s26 }
 0x190   :  { %9180 = vrot.lane.b32.xlu1 %v9179_v52, %s10017_s28  ;;  %v705_v52 = vsel %vm247_vm1, %v10433_v4, %v9073_v55  ;;  %v8947_v4 = vunpack.i.l.bf16 %v15248_v19  ;;  %v9092_v55 = vunpack.i.l.bf16 %v15252_v15 }
 0x192   :  { %9195 = vrot.lane.b32.xlu0 %v9194_v12, %s10014_s25  ;;  %v10946_v18 = vsel %vm257_vm6, %v256_v46, %v8947_v4  ;;  %v15259_v46 = vld [vmem:[#allocation46_spill] sm:$0xff] }
 0x193   :  { %v9098_v5 = vunpack.i.h.bf16 %v15259_v46  ;;  %v9097_v15 = vunpack.i.l.bf16 %v15259_v46  ;;  %v15262_v46 = vld [vmem:[#allocation43_spill] sm:$0xff] }
 0x194   :  { %9190 = vrot.lane.b32.xlu1 %v9189_v58, %s10018_s29  ;;  %v9023_v58 = vunpack.i.h.bf16 %v15247_v57  ;;  %v15256_v57 = vld [vmem:[#allocation36_spill] sm:$0xff] }
 0x196   :  { %9205 = vrot.lane.b32.xlu0 %v9204_v62, %s10016_s27  ;;  %v8948_v62 = vunpack.i.h.bf16 %v15248_v19  ;;  %v706_v21 = vsel %vm249_vm2, %v705_v52, %v9023_v58  ;;  %v15255_v52 = vld [vmem:[#allocation28_spill] sm:$0xff]  ;;  %v9058_v58 = vunpack.i.h.bf16 %v15256_v57 }
 0x197   :  { %v707_v45 = vsel %vm251_vm3, %v706_v21, %v9078_v60  ;;  %v9032_v60 = vunpack.i.l.bf16 %v15255_v52 }
 0x198   :  { %9200 = vrot.lane.b32.xlu1 %v9199_v59, %s10019_s30  ;;  %v708_v19 = vsel %vm253_vm4, %v707_v45, %v9028_v13  ;;  %v15260_v45 = vld [vmem:[#allocation49_spill] sm:$0xff] }
 0x199   :  { %v709_v21 = vsel %vm255_vm5, %v708_v19, %v9083_v53 }
 0x19a   :  { %1887 = vrot.lane.b32.xlu0 %v10617_v30, %s10021_s7 }
 0x19c   :  { %9210 = vrot.lane.b32.xlu1 %v9209_v61, %s10020_s6  ;;  %v699_v61 = vsel %vm249_vm2, %v698_v41, %v9022_v47  ;;  %v9033_v41 = vunpack.i.h.bf16 %v15255_v52  ;;  %v9057_v47 = vunpack.i.l.bf16 %v15256_v57 }
 0x19d   :  { %v700_v16 = vsel %vm251_vm3, %v699_v61, %v9077_v0  ;;  %v10943_v0 = vsel %vm257_vm6, %v265_v37, %v8948_v62  ;;  %v15258_v37 = vld [vmem:[#allocation24_spill] sm:$0xff] }
 0x19e   :  { %1891 = vrot.lane.b32.xlu0 %v10620_v32, %s10021_s7  ;;  %v701_v43 = vsel %vm253_vm4, %v700_v16, %v9027_v6  ;;  %v1166_v4 = vsel %vm247_vm1, %v15258_v37, %v9092_v55  ;;  %v710_v19 = vsel %vm257_vm6, %v709_v21, %v9033_v41  ;;  %v15263_v41 = vld [vmem:[#allocation47_spill] sm:$0xff] }
 0x19f   :  { %v702_v61 = vsel %vm255_vm5, %v701_v43, %v9082_v50  ;;  %v15261_v50 = vld [vmem:[#allocation38_spill] sm:$0xff]  ;;  %v1167_v37 = vsel %vm249_vm2, %v1166_v4, %v9057_v47  ;;  %v9103_v21 = vunpack.i.h.bf16 %v15263_v41 }
 0x1a0   :  { %1889 = vrot.lane.b32.xlu1 %v10629_v54, %s10021_s7  ;;  %v9063_v6 = vunpack.i.h.bf16 %v15261_v50  ;;  %v9062_v53 = vunpack.i.l.bf16 %v15261_v50  ;;  %v9087_v50 = vunpack.i.l.bf16 %v15262_v46 }
 0x1a2   :  { %1895 = vrot.lane.b32.xlu0 %v10623_v34, %s10021_s7 }
 0x1a4   :  { %1893 = vrot.lane.b32.xlu1 %v10632_v39, %s10021_s7 }
 0x1a6   :  { %1899 = vrot.lane.b32.xlu0 %v10626_v31, %s10021_s7 }
 0x1a8   :  { %1897 = vrot.lane.b32.xlu1 %v10635_v36, %s10021_s7 }
 0x1ac   :  { %1901 = vrot.lane.b32.xlu1 %v10638_v14, %s10021_s7 }
 0x1e4   :  { %v10885_v11 = vpop.permute.xlu0 %9115 }
 0x1e5   :  { %15242 = vst [vmem:[#allocation54_spill] sm:$0xff] %v10885_v11 }
 0x1e6   :  { %v10891_v38 = vpop.permute.xlu1 %9110 }
 0x1e7   :  { %15243 = vst [vmem:[#allocation55_spill] sm:$0xff] %v10891_v38  ;;  %v9998_v38 = vld [vmem:[%s14986_s1 + $0x50] sm:$0xff] }
 0x1e8   :  { %v10898_v1 = vpop.permute.xlu0 %9125 }
 0x1e9   :  { %15244 = vst [vmem:[#allocation56_spill] sm:$0xff] %v10898_v1 }
 0x1ea   :  { %v10903_v3 = vpop.permute.xlu1 %9120 }
 0x1eb   :  { %15245 = vst [vmem:[#allocation57_spill] sm:$0xff] %v10903_v3 }
 0x1ec   :  { %v10913_v12 = vpop.permute.xlu0 %9135 }
 0x1ed   :  { %15246 = vst [vmem:[#allocation58_spill] sm:$0xff] %v10913_v12 }
 0x1ee   :  { %v10922_v59 = vpop.permute.xlu1 %9130 }
 0x1ef   :  { %15249 = vst [vmem:[#allocation26_spill] sm:$0xff] %v10922_v59 }
 0x1f0   :  { %v9146_v40 = vpop.permute.xlu0 %9145 }
 0x1f1   :  { %v9148_v51 = vunpack.i.h.bf16 %v9146_v40  ;;  %v9147_v48 = vunpack.i.l.bf16 %v9146_v40  ;;  %v15257_v40 = vld [vmem:[#allocation25_spill] sm:$0xff] }
 0x1f2   :  { %v10938_v63 = vpop.permute.xlu1 %9140  ;;  %v1173_v62 = vsel %vm247_vm1, %v15257_v40, %v9093_v10  ;;  %v703_v40 = vsel %vm257_vm6, %v702_v61, %v9032_v60  ;;  %v9102_v60 = vunpack.i.l.bf16 %v15263_v41 }
 0x1f3   :  { %15254 = vst [vmem:[#allocation13_spill] sm:$0xff] %v10938_v63  ;;  %v1642_v16 = vsel %vm247_vm1, %v10693_v26, %v9148_v51  ;;  %v1635_v8 = vsel %vm247_vm1, %v15260_v45, %v9147_v48  ;;  %v1174_v26 = vsel %vm249_vm2, %v1173_v62, %v9058_v58  ;;  %v9088_v45 = vunpack.i.h.bf16 %v15262_v46 }
 0x1f4   :  { %v9156_v44 = vpop.permute.xlu0 %9155 }
 0x1f5   :  { %v9158_v57 = vunpack.i.h.bf16 %v9156_v44  ;;  %v9157_v43 = vunpack.i.l.bf16 %v9156_v44  ;;  %v1175_v44 = vsel %vm251_vm3, %v1174_v26, %v9098_v5 }
 0x1f6   :  { %v9151_v13 = vpop.permute.xlu1 %9150 }
 0x1f7   :  { %v9153_v52 = vunpack.i.h.bf16 %v9151_v13  ;;  %v9152_v10 = vunpack.i.l.bf16 %v9151_v13  ;;  %v1168_v13 = vsel %vm251_vm3, %v1167_v37, %v9097_v15 }
 0x1f8   :  { %v9166_v55 = vpop.permute.xlu0 %9165 }
 0x1f9   :  { %v1643_v51 = vsel %vm249_vm2, %v1642_v16, %v9153_v52  ;;  %v1636_v48 = vsel %vm249_vm2, %v1635_v8, %v9152_v10  ;;  %v9168_v58 = vunpack.i.h.bf16 %v9166_v55  ;;  %v9167_v62 = vunpack.i.l.bf16 %v9166_v55  ;;  %v15264_v52 = vld [vmem:[#allocation44_spill] sm:$0xff] }
 0x1fa   :  { %v9161_v22 = vpop.permute.xlu1 %9160  ;;  %v1637_v4 = vsel %vm251_vm3, %v1636_v48, %v9157_v43  ;;  %v1644_v16 = vsel %vm251_vm3, %v1643_v51, %v9158_v57  ;;  %v9068_v10 = vunpack.i.h.bf16 %v15264_v52  ;;  %v9067_v15 = vunpack.i.l.bf16 %v15264_v52 }
 0x1fb   :  { %v9163_v47 = vunpack.i.h.bf16 %v9161_v22  ;;  %v9162_v61 = vunpack.i.l.bf16 %v9161_v22  ;;  %v711_v22 = vsel %vm259_vm7, %v710_v19, %v9088_v45  ;;  %v704_v55 = vsel %vm259_vm7, %v703_v40, %v9087_v50 }
 0x1fc   :  { %v9176_v8 = vpop.permute.xlu0 %9175  ;;  %v1169_v43 = vsel %vm253_vm4, %v1168_v13, %v9062_v53  ;;  %v1176_v51 = vsel %vm253_vm4, %v1175_v44, %v9063_v6  ;;  %v4199_v13 = vrot.slane %v711_v22, 4 }
 0x1fd   :  { %v1638_v5 = vsel %vm253_vm4, %v1637_v4, %v9162_v61  ;;  %v1645_v37 = vsel %vm253_vm4, %v1644_v16, %v9163_v47  ;;  %v9178_v26 = vunpack.i.h.bf16 %v9176_v8  ;;  %v9177_v46 = vunpack.i.l.bf16 %v9176_v8  ;;  %v15266_v16 = vld [vmem:[#allocation48_spill] sm:$0xff] }
 0x1fe   :  { %v9171_v41 = vpop.permute.xlu1 %9170  ;;  %v1170_v2 = vsel %vm255_vm5, %v1169_v43, %v9102_v60  ;;  %v1639_v52 = vsel %vm255_vm5, %v1638_v5, %v9167_v62  ;;  %v1177_v47 = vsel %vm255_vm5, %v1176_v51, %v9103_v21  ;;  %v1646_v4 = vsel %vm255_vm5, %v1645_v37, %v9168_v58 }
 0x1ff   :  { %v9173_v48 = vunpack.i.h.bf16 %v9171_v41  ;;  %v9172_v57 = vunpack.i.l.bf16 %v9171_v41  ;;  %v9108_v19 = vunpack.i.h.bf16 %v15266_v16  ;;  %v9107_v40 = vunpack.i.l.bf16 %v15266_v16 }
 0x200   :  { %v10990_v61 = vpop.permute.xlu0 %9185  ;;  %v4198_v60 = vrot.slane %v704_v55, 4  ;;  %v15269_v58 = vunpack.i.h.bf16 %v15250_v20  ;;  %v1178_v37 = vsel %vm257_vm6, %v1177_v47, %v9068_v10  ;;  %v1171_v41 = vsel %vm257_vm6, %v1170_v2, %v9067_v15 }
 0x201   :  { %15265 = vst [vmem:[#allocation14_spill] sm:$0xff] %v10990_v61  ;;  %v1640_v53 = vsel %vm257_vm6, %v1639_v52, %v9172_v57  ;;  %v1647_v45 = vsel %vm257_vm6, %v1646_v4, %v9173_v48  ;;  %v1179_v43 = vsel %vm259_vm7, %v1178_v37, %v9108_v19  ;;  %v1172_v22 = vsel %vm259_vm7, %v1171_v41, %v9107_v40 }
 0x202   :  { %v10998_v50 = vpop.permute.xlu1 %9180  ;;  %v1648_v6 = vsel %vm259_vm7, %v1647_v45, %v9178_v26  ;;  %v1641_v44 = vsel %vm259_vm7, %v1640_v53, %v9177_v46  ;;  %v267_v5 = vsel %vm259_vm7, %v10943_v0, %v15269_v58  ;;  %v15270_v26 = vunpack.i.l.bf16 %v15250_v20 }
 0x203   :  { %15267 = vst [vmem:[#allocation37_spill] sm:$0xff] %v10998_v50  ;;  %v4205_v62 = vrot.slane %v1648_v6, 4  ;;  %v4204_v21 = vrot.slane %v1641_v44, 4  ;;  %v4222_v48 = vsel %vm4220_vm8, %v267_v5, %v4199_v13 }
 0x204   :  { %v11002_v8 = vpop.permute.xlu0 %9195  ;;  %v260_v46 = vsel %vm259_vm7, %v10946_v18, %v15270_v26 }
 0x205   :  { %15268 = vst [vmem:[#allocation45_spill] sm:$0xff] %v11002_v8  ;;  %v4224_v0 = vsel %vm4220_vm8, %v1179_v43, %v4205_v62  ;;  %v4221_v10 = vsel %vm4220_vm8, %v260_v46, %v4198_v60  ;;  %v4223_v2 = vsel %vm4220_vm8, %v1172_v22, %v4204_v21 }
 0x206   :  { %v11016_v55 = vpop.permute.xlu1 %9190  ;;  %v8887_v15 = vpack.c.bf16 %v4224_v0, %v4222_v48  ;;  %v8889_v57 = vpack.c.bf16 %v4223_v2, %v4221_v10 }
 0x207   :  { %15271 = vst [vmem:[#allocation27_spill] sm:$0xff] %v11016_v55 }
 0x208   :  { %v11022_v51 = vpop.permute.xlu0 %9205  ;;  %8888 = vmatprep.subr.bf16.mxu0 %v8887_v15 }
 0x209   :  { %15272 = vst [vmem:[#allocation28_spill] sm:$0xff] %v11022_v51  ;;  %8890 = vmatpush1.bf16.msra.mxu0 %v8889_v57 }
 0x20a   :  { %v11024_v20 = vpop.permute.xlu1 %9200 }
 0x20b   :  { %15273 = vst [vmem:[#allocation36_spill] sm:$0xff] %v11024_v20 }
 0x20c   :  { %v1888_v18 = vpop.permute.xlu0 %1887 }
 0x20e   :  { %v11026_v52 = vpop.permute.xlu1 %9210 }
 0x20f   :  { %15274 = vst [vmem:[#allocation25_spill] sm:$0xff] %v11026_v52 }
 0x210   :  { %v1892_v47 = vpop.permute.xlu0 %1891 }
 0x212   :  { %v1890_v4 = vpop.permute.xlu1 %1889 }
 0x214   :  { %v1896_v16 = vpop.permute.xlu0 %1895 }
 0x215   :  { %v1911_v40 = vcombine.low %v1888_v18, %v1896_v16  ;;  %v1912_v37 = vcombine.high %v1888_v18, %v1896_v16 }
 0x216   :  { %v1894_v19 = vpop.permute.xlu1 %1893 }
 0x217   :  { %v1919_v44 = vrot.slane %v1911_v40, %v10133_v28  ;;  %v1926_v15 = vrot.slane %v1912_v37, %v10133_v28 }
 0x218   :  { %v1900_v53 = vpop.permute.xlu0 %1899 }
 0x219   :  { %v1927_v45 = vcombine.low %v1892_v47, %v1900_v53  ;;  %v1928_v60 = vcombine.high %v1892_v47, %v1900_v53 }
 0x21a   :  { %v1898_v6 = vpop.permute.xlu1 %1897 }
 0x21b   :  { %v1935_v13 = vrot.slane %v1927_v45, %v10133_v28  ;;  %v1979_v62 = vcombine.low %v1890_v4, %v1898_v6  ;;  %v1980_v21 = vcombine.high %v1890_v4, %v1898_v6  ;;  %v1942_v26 = vrot.slane %v1928_v60, %v10133_v28 }
 0x21d   :  { %v1943_v58 = vcombine.low %v1919_v44, %v1935_v13  ;;  %v1944_v46 = vcombine.high %v1919_v44, %v1935_v13  ;;  %v1987_v22 = vrot.slane %v1979_v62, %v10133_v28  ;;  %v1994_v48 = vrot.slane %v1980_v21, %v10133_v28 }
 0x21e   :  { %v1902_v5 = vpop.permute.xlu1 %1901  ;;  %v1959_v4 = vcombine.low %v1926_v15, %v1942_v26  ;;  %v1960_v60 = vcombine.high %v1926_v15, %v1942_v26 }
 0x21f   :  { %v1995_v41 = vcombine.low %v1894_v19, %v1902_v5  ;;  %v1996_v43 = vcombine.high %v1894_v19, %v1902_v5  ;;  %v11036_v2 = vrot.slane %v1943_v58, %v10150_v33  ;;  %v1958_v16 = vrot.slane %v1944_v46, %v10150_v33 }
 0x220   :  { %v1967_v58 = vrot.slane %v1959_v4, %v10150_v33  ;;  %v1974_v46 = vrot.slane %v1960_v60, %v10150_v33 }
 0x221   :  { %v2003_v0 = vrot.slane %v1995_v41, %v10133_v28  ;;  %v2010_v10 = vrot.slane %v1996_v43, %v10133_v28  ;;  %v1975_v53 = vcombine.high %v11036_v2, %v15211_v42  ;;  %v1976_v5 = vcombine.high %v1958_v16, %v15211_v42 }
 0x222   :  { %v1978_v15 = vcombine.high %v1974_v46, %v15211_v42 }
 0x223   :  { %v2011_v57 = vcombine.low %v1987_v22, %v2003_v0  ;;  %v2012_v18 = vcombine.high %v1987_v22, %v2003_v0  ;;  %v2027_v47 = vcombine.low %v1994_v48, %v2010_v10  ;;  %v2028_v45 = vcombine.high %v1994_v48, %v2010_v10 }
 0x224   :  { %v1977_v48 = vcombine.high %v1967_v58, %v15211_v42 }
 0x225   :  { %v2026_v19 = vrot.slane %v2012_v18, %v10150_v33  ;;  %v11042_v40 = vrot.slane %v2011_v57, %v10150_v33  ;;  %v2035_v44 = vrot.slane %v2027_v47, %v10150_v33  ;;  %v2042_v41 = vrot.slane %v2028_v45, %v10150_v33 }
 0x227   :  { %v9219_v6 = vpack.i.bf16 %v2026_v19, %v1958_v16  ;;  %v2043_v13 = vcombine.high %v11042_v40, %v15211_v42  ;;  %v2044_v62 = vcombine.high %v2026_v19, %v15211_v42  ;;  %v9229_v37 = vpack.i.bf16 %v2035_v44, %v1967_v58 }
 0x228   :  { %v2045_v26 = vcombine.high %v2035_v44, %v15211_v42  ;;  %v9239_v22 = vpack.i.bf16 %v2042_v41, %v1974_v46  ;;  %v2046_v10 = vcombine.high %v2042_v41, %v15211_v42 }
 0x229   :  { %9220 = vrot.lane.b32.xlu1 %v9219_v6, %s10015_s26  ;;  %v9214_v21 = vpack.i.bf16 %v2043_v13, %v1975_v53  ;;  %v9224_v43 = vpack.i.bf16 %v2044_v62, %v1976_v5 }
 0x22a   :  { %v9234_v0 = vpack.i.bf16 %v2045_v26, %v1977_v48  ;;  %v9244_v57 = vpack.i.bf16 %v2046_v10, %v1978_v15 }
 0x22b   :  { %9215 = vrot.lane.b32.xlu0 %v9214_v21, %s10017_s28 }
 0x22d   :  { %9230 = vrot.lane.b32.xlu1 %v9229_v37, %s10014_s25 }
 0x22f   :  { %9225 = vrot.lane.b32.xlu0 %v9224_v43, %s10018_s29 }
 0x231   :  { %9240 = vrot.lane.b32.xlu1 %v9239_v22, %s10016_s27 }
 0x233   :  { %9235 = vrot.lane.b32.xlu0 %v9234_v0, %s10019_s30 }
 0x235   :  { %2117 = vrot.lane.b32.xlu1 %v10747_v7, %s10021_s7 }
 0x237   :  { %9245 = vrot.lane.b32.xlu0 %v9244_v57, %s10020_s6 }
 0x239   :  { %2121 = vrot.lane.b32.xlu1 %v10762_v9, %s10021_s7 }
 0x23b   :  { %2119 = vrot.lane.b32.xlu0 %v10750_v24, %s10021_s7 }
 0x23d   :  { %2125 = vrot.lane.b32.xlu1 %v10753_v29, %s10021_s7 }
 0x23f   :  { %2123 = vrot.lane.b32.xlu0 %v10765_v35, %s10021_s7 }
 0x241   :  { %2129 = vrot.lane.b32.xlu1 %v10768_v25, %s10021_s7 }
 0x243   :  { %2127 = vrot.lane.b32.xlu0 %v10759_v49, %s10021_s7 }
 0x247   :  { %2131 = vrot.lane.b32.xlu0 %v10771_v56, %s10021_s7 }
 0x29b   :  { %v11081_v18 = vpop.permute.xlu1 %9220 }
 0x29d   :  { %v11083_v47 = vpop.permute.xlu0 %9215 }
 0x29f   :  { %v11085_v4 = vpop.permute.xlu1 %9230 }
 0x2a1   :  { %v11087_v16 = vpop.permute.xlu0 %9225 }
 0x2a3   :  { %v11089_v19 = vpop.permute.xlu1 %9240 }
 0x2a5   :  { %v11091_v53 = vpop.permute.xlu0 %9235 }
 0x2a7   :  { %v2118_v45 = vpop.permute.xlu1 %2117 }
 0x2a9   :  { %v11093_v6 = vpop.permute.xlu0 %9245 }
 0x2ab   :  { %v2122_v13 = vpop.permute.xlu1 %2121 }
 0x2ad   :  { %v2120_v44 = vpop.permute.xlu0 %2119 }
 0x2af   :  { %v2126_v60 = vpop.permute.xlu1 %2125 }
 0x2b0   :  { %v2141_v21 = vcombine.low %v2118_v45, %v2126_v60  ;;  %v2142_v10 = vcombine.high %v2118_v45, %v2126_v60 }
 0x2b1   :  { %v2124_v62 = vpop.permute.xlu0 %2123 }
 0x2b2   :  { %v2149_v43 = vrot.slane %v2141_v21, %v10133_v28 }
 0x2b3   :  { %v2130_v58 = vpop.permute.xlu1 %2129 }
 0x2b4   :  { %v2157_v5 = vcombine.low %v2122_v13, %v2130_v58  ;;  %v2158_v46 = vcombine.high %v2122_v13, %v2130_v58 }
 0x2b5   :  { %v2128_v37 = vpop.permute.xlu0 %2127 }
 0x2b6   :  { %v2165_v41 = vrot.slane %v2157_v5, %v10133_v28  ;;  %v2209_v26 = vcombine.low %v2120_v44, %v2128_v37  ;;  %v2210_v22 = vcombine.high %v2120_v44, %v2128_v37  ;;  %v2172_v12 = vrot.slane %v2158_v46, %v10133_v28 }
 0x2b7   :  { %v2156_v44 = vrot.slane %v2142_v10, %v10133_v28 }
 0x2b8   :  { %v2173_v48 = vcombine.low %v2149_v43, %v2165_v41  ;;  %v2174_v63 = vcombine.high %v2149_v43, %v2165_v41  ;;  %v2217_v1 = vrot.slane %v2209_v26, %v10133_v28  ;;  %v2224_v59 = vrot.slane %v2210_v22, %v10133_v28 }
 0x2b9   :  { %v2132_v0 = vpop.permute.xlu0 %2131 }
 0x2ba   :  { %v2225_v15 = vcombine.low %v2124_v62, %v2132_v0  ;;  %v2226_v57 = vcombine.high %v2124_v62, %v2132_v0  ;;  %v11103_v13 = vrot.slane %v2173_v48, %v10150_v33  ;;  %v2189_v62 = vcombine.low %v2156_v44, %v2172_v12 }
 0x2bb   :  { %v2188_v37 = vrot.slane %v2174_v63, %v10150_v33 }
 0x2bc   :  { %v2233_v52 = vrot.slane %v2225_v15, %v10133_v28  ;;  %v2240_v5 = vrot.slane %v2226_v57, %v10133_v28  ;;  %15275 = vst [vmem:[#allocation24_spill] sm:$0xff] %v11103_v13  ;;  %v2205_v43 = vcombine.high %v11103_v13, %v15211_v42  ;;  %v2197_v0 = vrot.slane %v2189_v62, %v10150_v33 }
 0x2bd   :  { %v2206_v15 = vcombine.high %v2188_v37, %v15211_v42 }
 0x2be   :  { %v2241_v21 = vcombine.low %v2217_v1, %v2233_v52  ;;  %v2242_v45 = vcombine.high %v2217_v1, %v2233_v52  ;;  %v2257_v60 = vcombine.low %v2224_v59, %v2240_v5  ;;  %v2258_v46 = vcombine.high %v2224_v59, %v2240_v5 }
 0x2bf   :  { %v2190_v1 = vcombine.high %v2156_v44, %v2172_v12 }
 0x2c0   :  { %v11107_v58 = vrot.slane %v2241_v21, %v10150_v33  ;;  %v2256_v41 = vrot.slane %v2242_v45, %v10150_v33  ;;  %v2265_v48 = vrot.slane %v2257_v60, %v10150_v33  ;;  %v2272_v59 = vrot.slane %v2258_v46, %v10150_v33 }
 0x2c1   :  { %v2204_v5 = vrot.slane %v2190_v1, %v10150_v33  ;;  %v2207_v21 = vcombine.high %v2197_v0, %v15211_v42 }
 0x2c2   :  { %15276 = vst [vmem:[#allocation46_spill] sm:$0xff] %v11107_v58  ;;  %v9254_v26 = vpack.i.bf16 %v2256_v41, %v2188_v37  ;;  %v2273_v22 = vcombine.high %v11107_v58, %v15211_v42  ;;  %v2274_v63 = vcombine.high %v2256_v41, %v15211_v42  ;;  %v9264_v10 = vpack.i.bf16 %v2265_v48, %v2197_v0 }
 0x2c3   :  { %v2275_v12 = vcombine.high %v2265_v48, %v15211_v42  ;;  %v9274_v44 = vpack.i.bf16 %v2272_v59, %v2204_v5  ;;  %v2276_v60 = vcombine.high %v2272_v59, %v15211_v42  ;;  %v2208_v62 = vcombine.high %v2204_v5, %v15211_v42 }
 0x2c4   :  { %9255 = vrot.lane.b32.xlu0 %v9254_v26, %s10015_s26  ;;  %v9249_v52 = vpack.i.bf16 %v2273_v22, %v2205_v43  ;;  %v9259_v57 = vpack.i.bf16 %v2274_v63, %v2206_v15 }
 0x2c5   :  { %v9269_v45 = vpack.i.bf16 %v2275_v12, %v2207_v21  ;;  %v9279_v37 = vpack.i.bf16 %v2276_v60, %v2208_v62 }
 0x2c6   :  { %9250 = vrot.lane.b32.xlu1 %v9249_v52, %s10017_s28 }
 0x2c8   :  { %9265 = vrot.lane.b32.xlu0 %v9264_v10, %s10014_s25 }
 0x2ca   :  { %9260 = vrot.lane.b32.xlu1 %v9259_v57, %s10018_s29 }
 0x2cc   :  { %9275 = vrot.lane.b32.xlu0 %v9274_v44, %s10016_s27 }
 0x2ce   :  { %9270 = vrot.lane.b32.xlu1 %v9269_v45, %s10019_s30 }
 0x2d0   :  { %2347 = vrot.lane.b32.xlu0 %v10617_v30, %s10022_s8 }
 0x2d2   :  { %9280 = vrot.lane.b32.xlu1 %v9279_v37, %s10020_s6 }
 0x2d4   :  { %2351 = vrot.lane.b32.xlu0 %v10620_v32, %s10022_s8 }
 0x2d6   :  { %2349 = vrot.lane.b32.xlu1 %v10629_v54, %s10022_s8 }
 0x2d8   :  { %2355 = vrot.lane.b32.xlu0 %v10623_v34, %s10022_s8 }
 0x2da   :  { %2353 = vrot.lane.b32.xlu1 %v10632_v39, %s10022_s8 }
 0x2dc   :  { %2359 = vrot.lane.b32.xlu0 %v10626_v31, %s10022_s8 }
 0x2de   :  { %2357 = vrot.lane.b32.xlu1 %v10635_v36, %s10022_s8 }
 0x2e2   :  { %2361 = vrot.lane.b32.xlu1 %v10638_v14, %s10022_s8 }
 0x336   :  { %v11148_v30 = vpop.permute.xlu0 %9255 }
 0x337   :  { %15277 = vst [vmem:[#allocation49_spill] sm:$0xff] %v11148_v30 }
 0x338   :  { %v11150_v32 = vpop.permute.xlu1 %9250 }
 0x339   :  { %15278 = vst [vmem:[#allocation38_spill] sm:$0xff] %v11150_v32 }
 0x33a   :  { %v11152_v54 = vpop.permute.xlu0 %9265 }
 0x33b   :  { %15279 = vst [vmem:[#allocation43_spill] sm:$0xff] %v11152_v54 }
 0x33c   :  { %v11154_v41 = vpop.permute.xlu1 %9260 }
 0x33d   :  { %15280 = vst [vmem:[#allocation47_spill] sm:$0xff] %v11154_v41 }
 0x33e   :  { %v11156_v34 = vpop.permute.xlu0 %9275 }
 0x33f   :  { %15281 = vst [vmem:[#allocation44_spill] sm:$0xff] %v11156_v34 }
 0x340   :  { %v11158_v39 = vpop.permute.xlu1 %9270 }
 0x341   :  { %15282 = vst [vmem:[#allocation48_spill] sm:$0xff] %v11158_v39 }
 0x342   :  { %v2348_v43 = vpop.permute.xlu0 %2347 }
 0x344   :  { %v11160_v31 = vpop.permute.xlu1 %9280 }
 0x345   :  { %15283 = vst [vmem:[#allocation59_spill] sm:$0xff] %v11160_v31 }
 0x346   :  { %v2352_v46 = vpop.permute.xlu0 %2351 }
 0x348   :  { %v2350_v36 = vpop.permute.xlu1 %2349 }
 0x34a   :  { %v2356_v26 = vpop.permute.xlu0 %2355 }
 0x34b   :  { %v2371_v14 = vcombine.low %v2348_v43, %v2356_v26  ;;  %v2372_v12 = vcombine.high %v2348_v43, %v2356_v26 }
 0x34c   :  { %v2354_v22 = vpop.permute.xlu1 %2353 }
 0x34d   :  { %v2379_v63 = vrot.slane %v2371_v14, %v10133_v28 }
 0x34e   :  { %v2360_v48 = vpop.permute.xlu0 %2359 }
 0x34f   :  { %v2387_v1 = vcombine.low %v2352_v46, %v2360_v48  ;;  %v2388_v10 = vcombine.high %v2352_v46, %v2360_v48 }
 0x350   :  { %v2358_v52 = vpop.permute.xlu1 %2357 }
 0x351   :  { %v2395_v0 = vrot.slane %v2387_v1, %v10133_v28  ;;  %v2439_v15 = vcombine.low %v2350_v36, %v2358_v52  ;;  %v2440_v59 = vcombine.high %v2350_v36, %v2358_v52  ;;  %v2402_v45 = vrot.slane %v2388_v10, %v10133_v28 }
 0x352   :  { %v2386_v36 = vrot.slane %v2372_v12, %v10133_v28 }
 0x353   :  { %v2403_v57 = vcombine.low %v2379_v63, %v2395_v0  ;;  %v2404_v60 = vcombine.high %v2379_v63, %v2395_v0  ;;  %v2447_v62 = vrot.slane %v2439_v15, %v10133_v28  ;;  %v2454_v37 = vrot.slane %v2440_v59, %v10133_v28 }
 0x354   :  { %v2362_v5 = vpop.permute.xlu1 %2361 }
 0x355   :  { %v2455_v44 = vcombine.low %v2354_v22, %v2362_v5  ;;  %v2456_v21 = vcombine.high %v2354_v22, %v2362_v5  ;;  %v11170_v46 = vrot.slane %v2403_v57, %v10150_v33  ;;  %v2419_v22 = vcombine.low %v2386_v36, %v2402_v45 }
 0x356   :  { %v2418_v52 = vrot.slane %v2404_v60, %v10150_v33 }
 0x357   :  { %v2463_v31 = vrot.slane %v2455_v44, %v10133_v28  ;;  %v2470_v1 = vrot.slane %v2456_v21, %v10133_v28  ;;  %v2435_v63 = vcombine.high %v11170_v46, %v15211_v42  ;;  %v2427_v12 = vrot.slane %v2419_v22, %v10150_v33 }
 0x358   :  { %v2436_v60 = vcombine.high %v2418_v52, %v15211_v42 }
 0x359   :  { %v2471_v14 = vcombine.low %v2447_v62, %v2463_v31  ;;  %v2472_v43 = vcombine.high %v2447_v62, %v2463_v31  ;;  %v2487_v26 = vcombine.low %v2454_v37, %v2470_v1  ;;  %v2488_v10 = vcombine.high %v2454_v37, %v2470_v1 }
 0x35a   :  { %v2420_v31 = vcombine.high %v2386_v36, %v2402_v45 }
 0x35b   :  { %v11174_v48 = vrot.slane %v2471_v14, %v10150_v33  ;;  %v2486_v0 = vrot.slane %v2472_v43, %v10150_v33  ;;  %v2495_v57 = vrot.slane %v2487_v26, %v10150_v33  ;;  %v2502_v62 = vrot.slane %v2488_v10, %v10150_v33 }
 0x35c   :  { %v2434_v1 = vrot.slane %v2420_v31, %v10150_v33  ;;  %v2437_v14 = vcombine.high %v2427_v12, %v15211_v42  ;;  %v15287_v31 = vld [vmem:[#allocation5_spill] sm:$0xff] }
 0x35d   :  { %v9289_v15 = vpack.i.bf16 %v2486_v0, %v2418_v52  ;;  %v2503_v59 = vcombine.high %v11174_v48, %v15211_v42  ;;  %v2504_v44 = vcombine.high %v2486_v0, %v15211_v42  ;;  %v9299_v21 = vpack.i.bf16 %v2495_v57, %v2427_v12  ;;  %v15288_v12 = vld [vmem:[#allocation6_spill] sm:$0xff] }
 0x35e   :  { %v2505_v45 = vcombine.high %v2495_v57, %v15211_v42  ;;  %v9309_v36 = vpack.i.bf16 %v2502_v62, %v2434_v1  ;;  %v2506_v26 = vcombine.high %v2502_v62, %v15211_v42  ;;  %v2438_v22 = vcombine.high %v2434_v1, %v15211_v42  ;;  %v15290_v62 = vld [vmem:[#allocation8_spill] sm:$0xff]  ;;  %v15291_v1 = vld [vmem:[#allocation9_spill] sm:$0xff] }
 0x35f   :  { %9290 = vrot.lane.b32.xlu1 %v9289_v15, %s10015_s26  ;;  %v9284_v5 = vpack.i.bf16 %v2503_v59, %v2435_v63  ;;  %v9294_v37 = vpack.i.bf16 %v2504_v44, %v2436_v60  ;;  %v15285_v15 = vld [vmem:[#allocation4_spill] sm:$0xff]  ;;  %v15286_v59 = vld [vmem:[#allocation39_spill] sm:$0xff]  ;;  %v2814_v44 = vrot.slane %v15288_v12, 2 }
 0x360   :  { %v9304_v43 = vpack.i.bf16 %v2505_v45, %v2437_v14  ;;  %v9314_v52 = vpack.i.bf16 %v2506_v26, %v2438_v22  ;;  %v2811_v57 = vrot.slane %v15286_v59, 2  ;;  %v2823_v45 = vrot.slane %v15291_v1, 2  ;;  %v15293_v26 = vld [vmem:[#allocation40_spill] sm:$0xff] }
 0x361   :  { %9285 = vrot.lane.b32.xlu0 %v9284_v5, %s10017_s28  ;;  %v2813_v5 = vrot.slane %v15287_v31, 2  ;;  %v2816_v22 = vrot.slane %v15293_v26, 2 }
 0x363   :  { %9300 = vrot.lane.b32.xlu1 %v9299_v21, %s10014_s25  ;;  %v15289_v21 = vld [vmem:[#allocation7_spill] sm:$0xff]  ;;  %v11247_v12 = vsel %vm2807_vm9, %v2813_v5, %v2814_v44  ;;  %v11259_v26 = vsel %vm2807_vm9, %v2814_v44, %v2816_v22 }
 0x364   :  { %v2818_v60 = vrot.slane %v15289_v21, 2 }
 0x365   :  { %9295 = vrot.lane.b32.xlu0 %v9294_v37, %s10018_s29  ;;  %v2819_v37 = vrot.slane %v15290_v62, 2 }
 0x367   :  { %9310 = vrot.lane.b32.xlu1 %v9309_v36, %s10016_s27  ;;  %v15292_v36 = vld [vmem:[#allocation10_spill] sm:$0xff]  ;;  %v11250_v21 = vsel %vm2807_vm9, %v2818_v60, %v2819_v37 }
 0x368   :  { %v2824_v14 = vrot.slane %v15292_v36, 2  ;;  %15297 = vst [vmem:[#allocation4_spill] sm:$0xff] %v11250_v21 }
 0x369   :  { %9305 = vrot.lane.b32.xlu0 %v9304_v43, %s10019_s30 }
 0x36a   :  { %v11253_v62 = vsel %vm2807_vm9, %v2823_v45, %v2824_v14 }
 0x36b   :  { %2577 = vrot.lane.b32.xlu1 %v10747_v7, %s10022_s8  ;;  %15298 = vst [vmem:[#allocation39_spill] sm:$0xff] %v11253_v62  ;;  %v2852_v45 = vcombine.low %v11247_v12, %v11253_v62 }
 0x36d   :  { %9315 = vrot.lane.b32.xlu0 %v9314_v52, %s10020_s6  ;;  %v15294_v52 = vld [vmem:[#allocation41_spill] sm:$0xff] }
 0x36f   :  { %2581 = vrot.lane.b32.xlu1 %v10762_v9, %s10022_s8 }
 0x371   :  { %2579 = vrot.lane.b32.xlu0 %v10750_v24, %s10022_s8 }
 0x373   :  { %2585 = vrot.lane.b32.xlu1 %v10753_v29, %s10022_s8 }
 0x375   :  { %2583 = vrot.lane.b32.xlu0 %v10765_v35, %s10022_s8 }
 0x377   :  { %2589 = vrot.lane.b32.xlu1 %v10768_v25, %s10022_s8  ;;  %v15284_v25 = vld [vmem:[#allocation3_spill] sm:$0xff] }
 0x378   :  { %v2808_v10 = vrot.slane %v15284_v25, 2  ;;  %v2821_v25 = vrot.slane %v15294_v52, 2  ;;  %15296 = vst [vmem:[#allocation3_spill] sm:$0xff] %v11247_v12 }
 0x379   :  { %2587 = vrot.lane.b32.xlu0 %v10759_v49, %s10022_s8 }
 0x37a   :  { %v11262_v52 = vsel %vm2807_vm9, %v2819_v37, %v2821_v25 }
 0x37b   :  { %15299 = vst [vmem:[#allocation5_spill] sm:$0xff] %v11262_v52 }
 0x37d   :  { %2591 = vrot.lane.b32.xlu0 %v10771_v56, %s10022_s8  ;;  %v2809_v56 = vrot.slane %v15285_v15, 2  ;;  %v15295_v15 = vld [vmem:[#allocation42_spill] sm:$0xff] }
 0x37e   :  { %v2826_v59 = vrot.slane %v15295_v15, 2  ;;  %v2860_v15 = vrot.slane %v2852_v45, %v10133_v28 }
 0x37f   :  { %v11244_v31 = vsel %vm2807_vm9, %v2808_v10, %v2809_v56  ;;  %v11256_v36 = vsel %vm2807_vm9, %v2809_v56, %v2811_v57 }
 0x380   :  { %v11265_v10 = vsel %vm2807_vm9, %v2824_v14, %v2826_v59  ;;  %v2836_v60 = vcombine.low %v11244_v31, %v11250_v21  ;;  %v2904_v56 = vcombine.low %v11256_v36, %v11262_v52 }
 0x381   :  { %15300 = vst [vmem:[#allocation6_spill] sm:$0xff] %v11265_v10  ;;  %v2920_v57 = vcombine.low %v11259_v26, %v11265_v10 }
 0x382   :  { %v2844_v14 = vrot.slane %v2836_v60, %v10133_v28  ;;  %v2912_v39 = vrot.slane %v2904_v56, %v10133_v28 }
 0x383   :  { %v2928_v54 = vrot.slane %v2920_v57, %v10133_v28 }
 0x384   :  { %v2868_v3 = vcombine.low %v2844_v14, %v2860_v15  ;;  %v2869_v56 = vcombine.high %v2844_v14, %v2860_v15 }
 0x385   :  { %v2936_v20 = vcombine.low %v2912_v39, %v2928_v54  ;;  %v2937_v8 = vcombine.high %v2912_v39, %v2928_v54 }
 0x387   :  { %v11320_v14 = vrot.slane %v2937_v8, %v10150_v33 }
 0x3d1   :  { %v11215_v7 = vpop.permute.xlu1 %9290 }
 0x3d3   :  { %v11217_v9 = vpop.permute.xlu0 %9285 }
 0x3d5   :  { %v11219_v24 = vpop.permute.xlu1 %9300 }
 0x3d7   :  { %v11221_v0 = vpop.permute.xlu0 %9295 }
 0x3d9   :  { %v11223_v29 = vpop.permute.xlu1 %9310 }
 0x3db   :  { %v11225_v35 = vpop.permute.xlu0 %9305 }
 0x3dd   :  { %v11227_v63 = vpop.permute.xlu1 %2577 }
 0x3df   :  { %v11230_v49 = vpop.permute.xlu0 %9315 }
 0x3e1   :  { %v2582_v43 = vpop.permute.xlu1 %2581 }
 0x3e3   :  { %v2580_v34 = vpop.permute.xlu0 %2579 }
 0x3e5   :  { %v2586_v1 = vpop.permute.xlu1 %2585 }
 0x3e6   :  { %v2601_v44 = vcombine.low %v11227_v63, %v2586_v1  ;;  %v2602_v27 = vcombine.high %v11227_v63, %v2586_v1  ;;  %v2921_v63 = vcombine.high %v11259_v26, %v11265_v10 }
 0x3e7   :  { %v2584_v5 = vpop.permute.xlu0 %2583 }
 0x3e8   :  { %v2609_v30 = vrot.slane %v2601_v44, %v10133_v28 }
 0x3e9   :  { %v2590_v37 = vpop.permute.xlu1 %2589 }
 0x3ea   :  { %v2617_v22 = vcombine.low %v2582_v43, %v2590_v37  ;;  %v2618_v41 = vcombine.high %v2582_v43, %v2590_v37 }
 0x3eb   :  { %v2588_v25 = vpop.permute.xlu0 %2587 }
 0x3ec   :  { %v2625_v59 = vrot.slane %v2617_v22, %v10133_v28  ;;  %v2669_v13 = vcombine.low %v2580_v34, %v2588_v25  ;;  %v2670_v58 = vcombine.high %v2580_v34, %v2588_v25  ;;  %v11284_v45 = vrot.slane %v2618_v41, %v10133_v28 }
 0x3ed   :  { %v2837_v41 = vcombine.high %v11244_v31, %v11250_v21 }
 0x3ee   :  { %v2633_v32 = vcombine.low %v2609_v30, %v2625_v59  ;;  %v2634_v22 = vcombine.high %v2609_v30, %v2625_v59  ;;  %v2677_v57 = vrot.slane %v2669_v13, %v10133_v28  ;;  %v2684_v43 = vrot.slane %v2670_v58, %v10133_v28 }
 0x3ef   :  { %v2592_v51 = vpop.permute.xlu0 %2591  ;;  %v2853_v30 = vcombine.high %v11247_v12, %v11253_v62  ;;  %v2616_v13 = vrot.slane %v2602_v27, %v10133_v28  ;;  %v11323_v15 = vrot.slane %v2837_v41, %v10133_v28  ;;  %v2935_v41 = vrot.slane %v2921_v63, %v10133_v28 }
 0x3f0   :  { %v2685_v11 = vcombine.low %v2584_v5, %v2592_v51  ;;  %v2686_v60 = vcombine.high %v2584_v5, %v2592_v51  ;;  %v11291_v37 = vrot.slane %v2633_v32, %v10150_v33  ;;  %v11294_v51 = vrot.slane %v2868_v3, %v10150_v33 }
 0x3f1   :  { %v11305_v32 = vrot.slane %v2869_v56, %v10150_v33  ;;  %v2905_v3 = vcombine.high %v11256_v36, %v11262_v52  ;;  %v2649_v1 = vcombine.low %v2616_v13, %v11284_v45  ;;  %v2648_v27 = vrot.slane %v2634_v22, %v10150_v33 }
 0x3f2   :  { %v2693_v34 = vrot.slane %v2685_v11, %v10133_v28  ;;  %v2700_v44 = vrot.slane %v2686_v60, %v10133_v28  ;;  %15301 = vst [vmem:[#allocation7_spill] sm:$0xff] %v11291_v37  ;;  %v11302_v11 = vrot.slane %v2936_v20, %v10150_v33  ;;  %v2665_v20 = vcombine.high %v11291_v37, %v15211_v42 }
 0x3f3   :  { %v2867_v59 = vrot.slane %v2853_v30, %v10133_v28  ;;  %v2919_v8 = vrot.slane %v2905_v3, %v10133_v28  ;;  %v11346_v3 = vld [vmem:[%s14986_s1 + $0x8] sm:$0xff] }
 0x3f4   :  { %v2701_v54 = vcombine.low %v2677_v57, %v2693_v34  ;;  %v2702_v58 = vcombine.high %v2677_v57, %v2693_v34  ;;  %v2717_v39 = vcombine.low %v2684_v43, %v2700_v44  ;;  %v2718_v60 = vcombine.high %v2684_v43, %v2700_v44 }
 0x3f5   :  { %v2900_v34 = vcombine.high %v11294_v51, %v15211_v42  ;;  %v2657_v44 = vrot.slane %v2649_v1, %v10150_v33  ;;  %v2952_v23 = vcombine.low %v2919_v8, %v2935_v41 }
 0x3f6   :  { %v11313_v5 = vrot.slane %v2701_v54, %v10150_v33  ;;  %v2716_v25 = vrot.slane %v2702_v58, %v10150_v33  ;;  %v2725_v22 = vrot.slane %v2717_v39, %v10150_v33  ;;  %v2968_v54 = vcombine.high %v11302_v11, %v15211_v42 }
 0x3f7   :  { %v2650_v58 = vcombine.high %v2616_v13, %v11284_v45  ;;  %v2884_v39 = vcombine.low %v11323_v15, %v2867_v59  ;;  %v9993_v13 = vld [vmem:[%s14986_s1 + $0x18] sm:$0xff] }
 0x3f8   :  { %15302 = vst [vmem:[#allocation8_spill] sm:$0xff] %v11313_v5  ;;  %v9324_v56 = vpack.i.bf16 %v2716_v25, %v2648_v27  ;;  %v2733_v57 = vcombine.high %v11313_v5, %v15211_v42  ;;  %v2734_v30 = vcombine.high %v2716_v25, %v15211_v42  ;;  %v9991_v5 = vld [vmem:[%s14986_s1] sm:$0xff]  ;;  %v3047_v63 = vrot.slane %v9993_v13, 2 }
 0x3f9   :  { %v3042_v37 = vrot.slane %v9991_v5, 2  ;;  %v9334_v1 = vpack.i.bf16 %v2725_v22, %v2657_v44  ;;  %v2666_v25 = vcombine.high %v2648_v27, %v15211_v42  ;;  %v11358_v5 = vld [vmem:[%s14986_s1 + $0x20] sm:$0xff]  ;;  %v9997_v27 = vld [vmem:[%s14986_s1 + $0x48] sm:$0xff]  ;;  %v2735_v17 = vcombine.high %v2725_v22, %v15211_v42 }
 0x3fa   :  { %9325 = vrot.lane.b32.xlu0 %v9324_v56, %s10015_s26  ;;  %v9319_v43 = vpack.i.bf16 %v2733_v57, %v2665_v20  ;;  %v2732_v20 = vrot.slane %v2718_v60, %v10150_v33  ;;  %v3048_v56 = vrot.slane %v11358_v5, 2  ;;  %v9995_v57 = vld [vmem:[%s14986_s1 + $0x30] sm:$0xff]  ;;  %v3057_v60 = vrot.slane %v9997_v27, 2 }
 0x3fb   :  { %v3052_v45 = vrot.slane %v9995_v57, 2  ;;  %v3058_v5 = vrot.slane %v9998_v38, 2  ;;  %v9329_v55 = vpack.i.bf16 %v2734_v30, %v2666_v25  ;;  %v2664_v57 = vrot.slane %v2650_v58, %v10150_v33 }
 0x3fc   :  { %9320 = vrot.lane.b32.xlu1 %v9319_v43, %s10017_s28  ;;  %v9996_v43 = vld [vmem:[%s14986_s1 + $0x38] sm:$0xff]  ;;  %v9354_v61 = vpack.i.bf16 %v2968_v54, %v2900_v34  ;;  %v2969_v27 = vcombine.high %v11320_v14, %v15211_v42  ;;  %v2667_v38 = vcombine.high %v2657_v44, %v15211_v42  ;;  %v2953_v30 = vcombine.high %v2919_v8, %v2935_v41 }
 0x3fd   :  { %v3053_v13 = vrot.slane %v9996_v43, 2  ;;  %v2901_v43 = vcombine.high %v11305_v32, %v15211_v42  ;;  %v9344_v50 = vpack.i.bf16 %v2732_v20, %v2664_v57  ;;  %v15303_v58 = vrot.slane %v11346_v3, 2 }
 0x3fe   :  { %9335 = vrot.lane.b32.xlu0 %v9334_v1, %s10014_s25  ;;  %v2885_v1 = vcombine.high %v11323_v15, %v2867_v59  ;;  %v11389_v34 = vsel %vm2807_vm9, %v3047_v63, %v3048_v56  ;;  %v11395_v25 = vsel %vm2807_vm9, %v3057_v60, %v3058_v5  ;;  %v2736_v15 = vcombine.high %v2732_v20, %v15211_v42  ;;  %v9999_v20 = vld [vmem:[%s14986_s1 + $0x10] sm:$0x3] }
 0x3ff   :  { %v11386_v22 = vsel %vm2807_vm9, %v3042_v37, %v15303_v58  ;;  %v11392_v54 = vsel %vm2807_vm9, %v3052_v45, %v3053_v13  ;;  %v2892_v59 = vrot.slane %v2884_v39, %v10150_v33  ;;  %v2960_v8 = vrot.slane %v2952_v23, %v10150_v33 }
 0x400   :  { %9330 = vrot.lane.b32.xlu1 %v9329_v55, %s10018_s29  ;;  %v9339_v55 = vpack.i.bf16 %v2735_v17, %v2667_v38  ;;  %v2668_v37 = vcombine.high %v2664_v57, %v15211_v42  ;;  %v3070_v41 = vcombine.low %v11386_v22, %v11392_v54  ;;  %v3086_v44 = vcombine.low %v11389_v34, %v11395_v25  ;;  %v10000_v57 = vld [vmem:[%s14986_s1 + $0x28] sm:$0x3] }
 0x401   :  { %v2899_v45 = vrot.slane %v2885_v1, %v10150_v33  ;;  %v2967_v17 = vrot.slane %v2953_v30, %v10150_v33  ;;  %v9364_v39 = vpack.i.bf16 %v2969_v27, %v2901_v43  ;;  %v2902_v23 = vcombine.high %v2892_v59, %v15211_v42  ;;  %v10002_v43 = vld [vmem:[%s14986_s1 + $0x58] sm:$0x3] }
 0x402   :  { %9345 = vrot.lane.b32.xlu0 %v9344_v50, %s10016_s27  ;;  %v9349_v50 = vpack.i.bf16 %v2736_v15, %v2668_v37  ;;  %v2970_v63 = vcombine.high %v2960_v8, %v15211_v42  ;;  %v3045_v60 = vrot.slane %v9999_v20, 2  ;;  %v3050_v38 = vrot.slane %v10000_v57, 2 }
 0x403   :  { %v3060_v27 = vrot.slane %v10002_v43, 2  ;;  %v9359_v30 = vpack.i.bf16 %v11320_v14, %v11305_v32  ;;  %v3078_v58 = vrot.slane %v3070_v41, %v10133_v28  ;;  %v2903_v15 = vcombine.high %v2899_v45, %v15211_v42 }
 0x404   :  { %9340 = vrot.lane.b32.xlu1 %v9339_v55, %s10019_s30  ;;  %v3094_v55 = vrot.slane %v3086_v44, %v10133_v28  ;;  %v2971_v37 = vcombine.high %v2967_v17, %v15211_v42  ;;  %v3071_v20 = vcombine.high %v11386_v22, %v11392_v54  ;;  %v9374_v57 = vpack.i.bf16 %v2970_v63, %v2902_v23 }
 0x405   :  { %v11442_v14 = vsel %vm2807_vm9, %v3048_v56, %v3050_v38  ;;  %v11448_v44 = vsel %vm2807_vm9, %v3058_v5, %v3060_v27  ;;  %v9379_v5 = vpack.i.bf16 %v2967_v17, %v2899_v45 }
 0x406   :  { %9355 = vrot.lane.b32.xlu0 %v9354_v61, %s10017_s28  ;;  %v10001_v61 = vld [vmem:[%s14986_s1 + $0x40] sm:$0x3]  ;;  %v3102_v23 = vcombine.low %v3078_v58, %v3094_v55  ;;  %v9384_v63 = vpack.i.bf16 %v2971_v37, %v2903_v15  ;;  %v3085_v43 = vrot.slane %v3071_v20, %v10133_v28  ;;  %v3155_v15 = vcombine.high %v11442_v14, %v11448_v44 }
 0x407   :  { %v3055_v1 = vrot.slane %v10001_v61, 2  ;;  %v15304_v61 = vrot.slane %v11346_v3, 2  ;;  %v3103_v3 = vcombine.high %v3078_v58, %v3094_v55 }
 0x408   :  { %9350 = vrot.lane.b32.xlu1 %v9349_v50, %s10020_s6  ;;  %v3087_v50 = vcombine.high %v11389_v34, %v11395_v25 }
 0x409   :  { %v11439_v32 = vsel %vm2807_vm9, %v15304_v61, %v3045_v60  ;;  %v11445_v41 = vsel %vm2807_vm9, %v3053_v13, %v3055_v1  ;;  %v3154_v13 = vcombine.low %v11442_v14, %v11448_v44 }
 0x40a   :  { %9365 = vrot.lane.b32.xlu0 %v9364_v39, %s10018_s29  ;;  %v9369_v39 = vpack.i.bf16 %v2960_v8, %v2892_v59  ;;  %v3101_v60 = vrot.slane %v3087_v50, %v10133_v28  ;;  %v3138_v56 = vcombine.low %v11439_v32, %v11445_v41  ;;  %v11460_v59 = vrot.slane %v3102_v23, %v10150_v33 }
 0x40b   :  { %v3117_v8 = vrot.slane %v3103_v3, %v10150_v33  ;;  %v3162_v27 = vrot.slane %v3154_v13, %v10133_v28  ;;  %v3139_v55 = vcombine.high %v11439_v32, %v11445_v41 }
 0x40c   :  { %9360 = vrot.lane.b32.xlu1 %v9359_v30, %s10015_s26  ;;  %15305 = vst [vmem:[#allocation9_spill] sm:$0xff] %v11460_v59  ;;  %v3118_v38 = vcombine.low %v3085_v43, %v3101_v60  ;;  %v3146_v1 = vrot.slane %v3138_v56, %v10133_v28  ;;  %v3134_v30 = vcombine.high %v11460_v59, %v15211_v42 }
 0x40d   :  { %v3119_v58 = vcombine.high %v3085_v43, %v3101_v60  ;;  %v3135_v37 = vcombine.high %v3117_v8, %v15211_v42  ;;  %v3153_v61 = vrot.slane %v3139_v55, %v10133_v28 }
 0x40e   :  { %9375 = vrot.lane.b32.xlu0 %v9374_v57, %s10019_s30  ;;  %v3126_v45 = vrot.slane %v3118_v38, %v10150_v33  ;;  %v3170_v17 = vcombine.low %v3146_v1, %v3162_v27  ;;  %v3171_v50 = vcombine.high %v3146_v1, %v3162_v27 }
 0x40f   :  { %v3133_v20 = vrot.slane %v3119_v58, %v10150_v33 }
 0x410   :  { %9370 = vrot.lane.b32.xlu1 %v9369_v39, %s10014_s25  ;;  %v11480_v57 = vrot.slane %v3170_v17, %v10150_v33  ;;  %v3169_v39 = vrot.slane %v3155_v15, %v10133_v28  ;;  %v3136_v23 = vcombine.high %v3126_v45, %v15211_v42  ;;  %v3185_v43 = vrot.slane %v3171_v50, %v10150_v33 }
 0x411   :  { %v3137_v60 = vcombine.high %v3133_v20, %v15211_v42 }
 0x412   :  { %9385 = vrot.lane.b32.xlu0 %v9384_v63, %s10020_s6  ;;  %15306 = vst [vmem:[#allocation10_spill] sm:$0xff] %v11480_v57  ;;  %v3202_v63 = vcombine.high %v11480_v57, %v15211_v42  ;;  %v3186_v3 = vcombine.low %v3153_v61, %v3169_v39  ;;  %v3203_v56 = vcombine.high %v3185_v43, %v15211_v42 }
 0x414   :  { %9380 = vrot.lane.b32.xlu1 %v9379_v5, %s10016_s27  ;;  %v3194_v13 = vrot.slane %v3186_v3, %v10150_v33  ;;  %v3187_v5 = vcombine.high %v3153_v61, %v3169_v39 }
 0x416   :  { %3211 = vrot.lane.b32.xlu0 %v3117_v8, %s10015_s26  ;;  %v3204_v8 = vcombine.high %v3194_v13, %v15211_v42  ;;  %v3201_v38 = vrot.slane %v3187_v5, %v10150_v33 }
 0x418   :  { %3207 = vrot.lane.b32.xlu1 %v3134_v30, %s10017_s28  ;;  %v3205_v1 = vcombine.high %v3201_v38, %v15211_v42 }
 0x41a   :  { %3219 = vrot.lane.b32.xlu0 %v3126_v45, %s10014_s25 }
 0x41c   :  { %3215 = vrot.lane.b32.xlu1 %v3135_v37, %s10018_s29 }
 0x41e   :  { %3227 = vrot.lane.b32.xlu0 %v3133_v20, %s10016_s27 }
 0x420   :  { %3223 = vrot.lane.b32.xlu1 %v3136_v23, %s10019_s30 }
 0x422   :  { %3235 = vrot.lane.b32.xlu0 %v3202_v63, %s10017_s28 }
 0x424   :  { %3231 = vrot.lane.b32.xlu1 %v3137_v60, %s10020_s6 }
 0x426   :  { %3243 = vrot.lane.b32.xlu0 %v3203_v56, %s10018_s29 }
 0x428   :  { %3239 = vrot.lane.b32.xlu1 %v3185_v43, %s10015_s26 }
 0x42a   :  { %3251 = vrot.lane.b32.xlu0 %v3204_v8, %s10019_s30 }
 0x42c   :  { %3247 = vrot.lane.b32.xlu1 %v3194_v13, %s10014_s25 }
 0x42e   :  { %3259 = vrot.lane.b32.xlu0 %v3205_v1, %s10020_s6 }
 0x430   :  { %3255 = vrot.lane.b32.xlu1 %v3201_v38, %s10016_s27 }
 0x432   :  { %3278 = vrot.lane.b32.xlu0 %v11256_v36, %s10021_s7 }
 0x434   :  { %3276 = vrot.lane.b32.xlu1 %v11244_v31, %s10021_s7 }
 0x436   :  { %3282 = vrot.lane.b32.xlu0 %v11259_v26, %s10021_s7 }
 0x438   :  { %3280 = vrot.lane.b32.xlu1 %v11247_v12, %s10021_s7 }
 0x43a   :  { %3286 = vrot.lane.b32.xlu0 %v11262_v52, %s10021_s7 }
 0x43c   :  { %3284 = vrot.lane.b32.xlu1 %v11250_v21, %s10021_s7 }
 0x43e   :  { %3290 = vrot.lane.b32.xlu0 %v11265_v10, %s10021_s7 }
 0x440   :  { %3288 = vrot.lane.b32.xlu1 %v11253_v62, %s10021_s7 }
 0x46c   :  { %v11521_v27 = vpop.permute.xlu0 %9325 }
 0x46d   :  { %15307 = vst [vmem:[#allocation40_spill] sm:$0xff] %v11521_v27 }
 0x46e   :  { %v11523_v30 = vpop.permute.xlu1 %9320 }
 0x46f   :  { %15308 = vst [vmem:[#allocation41_spill] sm:$0xff] %v11523_v30 }
 0x470   :  { %v11525_v58 = vpop.permute.xlu0 %9335 }
 0x471   :  { %15309 = vst [vmem:[#allocation42_spill] sm:$0xff] %v11525_v58 }
 0x472   :  { %v11527_v45 = vpop.permute.xlu1 %9330 }
 0x473   :  { %15310 = vst [vmem:[#allocation60_spill] sm:$0xff] %v11527_v45 }
 0x474   :  { %v11529_v17 = vpop.permute.xlu0 %9345 }
 0x475   :  { %15311 = vst [vmem:[#allocation61_spill] sm:$0xff] %v11529_v17 }
 0x476   :  { %v11531_v55 = vpop.permute.xlu1 %9340 }
 0x477   :  { %15312 = vst [vmem:[#allocation62_spill] sm:$0xff] %v11531_v55 }
 0x478   :  { %v11533_v15 = vpop.permute.xlu0 %9355 }
 0x47a   :  { %v11535_v37 = vpop.permute.xlu1 %9350 }
 0x47b   :  { %15313 = vst [vmem:[#allocation63_spill] sm:$0xff] %v11535_v37 }
 0x47c   :  { %v11537_v20 = vpop.permute.xlu0 %9365 }
 0x47e   :  { %v11539_v50 = vpop.permute.xlu1 %9360 }
 0x480   :  { %v11541_v61 = vpop.permute.xlu0 %9375 }
 0x482   :  { %v11543_v39 = vpop.permute.xlu1 %9370 }
 0x484   :  { %v11545_v23 = vpop.permute.xlu0 %9385 }
 0x486   :  { %v11547_v63 = vpop.permute.xlu1 %9380 }
 0x488   :  { %v11549_v43 = vpop.permute.xlu0 %3211 }
 0x489   :  { %15314 = vst [vmem:[#allocation64_spill] sm:$0xff] %v11549_v43 }
 0x48a   :  { %v11551_v3 = vpop.permute.xlu1 %3207 }
 0x48b   :  { %15315 = vst [vmem:[#allocation65_spill] sm:$0xff] %v11551_v3 }
 0x48c   :  { %v11553_v60 = vpop.permute.xlu0 %3219 }
 0x48d   :  { %15316 = vst [vmem:[#allocation66_spill] sm:$0xff] %v11553_v60 }
 0x48e   :  { %v11555_v56 = vpop.permute.xlu1 %3215 }
 0x48f   :  { %15317 = vst [vmem:[#allocation67_spill] sm:$0xff] %v11555_v56 }
 0x490   :  { %v11557_v13 = vpop.permute.xlu0 %3227 }
 0x491   :  { %15318 = vst [vmem:[#allocation68_spill] sm:$0xff] %v11557_v13 }
 0x492   :  { %v11559_v5 = vpop.permute.xlu1 %3223 }
 0x493   :  { %15319 = vst [vmem:[#allocation69_spill] sm:$0xff] %v11559_v5 }
 0x494   :  { %v11561_v8 = vpop.permute.xlu0 %3235 }
 0x495   :  { %15320 = vst [vmem:[#allocation70_spill] sm:$0xff] %v11561_v8 }
 0x496   :  { %v11563_v38 = vpop.permute.xlu1 %3231 }
 0x497   :  { %15321 = vst [vmem:[#allocation71_spill] sm:$0xff] %v11563_v38 }
 0x498   :  { %v11565_v1 = vpop.permute.xlu0 %3243 }
 0x499   :  { %15322 = vst [vmem:[#allocation72_spill] sm:$0xff] %v11565_v1 }
 0x49a   :  { %v11567_v59 = vpop.permute.xlu1 %3239 }
 0x49b   :  { %15323 = vst [vmem:[#allocation73_spill] sm:$0xff] %v11567_v59 }
 0x49c   :  { %v11569_v37 = vpop.permute.xlu0 %3251 }
 0x49d   :  { %15324 = vst [vmem:[#allocation74_spill] sm:$0xff] %v11569_v37 }
 0x49e   :  { %v11571_v43 = vpop.permute.xlu1 %3247 }
 0x49f   :  { %15325 = vst [vmem:[#allocation75_spill] sm:$0xff] %v11571_v43 }
 0x4a0   :  { %v11573_v3 = vpop.permute.xlu0 %3259 }
 0x4a1   :  { %15326 = vst [vmem:[#allocation76_spill] sm:$0xff] %v11573_v3 }
 0x4a2   :  { %v11575_v60 = vpop.permute.xlu1 %3255 }
 0x4a3   :  { %15327 = vst [vmem:[#allocation77_spill] sm:$0xff] %v11575_v60 }
 0x4a4   :  { %v3279_v56 = vpop.permute.xlu0 %3278 }
 0x4a6   :  { %v3277_v13 = vpop.permute.xlu1 %3276 }
 0x4a8   :  { %v3283_v17 = vpop.permute.xlu0 %3282 }
 0x4aa   :  { %v3281_v5 = vpop.permute.xlu1 %3280 }
 0x4ac   :  { %v3287_v57 = vpop.permute.xlu0 %3286 }
 0x4ad   :  { %v3368_v58 = vcombine.low %v3279_v56, %v3287_v57  ;;  %v3369_v59 = vcombine.high %v3279_v56, %v3287_v57 }
 0x4ae   :  { %v3285_v8 = vpop.permute.xlu1 %3284 }
 0x4af   :  { %v3300_v55 = vcombine.low %v3277_v13, %v3285_v8  ;;  %v3301_v1 = vcombine.high %v3277_v13, %v3285_v8  ;;  %v3376_v43 = vrot.slane %v3368_v58, %v10133_v28 }
 0x4b0   :  { %v3291_v38 = vpop.permute.xlu0 %3290 }
 0x4b1   :  { %v3384_v27 = vcombine.low %v3283_v17, %v3291_v38  ;;  %v3385_v45 = vcombine.high %v3283_v17, %v3291_v38  ;;  %v3308_v62 = vrot.slane %v3300_v55, %v10133_v28  ;;  %v3315_v10 = vrot.slane %v3301_v1, %v10133_v28 }
 0x4b2   :  { %v3289_v37 = vpop.permute.xlu1 %3288  ;;  %v3383_v17 = vrot.slane %v3369_v59, %v10133_v28 }
 0x4b3   :  { %v3392_v3 = vrot.slane %v3384_v27, %v10133_v28  ;;  %v3316_v30 = vcombine.low %v3281_v5, %v3289_v37  ;;  %v3317_v60 = vcombine.high %v3281_v5, %v3289_v37  ;;  %v3399_v52 = vrot.slane %v3385_v45, %v10133_v28 }
 0x4b5   :  { %v3400_v21 = vcombine.low %v3376_v43, %v3392_v3  ;;  %v3401_v12 = vcombine.high %v3376_v43, %v3392_v3  ;;  %v3324_v13 = vrot.slane %v3316_v30, %v10133_v28  ;;  %v3331_v57 = vrot.slane %v3317_v60, %v10133_v28 }
 0x4b6   :  { %v3416_v5 = vcombine.low %v3383_v17, %v3399_v52 }
 0x4b7   :  { %v11586_v58 = vrot.slane %v3400_v21, %v10150_v33  ;;  %v3332_v27 = vcombine.low %v3308_v62, %v3324_v13  ;;  %v3333_v56 = vcombine.high %v3308_v62, %v3324_v13  ;;  %v3348_v37 = vcombine.low %v3315_v10, %v3331_v57 }
 0x4b8   :  { %v3415_v45 = vrot.slane %v3401_v12, %v10150_v33  ;;  %v3349_v43 = vcombine.high %v3315_v10, %v3331_v57  ;;  %v3417_v62 = vcombine.high %v3383_v17, %v3399_v52  ;;  %v3424_v38 = vrot.slane %v3416_v5, %v10150_v33 }
 0x4b9   :  { %v11589_v55 = vrot.slane %v3332_v27, %v10150_v33  ;;  %v3347_v8 = vrot.slane %v3333_v56, %v10150_v33  ;;  %v3432_v21 = vcombine.high %v11586_v58, %v15211_v42  ;;  %v3356_v59 = vrot.slane %v3348_v37, %v10150_v33 }
 0x4ba   :  { %v3433_v10 = vcombine.high %v3415_v45, %v15211_v42  ;;  %v3363_v13 = vrot.slane %v3349_v43, %v10150_v33  ;;  %v3431_v27 = vrot.slane %v3417_v62, %v10150_v33  ;;  %v3434_v56 = vcombine.high %v3424_v38, %v15211_v42 }
 0x4bb   :  { %v9394_v30 = vpack.i.bf16 %v3415_v45, %v3347_v8  ;;  %v3364_v3 = vcombine.high %v11589_v55, %v15211_v42  ;;  %v3365_v1 = vcombine.high %v3347_v8, %v15211_v42  ;;  %v9404_v12 = vpack.i.bf16 %v3424_v38, %v3356_v59 }
 0x4bc   :  { %v3366_v52 = vcombine.high %v3356_v59, %v15211_v42  ;;  %v9414_v17 = vpack.i.bf16 %v3431_v27, %v3363_v13  ;;  %v3367_v5 = vcombine.high %v3363_v13, %v15211_v42  ;;  %v3435_v8 = vcombine.high %v3431_v27, %v15211_v42 }
 0x4bd   :  { %9395 = vrot.lane.b32.xlu0 %v9394_v30, %s10015_s26  ;;  %v9389_v60 = vpack.i.bf16 %v3432_v21, %v3364_v3  ;;  %v9399_v57 = vpack.i.bf16 %v3433_v10, %v3365_v1  ;;  %v9218_v43 = vunpack.i.h.bf16 %v11083_v47  ;;  %v9217_v30 = vunpack.i.l.bf16 %v11083_v47 }
 0x4be   :  { %v9409_v37 = vpack.i.bf16 %v3434_v56, %v3366_v52  ;;  %v9419_v45 = vpack.i.bf16 %v3435_v8, %v3367_v5  ;;  %v9288_v3 = vunpack.i.h.bf16 %v11217_v9  ;;  %v9287_v21 = vunpack.i.l.bf16 %v11217_v9 }
 0x4bf   :  { %9390 = vrot.lane.b32.xlu1 %v9389_v60, %s10017_s28  ;;  %v9223_v59 = vunpack.i.h.bf16 %v11081_v18  ;;  %v9222_v62 = vunpack.i.l.bf16 %v11081_v18  ;;  %v2110_v60 = vsel %vm247_vm1, %v11042_v40, %v9218_v43  ;;  %v2103_v38 = vsel %vm247_vm1, %v11036_v2, %v9217_v30 }
 0x4c0   :  { %v9228_v1 = vunpack.i.h.bf16 %v11087_v16  ;;  %v2570_v47 = vsel %vm247_vm1, %v11174_v48, %v9288_v3  ;;  %v2563_v9 = vsel %vm247_vm1, %v11170_v46, %v9287_v21  ;;  %v9298_v10 = vunpack.i.h.bf16 %v11221_v0 }
 0x4c1   :  { %9405 = vrot.lane.b32.xlu0 %v9404_v12, %s10014_s25  ;;  %v9227_v12 = vunpack.i.l.bf16 %v11087_v16  ;;  %v9297_v18 = vunpack.i.l.bf16 %v11221_v0  ;;  %v9293_v13 = vunpack.i.h.bf16 %v11215_v7  ;;  %v9292_v40 = vunpack.i.l.bf16 %v11215_v7 }
 0x4c2   :  { %v9233_v2 = vunpack.i.h.bf16 %v11085_v4  ;;  %v2104_v16 = vsel %vm249_vm2, %v2103_v38, %v9222_v62  ;;  %v2111_v27 = vsel %vm249_vm2, %v2110_v60, %v9223_v59  ;;  %v9308_v56 = vunpack.i.h.bf16 %v11225_v35 }
 0x4c3   :  { %9400 = vrot.lane.b32.xlu1 %v9399_v57, %s10018_s29  ;;  %v9232_v57 = vunpack.i.l.bf16 %v11085_v4  ;;  %v2105_v48 = vsel %vm251_vm3, %v2104_v16, %v9227_v12  ;;  %v2112_v46 = vsel %vm251_vm3, %v2111_v27, %v9228_v1  ;;  %v2564_v52 = vsel %vm249_vm2, %v2563_v9, %v9292_v40 }
 0x4c4   :  { %v2571_v0 = vsel %vm249_vm2, %v2570_v47, %v9293_v13  ;;  %v9307_v4 = vunpack.i.l.bf16 %v11225_v35  ;;  %v9237_v5 = vunpack.i.l.bf16 %v11091_v53  ;;  %v9303_v8 = vunpack.i.h.bf16 %v11219_v24 }
 0x4c5   :  { %9415 = vrot.lane.b32.xlu0 %v9414_v17, %s10016_s27  ;;  %v2565_v17 = vsel %vm251_vm3, %v2564_v52, %v9297_v18  ;;  %v2572_v7 = vsel %vm251_vm3, %v2571_v0, %v9298_v10  ;;  %v9243_v43 = vunpack.i.h.bf16 %v11089_v19  ;;  %v9242_v30 = vunpack.i.l.bf16 %v11089_v19 }
 0x4c6   :  { %v2106_v3 = vsel %vm253_vm4, %v2105_v48, %v9232_v57  ;;  %v2113_v21 = vsel %vm253_vm4, %v2112_v46, %v9233_v2  ;;  %v2573_v35 = vsel %vm253_vm4, %v2572_v7, %v9303_v8  ;;  %v9358_v60 = vunpack.i.h.bf16 %v11533_v15 }
 0x4c7   :  { %9410 = vrot.lane.b32.xlu1 %v9409_v37, %s10019_s30  ;;  %v9238_v37 = vunpack.i.h.bf16 %v11091_v53  ;;  %v2574_v53 = vsel %vm255_vm5, %v2573_v35, %v9308_v56  ;;  %v11677_v1 = vsel %vm255_vm5, %v2106_v3, %v9237_v5  ;;  %v9313_v47 = vunpack.i.h.bf16 %v11223_v29 }
 0x4c8   :  { %v9312_v9 = vunpack.i.l.bf16 %v11223_v29  ;;  %v9248_v10 = vunpack.i.h.bf16 %v11093_v6  ;;  %v9247_v18 = vunpack.i.l.bf16 %v11093_v6  ;;  %v9363_v13 = vunpack.i.h.bf16 %v11539_v50 }
 0x4c9   :  { %3506 = vrot.lane.b32.xlu0 %v11386_v22, %s10021_s7  ;;  %v11680_v12 = vsel %vm255_vm5, %v2113_v21, %v9238_v37  ;;  %v9362_v40 = vunpack.i.l.bf16 %v11539_v50  ;;  %v2575_v57 = vsel %vm257_vm6, %v2574_v53, %v9313_v47  ;;  %v9318_v48 = vunpack.i.h.bf16 %v11230_v49 }
 0x4ca   :  { %v9317_v46 = vunpack.i.l.bf16 %v11230_v49  ;;  %v3035_v29 = vsel %vm247_vm1, %v11302_v11, %v9358_v60  ;;  %v9368_v50 = vunpack.i.h.bf16 %v11537_v20  ;;  %v9372_v8 = vunpack.i.l.bf16 %v11543_v39 }
 0x4cb   :  { %9420 = vrot.lane.b32.xlu1 %v9419_v45, %s10020_s6  ;;  %v9302_v45 = vunpack.i.l.bf16 %v11219_v24  ;;  %v9357_v24 = vunpack.i.l.bf16 %v11533_v15  ;;  %v9378_v35 = vunpack.i.h.bf16 %v11541_v61 }
 0x4cd   :  { %3510 = vrot.lane.b32.xlu0 %v11389_v34, %s10021_s7  ;;  %v2566_v59 = vsel %vm253_vm4, %v2565_v17, %v9302_v45  ;;  %v3028_v52 = vsel %vm247_vm1, %v11294_v51, %v9357_v24  ;;  %v9367_v17 = vunpack.i.l.bf16 %v11537_v20  ;;  %v9373_v51 = vunpack.i.h.bf16 %v11543_v39 }
 0x4ce   :  { %v2567_v62 = vsel %vm255_vm5, %v2566_v59, %v9307_v4  ;;  %v3036_v4 = vsel %vm249_vm2, %v3035_v29, %v9363_v13  ;;  %v3029_v49 = vsel %vm249_vm2, %v3028_v52, %v9362_v40 }
 0x4cf   :  { %3508 = vrot.lane.b32.xlu1 %v11439_v32, %s10021_s7  ;;  %v2568_v2 = vsel %vm257_vm6, %v2567_v62, %v9312_v9  ;;  %v9377_v62 = vunpack.i.l.bf16 %v11541_v61  ;;  %v3030_v39 = vsel %vm251_vm3, %v3029_v49, %v9367_v17  ;;  %v3037_v24 = vsel %vm251_vm3, %v3036_v4, %v9368_v50 }
 0x4d0   :  { %v2569_v20 = vsel %vm259_vm7, %v2568_v2, %v9317_v46  ;;  %v3031_v13 = vsel %vm253_vm4, %v3030_v39, %v9372_v8  ;;  %v3038_v40 = vsel %vm253_vm4, %v3037_v24, %v9373_v51  ;;  %v9382_v61 = vunpack.i.l.bf16 %v11547_v63 }
 0x4d1   :  { %3514 = vrot.lane.b32.xlu0 %v11392_v54, %s10021_s7  ;;  %v4210_v46 = vrot.slane %v2569_v20, 4  ;;  %v9388_v50 = vunpack.i.h.bf16 %v11545_v23  ;;  %v9387_v17 = vunpack.i.l.bf16 %v11545_v23  ;;  %v3039_v49 = vsel %vm255_vm5, %v3038_v40, %v9378_v35 }
 0x4d2   :  { %v2108_v35 = vsel %vm257_vm6, %v11677_v1, %v9242_v30 }
 0x4d3   :  { %3512 = vrot.lane.b32.xlu1 %v11442_v14, %s10021_s7 }
 0x4d5   :  { %3518 = vrot.lane.b32.xlu0 %v11395_v25, %s10021_s7 }
 0x4d7   :  { %3516 = vrot.lane.b32.xlu1 %v11445_v41, %s10021_s7 }
 0x4db   :  { %3520 = vrot.lane.b32.xlu1 %v11448_v44, %s10021_s7 }
 0x52f   :  { %v9396_v38 = vpop.permute.xlu0 %9395 }
 0x530   :  { %v9398_v37 = vunpack.i.h.bf16 %v9396_v38  ;;  %v9397_v11 = vunpack.i.l.bf16 %v9396_v38 }
 0x531   :  { %v9391_v15 = vpop.permute.xlu1 %9390 }
 0x532   :  { %v9393_v16 = vunpack.i.h.bf16 %v9391_v15  ;;  %v9392_v27 = vunpack.i.l.bf16 %v9391_v15 }
 0x533   :  { %v9406_v0 = vpop.permute.xlu0 %9405 }
 0x534   :  { %v3499_v7 = vsel %vm247_vm1, %v11586_v58, %v9393_v16  ;;  %v3492_v56 = vsel %vm247_vm1, %v11589_v55, %v9392_v27  ;;  %v2576_v58 = vsel %vm259_vm7, %v2575_v57, %v9318_v48  ;;  %v9408_v38 = vunpack.i.h.bf16 %v9406_v0 }
 0x535   :  { %v9401_v5 = vpop.permute.xlu1 %9400  ;;  %v3493_v21 = vsel %vm249_vm2, %v3492_v56, %v9397_v11  ;;  %v3500_v55 = vsel %vm249_vm2, %v3499_v7, %v9398_v37  ;;  %v9407_v47 = vunpack.i.l.bf16 %v9406_v0  ;;  %v9383_v57 = vunpack.i.h.bf16 %v11547_v63 }
 0x536   :  { %v9403_v45 = vunpack.i.h.bf16 %v9401_v5  ;;  %v9402_v3 = vunpack.i.l.bf16 %v9401_v5  ;;  %v4211_v29 = vrot.slane %v2576_v58, 4  ;;  %v3032_v63 = vsel %vm255_vm5, %v3031_v13, %v9377_v62 }
 0x537   :  { %v9416_v59 = vpop.permute.xlu0 %9415  ;;  %v3033_v5 = vsel %vm257_vm6, %v3032_v63, %v9382_v61  ;;  %v3040_v51 = vsel %vm257_vm6, %v3039_v49, %v9383_v57 }
 0x538   :  { %v3494_v53 = vsel %vm251_vm3, %v3493_v21, %v9402_v3  ;;  %v3501_v60 = vsel %vm251_vm3, %v3500_v55, %v9403_v45  ;;  %v9418_v7 = vunpack.i.h.bf16 %v9416_v59  ;;  %v9417_v56 = vunpack.i.l.bf16 %v9416_v59 }
 0x539   :  { %v9411_v9 = vpop.permute.xlu1 %9410  ;;  %v3495_v16 = vsel %vm253_vm4, %v3494_v53, %v9407_v47  ;;  %v3502_v27 = vsel %vm253_vm4, %v3501_v60, %v9408_v38  ;;  %v2115_v59 = vsel %vm257_vm6, %v11680_v12, %v9243_v43  ;;  %v3041_v53 = vsel %vm259_vm7, %v3040_v51, %v9388_v50 }
 0x53a   :  { %v9413_v15 = vunpack.i.h.bf16 %v9411_v9  ;;  %v9412_v2 = vunpack.i.l.bf16 %v9411_v9  ;;  %v2116_v62 = vsel %vm259_vm7, %v2115_v59, %v9248_v10  ;;  %v2109_v60 = vsel %vm259_vm7, %v2108_v35, %v9247_v18 }
 0x53b   :  { %v3507_v48 = vpop.permute.xlu0 %3506  ;;  %v3034_v39 = vsel %vm259_vm7, %v3033_v5, %v9387_v17  ;;  %v4226_v43 = vsel %vm4220_vm8, %v2116_v62, %v4211_v29  ;;  %v4225_v12 = vsel %vm4220_vm8, %v2109_v60, %v4210_v46 }
 0x53c   :  { %v3496_v52 = vsel %vm255_vm5, %v3495_v16, %v9412_v2  ;;  %v3503_v0 = vsel %vm255_vm5, %v3502_v27, %v9413_v15 }
 0x53d   :  { %v9421_v4 = vpop.permute.xlu1 %9420  ;;  %v3497_v8 = vsel %vm257_vm6, %v3496_v52, %v9417_v56  ;;  %v3504_v45 = vsel %vm257_vm6, %v3503_v0, %v9418_v7 }
 0x53e   :  { %v9423_v37 = vunpack.i.h.bf16 %v9421_v4  ;;  %v9422_v11 = vunpack.i.l.bf16 %v9421_v4 }
 0x53f   :  { %v3511_v3 = vpop.permute.xlu0 %3510 }
 0x540   :  { %v3498_v23 = vsel %vm259_vm7, %v3497_v8, %v9422_v11  ;;  %v3505_v20 = vsel %vm259_vm7, %v3504_v45, %v9423_v37 }
 0x541   :  { %v4216_v58 = vrot.slane %v3498_v23, 4  ;;  %v4217_v21 = vrot.slane %v3505_v20, 4  ;;  %v3509_v55 = vpop.permute.xlu1 %3508 }
 0x543   :  { %v3515_v24 = vpop.permute.xlu0 %3514  ;;  %v4228_v19 = vsel %vm4220_vm8, %v3041_v53, %v4217_v21  ;;  %v4227_v30 = vsel %vm4220_vm8, %v3034_v39, %v4216_v58 }
 0x544   :  { %v8891_v1 = vpack.c.bf16 %v4228_v19, %v4226_v43  ;;  %v8893_v38 = vpack.c.bf16 %v4227_v30, %v4225_v12  ;;  %v3530_v47 = vcombine.low %v3507_v48, %v3515_v24  ;;  %v3531_v6 = vcombine.high %v3507_v48, %v3515_v24  ;;  %v15328_v43 = vld [vmem:[#allocation3_spill] sm:$0xff]  ;;  %v15329_v19 = vld [vmem:[#allocation5_spill] sm:$0xff]  ;;  %v15330_v12 = vld [vmem:[#allocation4_spill] sm:$0xff] }
 0x545   :  { %v3513_v10 = vpop.permute.xlu1 %3512  ;;  %v15331_v30 = vld [vmem:[#allocation6_spill] sm:$0xff] }
 0x546   :  { %8892 = vmatprep.subr.bf16.mxu0 %v8891_v1  ;;  %v3538_v15 = vrot.slane %v3530_v47, %v10133_v28  ;;  %v3545_v61 = vrot.slane %v3531_v6, %v10133_v28 }
 0x547   :  { %v3519_v9 = vpop.permute.xlu0 %3518  ;;  %8894 = vmatpush1.bf16.msra.mxu0 %v8893_v38 }
 0x548   :  { %v3546_v18 = vcombine.low %v3511_v3, %v3519_v9  ;;  %v3547_v13 = vcombine.high %v3511_v3, %v3519_v9 }
 0x549   :  { %v3517_v40 = vpop.permute.xlu1 %3516 }
 0x54a   :  { %v3554_v2 = vrot.slane %v3546_v18, %v10133_v28  ;;  %v3561_v57 = vrot.slane %v3547_v13, %v10133_v28  ;;  %v3598_v46 = vcombine.low %v3509_v55, %v3517_v40  ;;  %v3599_v11 = vcombine.high %v3509_v55, %v3517_v40 }
 0x54c   :  { %v3562_v16 = vcombine.low %v3538_v15, %v3554_v2  ;;  %v3563_v27 = vcombine.high %v3538_v15, %v3554_v2  ;;  %v3578_v52 = vcombine.low %v3545_v61, %v3561_v57  ;;  %v3606_v17 = vrot.slane %v3598_v46, %v10133_v28 }
 0x54d   :  { %v3521_v29 = vpop.permute.xlu1 %3520  ;;  %v3579_v4 = vcombine.high %v3545_v61, %v3561_v57  ;;  %v3613_v23 = vrot.slane %v3599_v11, %v10133_v28 }
 0x54e   :  { %v3614_v0 = vcombine.low %v3513_v10, %v3521_v29  ;;  %v3577_v50 = vrot.slane %v3563_v27, %v10150_v33  ;;  %v11760_v48 = vrot.slane %v3562_v16, %v10150_v33  ;;  %v3615_v63 = vcombine.high %v3513_v10, %v3521_v29 }
 0x54f   :  { %v3586_v37 = vrot.slane %v3578_v52, %v10150_v33  ;;  %v3593_v45 = vrot.slane %v3579_v4, %v10150_v33 }
 0x550   :  { %v3622_v7 = vrot.slane %v3614_v0, %v10133_v28  ;;  %3671 = vrot.lane.b32.xlu1 %v3577_v50, %s10015_s26  ;;  %v3594_v56 = vcombine.high %v11760_v48, %v15211_v42  ;;  %v3595_v5 = vcombine.high %v3577_v50, %v15211_v42  ;;  %v3629_v51 = vrot.slane %v3615_v63, %v10133_v28 }
 0x551   :  { %v3596_v20 = vcombine.high %v3586_v37, %v15211_v42  ;;  %v3597_v59 = vcombine.high %v3593_v45, %v15211_v42 }
 0x552   :  { %v3630_v49 = vcombine.low %v3606_v17, %v3622_v7  ;;  %3667 = vrot.lane.b32.xlu0 %v3594_v56, %s10017_s28  ;;  %v3631_v8 = vcombine.high %v3606_v17, %v3622_v7  ;;  %v3646_v58 = vcombine.low %v3613_v23, %v3629_v51  ;;  %v3647_v35 = vcombine.high %v3613_v23, %v3629_v51 }
 0x554   :  { %3679 = vrot.lane.b32.xlu1 %v3586_v37, %s10014_s25  ;;  %v11775_v3 = vrot.slane %v3630_v49, %v10150_v33  ;;  %v3645_v55 = vrot.slane %v3631_v8, %v10150_v33  ;;  %v3654_v53 = vrot.slane %v3646_v58, %v10150_v33  ;;  %v3661_v39 = vrot.slane %v3647_v35, %v10150_v33 }
 0x556   :  { %3675 = vrot.lane.b32.xlu0 %v3595_v5, %s10018_s29  ;;  %v3662_v21 = vcombine.high %v11775_v3, %v15211_v42  ;;  %v3663_v62 = vcombine.high %v3645_v55, %v15211_v42  ;;  %v3664_v60 = vcombine.high %v3654_v53, %v15211_v42  ;;  %v3665_v24 = vcombine.high %v3661_v39, %v15211_v42 }
 0x558   :  { %3687 = vrot.lane.b32.xlu1 %v3593_v45, %s10016_s27 }
 0x55a   :  { %3683 = vrot.lane.b32.xlu0 %v3596_v20, %s10019_s30 }
 0x55c   :  { %3695 = vrot.lane.b32.xlu1 %v3662_v21, %s10017_s28 }
 0x55e   :  { %3691 = vrot.lane.b32.xlu0 %v3597_v59, %s10020_s6 }
 0x560   :  { %3703 = vrot.lane.b32.xlu1 %v3663_v62, %s10018_s29 }
 0x562   :  { %3699 = vrot.lane.b32.xlu0 %v3645_v55, %s10015_s26 }
 0x564   :  { %3711 = vrot.lane.b32.xlu1 %v3664_v60, %s10019_s30 }
 0x566   :  { %3707 = vrot.lane.b32.xlu0 %v3654_v53, %s10014_s25 }
 0x568   :  { %3719 = vrot.lane.b32.xlu1 %v3665_v24, %s10020_s6 }
 0x56a   :  { %3715 = vrot.lane.b32.xlu0 %v3661_v39, %s10016_s27 }
 0x56c   :  { %3738 = vrot.lane.b32.xlu1 %v11256_v36, %s10022_s8  ;;  %v15332_v36 = vld [vmem:[#allocation39_spill] sm:$0xff] }
 0x56e   :  { %3736 = vrot.lane.b32.xlu0 %v11244_v31, %s10022_s8 }
 0x570   :  { %3742 = vrot.lane.b32.xlu1 %v11259_v26, %s10022_s8 }
 0x572   :  { %3740 = vrot.lane.b32.xlu0 %v15328_v43, %s10022_s8 }
 0x574   :  { %3746 = vrot.lane.b32.xlu1 %v15329_v19, %s10022_s8 }
 0x576   :  { %3744 = vrot.lane.b32.xlu0 %v15330_v12, %s10022_s8 }
 0x578   :  { %3750 = vrot.lane.b32.xlu1 %v15331_v30, %s10022_s8 }
 0x57a   :  { %3748 = vrot.lane.b32.xlu0 %v15332_v36, %s10022_s8 }
 0x5c2   :  { %v11814_v1 = vpop.permute.xlu1 %3671 }
 0x5c4   :  { %v11816_v31 = vpop.permute.xlu0 %3667 }
 0x5c6   :  { %v11818_v26 = vpop.permute.xlu1 %3679 }
 0x5c8   :  { %v11820_v38 = vpop.permute.xlu0 %3675 }
 0x5ca   :  { %v11822_v10 = vpop.permute.xlu1 %3687 }
 0x5cc   :  { %v11824_v47 = vpop.permute.xlu0 %3683 }
 0x5ce   :  { %v11826_v9 = vpop.permute.xlu1 %3695 }
 0x5d0   :  { %v11828_v6 = vpop.permute.xlu0 %3691 }
 0x5d2   :  { %v11830_v18 = vpop.permute.xlu1 %3703 }
 0x5d4   :  { %v11832_v13 = vpop.permute.xlu0 %3699 }
 0x5d6   :  { %v11834_v40 = vpop.permute.xlu1 %3711 }
 0x5d8   :  { %v11836_v15 = vpop.permute.xlu0 %3707 }
 0x5da   :  { %v11838_v2 = vpop.permute.xlu1 %3719 }
 0x5dc   :  { %v11840_v57 = vpop.permute.xlu0 %3715 }
 0x5de   :  { %v3739_v61 = vpop.permute.xlu1 %3738 }
 0x5e0   :  { %v3737_v16 = vpop.permute.xlu0 %3736 }
 0x5e2   :  { %v3743_v27 = vpop.permute.xlu1 %3742 }
 0x5e4   :  { %v3741_v46 = vpop.permute.xlu0 %3740 }
 0x5e6   :  { %v3747_v29 = vpop.permute.xlu1 %3746 }
 0x5e7   :  { %v3828_v0 = vcombine.low %v3739_v61, %v3747_v29  ;;  %v3829_v4 = vcombine.high %v3739_v61, %v3747_v29 }
 0x5e8   :  { %v3745_v52 = vpop.permute.xlu0 %3744 }
 0x5e9   :  { %v3760_v17 = vcombine.low %v3737_v16, %v3745_v52  ;;  %v3761_v7 = vcombine.high %v3737_v16, %v3745_v52  ;;  %v3836_v37 = vrot.slane %v3828_v0, %v10133_v28  ;;  %v3843_v59 = vrot.slane %v3829_v4, %v10133_v28 }
 0x5ea   :  { %v3751_v50 = vpop.permute.xlu1 %3750 }
 0x5eb   :  { %v3844_v56 = vcombine.low %v3743_v27, %v3751_v50  ;;  %v3845_v63 = vcombine.high %v3743_v27, %v3751_v50  ;;  %v3768_v8 = vrot.slane %v3760_v17, %v10133_v28  ;;  %v3775_v45 = vrot.slane %v3761_v7, %v10133_v28 }
 0x5ec   :  { %v3749_v49 = vpop.permute.xlu0 %3748 }
 0x5ed   :  { %v3852_v11 = vrot.slane %v3844_v56, %v10133_v28  ;;  %v3776_v5 = vcombine.low %v3741_v46, %v3749_v49  ;;  %v3777_v51 = vcombine.high %v3741_v46, %v3749_v49  ;;  %v3859_v20 = vrot.slane %v3845_v63, %v10133_v28 }
 0x5ef   :  { %v3860_v23 = vcombine.low %v3836_v37, %v3852_v11  ;;  %v3861_v58 = vcombine.high %v3836_v37, %v3852_v11  ;;  %v3784_v21 = vrot.slane %v3776_v5, %v10133_v28  ;;  %v3791_v55 = vrot.slane %v3777_v51, %v10133_v28 }
 0x5f0   :  { %v3876_v39 = vcombine.low %v3843_v59, %v3859_v20  ;;  %v3877_v27 = vcombine.high %v3843_v59, %v3859_v20  ;;  %v15336_v20 = vld [vmem:[#allocation17_spill] sm:$0xff] }
 0x5f1   :  { %v11851_v35 = vrot.slane %v3860_v23, %v10150_v33  ;;  %v3792_v62 = vcombine.low %v3768_v8, %v3784_v21  ;;  %v3793_v53 = vcombine.high %v3768_v8, %v3784_v21  ;;  %v3808_v60 = vcombine.low %v3775_v45, %v3791_v55  ;;  %v15335_v23 = vld [vmem:[#allocation12_spill] sm:$0xff] }
 0x5f2   :  { %v3875_v19 = vrot.slane %v3861_v58, %v10150_v33  ;;  %v3809_v12 = vcombine.high %v3775_v45, %v3791_v55  ;;  %v3884_v29 = vrot.slane %v3876_v39, %v10150_v33  ;;  %v3891_v56 = vrot.slane %v3877_v27, %v10150_v33  ;;  %v15338_v55 = vld [vmem:[#allocation18_spill] sm:$0xff] }
 0x5f3   :  { %v11854_v24 = vrot.slane %v3792_v62, %v10150_v33  ;;  %v3807_v43 = vrot.slane %v3793_v53, %v10150_v33  ;;  %v3892_v61 = vcombine.high %v11851_v35, %v15211_v42  ;;  %v3816_v16 = vrot.slane %v3808_v60, %v10150_v33  ;;  %v15339_v53 = vld [vmem:[#allocation30_spill] sm:$0xff] }
 0x5f4   :  { %v3893_v50 = vcombine.high %v3875_v19, %v15211_v42  ;;  %v3823_v17 = vrot.slane %v3809_v12, %v10150_v33  ;;  %v3894_v49 = vcombine.high %v3884_v29, %v15211_v42  ;;  %v3895_v5 = vcombine.high %v3891_v56, %v15211_v42 }
 0x5f5   :  { %v9429_v30 = vpack.i.bf16 %v3875_v19, %v3807_v43  ;;  %v3824_v36 = vcombine.high %v11854_v24, %v15211_v42  ;;  %v3825_v52 = vcombine.high %v3807_v43, %v15211_v42  ;;  %v9439_v0 = vpack.i.bf16 %v3884_v29, %v3816_v16  ;;  %v15340_v19 = vld [vmem:[#allocation19_spill] sm:$0xff] }
 0x5f6   :  { %v3826_v4 = vcombine.high %v3816_v16, %v15211_v42  ;;  %v9449_v63 = vpack.i.bf16 %v3891_v56, %v3823_v17  ;;  %v3827_v11 = vcombine.high %v3823_v17, %v15211_v42  ;;  %v8983_v58 = vunpack.i.h.bf16 %v15336_v20  ;;  %v15341_v16 = vld [vmem:[#allocation22_spill] sm:$0xff]  ;;  %v15344_v56 = vld [vmem:[#allocation29_spill] sm:$0xff] }
 0x5f7   :  { %9430 = vrot.lane.b32.xlu1 %v9429_v30, %s10015_s26  ;;  %v9424_v46 = vpack.i.bf16 %v3892_v61, %v3824_v36  ;;  %v9434_v7 = vpack.i.bf16 %v3893_v50, %v3825_v52  ;;  %v8988_v59 = vunpack.i.h.bf16 %v15338_v55  ;;  %v9038_v60 = vunpack.i.h.bf16 %v15339_v53  ;;  %v15343_v52 = vld [vmem:[#allocation32_spill] sm:$0xff] }
 0x5f8   :  { %v9444_v37 = vpack.i.bf16 %v3894_v49, %v3826_v4  ;;  %v9454_v51 = vpack.i.bf16 %v3895_v5, %v3827_v11  ;;  %v9037_v39 = vunpack.i.l.bf16 %v15339_v53  ;;  %v8987_v43 = vunpack.i.l.bf16 %v15338_v55  ;;  %v15345_v49 = vld [vmem:[#allocation20_spill] sm:$0xff]  ;;  %v15346_v5 = vld [vmem:[#allocation37_spill] sm:$0xff]  ;;  %v15350_v55 = vld [vmem:[#allocation14_spill] sm:$0xff] }
 0x5f9   :  { %9425 = vrot.lane.b32.xlu0 %v9424_v46, %s10017_s28  ;;  %v8993_v12 = vunpack.i.h.bf16 %v15340_v19  ;;  %v943_v27 = vsel %vm247_vm1, %v15341_v16, %v9038_v60  ;;  %v15342_v46 = vld [vmem:[#allocation23_spill] sm:$0xff]  ;;  %v9042_v50 = vunpack.i.l.bf16 %v15343_v52  ;;  %v8992_v17 = vunpack.i.l.bf16 %v15340_v19  ;;  %v15351_v53 = vld [vmem:[#allocation53_spill] sm:$0xff] }
 0x5fa   :  { %v936_v29 = vsel %vm247_vm1, %v15342_v46, %v9037_v39  ;;  %v9008_v4 = vunpack.i.h.bf16 %v15344_v56  ;;  %v15352_v39 = vld [vmem:[#allocation52_spill] sm:$0xff] }
 0x5fb   :  { %9440 = vrot.lane.b32.xlu1 %v9439_v0, %s10014_s25  ;;  %v9043_v0 = vunpack.i.h.bf16 %v15343_v52 }
 0x5fd   :  { %9435 = vrot.lane.b32.xlu0 %v9434_v7, %s10018_s29 }
 0x5ff   :  { %9450 = vrot.lane.b32.xlu1 %v9449_v63, %s10016_s27  ;;  %v9007_v63 = vunpack.i.l.bf16 %v15344_v56 }
 0x601   :  { %9445 = vrot.lane.b32.xlu0 %v9444_v37, %s10019_s30  ;;  %v8998_v37 = vunpack.i.h.bf16 %v15345_v49 }
 0x603   :  { %3966 = vrot.lane.b32.xlu1 %v11386_v22, %s10022_s8  ;;  %v15333_v22 = vld [vmem:[#allocation15_spill] sm:$0xff] }
 0x604   :  { %v8977_v8 = vunpack.i.l.bf16 %v15333_v22 }
 0x605   :  { %9455 = vrot.lane.b32.xlu0 %v9454_v51, %s10020_s6  ;;  %v9183_v51 = vunpack.i.h.bf16 %v15346_v5 }
 0x607   :  { %3970 = vrot.lane.b32.xlu1 %v11389_v34, %s10022_s8  ;;  %v8978_v34 = vunpack.i.h.bf16 %v15333_v22  ;;  %v9182_v22 = vunpack.i.l.bf16 %v15346_v5  ;;  %v1880_v60 = vsel %vm247_vm1, %v15351_v53, %v9183_v51 }
 0x609   :  { %3968 = vrot.lane.b32.xlu0 %v11439_v32, %s10022_s8  ;;  %v15334_v32 = vld [vmem:[#allocation16_spill] sm:$0xff] }
 0x60a   :  { %v8973_v45 = vunpack.i.h.bf16 %v15334_v32 }
 0x60b   :  { %3974 = vrot.lane.b32.xlu1 %v11392_v54, %s10022_s8  ;;  %v8972_v54 = vunpack.i.l.bf16 %v15334_v32  ;;  %v8997_v32 = vunpack.i.l.bf16 %v15345_v49 }
 0x60d   :  { %3972 = vrot.lane.b32.xlu0 %v11442_v14, %s10022_s8  ;;  %v467_v14 = vsel %vm247_vm1, %v15335_v23, %v8978_v34  ;;  %v15347_v34 = vld [vmem:[#allocation21_spill] sm:$0xff] }
 0x60f   :  { %3978 = vrot.lane.b32.xlu1 %v11395_v25, %s10022_s8  ;;  %v15337_v25 = vld [vmem:[#allocation11_spill] sm:$0xff] }
 0x610   :  { %v460_v21 = vsel %vm247_vm1, %v15337_v25, %v8977_v8  ;;  %v9003_v8 = vunpack.i.h.bf16 %v15347_v34 }
 0x611   :  { %3976 = vrot.lane.b32.xlu0 %v11445_v41, %s10022_s8  ;;  %v8982_v41 = vunpack.i.l.bf16 %v15336_v20  ;;  %v461_v62 = vsel %vm249_vm2, %v460_v21, %v8972_v54  ;;  %v944_v54 = vsel %vm249_vm2, %v943_v27, %v9008_v4  ;;  %v15348_v20 = vld [vmem:[#allocation34_spill] sm:$0xff]  ;;  %v15349_v21 = vld [vmem:[#allocation31_spill] sm:$0xff] }
 0x612   :  { %v9047_v25 = vunpack.i.l.bf16 %v15348_v20 }
 0x613   :  { %v462_v36 = vsel %vm251_vm3, %v461_v62, %v8982_v41  ;;  %v9013_v41 = vunpack.i.h.bf16 %v15349_v21  ;;  %v9187_v62 = vunpack.i.l.bf16 %v15350_v55 }
 0x614   :  { %v11923_v7 = vsel %vm253_vm4, %v462_v36, %v8987_v43  ;;  %v1873_v43 = vsel %vm247_vm1, %v15352_v39, %v9182_v22  ;;  %v15360_v39 = vld [vmem:[#allocation51_spill] sm:$0xff] }
 0x615   :  { %3980 = vrot.lane.b32.xlu0 %v11448_v44, %s10022_s8  ;;  %v468_v44 = vsel %vm249_vm2, %v467_v14, %v8973_v45  ;;  %v937_v45 = vsel %vm249_vm2, %v936_v29, %v9007_v63  ;;  %v945_v14 = vsel %vm251_vm3, %v944_v54, %v9043_v0  ;;  %v15356_v63 = vld [vmem:[#allocation45_spill] sm:$0xff]  ;;  %v1874_v22 = vsel %vm249_vm2, %v1873_v43, %v9187_v62 }
 0x616   :  { %v469_v30 = vsel %vm251_vm3, %v468_v44, %v8983_v58  ;;  %v938_v23 = vsel %vm251_vm3, %v937_v45, %v9042_v50  ;;  %v9048_v58 = vunpack.i.h.bf16 %v15348_v20  ;;  %v9012_v44 = vunpack.i.l.bf16 %v15349_v21  ;;  %v15355_v50 = vld [vmem:[#allocation55_spill] sm:$0xff]  ;;  %v15362_v43 = vld [vmem:[#allocation57_spill] sm:$0xff] }
 0x617   :  { %v470_v61 = vsel %vm253_vm4, %v469_v30, %v8988_v59  ;;  %v9188_v59 = vunpack.i.h.bf16 %v15350_v55  ;;  %v946_v29 = vsel %vm253_vm4, %v945_v14, %v9013_v41  ;;  %v9113_v56 = vunpack.i.h.bf16 %v15355_v50  ;;  %v15357_v14 = vld [vmem:[#allocation36_spill] sm:$0xff] }
 0x618   :  { %v11929_v11 = vsel %vm255_vm5, %v470_v61, %v8993_v12  ;;  %v15353_v12 = vld [vmem:[#allocation27_spill] sm:$0xff]  ;;  %v15354_v61 = vld [vmem:[#allocation33_spill] sm:$0xff]  ;;  %v939_v46 = vsel %vm253_vm4, %v938_v23, %v9012_v44  ;;  %v947_v0 = vsel %vm255_vm5, %v946_v29, %v9048_v58  ;;  %v9112_v4 = vunpack.i.l.bf16 %v15355_v50  ;;  %v15359_v44 = vld [vmem:[#allocation54_spill] sm:$0xff] }
 0x619   :  { %v9193_v30 = vunpack.i.h.bf16 %v15353_v12  ;;  %v9192_v36 = vunpack.i.l.bf16 %v15353_v12  ;;  %v9018_v16 = vunpack.i.h.bf16 %v15354_v61  ;;  %v9017_v27 = vunpack.i.l.bf16 %v15354_v61 }
 0x61a   :  { %v940_v52 = vsel %vm255_vm5, %v939_v46, %v9047_v25  ;;  %v9198_v5 = vunpack.i.h.bf16 %v15356_v63  ;;  %v9197_v51 = vunpack.i.l.bf16 %v15356_v63  ;;  %v1881_v45 = vsel %vm249_vm2, %v1880_v60, %v9188_v59  ;;  %v15358_v25 = vld [vmem:[#allocation35_spill] sm:$0xff]  ;;  %v15361_v59 = vld [vmem:[#allocation50_spill] sm:$0xff] }
 0x61b   :  { %v1875_v54 = vsel %vm251_vm3, %v1874_v22, %v9192_v36  ;;  %v1882_v23 = vsel %vm251_vm3, %v1881_v45, %v9193_v30  ;;  %v9203_v20 = vunpack.i.h.bf16 %v15357_v14  ;;  %v9202_v58 = vunpack.i.l.bf16 %v15357_v14  ;;  %v15363_v36 = vld [vmem:[#allocation28_spill] sm:$0xff] }
 0x61c   :  { %v9053_v21 = vunpack.i.h.bf16 %v15358_v25  ;;  %v948_v41 = vsel %vm257_vm6, %v947_v0, %v9018_v16  ;;  %v9118_v55 = vunpack.i.h.bf16 %v15359_v44  ;;  %v9117_v53 = vunpack.i.l.bf16 %v15359_v44 }
 0x61d   :  { %v1403_v62 = vsel %vm247_vm1, %v15360_v39, %v9113_v56  ;;  %v1396_v60 = vsel %vm247_vm1, %v15361_v59, %v9112_v4  ;;  %v9123_v12 = vunpack.i.h.bf16 %v15362_v43  ;;  %v9122_v30 = vunpack.i.l.bf16 %v15362_v43  ;;  %v15364_v56 = vld [vmem:[#allocation25_spill] sm:$0xff] }
 0x61e   :  { %v9208_v61 = vunpack.i.h.bf16 %v15363_v36  ;;  %v9207_v46 = vunpack.i.l.bf16 %v15363_v36  ;;  %v1876_v16 = vsel %vm253_vm4, %v1875_v54, %v9197_v51  ;;  %v1883_v29 = vsel %vm253_vm4, %v1882_v23, %v9198_v5  ;;  %v15365_v54 = vld [vmem:[#allocation26_spill] sm:$0xff] }
 0x61f   :  { %v1877_v0 = vsel %vm255_vm5, %v1876_v16, %v9202_v58  ;;  %v1884_v50 = vsel %vm255_vm5, %v1883_v29, %v9203_v20  ;;  %v9213_v63 = vunpack.i.h.bf16 %v15364_v56  ;;  %v9212_v4 = vunpack.i.l.bf16 %v15364_v56  ;;  %v15366_v58 = vld [vmem:[#allocation56_spill] sm:$0xff]  ;;  %v15369_v56 = vld [vmem:[#allocation38_spill] sm:$0xff] }
 0x620   :  { %v9052_v22 = vunpack.i.l.bf16 %v15358_v25  ;;  %v949_v45 = vsel %vm259_vm7, %v948_v41, %v9053_v21  ;;  %v1397_v14 = vsel %vm249_vm2, %v1396_v60, %v9117_v53  ;;  %v1404_v44 = vsel %vm249_vm2, %v1403_v62, %v9118_v55 }
 0x621   :  { %v1398_v51 = vsel %vm251_vm3, %v1397_v14, %v9122_v30  ;;  %v1405_v5 = vsel %vm251_vm3, %v1404_v44, %v9123_v12  ;;  %v9133_v23 = vunpack.i.h.bf16 %v15365_v54  ;;  %v9132_v20 = vunpack.i.l.bf16 %v15365_v54  ;;  %v15370_v54 = vld [vmem:[#allocation46_spill] sm:$0xff] }
 0x622   :  { %v9128_v39 = vunpack.i.h.bf16 %v15366_v58  ;;  %v9127_v59 = vunpack.i.l.bf16 %v15366_v58  ;;  %v1878_v25 = vsel %vm257_vm6, %v1877_v0, %v9207_v46  ;;  %v1885_v21 = vsel %vm257_vm6, %v1884_v50, %v9208_v61  ;;  %v15367_v46 = vld [vmem:[#allocation13_spill] sm:$0xff] }
 0x623   :  { %v472_v41 = vsel %vm257_vm6, %v11929_v11, %v8998_v37  ;;  %v941_v55 = vsel %vm257_vm6, %v940_v52, %v9017_v27  ;;  %v1879_v53 = vsel %vm259_vm7, %v1878_v25, %v9212_v4  ;;  %v1886_v62 = vsel %vm259_vm7, %v1885_v21, %v9213_v63  ;;  %v15368_v11 = vld [vmem:[#allocation58_spill] sm:$0xff]  ;;  %v15373_v25 = vld [vmem:[#allocation49_spill] sm:$0xff] }
 0x624   :  { %v942_v60 = vsel %vm259_vm7, %v941_v55, %v9052_v22  ;;  %v4232_v43 = vrot.slane %v949_v45, 4  ;;  %v1399_v12 = vsel %vm253_vm4, %v1398_v51, %v9127_v59  ;;  %v1406_v30 = vsel %vm253_vm4, %v1405_v5, %v9128_v39  ;;  %v15374_v55 = vld [vmem:[#allocation41_spill] sm:$0xff] }
 0x625   :  { %v1400_v36 = vsel %vm255_vm5, %v1399_v12, %v9132_v20  ;;  %v1407_v61 = vsel %vm255_vm5, %v1406_v30, %v9133_v23  ;;  %v9143_v16 = vunpack.i.h.bf16 %v15367_v46  ;;  %v9142_v37 = vunpack.i.l.bf16 %v15367_v46  ;;  %v15372_v20 = vld [vmem:[#allocation47_spill] sm:$0xff] }
 0x626   :  { %v9138_v27 = vunpack.i.h.bf16 %v15368_v11  ;;  %v9137_v52 = vunpack.i.l.bf16 %v15368_v11  ;;  %v4237_v29 = vrot.slane %v1879_v53, 4  ;;  %v4238_v0 = vrot.slane %v1886_v62, 4  ;;  %v15375_v30 = vld [vmem:[#allocation43_spill] sm:$0xff] }
 0x627   :  { %v464_v50 = vsel %vm255_vm5, %v11923_v7, %v8992_v17  ;;  %v9253_v63 = vunpack.i.h.bf16 %v15369_v56  ;;  %v9252_v4 = vunpack.i.l.bf16 %v15369_v56  ;;  %v9002_v22 = vunpack.i.l.bf16 %v15347_v34  ;;  %v15371_v34 = vld [vmem:[#allocation24_spill] sm:$0xff] }
 0x628   :  { %v465_v45 = vsel %vm257_vm6, %v464_v50, %v8997_v32  ;;  %v1401_v14 = vsel %vm257_vm6, %v1400_v36, %v9137_v52  ;;  %v1408_v44 = vsel %vm257_vm6, %v1407_v61, %v9138_v27  ;;  %v473_v19 = vsel %vm259_vm7, %v472_v41, %v9003_v8  ;;  %v15376_v27 = vld [vmem:[#allocation48_spill] sm:$0xff] }
 0x629   :  { %v4231_v51 = vrot.slane %v942_v60, 4  ;;  %v1402_v17 = vsel %vm259_vm7, %v1401_v14, %v9142_v37  ;;  %v1409_v7 = vsel %vm259_vm7, %v1408_v44, %v9143_v16  ;;  %v12031_v5 = vsel %vm4220_vm8, %v473_v19, %v4232_v43  ;;  %v15377_v50 = vld [vmem:[#allocation44_spill] sm:$0xff] }
 0x62a   :  { %v12034_v49 = vsel %vm4220_vm8, %v1409_v7, %v4238_v0  ;;  %v12037_v32 = vsel %vm4220_vm8, %v1402_v17, %v4237_v29  ;;  %v2340_v23 = vsel %vm247_vm1, %v15370_v54, %v9253_v63  ;;  %v2333_v8 = vsel %vm247_vm1, %v15371_v34, %v9252_v4  ;;  %v15378_v63 = vld [vmem:[#allocation7_spill] sm:$0xff]  ;;  %v15380_v14 = vld [vmem:[#allocation40_spill] sm:$0xff] }
 0x62b   :  { %v9263_v58 = vunpack.i.h.bf16 %v15372_v20  ;;  %v9262_v39 = vunpack.i.l.bf16 %v15372_v20  ;;  %v466_v59 = vsel %vm259_vm7, %v465_v45, %v9002_v22  ;;  %v9258_v21 = vunpack.i.h.bf16 %v15373_v25  ;;  %v15379_v22 = vld [vmem:[#allocation60_spill] sm:$0xff] }
 0x62c   :  { %v9257_v41 = vunpack.i.l.bf16 %v15373_v25  ;;  %v9322_v53 = vunpack.i.l.bf16 %v15374_v55  ;;  %v9323_v62 = vunpack.i.h.bf16 %v15374_v55  ;;  %v8516_v60 = vrot.slane %v12031_v5, 4  ;;  %v15381_v19 = vld [vmem:[#allocation8_spill] sm:$0xff]  ;;  %v15383_v55 = vld [vmem:[#allocation42_spill] sm:$0xff] }
 0x62d   :  { %v8521_v43 = vrot.slane %v12034_v49, 4  ;;  %v12053_v12 = vsel %vm4220_vm8, %v466_v59, %v4231_v51  ;;  %v9268_v36 = vunpack.i.h.bf16 %v15375_v30  ;;  %v2341_v46 = vsel %vm249_vm2, %v2340_v23, %v9258_v21 }
 0x62e   :  { %v2334_v61 = vsel %vm249_vm2, %v2333_v8, %v9257_v41  ;;  %v8519_v16 = vrot.slane %v12037_v32, 4  ;;  %v2342_v11 = vsel %vm251_vm3, %v2341_v46, %v9263_v58  ;;  %v9273_v52 = vunpack.i.h.bf16 %v15376_v27  ;;  %v15384_v46 = vld [vmem:[#allocation70_spill] sm:$0xff]  ;;  %v8857_v32 = vld [vmem:[%s14985_s0 + $0x68] sm:$0xff] }
 0x62f   :  { %v2335_v37 = vsel %vm251_vm3, %v2334_v61, %v9262_v39  ;;  %v9272_v29 = vunpack.i.l.bf16 %v15376_v27  ;;  %v9267_v0 = vunpack.i.l.bf16 %v15375_v30  ;;  %v9278_v56 = vunpack.i.h.bf16 %v15377_v50 }
 0x630   :  { %v2793_v4 = vsel %vm247_vm1, %v15378_v63, %v9322_v53  ;;  %v9332_v45 = vunpack.i.l.bf16 %v15379_v22  ;;  %v9327_v44 = vunpack.i.l.bf16 %v15380_v14  ;;  %v2800_v51 = vsel %vm247_vm1, %v15381_v19, %v9323_v62 }
 0x631   :  { %v9333_v17 = vunpack.i.h.bf16 %v15379_v22  ;;  %v3729_v7 = vsel %vm247_vm1, %v11775_v3, %v11826_v9  ;;  %v2336_v54 = vsel %vm253_vm4, %v2335_v37, %v9267_v0  ;;  %v2343_v23 = vsel %vm253_vm4, %v2342_v11, %v9268_v36  ;;  %v15382_v9 = vld [vmem:[#allocation62_spill] sm:$0xff]  ;;  %v15387_v0 = vld [vmem:[#allocation59_spill] sm:$0xff] }
 0x632   :  { %v9328_v34 = vunpack.i.h.bf16 %v15380_v14  ;;  %v3730_v8 = vsel %vm249_vm2, %v3729_v7, %v11832_v13  ;;  %v9277_v20 = vunpack.i.l.bf16 %v15377_v50  ;;  %v2337_v58 = vsel %vm255_vm5, %v2336_v54, %v9272_v29  ;;  %v15385_v37 = vld [vmem:[#allocation10_spill] sm:$0xff]  ;;  %v15389_v14 = vld [vmem:[#allocation63_spill] sm:$0xff]  ;;  %v15391_v7 = vld [vmem:[#allocation9_spill] sm:$0xff] }
 0x633   :  { %v2344_v39 = vsel %vm255_vm5, %v2343_v23, %v9273_v52  ;;  %v2794_v59 = vsel %vm249_vm2, %v2793_v4, %v9327_v44  ;;  %v9342_v21 = vunpack.i.l.bf16 %v15382_v9  ;;  %v3722_v41 = vsel %vm247_vm1, %v11760_v48, %v11816_v31  ;;  %v15386_v52 = vld [vmem:[#allocation73_spill] sm:$0xff]  ;;  %v15392_v23 = vld [vmem:[#allocation72_spill] sm:$0xff] }
 0x634   :  { %v2795_v25 = vsel %vm251_vm3, %v2794_v59, %v9332_v45  ;;  %v2801_v3 = vsel %vm249_vm2, %v2800_v51, %v9328_v34  ;;  %v9337_v13 = vunpack.i.l.bf16 %v15383_v55  ;;  %v9343_v62 = vunpack.i.h.bf16 %v15382_v9 }
 0x635   :  { %v2802_v53 = vsel %vm251_vm3, %v2801_v3, %v9333_v17  ;;  %v3731_v30 = vsel %vm251_vm3, %v3730_v8, %v11830_v18  ;;  %v12096_v36 = vsel %vm257_vm6, %v2337_v58, %v9277_v20  ;;  %v9338_v61 = vunpack.i.h.bf16 %v15383_v55  ;;  %v15390_v17 = vld [vmem:[#allocation65_spill] sm:$0xff]  ;;  %v15393_v58 = vld [vmem:[#allocation75_spill] sm:$0xff]  ;;  %v15394_v55 = vld [vmem:[#allocation64_spill] sm:$0xff] }
 0x636   :  { %v3269_v11 = vsel %vm247_vm1, %v15385_v37, %v15384_v46  ;;  %v3732_v48 = vsel %vm253_vm4, %v3731_v30, %v11836_v15  ;;  %v2345_v31 = vsel %vm257_vm6, %v2344_v39, %v9278_v56  ;;  %v2796_v27 = vsel %vm253_vm4, %v2795_v25, %v9337_v13  ;;  %v15388_v15 = vld [vmem:[#allocation61_spill] sm:$0xff] }
 0x637   :  { %v3270_v29 = vsel %vm249_vm2, %v3269_v11, %v15386_v52  ;;  %v3723_v18 = vsel %vm249_vm2, %v3722_v41, %v11814_v1  ;;  %v9283_v50 = vunpack.i.h.bf16 %v15387_v0  ;;  %v2797_v63 = vsel %vm255_vm5, %v2796_v27, %v9342_v21  ;;  %v15397_v11 = vld [vmem:[#allocation77_spill] sm:$0xff] }
 0x638   :  { %v2803_v4 = vsel %vm253_vm4, %v2802_v53, %v9338_v61  ;;  %v3724_v22 = vsel %vm251_vm3, %v3723_v18, %v11820_v38  ;;  %v9347_v45 = vunpack.i.l.bf16 %v15388_v15  ;;  %v9353_v44 = vunpack.i.h.bf16 %v15389_v14  ;;  %v15396_v61 = vld [vmem:[#allocation74_spill] sm:$0xff] }
 0x639   :  { %v2804_v56 = vsel %vm255_vm5, %v2803_v4, %v9343_v62  ;;  %v3733_v19 = vsel %vm255_vm5, %v3732_v48, %v11834_v40  ;;  %v9348_v1 = vunpack.i.h.bf16 %v15388_v15  ;;  %v3262_v54 = vsel %vm247_vm1, %v15391_v7, %v15390_v17 }
 0x63a   :  { %v3271_v34 = vsel %vm251_vm3, %v3270_v29, %v15392_v23  ;;  %v3734_v38 = vsel %vm257_vm6, %v3733_v19, %v11840_v57  ;;  %v9282_v8 = vunpack.i.l.bf16 %v15387_v0  ;;  %v2798_v20 = vsel %vm257_vm6, %v2797_v63, %v9347_v45 }
 0x63b   :  { %v3272_v40 = vsel %vm253_vm4, %v3271_v34, %v15393_v58  ;;  %v3725_v39 = vsel %vm253_vm4, %v3724_v22, %v11818_v26  ;;  %v2805_v25 = vsel %vm257_vm6, %v2804_v56, %v9348_v1  ;;  %v9352_v57 = vunpack.i.l.bf16 %v15389_v14  ;;  %v15395_v26 = vld [vmem:[#allocation67_spill] sm:$0xff]  ;;  %v15398_v22 = vld [vmem:[#allocation66_spill] sm:$0xff]  ;;  %v15399_v14 = vld [vmem:[#allocation69_spill] sm:$0xff] }
 0x63c   :  { %v3726_v3 = vsel %vm255_vm5, %v3725_v39, %v11824_v47  ;;  %v2806_v41 = vsel %vm259_vm7, %v2805_v25, %v9353_v44  ;;  %v3263_v13 = vsel %vm249_vm2, %v3262_v54, %v15394_v55  ;;  %v3735_v53 = vsel %vm259_vm7, %v3734_v38, %v11838_v2  ;;  %v15401_v39 = vld [vmem:[#allocation68_spill] sm:$0xff] }
 0x63d   :  { %v3264_v30 = vsel %vm251_vm3, %v3263_v13, %v15395_v26  ;;  %v3273_v46 = vsel %vm255_vm5, %v3272_v40, %v15396_v61  ;;  %v3727_v27 = vsel %vm257_vm6, %v3726_v3, %v11822_v10  ;;  %v4250_v0 = vrot.slane %v3735_v53, 4 }
 0x63e   :  { %v3274_v48 = vsel %vm257_vm6, %v3273_v46, %v15397_v11  ;;  %v3728_v18 = vsel %vm259_vm7, %v3727_v27, %v11828_v6  ;;  %v4244_v10 = vrot.slane %v2806_v41, 4  ;;  %v2346_v34 = vsel %vm259_vm7, %v2345_v31, %v9283_v50 }
 0x63f   :  { %v4249_v17 = vrot.slane %v3728_v18, 4 }
 0x640   :  { %v4258_v50 = vsel %vm4220_vm8, %v2346_v34, %v4244_v10 }
 0x641   :  { %v8529_v27 = vrot.slane %v4258_v50, 4  ;;  %v12274_v50 = vld [vmem:[%s14986_s1 + $0x90] sm:$0xff] }
 0x643   :  { %v8530_v5 = vsel %vm4220_vm8, %v8521_v43, %v8529_v27 }
 0x669   :  { %v9431_v51 = vpop.permute.xlu1 %9430 }
 0x66a   :  { %v9433_v2 = vunpack.i.h.bf16 %v9431_v51  ;;  %v9432_v52 = vunpack.i.l.bf16 %v9431_v51  ;;  %v15400_v51 = vld [vmem:[#allocation76_spill] sm:$0xff] }
 0x66b   :  { %v9426_v59 = vpop.permute.xlu0 %9425  ;;  %v3275_v1 = vsel %vm259_vm7, %v3274_v48, %v15400_v51 }
 0x66c   :  { %v9428_v9 = vunpack.i.h.bf16 %v9426_v59  ;;  %v9427_v21 = vunpack.i.l.bf16 %v9426_v59  ;;  %v12170_v38 = vsel %vm4220_vm8, %v3275_v1, %v4250_v0 }
 0x66d   :  { %v9441_v62 = vpop.permute.xlu1 %9440  ;;  %v8537_v13 = vrot.slane %v12170_v38, 4 }
 0x66e   :  { %v3959_v47 = vsel %vm247_vm1, %v11851_v35, %v9428_v9  ;;  %v3952_v37 = vsel %vm247_vm1, %v11854_v24, %v9427_v21  ;;  %v2799_v35 = vsel %vm259_vm7, %v2798_v20, %v9352_v57  ;;  %v3265_v24 = vsel %vm253_vm4, %v3264_v30, %v15398_v22  ;;  %v15402_v21 = vld [vmem:[#allocation71_spill] sm:$0xff] }
 0x66f   :  { %v9436_v29 = vpop.permute.xlu0 %9435  ;;  %v3953_v15 = vsel %vm249_vm2, %v3952_v37, %v9432_v52  ;;  %v3960_v45 = vsel %vm249_vm2, %v3959_v47, %v9433_v2  ;;  %v3266_v44 = vsel %vm255_vm5, %v3265_v24, %v15399_v14  ;;  %v9443_v7 = vunpack.i.h.bf16 %v9441_v62 }
 0x670   :  { %v9438_v63 = vunpack.i.h.bf16 %v9436_v29  ;;  %v9437_v4 = vunpack.i.l.bf16 %v9436_v29  ;;  %v9442_v54 = vunpack.i.l.bf16 %v9441_v62  ;;  %v4243_v40 = vrot.slane %v2799_v35, 4 }
 0x671   :  { %v9451_v56 = vpop.permute.xlu1 %9450  ;;  %v3267_v59 = vsel %vm257_vm6, %v3266_v44, %v15401_v39  ;;  %v2339_v30 = vsel %vm259_vm7, %v12096_v36, %v9282_v8  ;;  %v8515_v47 = vrot.slane %v12053_v12, 4  ;;  %v8522_v36 = vsel %vm4220_vm8, %v8516_v60, %v8521_v43  ;;  %v8862_v39 = vld [vmem:[%s14985_s0 + $0x90] sm:$0xff] }
 0x672   :  { %v3954_v19 = vsel %vm251_vm3, %v3953_v15, %v9437_v4  ;;  %v3961_v6 = vsel %vm251_vm3, %v3960_v45, %v9438_v63  ;;  %v3268_v57 = vsel %vm259_vm7, %v3267_v59, %v15402_v21  ;;  %v9453_v53 = vunpack.i.h.bf16 %v9451_v56  ;;  %v8863_v59 = vld [vmem:[%s14985_s0 + $0x98] sm:$0xff] }
 0x673   :  { %v9446_v23 = vpop.permute.xlu0 %9445  ;;  %v3955_v25 = vsel %vm253_vm4, %v3954_v19, %v9442_v54  ;;  %v3962_v3 = vsel %vm253_vm4, %v3961_v6, %v9443_v7  ;;  %v12182_v55 = vsel %vm4220_vm8, %v3268_v57, %v4249_v17  ;;  %v9452_v62 = vunpack.i.l.bf16 %v9451_v56  ;;  %v8856_v54 = vld [vmem:[%s14985_s0 + $0x60] sm:$0xff]  ;;  %v12261_v21 = vld [vmem:[%s14986_s1 + $0x78] sm:$0xff] }
 0x674   :  { %v9448_v20 = vunpack.i.h.bf16 %v9446_v23  ;;  %v9447_v58 = vunpack.i.l.bf16 %v9446_v23  ;;  %v4257_v2 = vsel %vm4220_vm8, %v2339_v30, %v4243_v40  ;;  %v8535_v52 = vrot.slane %v12182_v55, 4  ;;  %v8860_v23 = vld [vmem:[%s14985_s0 + $0x80] sm:$0xff] }
 0x675   :  { %v3967_v9 = vpop.permute.xlu1 %3966  ;;  %v8520_v0 = vsel %vm4220_vm8, %v8515_v47, %v8519_v16  ;;  %v8538_v4 = vsel %vm4220_vm8, %v8529_v27, %v8537_v13  ;;  %v8527_v24 = vrot.slane %v4257_v2, 4 }
 0x676   :  { %v3956_v41 = vsel %vm255_vm5, %v3955_v25, %v9447_v58  ;;  %v3963_v31 = vsel %vm255_vm5, %v3962_v3, %v9448_v20  ;;  %v8865_v25 = vld [vmem:[%s14985_s0 + $0xa8] sm:$0xff]  ;;  %v12251_v3 = vld [vmem:[%s14986_s1 + $0x60] sm:$0xff] }
 0x677   :  { %v9456_v26 = vpop.permute.xlu0 %9455  ;;  %v3964_v11 = vsel %vm257_vm6, %v3963_v31, %v9453_v53  ;;  %v3957_v48 = vsel %vm257_vm6, %v3956_v41, %v9452_v62  ;;  %v8536_v45 = vsel %vm4220_vm8, %v8527_v24, %v8535_v52  ;;  %v8528_v14 = vsel %vm4220_vm8, %v8519_v16, %v8527_v24  ;;  %v8859_v16 = vld [vmem:[%s14985_s0 + $0x78] sm:$0xff]  ;;  %v8866_v41 = vld [vmem:[%s14985_s0 + $0xb0] sm:$0xff]  ;;  %v12269_v31 = vld [vmem:[%s14986_s1 + $0x80] sm:$0xff] }
 0x678   :  { %v9458_v61 = vunpack.i.h.bf16 %v9456_v26  ;;  %v9457_v46 = vunpack.i.l.bf16 %v9456_v26  ;;  %v8901_v19 = vpack.c.bf16 %v8536_v45, %v8528_v14 }
 0x679   :  { %v3971_v37 = vpop.permute.xlu1 %3970 }
 0x67a   :  { %v3965_v29 = vsel %vm259_vm7, %v3964_v11, %v9458_v61  ;;  %v3958_v12 = vsel %vm259_vm7, %v3957_v48, %v9457_v46  ;;  %v12284_v61 = vld [vmem:[%s14986_s1 + $0x98] sm:$0xff]  ;;  %v12289_v46 = vld [vmem:[%s14986_s1 + $0xa8] sm:$0xff]  ;;  %v12303_v48 = vmul.f32 %v12261_v21, %v8859_v16 }
 0x67b   :  { %v12199_v8 = vpop.permute.xlu0 %3968  ;;  %v8572_v18 = vsel %vm4220_vm8, %v3965_v29, %v8516_v60  ;;  %v8571_v63 = vsel %vm4220_vm8, %v3958_v12, %v8515_v47  ;;  %v8899_v60 = vpack.c.bf16 %v8538_v4, %v8530_v5  ;;  %v12294_v47 = vld [vmem:[%s14986_s1 + $0xb0] sm:$0xff]  ;;  %v12314_v12 = vmul.f32 %v12274_v50, %v8862_v39 }
 0x67c   :  { %v8895_v35 = vpack.c.bf16 %v8522_v36, %v8572_v18  ;;  %v8897_v22 = vpack.c.bf16 %v8520_v0, %v8571_v63  ;;  %15405 = vst [vmem:[#allocation4_spill] sm:$0xff] %v12303_v48  ;;  %v12311_v36 = vmul.f32 %v12269_v31, %v8860_v23  ;;  %v12317_v18 = vmul.f32 %v12284_v61, %v8863_v59 }
 0x67d   :  { %v3975_v15 = vpop.permute.xlu1 %3974  ;;  %15407 = vst [vmem:[#allocation39_spill] sm:$0xff] %v12314_v12  ;;  %v12320_v0 = vmul.f32 %v12289_v46, %v8865_v25  ;;  %v12323_v63 = vmul.f32 %v12294_v47, %v8866_v41 }
 0x67e   :  { %8896 = vmatprep.subr.bf16.mxu0 %v8895_v35  ;;  %v3990_v10 = vcombine.low %v3967_v9, %v3975_v15  ;;  %v3991_v49 = vcombine.high %v3967_v9, %v3975_v15  ;;  %v12256_v9 = vld [vmem:[%s14986_s1 + $0x68] sm:$0xff]  ;;  %15406 = vst [vmem:[#allocation6_spill] sm:$0xff] %v12311_v36  ;;  %15408 = vst [vmem:[#allocation15_spill] sm:$0xff] %v12317_v18 }
 0x67f   :  { %v12217_v56 = vpop.permute.xlu0 %3972  ;;  %8898 = vmatpush1.bf16.msra.mxu0 %v8897_v22  ;;  %v12300_v11 = vmul.f32 %v12256_v9, %v8857_v32  ;;  %15409 = vst [vmem:[#allocation16_spill] sm:$0xff] %v12320_v0  ;;  %15410 = vst [vmem:[#allocation12_spill] sm:$0xff] %v12323_v63  ;;  %v4315_v45 = vcombine.low %v12303_v48, %v12320_v0 }
 0x680   :  { %8900 = vmatprep.subr.bf16.mxu0 %v8899_v60  ;;  %v3998_v1 = vrot.slane %v3990_v10, %v10133_v28  ;;  %v4005_v34 = vrot.slane %v3991_v49, %v10133_v28  ;;  %v4383_v10 = vcombine.low %v12311_v36, %v12323_v63 }
 0x681   :  { %v3979_v44 = vpop.permute.xlu1 %3978  ;;  %15404 = vst [vmem:[#allocation5_spill] sm:$0xff] %v12300_v11 }
 0x682   :  { %v4006_v6 = vcombine.low %v3971_v37, %v3979_v44  ;;  %v4007_v43 = vcombine.high %v3971_v37, %v3979_v44  ;;  %v12297_v37 = vmul.f32 %v12251_v3, %v8856_v54  ;;  %v4323_v54 = vrot.slane %v4315_v45, %v10133_v28 }
 0x683   :  { %v3977_v51 = vpop.permute.xlu0 %3976  ;;  %8902 = vmatpush1.bf16.msra.mxu0 %v8901_v19  ;;  %v4391_v16 = vrot.slane %v4383_v10, %v10133_v28 }
 0x684   :  { %v4014_v17 = vrot.slane %v4006_v6, %v10133_v28  ;;  %v4021_v7 = vrot.slane %v4007_v43, %v10133_v28  ;;  %v4058_v40 = vcombine.low %v12199_v8, %v3977_v51  ;;  %15403 = vst [vmem:[#allocation3_spill] sm:$0xff] %v12297_v37  ;;  %v4059_v15 = vcombine.high %v12199_v8, %v3977_v51 }
 0x685   :  { %v4299_v60 = vcombine.low %v12297_v37, %v12314_v12  ;;  %v4300_v49 = vcombine.high %v12297_v37, %v12314_v12  ;;  %v4316_v6 = vcombine.high %v12303_v48, %v12320_v0 }
 0x686   :  { %v4022_v20 = vcombine.low %v3998_v1, %v4014_v17  ;;  %v4023_v58 = vcombine.high %v3998_v1, %v4014_v17  ;;  %v4038_v53 = vcombine.low %v4005_v34, %v4021_v7  ;;  %v4066_v27 = vrot.slane %v4058_v40, %v10133_v28 }
 0x687   :  { %v3981_v57 = vpop.permute.xlu0 %3980  ;;  %v4039_v4 = vcombine.high %v4005_v34, %v4021_v7  ;;  %v4073_v43 = vrot.slane %v4059_v15, %v10133_v28  ;;  %v4368_v1 = vcombine.high %v12300_v11, %v12317_v18  ;;  %v4384_v17 = vcombine.high %v12311_v36, %v12323_v63 }
 0x688   :  { %v4074_v62 = vcombine.low %v12217_v56, %v3981_v57  ;;  %v4037_v26 = vrot.slane %v4023_v58, %v10150_v33  ;;  %v12279_v30 = vrot.slane %v4022_v20, %v10150_v33  ;;  %v4075_v35 = vcombine.high %v12217_v56, %v3981_v57 }
 0x689   :  { %v4046_v24 = vrot.slane %v4038_v53, %v10150_v33  ;;  %v4367_v56 = vcombine.low %v12300_v11, %v12317_v18  ;;  %v4053_v8 = vrot.slane %v4039_v4, %v10150_v33  ;;  %v4307_v7 = vrot.slane %v4299_v60, %v10133_v28 }
 0x68a   :  { %v4082_v2 = vrot.slane %v4074_v62, %v10133_v28  ;;  %4131 = vrot.lane.b32.xlu0 %v4037_v26, %s10015_s26  ;;  %v4054_v29 = vcombine.high %v12279_v30, %v15211_v42  ;;  %v4055_v5 = vcombine.high %v4037_v26, %v15211_v42  ;;  %v4089_v14 = vrot.slane %v4075_v35, %v10133_v28 }
 0x68b   :  { %v4056_v51 = vcombine.high %v4046_v24, %v15211_v42  ;;  %v4375_v32 = vrot.slane %v4367_v56, %v10133_v28  ;;  %v4057_v58 = vcombine.high %v4053_v8, %v15211_v42  ;;  %v4314_v40 = vrot.slane %v4300_v49, %v10133_v28 }
 0x68c   :  { %v4090_v22 = vcombine.low %v4066_v27, %v4082_v2  ;;  %4127 = vrot.lane.b32.xlu1 %v4054_v29, %s10017_s28  ;;  %v4091_v44 = vcombine.high %v4066_v27, %v4082_v2  ;;  %v4106_v23 = vcombine.low %v4073_v43, %v4089_v14  ;;  %v4330_v39 = vrot.slane %v4316_v6, %v10133_v28 }
 0x68d   :  { %v4382_v59 = vrot.slane %v4368_v1, %v10133_v28  ;;  %v4332_v25 = vcombine.high %v4307_v7, %v4323_v54  ;;  %v4400_v57 = vcombine.high %v4375_v32, %v4391_v16  ;;  %v4331_v41 = vcombine.low %v4307_v7, %v4323_v54 }
 0x68e   :  { %4139 = vrot.lane.b32.xlu0 %v4046_v24, %s10014_s25  ;;  %v12343_v19 = vrot.slane %v4090_v22, %v10150_v33  ;;  %v4105_v20 = vrot.slane %v4091_v44, %v10150_v33  ;;  %v4398_v53 = vrot.slane %v4384_v17, %v10133_v28  ;;  %v4107_v62 = vcombine.high %v4073_v43, %v4089_v14 }
 0x68f   :  { %v4114_v27 = vrot.slane %v4106_v23, %v10150_v33  ;;  %v4399_v2 = vcombine.low %v4375_v32, %v4391_v16  ;;  %v4505_v29 = vcombine.low %v12251_v3, %v12274_v50  ;;  %v4521_v4 = vcombine.low %v12261_v21, %v12289_v46 }
 0x690   :  { %4135 = vrot.lane.b32.xlu1 %v4055_v5, %s10018_s29  ;;  %v4122_v34 = vcombine.high %v12343_v19, %v15211_v42  ;;  %v4123_v26 = vcombine.high %v4105_v20, %v15211_v42  ;;  %v4573_v35 = vcombine.low %v12256_v9, %v12284_v61  ;;  %v4589_v22 = vcombine.low %v12269_v31, %v12294_v47 }
 0x691   :  { %v4346_v24 = vrot.slane %v4332_v25, %v10150_v33  ;;  %v12384_v15 = vrot.slane %v4331_v41, %v10150_v33  ;;  %v4347_v5 = vcombine.low %v4314_v40, %v4330_v39  ;;  %v4415_v60 = vcombine.low %v4382_v59, %v4398_v53 }
 0x692   :  { %4147 = vrot.lane.b32.xlu0 %v4053_v8, %s10016_s27  ;;  %v4124_v45 = vcombine.high %v4114_v27, %v15211_v42  ;;  %v4121_v56 = vrot.slane %v4107_v62, %v10150_v33  ;;  %v4414_v10 = vrot.slane %v4400_v57, %v10150_v33  ;;  %v12391_v14 = vrot.slane %v4399_v2, %v10150_v33 }
 0x693   :  { %v4513_v44 = vrot.slane %v4505_v29, %v10133_v28  ;;  %v4529_v8 = vrot.slane %v4521_v4, %v10133_v28  ;;  %v4581_v49 = vrot.slane %v4573_v35, %v10133_v28  ;;  %v4597_v6 = vrot.slane %v4589_v22, %v10133_v28 }
 0x694   :  { %4143 = vrot.lane.b32.xlu1 %v4056_v51, %s10019_s30  ;;  %v4363_v43 = vcombine.high %v12384_v15, %v15211_v42  ;;  %v4355_v51 = vrot.slane %v4347_v5, %v10150_v33  ;;  %v4423_v1 = vrot.slane %v4415_v60, %v10150_v33  ;;  %v4125_v17 = vcombine.high %v4121_v56, %v15211_v42 }
 0x695   :  { %v4431_v7 = vcombine.high %v12391_v14, %v15211_v42  ;;  %v4348_v54 = vcombine.high %v4314_v40, %v4330_v39  ;;  %v4416_v32 = vcombine.high %v4382_v59, %v4398_v53  ;;  %v9464_v16 = vpack.i.bf16 %v4414_v10, %v4346_v24 }
 0x696   :  { %4155 = vrot.lane.b32.xlu0 %v4122_v34, %s10017_s28  ;;  %v4537_v23 = vcombine.low %v4513_v44, %v4529_v8  ;;  %v4605_v34 = vcombine.low %v4581_v49, %v4597_v6  ;;  %v4574_v25 = vcombine.high %v12256_v9, %v12284_v61  ;;  %v4590_v57 = vcombine.high %v12269_v31, %v12294_v47 }
 0x697   :  { %v9474_v41 = vpack.i.bf16 %v4423_v1, %v4355_v51  ;;  %v4364_v40 = vcombine.high %v4346_v24, %v15211_v42  ;;  %v9459_v39 = vpack.i.bf16 %v4431_v7, %v4363_v43  ;;  %v4432_v59 = vcombine.high %v4414_v10, %v15211_v42 }
 0x698   :  { %4151 = vrot.lane.b32.xlu1 %v4057_v58, %s10020_s6  ;;  %v4522_v58 = vcombine.high %v12261_v21, %v12289_v46  ;;  %v4362_v53 = vrot.slane %v4348_v54, %v10150_v33  ;;  %v4430_v62 = vrot.slane %v4416_v32, %v10150_v33  ;;  %v4538_v2 = vcombine.high %v4513_v44, %v4529_v8 }
 0x699   :  { %v4606_v29 = vcombine.high %v4581_v49, %v4597_v6  ;;  %v4588_v22 = vrot.slane %v4574_v25, %v10133_v28  ;;  %v4604_v24 = vrot.slane %v4590_v57, %v10133_v28  ;;  %v9469_v5 = vpack.i.bf16 %v4432_v59, %v4364_v40 }
 0x69a   :  { %4163 = vrot.lane.b32.xlu0 %v4123_v26, %s10018_s29  ;;  %v12421_v26 = vrot.slane %v4537_v23, %v10150_v33  ;;  %v4536_v35 = vrot.slane %v4522_v58, %v10133_v28  ;;  %v4365_v60 = vcombine.high %v4355_v51, %v15211_v42  ;;  %v4552_v44 = vrot.slane %v4538_v2, %v10150_v33 }
 0x69b   :  { %v4620_v8 = vrot.slane %v4606_v29, %v10150_v33  ;;  %v9484_v49 = vpack.i.bf16 %v4430_v62, %v4362_v53  ;;  %v4621_v43 = vcombine.low %v4588_v22, %v4604_v24 }
 0x69c   :  { %4159 = vrot.lane.b32.xlu1 %v4105_v20, %s10015_s26  ;;  %v4506_v20 = vcombine.high %v12251_v3, %v12274_v50  ;;  %15411 = vst [vmem:[#allocation17_spill] sm:$0xff] %v12421_v26  ;;  %v4570_v54 = vcombine.high %v4552_v44, %v15211_v42 }
 0x69d   :  { %v4638_v32 = vcombine.high %v4620_v8, %v15211_v42  ;;  %v4629_v23 = vrot.slane %v4621_v43, %v10150_v33  ;;  %v9499_v59 = vpack.i.bf16 %v4620_v8, %v4552_v44 }
 0x69e   :  { %4171 = vrot.lane.b32.xlu0 %v4124_v45, %s10019_s30  ;;  %v4520_v4 = vrot.slane %v4506_v20, %v10133_v28  ;;  %v4433_v45 = vcombine.high %v4423_v1, %v15211_v42  ;;  %v4366_v1 = vcombine.high %v4362_v53, %v15211_v42  ;;  %v4622_v20 = vcombine.high %v4588_v22, %v4604_v24 }
 0x69f   :  { %v9504_v25 = vpack.i.bf16 %v4638_v32, %v4570_v54 }
 0x6a0   :  { %4167 = vrot.lane.b32.xlu1 %v4114_v27, %s10014_s25  ;;  %v12424_v27 = vrot.slane %v4605_v34, %v10150_v33  ;;  %v4553_v6 = vcombine.low %v4520_v4, %v4536_v35  ;;  %v9479_v51 = vpack.i.bf16 %v4433_v45, %v4365_v60  ;;  %v4554_v34 = vcombine.high %v4520_v4, %v4536_v35 }
 0x6a2   :  { %4179 = vrot.lane.b32.xlu0 %v4125_v17, %s10020_s6  ;;  %15412 = vst [vmem:[#allocation11_spill] sm:$0xff] %v12424_v27  ;;  %v4637_v10 = vcombine.high %v12424_v27, %v15211_v42  ;;  %v4434_v17 = vcombine.high %v4430_v62, %v15211_v42  ;;  %v4568_v40 = vrot.slane %v4554_v34, %v10150_v33 }
 0x6a4   :  { %4175 = vrot.lane.b32.xlu1 %v4121_v56, %s10016_s27  ;;  %v4569_v56 = vcombine.high %v12421_v26, %v15211_v42  ;;  %v9489_v58 = vpack.i.bf16 %v4434_v17, %v4366_v1  ;;  %v4572_v62 = vcombine.high %v4568_v40, %v15211_v42 }
 0x6a6   :  { %9465 = vrot.lane.b32.xlu0 %v9464_v16, %s10015_s26  ;;  %v9494_v7 = vpack.i.bf16 %v4637_v10, %v4569_v56  ;;  %v4561_v16 = vrot.slane %v4553_v6, %v10150_v33 }
 0x6a8   :  { %9460 = vrot.lane.b32.xlu1 %v9459_v39, %s10017_s28  ;;  %v4571_v57 = vcombine.high %v4561_v16, %v15211_v42  ;;  %v4636_v39 = vrot.slane %v4622_v20, %v10150_v33  ;;  %v9509_v29 = vpack.i.bf16 %v4629_v23, %v4561_v16 }
 0x6aa   :  { %9475 = vrot.lane.b32.xlu0 %v9474_v41, %s10014_s25  ;;  %v4639_v41 = vcombine.high %v4629_v23, %v15211_v42  ;;  %v4640_v2 = vcombine.high %v4636_v39, %v15211_v42  ;;  %v9519_v35 = vpack.i.bf16 %v4636_v39, %v4568_v40 }
 0x6ac   :  { %9470 = vrot.lane.b32.xlu1 %v9469_v5, %s10018_s29  ;;  %v9514_v53 = vpack.i.bf16 %v4639_v41, %v4571_v57  ;;  %v9524_v4 = vpack.i.bf16 %v4640_v2, %v4572_v62 }
 0x6ae   :  { %9485 = vrot.lane.b32.xlu0 %v9484_v49, %s10016_s27 }
 0x6b0   :  { %9480 = vrot.lane.b32.xlu1 %v9479_v51, %s10019_s30 }
 0x6b2   :  { %9495 = vrot.lane.b32.xlu0 %v9494_v7, %s10017_s28 }
 0x6b4   :  { %9490 = vrot.lane.b32.xlu1 %v9489_v58, %s10020_s6 }
 0x6b6   :  { %9505 = vrot.lane.b32.xlu0 %v9504_v25, %s10018_s29 }
 0x6b8   :  { %9500 = vrot.lane.b32.xlu1 %v9499_v59, %s10015_s26 }
 0x6ba   :  { %9515 = vrot.lane.b32.xlu0 %v9514_v53, %s10019_s30 }
 0x6bc   :  { %9510 = vrot.lane.b32.xlu1 %v9509_v29, %s10014_s25 }
 0x6be   :  { %9525 = vrot.lane.b32.xlu0 %v9524_v4, %s10020_s6 }
 0x6c0   :  { %9520 = vrot.lane.b32.xlu1 %v9519_v35, %s10016_s27 }
 0x6c2   :  { %4721 = vrot.lane.b32.xlu0 %v12300_v11, %s10021_s7 }
 0x6c4   :  { %4719 = vrot.lane.b32.xlu1 %v12297_v37, %s10021_s7 }
 0x6c6   :  { %4725 = vrot.lane.b32.xlu0 %v12311_v36, %s10021_s7 }
 0x6c8   :  { %4723 = vrot.lane.b32.xlu1 %v12303_v48, %s10021_s7 }
 0x6ca   :  { %4729 = vrot.lane.b32.xlu0 %v12317_v18, %s10021_s7 }
 0x6cc   :  { %4727 = vrot.lane.b32.xlu1 %v12314_v12, %s10021_s7 }
 0x6ce   :  { %4733 = vrot.lane.b32.xlu0 %v12323_v63, %s10021_s7 }
 0x6d0   :  { %4731 = vrot.lane.b32.xlu1 %v12320_v0, %s10021_s7 }
 0x6fc   :  { %v4132_v22 = vpop.permute.xlu0 %4131 }
 0x6fe   :  { %v4128_v24 = vpop.permute.xlu1 %4127 }
 0x6ff   :  { %v4182_v44 = vsel %vm247_vm1, %v12279_v30, %v4128_v24 }
 0x700   :  { %v4140_v5 = vpop.permute.xlu0 %4139  ;;  %v4183_v49 = vsel %vm249_vm2, %v4182_v44, %v4132_v22 }
 0x702   :  { %v4136_v60 = vpop.permute.xlu1 %4135 }
 0x703   :  { %v4184_v43 = vsel %vm251_vm3, %v4183_v49, %v4136_v60 }
 0x704   :  { %v4148_v45 = vpop.permute.xlu0 %4147  ;;  %v4185_v7 = vsel %vm253_vm4, %v4184_v43, %v4140_v5 }
 0x706   :  { %v4144_v56 = vpop.permute.xlu1 %4143 }
 0x707   :  { %v4186_v32 = vsel %vm255_vm5, %v4185_v7, %v4144_v56 }
 0x708   :  { %v4156_v10 = vpop.permute.xlu0 %4155  ;;  %v4187_v34 = vsel %vm257_vm6, %v4186_v32, %v4148_v45 }
 0x709   :  { %v4189_v51 = vsel %vm247_vm1, %v12343_v19, %v4156_v10 }
 0x70a   :  { %v4152_v8 = vpop.permute.xlu1 %4151 }
 0x70b   :  { %v4188_v58 = vsel %vm259_vm7, %v4187_v34, %v4152_v8 }
 0x70c   :  { %v4164_v6 = vpop.permute.xlu0 %4163  ;;  %v8543_v41 = vrot.slane %v4188_v58, 4 }
 0x70e   :  { %v4160_v1 = vpop.permute.xlu1 %4159  ;;  %v8544_v29 = vsel %vm4220_vm8, %v8535_v52, %v8543_v41 }
 0x70f   :  { %v4190_v17 = vsel %vm249_vm2, %v4189_v51, %v4160_v1 }
 0x710   :  { %v4172_v54 = vpop.permute.xlu0 %4171  ;;  %v4191_v30 = vsel %vm251_vm3, %v4190_v17, %v4164_v6 }
 0x712   :  { %v4168_v16 = vpop.permute.xlu1 %4167 }
 0x713   :  { %v4192_v23 = vsel %vm253_vm4, %v4191_v30, %v4168_v16 }
 0x714   :  { %v4180_v20 = vpop.permute.xlu0 %4179  ;;  %v4193_v19 = vsel %vm255_vm5, %v4192_v23, %v4172_v54 }
 0x716   :  { %v4176_v25 = vpop.permute.xlu1 %4175 }
 0x717   :  { %v4194_v57 = vsel %vm257_vm6, %v4193_v19, %v4176_v25 }
 0x718   :  { %v4195_v40 = vsel %vm259_vm7, %v4194_v57, %v4180_v20  ;;  %v12496_v39 = vpop.permute.xlu0 %9465 }
 0x719   :  { %v8545_v59 = vrot.slane %v4195_v40, 4 }
 0x71a   :  { %v12498_v53 = vpop.permute.xlu1 %9460 }
 0x71b   :  { %v8546_v62 = vsel %vm4220_vm8, %v8537_v13, %v8545_v59 }
 0x71c   :  { %v12503_v2 = vpop.permute.xlu0 %9475  ;;  %8600 = vmatprep.subr.mxu0 %v8546_v62 }
 0x71d   :  { %8601 = vmatpush1.msra.mxu0 %v8544_v29 }
 0x71e   :  { %v12508_v4 = vpop.permute.xlu1 %9470 }
 0x720   :  { %v12510_v35 = vpop.permute.xlu0 %9485 }
 0x721   :  { %15413 = vst [vmem:[#allocation18_spill] sm:$0xff] %v12510_v35 }
 0x722   :  { %v12512_v22 = vpop.permute.xlu1 %9480 }
 0x723   :  { %15414 = vst [vmem:[#allocation30_spill] sm:$0xff] %v12512_v22 }
 0x724   :  { %v12514_v24 = vpop.permute.xlu0 %9495 }
 0x725   :  { %15415 = vst [vmem:[#allocation19_spill] sm:$0xff] %v12514_v24 }
 0x726   :  { %v12516_v5 = vpop.permute.xlu1 %9490 }
 0x727   :  { %15416 = vst [vmem:[#allocation22_spill] sm:$0xff] %v12516_v5 }
 0x728   :  { %v12518_v38 = vpop.permute.xlu0 %9505 }
 0x729   :  { %15417 = vst [vmem:[#allocation23_spill] sm:$0xff] %v12518_v38 }
 0x72a   :  { %v12520_v13 = vpop.permute.xlu1 %9500 }
 0x72b   :  { %15418 = vst [vmem:[#allocation32_spill] sm:$0xff] %v12520_v13 }
 0x72c   :  { %v12522_v60 = vpop.permute.xlu0 %9515 }
 0x72d   :  { %15419 = vst [vmem:[#allocation29_spill] sm:$0xff] %v12522_v60 }
 0x72e   :  { %v12524_v55 = vpop.permute.xlu1 %9510 }
 0x72f   :  { %15420 = vst [vmem:[#allocation20_spill] sm:$0xff] %v12524_v55 }
 0x730   :  { %v12526_v52 = vpop.permute.xlu0 %9525 }
 0x731   :  { %15421 = vst [vmem:[#allocation37_spill] sm:$0xff] %v12526_v52 }
 0x732   :  { %v12528_v45 = vpop.permute.xlu1 %9520 }
 0x733   :  { %15422 = vst [vmem:[#allocation21_spill] sm:$0xff] %v12528_v45 }
 0x734   :  { %v4722_v56 = vpop.permute.xlu0 %4721 }
 0x736   :  { %v4720_v10 = vpop.permute.xlu1 %4719 }
 0x738   :  { %v4726_v44 = vpop.permute.xlu0 %4725 }
 0x73a   :  { %v4724_v8 = vpop.permute.xlu1 %4723 }
 0x73c   :  { %v4730_v49 = vpop.permute.xlu0 %4729 }
 0x73d   :  { %v4811_v43 = vcombine.low %v4722_v56, %v4730_v49  ;;  %v4812_v54 = vcombine.high %v4722_v56, %v4730_v49 }
 0x73e   :  { %v4728_v6 = vpop.permute.xlu1 %4727 }
 0x73f   :  { %v4743_v1 = vcombine.low %v4720_v10, %v4728_v6  ;;  %v4744_v17 = vcombine.high %v4720_v10, %v4728_v6  ;;  %v4819_v30 = vrot.slane %v4811_v43, %v10133_v28  ;;  %v4826_v62 = vrot.slane %v4812_v54, %v10133_v28 }
 0x740   :  { %v4734_v51 = vpop.permute.xlu0 %4733 }
 0x741   :  { %v4827_v7 = vcombine.low %v4726_v44, %v4734_v51  ;;  %v4828_v32 = vcombine.high %v4726_v44, %v4734_v51  ;;  %v4751_v58 = vrot.slane %v4743_v1, %v10133_v28  ;;  %v4758_v25 = vrot.slane %v4744_v17, %v10133_v28 }
 0x742   :  { %v4732_v16 = vpop.permute.xlu1 %4731 }
 0x743   :  { %v4835_v23 = vrot.slane %v4827_v7, %v10133_v28  ;;  %v4759_v34 = vcombine.low %v4724_v8, %v4732_v16  ;;  %v4760_v20 = vcombine.high %v4724_v8, %v4732_v16  ;;  %v4842_v57 = vrot.slane %v4828_v32, %v10133_v28 }
 0x745   :  { %v4843_v19 = vcombine.low %v4819_v30, %v4835_v23  ;;  %v4844_v41 = vcombine.high %v4819_v30, %v4835_v23  ;;  %v4767_v40 = vrot.slane %v4759_v34, %v10133_v28  ;;  %v4774_v59 = vrot.slane %v4760_v20, %v10133_v28 }
 0x746   :  { %v4859_v8 = vcombine.low %v4826_v62, %v4842_v57  ;;  %v4860_v32 = vcombine.high %v4826_v62, %v4842_v57 }
 0x747   :  { %v12539_v29 = vrot.slane %v4843_v19, %v10150_v33  ;;  %v4775_v56 = vcombine.low %v4751_v58, %v4767_v40  ;;  %v4776_v10 = vcombine.high %v4751_v58, %v4767_v40  ;;  %v4791_v44 = vcombine.low %v4758_v25, %v4774_v59 }
 0x748   :  { %v4858_v43 = vrot.slane %v4844_v41, %v10150_v33  ;;  %v4792_v51 = vcombine.high %v4758_v25, %v4774_v59  ;;  %v4867_v30 = vrot.slane %v4859_v8, %v10150_v33  ;;  %v4874_v19 = vrot.slane %v4860_v32, %v10150_v33 }
 0x749   :  { %v12542_v49 = vrot.slane %v4775_v56, %v10150_v33  ;;  %v4790_v6 = vrot.slane %v4776_v10, %v10150_v33  ;;  %v4875_v7 = vcombine.high %v12539_v29, %v15211_v42  ;;  %v4799_v54 = vrot.slane %v4791_v44, %v10150_v33 }
 0x74a   :  { %v4876_v20 = vcombine.high %v4858_v43, %v15211_v42  ;;  %v4806_v58 = vrot.slane %v4792_v51, %v10150_v33  ;;  %v4877_v40 = vcombine.high %v4867_v30, %v15211_v42  ;;  %v4878_v56 = vcombine.high %v4874_v19, %v15211_v42 }
 0x74b   :  { %v9534_v1 = vpack.i.bf16 %v4858_v43, %v4790_v6  ;;  %v4807_v17 = vcombine.high %v12542_v49, %v15211_v42  ;;  %v4808_v23 = vcombine.high %v4790_v6, %v15211_v42  ;;  %v9544_v34 = vpack.i.bf16 %v4867_v30, %v4799_v54 }
 0x74c   :  { %v4809_v57 = vcombine.high %v4799_v54, %v15211_v42  ;;  %v9554_v41 = vpack.i.bf16 %v4874_v19, %v4806_v58  ;;  %v4810_v62 = vcombine.high %v4806_v58, %v15211_v42 }
 0x74d   :  { %9535 = vrot.lane.b32.xlu0 %v9534_v1, %s10015_s26  ;;  %v9529_v16 = vpack.i.bf16 %v4875_v7, %v4807_v17  ;;  %v9539_v25 = vpack.i.bf16 %v4876_v20, %v4808_v23 }
 0x74e   :  { %v9549_v59 = vpack.i.bf16 %v4877_v40, %v4809_v57  ;;  %v9559_v10 = vpack.i.bf16 %v4878_v56, %v4810_v62 }
 0x74f   :  { %9530 = vrot.lane.b32.xlu1 %v9529_v16, %s10017_s28 }
 0x751   :  { %9545 = vrot.lane.b32.xlu0 %v9544_v34, %s10014_s25 }
 0x753   :  { %9540 = vrot.lane.b32.xlu1 %v9539_v25, %s10018_s29 }
 0x755   :  { %9555 = vrot.lane.b32.xlu0 %v9554_v41, %s10016_s27 }
 0x757   :  { %9550 = vrot.lane.b32.xlu1 %v9549_v59, %s10019_s30 }
 0x759   :  { %4957 = vrot.lane.b32.xlu0 %v12251_v3, %s10021_s7 }
 0x75b   :  { %9560 = vrot.lane.b32.xlu1 %v9559_v10, %s10020_s6 }
 0x75d   :  { %4961 = vrot.lane.b32.xlu0 %v12261_v21, %s10021_s7 }
 0x75f   :  { %4959 = vrot.lane.b32.xlu1 %v12256_v9, %s10021_s7 }
 0x761   :  { %4965 = vrot.lane.b32.xlu0 %v12274_v50, %s10021_s7 }
 0x763   :  { %4963 = vrot.lane.b32.xlu1 %v12269_v31, %s10021_s7 }
 0x765   :  { %4969 = vrot.lane.b32.xlu0 %v12289_v46, %s10021_s7 }
 0x767   :  { %4967 = vrot.lane.b32.xlu1 %v12284_v61, %s10021_s7 }
 0x76b   :  { %4971 = vrot.lane.b32.xlu1 %v12294_v47, %s10021_s7 }
 0x7bf   :  { %v12583_v44 = vpop.permute.xlu0 %9535 }
 0x7c1   :  { %v12585_v8 = vpop.permute.xlu1 %9530 }
 0x7c3   :  { %v12587_v6 = vpop.permute.xlu0 %9545 }
 0x7c4   :  { %15423 = vst [vmem:[#allocation34_spill] sm:$0xff] %v12587_v6 }
 0x7c5   :  { %v12589_v43 = vpop.permute.xlu1 %9540 }
 0x7c7   :  { %v12591_v51 = vpop.permute.xlu0 %9555 }
 0x7c8   :  { %15424 = vst [vmem:[#allocation31_spill] sm:$0xff] %v12591_v51 }
 0x7c9   :  { %v12593_v1 = vpop.permute.xlu1 %9550 }
 0x7cb   :  { %v4958_v17 = vpop.permute.xlu0 %4957 }
 0x7cd   :  { %v12595_v7 = vpop.permute.xlu1 %9560 }
 0x7ce   :  { %15425 = vst [vmem:[#allocation14_spill] sm:$0xff] %v12595_v7 }
 0x7cf   :  { %v4962_v54 = vpop.permute.xlu0 %4961 }
 0x7d1   :  { %v4960_v32 = vpop.permute.xlu1 %4959 }
 0x7d3   :  { %v4966_v16 = vpop.permute.xlu0 %4965 }
 0x7d4   :  { %v4981_v23 = vcombine.low %v4958_v17, %v4966_v16  ;;  %v4982_v56 = vcombine.high %v4958_v17, %v4966_v16 }
 0x7d5   :  { %v4964_v30 = vpop.permute.xlu1 %4963 }
 0x7d6   :  { %v4989_v19 = vrot.slane %v4981_v23, %v10133_v28 }
 0x7d7   :  { %v4970_v34 = vpop.permute.xlu0 %4969 }
 0x7d8   :  { %v4997_v20 = vcombine.low %v4962_v54, %v4970_v34  ;;  %v4998_v57 = vcombine.high %v4962_v54, %v4970_v34 }
 0x7d9   :  { %v4968_v58 = vpop.permute.xlu1 %4967 }
 0x7da   :  { %v5005_v25 = vrot.slane %v4997_v20, %v10133_v28  ;;  %v5049_v41 = vcombine.low %v4960_v32, %v4968_v58  ;;  %v5050_v40 = vcombine.high %v4960_v32, %v4968_v58  ;;  %v5012_v45 = vrot.slane %v4998_v57, %v10133_v28 }
 0x7db   :  { %v4996_v32 = vrot.slane %v4982_v56, %v10133_v28 }
 0x7dc   :  { %v5013_v59 = vcombine.low %v4989_v19, %v5005_v25  ;;  %v5014_v60 = vcombine.high %v4989_v19, %v5005_v25  ;;  %v5057_v55 = vrot.slane %v5049_v41, %v10133_v28  ;;  %v5064_v38 = vrot.slane %v5050_v40, %v10133_v28 }
 0x7dd   :  { %v4972_v62 = vpop.permute.xlu1 %4971 }
 0x7de   :  { %v5065_v10 = vcombine.low %v4964_v30, %v4972_v62  ;;  %v5066_v52 = vcombine.high %v4964_v30, %v4972_v62  ;;  %v12605_v54 = vrot.slane %v5013_v59, %v10150_v33  ;;  %v5029_v30 = vcombine.low %v4996_v32, %v5012_v45 }
 0x7df   :  { %v5028_v58 = vrot.slane %v5014_v60, %v10150_v33 }
 0x7e0   :  { %v5073_v26 = vrot.slane %v5065_v10, %v10133_v28  ;;  %v5080_v20 = vrot.slane %v5066_v52, %v10133_v28  ;;  %15426 = vst [vmem:[#allocation53_spill] sm:$0xff] %v12605_v54  ;;  %v5045_v19 = vcombine.high %v12605_v54, %v15211_v42  ;;  %v5037_v59 = vrot.slane %v5029_v30, %v10150_v33 }
 0x7e1   :  { %v5046_v56 = vcombine.high %v5028_v58, %v15211_v42 }
 0x7e2   :  { %v5081_v23 = vcombine.low %v5057_v55, %v5073_v26  ;;  %v5082_v17 = vcombine.high %v5057_v55, %v5073_v26  ;;  %v5097_v16 = vcombine.low %v5064_v38, %v5080_v20  ;;  %v5098_v52 = vcombine.high %v5064_v38, %v5080_v20 }
 0x7e3   :  { %v5030_v26 = vcombine.high %v4996_v32, %v5012_v45 }
 0x7e4   :  { %v12609_v34 = vrot.slane %v5081_v23, %v10150_v33  ;;  %v5096_v25 = vrot.slane %v5082_v17, %v10150_v33  ;;  %v5105_v40 = vrot.slane %v5097_v16, %v10150_v33  ;;  %v5112_v38 = vrot.slane %v5098_v52, %v10150_v33 }
 0x7e5   :  { %v5044_v20 = vrot.slane %v5030_v26, %v10150_v33  ;;  %v5047_v23 = vcombine.high %v5037_v59, %v15211_v42 }
 0x7e6   :  { %15427 = vst [vmem:[#allocation52_spill] sm:$0xff] %v12609_v34  ;;  %v9569_v57 = vpack.i.bf16 %v5096_v25, %v5028_v58  ;;  %v5113_v41 = vcombine.high %v12609_v34, %v15211_v42  ;;  %v5114_v60 = vcombine.high %v5096_v25, %v15211_v42  ;;  %v9579_v62 = vpack.i.bf16 %v5105_v40, %v5037_v59 }
 0x7e7   :  { %v5115_v45 = vcombine.high %v5105_v40, %v15211_v42  ;;  %v9589_v32 = vpack.i.bf16 %v5112_v38, %v5044_v20  ;;  %v5116_v16 = vcombine.high %v5112_v38, %v15211_v42  ;;  %v5048_v30 = vcombine.high %v5044_v20, %v15211_v42 }
 0x7e8   :  { %9570 = vrot.lane.b32.xlu1 %v9569_v57, %s10015_s26  ;;  %v9564_v55 = vpack.i.bf16 %v5113_v41, %v5045_v19  ;;  %v9574_v10 = vpack.i.bf16 %v5114_v60, %v5046_v56 }
 0x7e9   :  { %v9584_v17 = vpack.i.bf16 %v5115_v45, %v5047_v23  ;;  %v9594_v58 = vpack.i.bf16 %v5116_v16, %v5048_v30 }
 0x7ea   :  { %9565 = vrot.lane.b32.xlu0 %v9564_v55, %s10017_s28 }
 0x7ec   :  { %9580 = vrot.lane.b32.xlu1 %v9579_v62, %s10014_s25 }
 0x7ee   :  { %9575 = vrot.lane.b32.xlu0 %v9574_v10, %s10018_s29 }
 0x7f0   :  { %9590 = vrot.lane.b32.xlu1 %v9589_v32, %s10016_s27 }
 0x7f2   :  { %9585 = vrot.lane.b32.xlu0 %v9584_v17, %s10019_s30 }
 0x7f4   :  { %5187 = vrot.lane.b32.xlu1 %v12297_v37, %s10022_s8 }
 0x7f6   :  { %9595 = vrot.lane.b32.xlu0 %v9594_v58, %s10020_s6 }
 0x7f8   :  { %5191 = vrot.lane.b32.xlu1 %v12303_v48, %s10022_s8 }
 0x7fa   :  { %5189 = vrot.lane.b32.xlu0 %v12300_v11, %s10022_s8 }
 0x7fc   :  { %5195 = vrot.lane.b32.xlu1 %v12314_v12, %s10022_s8 }
 0x7fe   :  { %5193 = vrot.lane.b32.xlu0 %v12311_v36, %s10022_s8 }
 0x800   :  { %5199 = vrot.lane.b32.xlu1 %v12320_v0, %s10022_s8 }
 0x802   :  { %5197 = vrot.lane.b32.xlu0 %v12317_v18, %s10022_s8 }
 0x806   :  { %5201 = vrot.lane.b32.xlu0 %v12323_v63, %s10022_s8 }
 0x85a   :  { %v12650_v25 = vpop.permute.xlu1 %9570 }
 0x85b   :  { %15428 = vst [vmem:[#allocation27_spill] sm:$0xff] %v12650_v25 }
 0x85c   :  { %v12652_v19 = vpop.permute.xlu0 %9565 }
 0x85d   :  { %15429 = vst [vmem:[#allocation33_spill] sm:$0xff] %v12652_v19 }
 0x85e   :  { %v12654_v52 = vpop.permute.xlu1 %9580 }
 0x85f   :  { %15430 = vst [vmem:[#allocation55_spill] sm:$0xff] %v12654_v52 }
 0x860   :  { %v12656_v57 = vpop.permute.xlu0 %9575 }
 0x861   :  { %15431 = vst [vmem:[#allocation45_spill] sm:$0xff] %v12656_v57 }
 0x862   :  { %v12658_v41 = vpop.permute.xlu1 %9590 }
 0x863   :  { %15432 = vst [vmem:[#allocation36_spill] sm:$0xff] %v12658_v41 }
 0x864   :  { %v12660_v40 = vpop.permute.xlu0 %9585 }
 0x865   :  { %15433 = vst [vmem:[#allocation35_spill] sm:$0xff] %v12660_v40 }
 0x866   :  { %v5188_v26 = vpop.permute.xlu1 %5187 }
 0x868   :  { %v12662_v55 = vpop.permute.xlu0 %9595 }
 0x869   :  { %15434 = vst [vmem:[#allocation54_spill] sm:$0xff] %v12662_v55 }
 0x86a   :  { %v5192_v59 = vpop.permute.xlu1 %5191 }
 0x86c   :  { %v5190_v60 = vpop.permute.xlu0 %5189 }
 0x86e   :  { %v5196_v62 = vpop.permute.xlu1 %5195 }
 0x86f   :  { %v5211_v38 = vcombine.low %v5188_v26, %v5196_v62  ;;  %v5212_v40 = vcombine.high %v5188_v26, %v5196_v62 }
 0x870   :  { %v5194_v56 = vpop.permute.xlu0 %5193 }
 0x871   :  { %v5219_v23 = vrot.slane %v5211_v38, %v10133_v28 }
 0x872   :  { %v5200_v10 = vpop.permute.xlu1 %5199 }
 0x873   :  { %v5227_v20 = vcombine.low %v5192_v59, %v5200_v10  ;;  %v5228_v17 = vcombine.high %v5192_v59, %v5200_v10 }
 0x874   :  { %v5198_v45 = vpop.permute.xlu0 %5197 }
 0x875   :  { %v5235_v32 = vrot.slane %v5227_v20, %v10133_v28  ;;  %v5279_v16 = vcombine.low %v5190_v60, %v5198_v45  ;;  %v5280_v30 = vcombine.high %v5190_v60, %v5198_v45  ;;  %v5242_v25 = vrot.slane %v5228_v17, %v10133_v28 }
 0x876   :  { %v5226_v60 = vrot.slane %v5212_v40, %v10133_v28 }
 0x877   :  { %v5243_v58 = vcombine.low %v5219_v23, %v5235_v32  ;;  %v5244_v57 = vcombine.high %v5219_v23, %v5235_v32  ;;  %v5287_v54 = vrot.slane %v5279_v16, %v10133_v28  ;;  %v5294_v34 = vrot.slane %v5280_v30, %v10133_v28 }
 0x878   :  { %v5202_v41 = vpop.permute.xlu0 %5201 }
 0x879   :  { %v5295_v52 = vcombine.low %v5194_v56, %v5202_v41  ;;  %v5296_v55 = vcombine.high %v5194_v56, %v5202_v41  ;;  %v12672_v59 = vrot.slane %v5243_v58, %v10150_v33  ;;  %v5259_v41 = vcombine.low %v5226_v60, %v5242_v25 }
 0x87a   :  { %v5258_v10 = vrot.slane %v5244_v57, %v10150_v33 }
 0x87b   :  { %v5303_v19 = vrot.slane %v5295_v52, %v10133_v28  ;;  %v5310_v20 = vrot.slane %v5296_v55, %v10133_v28  ;;  %15435 = vst [vmem:[#allocation51_spill] sm:$0xff] %v12672_v59  ;;  %v5275_v52 = vcombine.high %v12672_v59, %v15211_v42  ;;  %v5267_v17 = vrot.slane %v5259_v41, %v10150_v33 }
 0x87c   :  { %v5276_v30 = vcombine.high %v5258_v10, %v15211_v42 }
 0x87d   :  { %v5311_v38 = vcombine.low %v5287_v54, %v5303_v19  ;;  %v5312_v26 = vcombine.high %v5287_v54, %v5303_v19  ;;  %v5327_v62 = vcombine.low %v5294_v34, %v5310_v20  ;;  %v5328_v55 = vcombine.high %v5294_v34, %v5310_v20 }
 0x87e   :  { %v5260_v54 = vcombine.high %v5226_v60, %v5242_v25 }
 0x87f   :  { %v12676_v56 = vrot.slane %v5311_v38, %v10150_v33  ;;  %v5326_v45 = vrot.slane %v5312_v26, %v10150_v33  ;;  %v5335_v40 = vrot.slane %v5327_v62, %v10150_v33  ;;  %v5342_v34 = vrot.slane %v5328_v55, %v10150_v33 }
 0x880   :  { %v5274_v20 = vrot.slane %v5260_v54, %v10150_v33  ;;  %v5277_v38 = vcombine.high %v5267_v17, %v15211_v42 }
 0x881   :  { %15436 = vst [vmem:[#allocation50_spill] sm:$0xff] %v12676_v56  ;;  %v9604_v32 = vpack.i.bf16 %v5326_v45, %v5258_v10  ;;  %v5343_v23 = vcombine.high %v12676_v56, %v15211_v42  ;;  %v5344_v57 = vcombine.high %v5326_v45, %v15211_v42  ;;  %v9614_v16 = vpack.i.bf16 %v5335_v40, %v5267_v17  ;;  %v12746_v45 = vld [vmem:[%s14986_s1 + $0xa0] sm:$0x3] }
 0x882   :  { %v5345_v25 = vcombine.high %v5335_v40, %v15211_v42  ;;  %v9624_v60 = vpack.i.bf16 %v5342_v34, %v5274_v20  ;;  %v5346_v62 = vcombine.high %v5342_v34, %v15211_v42  ;;  %v5278_v41 = vcombine.high %v5274_v20, %v15211_v42  ;;  %15440 = vst [vmem:[#allocation26_spill] sm:$0xff] %v12746_v45 }
 0x883   :  { %9605 = vrot.lane.b32.xlu0 %v9604_v32, %s10015_s26  ;;  %v9599_v19 = vpack.i.bf16 %v5343_v23, %v5275_v52  ;;  %v9609_v58 = vpack.i.bf16 %v5344_v57, %v5276_v30  ;;  %v12751_v52 = vld [vmem:[%s14986_s1 + $0xb8] sm:$0x3]  ;;  %v5651_v57 = vrot.slane %v12297_v37, 1  ;;  %v5656_v34 = vrot.slane %v12303_v48, 1 }
 0x884   :  { %v9619_v26 = vpack.i.bf16 %v5345_v25, %v5277_v38  ;;  %v9629_v10 = vpack.i.bf16 %v5346_v62, %v5278_v41  ;;  %v5661_v25 = vrot.slane %v12314_v12, 1  ;;  %v5666_v62 = vrot.slane %v12320_v0, 1 }
 0x885   :  { %9600 = vrot.lane.b32.xlu1 %v9599_v19, %s10017_s28  ;;  %v5667_v41 = vrot.slane %v12323_v63, 1  ;;  %v5907_v6 = vrot.slane %v12751_v52, 1 }
 0x887   :  { %9615 = vrot.lane.b32.xlu0 %v9614_v16, %s10014_s25  ;;  %v5652_v16 = vrot.slane %v12300_v11, 1 }
 0x889   :  { %9610 = vrot.lane.b32.xlu1 %v9609_v58, %s10018_s29  ;;  %v5657_v58 = vrot.slane %v12311_v36, 1 }
 0x88b   :  { %9625 = vrot.lane.b32.xlu0 %v9624_v60, %s10016_s27  ;;  %v5662_v60 = vrot.slane %v12317_v18, 1 }
 0x88d   :  { %9620 = vrot.lane.b32.xlu1 %v9619_v26, %s10019_s30  ;;  %v12802_v24 = vsel %vm1414_vm0, %v5661_v25, %v5662_v60 }
 0x88f   :  { %5417 = vrot.lane.b32.xlu0 %v12251_v3, %s10022_s8 }
 0x891   :  { %9630 = vrot.lane.b32.xlu1 %v9629_v10, %s10020_s6 }
 0x893   :  { %5421 = vrot.lane.b32.xlu0 %v12261_v21, %s10022_s8  ;;  %v12725_v21 = vld [vmem:[%s14986_s1 + $0x70] sm:$0x3] }
 0x894   :  { %15438 = vst [vmem:[#allocation28_spill] sm:$0xff] %v12725_v21 }
 0x895   :  { %5419 = vrot.lane.b32.xlu1 %v12256_v9, %s10022_s8  ;;  %v8858_v9 = vld [vmem:[%s14985_s0 + $0x70] sm:$0x3] }
 0x896   :  { %v12756_v32 = vmul.f32 %v12725_v21, %v8858_v9 }
 0x897   :  { %5425 = vrot.lane.b32.xlu0 %v12274_v50, %s10022_s8  ;;  %v8861_v50 = vld [vmem:[%s14985_s0 + $0x88] sm:$0x3] }
 0x898   :  { %15442 = vst [vmem:[#allocation13_spill] sm:$0xff] %v12756_v32  ;;  %v5654_v30 = vrot.slane %v12756_v32, 1 }
 0x899   :  { %5423 = vrot.lane.b32.xlu1 %v12269_v31, %s10022_s8 }
 0x89b   :  { %5429 = vrot.lane.b32.xlu0 %v12289_v46, %s10022_s8  ;;  %v12738_v46 = vld [vmem:[%s14986_s1 + $0x88] sm:$0x3] }
 0x89c   :  { %v12759_v23 = vmul.f32 %v12738_v46, %v8861_v50  ;;  %v12788_v50 = vsel %vm1414_vm0, %v5651_v57, %v5652_v16  ;;  %v12808_v57 = vsel %vm1414_vm0, %v5666_v62, %v5667_v41  ;;  %v5897_v35 = vrot.slane %v12738_v46, 1 }
 0x89d   :  { %5427 = vrot.lane.b32.xlu1 %v12284_v61, %s10022_s8  ;;  %v8864_v61 = vld [vmem:[%s14985_s0 + $0xa0] sm:$0x3]  ;;  %v5680_v36 = vcombine.high %v12788_v50, %v12802_v24 }
 0x89e   :  { %15443 = vst [vmem:[#allocation58_spill] sm:$0xff] %v12759_v23  ;;  %v12764_v54 = vmul.f32 %v12746_v45, %v8864_v61  ;;  %v5659_v20 = vrot.slane %v12759_v23, 1  ;;  %v12791_v61 = vsel %vm1414_vm0, %v5652_v16, %v5654_v30 }
 0x8a0   :  { %15445 = vst [vmem:[#allocation46_spill] sm:$0xff] %v12764_v54  ;;  %v5664_v26 = vrot.slane %v12764_v54, 1  ;;  %v12797_v27 = vsel %vm1414_vm0, %v5657_v58, %v5659_v20 }
 0x8a1   :  { %5431 = vrot.lane.b32.xlu1 %v12294_v47, %s10022_s8  ;;  %v8867_v47 = vld [vmem:[%s14985_s0 + $0xb8] sm:$0x3] }
 0x8a2   :  { %v12767_v19 = vmul.f32 %v12751_v52, %v8867_v47  ;;  %v12794_v47 = vsel %vm1414_vm0, %v5656_v34, %v5657_v58  ;;  %v12805_v12 = vsel %vm1414_vm0, %v5662_v60, %v5664_v26  ;;  %v5679_v34 = vcombine.low %v12788_v50, %v12802_v24 }
 0x8a3   :  { %v5695_v58 = vcombine.low %v12794_v47, %v12808_v57  ;;  %v5747_v20 = vcombine.low %v12791_v61, %v12805_v12 }
 0x8a4   :  { %15446 = vst [vmem:[#allocation24_spill] sm:$0xff] %v12767_v19  ;;  %v5669_v10 = vrot.slane %v12767_v19, 1  ;;  %v5687_v62 = vrot.slane %v5679_v34, %v10133_v28  ;;  %v5696_v34 = vcombine.high %v12794_v47, %v12808_v57 }
 0x8a6   :  { %v12811_v16 = vsel %vm1414_vm0, %v5667_v41, %v5669_v10  ;;  %v5703_v41 = vrot.slane %v5695_v58, %v10133_v28  ;;  %v5755_v10 = vrot.slane %v5747_v20, %v10133_v28 }
 0x8a7   :  { %v5763_v25 = vcombine.low %v12797_v27, %v12811_v16 }
 0x8a8   :  { %v5711_v63 = vcombine.low %v5687_v62, %v5703_v41  ;;  %v5712_v32 = vcombine.high %v5687_v62, %v5703_v41 }
 0x8a9   :  { %v5771_v0 = vrot.slane %v5763_v25, %v10133_v28 }
 0x8aa   :  { %v12837_v41 = vrot.slane %v5711_v63, %v10150_v33 }
 0x8ab   :  { %v5779_v19 = vcombine.low %v5755_v10, %v5771_v0  ;;  %v5780_v20 = vcombine.high %v5755_v10, %v5771_v0  ;;  %v12843_v0 = vrot.slane %v5712_v32, %v10150_v33 }
 0x8ac   :  { %15450 = vst [vmem:[#allocation43_spill] sm:$0xff] %v12837_v41 }
 0x8ad   :  { %v12853_v63 = vrot.slane %v5780_v20, %v10150_v33 }
 0x8f5   :  { %v12717_v3 = vpop.permute.xlu0 %9605 }
 0x8f6   :  { %15437 = vst [vmem:[#allocation57_spill] sm:$0xff] %v12717_v3 }
 0x8f7   :  { %v12727_v31 = vpop.permute.xlu1 %9600 }
 0x8f8   :  { %15439 = vst [vmem:[#allocation25_spill] sm:$0xff] %v12727_v31  ;;  %v5892_v31 = vrot.slane %v12725_v21, 1 }
 0x8f9   :  { %v12753_v55 = vpop.permute.xlu0 %9615 }
 0x8fa   :  { %15441 = vst [vmem:[#allocation56_spill] sm:$0xff] %v12753_v55 }
 0x8fb   :  { %v12761_v40 = vpop.permute.xlu1 %9610 }
 0x8fc   :  { %15444 = vst [vmem:[#allocation38_spill] sm:$0xff] %v12761_v40 }
 0x8fd   :  { %v12769_v17 = vpop.permute.xlu0 %9625 }
 0x8fe   :  { %15447 = vst [vmem:[#allocation47_spill] sm:$0xff] %v12769_v17  ;;  %v5748_v17 = vcombine.high %v12791_v61, %v12805_v12 }
 0x8ff   :  { %v12779_v38 = vpop.permute.xlu1 %9620 }
 0x900   :  { %15448 = vst [vmem:[#allocation49_spill] sm:$0xff] %v12779_v38  ;;  %v12840_v38 = vrot.slane %v5779_v19, %v10150_v33  ;;  %v12859_v32 = vrot.slane %v5748_v17, %v10133_v28 }
 0x901   :  { %v12785_v9 = vpop.permute.xlu0 %5417 }
 0x903   :  { %v12799_v13 = vpop.permute.xlu1 %9630 }
 0x904   :  { %15449 = vst [vmem:[#allocation41_spill] sm:$0xff] %v12799_v13  ;;  %v5764_v13 = vcombine.high %v12797_v27, %v12811_v16 }
 0x905   :  { %v5422_v30 = vpop.permute.xlu0 %5421 }
 0x907   :  { %v5420_v60 = vpop.permute.xlu1 %5419 }
 0x909   :  { %v5426_v26 = vpop.permute.xlu0 %5425 }
 0x90a   :  { %v5441_v48 = vcombine.low %v12785_v9, %v5426_v26 }
 0x90b   :  { %v5424_v37 = vpop.permute.xlu1 %5423 }
 0x90c   :  { %v5449_v25 = vrot.slane %v5441_v48, %v10133_v28  ;;  %v12846_v48 = vrot.slane %v5680_v36, %v10133_v28  ;;  %v12862_v36 = vrot.slane %v5764_v13, %v10133_v28  ;;  %v12880_v13 = vld [vmem:[%s14986_s1 + $0x60] sm:$0xff] }
 0x90d   :  { %v5430_v18 = vpop.permute.xlu0 %5429  ;;  %15452 = vst [vmem:[#allocation44_spill] sm:$0xff] %v12880_v13 }
 0x90e   :  { %v5457_v54 = vcombine.low %v5422_v30, %v5430_v18  ;;  %v5458_v23 = vcombine.high %v5422_v30, %v5430_v18  ;;  %v12849_v18 = vrot.slane %v5696_v34, %v10133_v28  ;;  %v5442_v30 = vcombine.high %v12785_v9, %v5426_v26 }
 0x90f   :  { %v5428_v11 = vpop.permute.xlu1 %5427 }
 0x910   :  { %v5465_v58 = vrot.slane %v5457_v54, %v10133_v28  ;;  %v5509_v55 = vcombine.low %v5420_v60, %v5428_v11  ;;  %v5510_v62 = vcombine.high %v5420_v60, %v5428_v11  ;;  %v12856_v19 = vrot.slane %v5458_v23, %v10133_v28 }
 0x911   :  { %v12873_v23 = vcombine.high %v12837_v41, %v15211_v42  ;;  %v5727_v17 = vcombine.low %v12846_v48, %v12849_v18 }
 0x912   :  { %v5473_v3 = vcombine.low %v5449_v25, %v5465_v58  ;;  %v5474_v10 = vcombine.high %v5449_v25, %v5465_v58  ;;  %v5517_v34 = vrot.slane %v5509_v55, %v10133_v28  ;;  %v5524_v40 = vrot.slane %v5510_v62, %v10133_v28  ;;  %v12887_v62 = vld [vmem:[%s14986_s1 + $0x68] sm:$0xff] }
 0x913   :  { %v5432_v54 = vpop.permute.xlu1 %5431  ;;  %v5889_v55 = vrot.slane %v12880_v13, 1  ;;  %v5456_v58 = vrot.slane %v5442_v30, %v10133_v28  ;;  %15453 = vst [vmem:[#allocation7_spill] sm:$0xff] %v12887_v62  ;;  %v12899_v30 = vld [vmem:[%s14986_s1 + $0x80] sm:$0xff] }
 0x914   :  { %v5525_v11 = vcombine.low %v5424_v37, %v5432_v54  ;;  %v5526_v60 = vcombine.high %v5424_v37, %v5432_v54  ;;  %v12869_v26 = vrot.slane %v5473_v3, %v10150_v33  ;;  %v5890_v54 = vrot.slane %v12887_v62, 1  ;;  %15455 = vst [vmem:[#allocation40_spill] sm:$0xff] %v12899_v30 }
 0x915   :  { %v5489_v62 = vcombine.low %v5456_v58, %v12856_v19  ;;  %v5490_v22 = vcombine.high %v5456_v58, %v12856_v19 }
 0x916   :  { %v5533_v9 = vrot.slane %v5525_v11, %v10133_v28  ;;  %v5540_v37 = vrot.slane %v5526_v60, %v10133_v28  ;;  %15451 = vst [vmem:[#allocation48_spill] sm:$0xff] %v12869_v26  ;;  %v12893_v11 = vld [vmem:[%s14986_s1 + $0x78] sm:$0xff]  ;;  %v5505_v56 = vcombine.high %v12869_v26, %v15211_v42  ;;  %v12963_v19 = vsel %vm1414_vm0, %v5890_v54, %v5892_v31 }
 0x917   :  { %15454 = vst [vmem:[#allocation60_spill] sm:$0xff] %v12893_v11  ;;  %v5894_v60 = vrot.slane %v12893_v11, 1  ;;  %v5488_v11 = vrot.slane %v5474_v10, %v10150_v33  ;;  %v12931_v10 = vld [vmem:[%s14986_s1 + $0xb0] sm:$0xff]  ;;  %v5811_v31 = vcombine.high %v12840_v38, %v15211_v42 }
 0x918   :  { %v5541_v20 = vcombine.low %v5517_v34, %v5533_v9  ;;  %v5542_v25 = vcombine.high %v5517_v34, %v5533_v9  ;;  %v5557_v3 = vcombine.low %v5524_v40, %v5540_v37  ;;  %v5895_v34 = vrot.slane %v12899_v30, 1  ;;  %v12905_v9 = vld [vmem:[%s14986_s1 + $0x90] sm:$0xff]  ;;  %v12919_v30 = vld [vmem:[%s14986_s1 + $0x98] sm:$0xff]  ;;  %15460 = vst [vmem:[#allocation10_spill] sm:$0xff] %v12931_v10 }
 0x919   :  { %15456 = vst [vmem:[#allocation8_spill] sm:$0xff] %v12905_v9  ;;  %v5899_v13 = vrot.slane %v12905_v9, 1  ;;  %15458 = vst [vmem:[#allocation42_spill] sm:$0xff] %v12919_v30  ;;  %v5900_v5 = vrot.slane %v12919_v30, 1  ;;  %v12925_v9 = vld [vmem:[%s14986_s1 + $0xa8] sm:$0xff]  ;;  %v5558_v26 = vcombine.high %v5524_v40, %v5540_v37  ;;  %v5497_v40 = vrot.slane %v5489_v62, %v10150_v33 }
 0x91a   :  { %v12910_v41 = vrot.slane %v5541_v20, %v10150_v33  ;;  %v5556_v59 = vrot.slane %v5542_v25, %v10150_v33  ;;  %15459 = vst [vmem:[#allocation70_spill] sm:$0xff] %v12925_v9  ;;  %v5904_v20 = vrot.slane %v12925_v9, 1  ;;  %v5905_v25 = vrot.slane %v12931_v10, 1 }
 0x91b   :  { %v5565_v30 = vrot.slane %v5557_v3, %v10150_v33  ;;  %v5902_v9 = vrot.slane %v12746_v45, 1  ;;  %v5795_v3 = vcombine.low %v12859_v32, %v12862_v36  ;;  %v12951_v21 = vsel %vm1414_vm0, %v5894_v60, %v5895_v34 }
 0x91c   :  { %15457 = vst [vmem:[#allocation62_spill] sm:$0xff] %v12910_v41  ;;  %v9639_v7 = vpack.i.bf16 %v5556_v59, %v5488_v11  ;;  %v5573_v51 = vcombine.high %v12910_v41, %v15211_v42  ;;  %v5574_v37 = vcombine.high %v5556_v59, %v15211_v42  ;;  %v12948_v41 = vsel %vm1414_vm0, %v5889_v55, %v5890_v54 }
 0x91d   :  { %v12954_v45 = vsel %vm1414_vm0, %v5899_v13, %v5900_v5  ;;  %v12960_v59 = vsel %vm1414_vm0, %v5904_v20, %v5905_v25  ;;  %v12966_v55 = vsel %vm1414_vm0, %v5895_v34, %v5897_v35  ;;  %v12969_v58 = vsel %vm1414_vm0, %v5900_v5, %v5902_v9 }
 0x91e   :  { %9640 = vrot.lane.b32.xlu1 %v9639_v7, %s10015_s26  ;;  %v9634_v10 = vpack.i.bf16 %v5573_v51, %v5505_v56  ;;  %v9649_v7 = vpack.i.bf16 %v5565_v30, %v5497_v40  ;;  %v5506_v51 = vcombine.high %v5488_v11, %v15211_v42  ;;  %v5572_v56 = vrot.slane %v5558_v26, %v10150_v33 }
 0x91f   :  { %v12972_v13 = vsel %vm1414_vm0, %v5905_v25, %v5907_v6  ;;  %v5504_v26 = vrot.slane %v5490_v22, %v10150_v33  ;;  %v5575_v11 = vcombine.high %v5565_v30, %v15211_v42  ;;  %v5735_v54 = vrot.slane %v5727_v17, %v10150_v33 }
 0x920   :  { %9635 = vrot.lane.b32.xlu0 %v9634_v10, %s10017_s28  ;;  %v9644_v62 = vpack.i.bf16 %v5574_v37, %v5506_v51  ;;  %v5803_v35 = vrot.slane %v5795_v3, %v10150_v33  ;;  %v5917_v5 = vcombine.low %v12948_v41, %v12954_v45  ;;  %v5933_v6 = vcombine.low %v12951_v21, %v12960_v59 }
 0x921   :  { %v9659_v60 = vpack.i.bf16 %v5572_v56, %v5504_v26  ;;  %v5507_v22 = vcombine.high %v5497_v40, %v15211_v42  ;;  %v5985_v30 = vcombine.low %v12963_v19, %v12969_v58  ;;  %v6001_v34 = vcombine.low %v12966_v55, %v12972_v13 }
 0x922   :  { %9650 = vrot.lane.b32.xlu1 %v9649_v7, %s10014_s25  ;;  %v5744_v17 = vcombine.high %v12843_v0, %v15211_v42  ;;  %v5728_v9 = vcombine.high %v12846_v48, %v12849_v18  ;;  %v5796_v20 = vcombine.high %v12859_v32, %v12862_v36  ;;  %v9669_v25 = vpack.i.bf16 %v5811_v31, %v12873_v23 }
 0x923   :  { %v9654_v10 = vpack.i.bf16 %v5575_v11, %v5507_v22  ;;  %v5576_v40 = vcombine.high %v5572_v56, %v15211_v42  ;;  %v5812_v37 = vcombine.high %v12853_v63, %v15211_v42  ;;  %v5745_v3 = vcombine.high %v5735_v54, %v15211_v42 }
 0x924   :  { %9645 = vrot.lane.b32.xlu0 %v9644_v62, %s10018_s29  ;;  %v5813_v7 = vcombine.high %v5803_v35, %v15211_v42  ;;  %v5925_v51 = vrot.slane %v5917_v5, %v10133_v28  ;;  %v5508_v48 = vcombine.high %v5504_v26, %v15211_v42  ;;  %v5941_v18 = vrot.slane %v5933_v6, %v10133_v28 }
 0x925   :  { %v5993_v32 = vrot.slane %v5985_v30, %v10133_v28  ;;  %v6009_v36 = vrot.slane %v6001_v34, %v10133_v28  ;;  %v5742_v23 = vrot.slane %v5728_v9, %v10150_v33  ;;  %v5810_v56 = vrot.slane %v5796_v20, %v10150_v33 }
 0x926   :  { %9660 = vrot.lane.b32.xlu1 %v9659_v60, %s10016_s27  ;;  %v5918_v62 = vcombine.high %v12948_v41, %v12954_v45  ;;  %v5934_v11 = vcombine.high %v12951_v21, %v12960_v59  ;;  %v9664_v31 = vpack.i.bf16 %v5576_v40, %v5508_v48  ;;  %v9679_v26 = vpack.i.bf16 %v5812_v37, %v5744_v17 }
 0x927   :  { %v5986_v5 = vcombine.high %v12963_v19, %v12969_v58  ;;  %v6002_v6 = vcombine.high %v12966_v55, %v12972_v13  ;;  %v9674_v60 = vpack.i.bf16 %v12853_v63, %v12843_v0  ;;  %v9689_v22 = vpack.i.bf16 %v5813_v7, %v5745_v3 }
 0x928   :  { %9655 = vrot.lane.b32.xlu0 %v9654_v10, %s10019_s30  ;;  %v5949_v30 = vcombine.low %v5925_v51, %v5941_v18  ;;  %v6017_v34 = vcombine.low %v5993_v32, %v6009_v36  ;;  %v5746_v9 = vcombine.high %v5742_v23, %v15211_v42  ;;  %v5814_v20 = vcombine.high %v5810_v56, %v15211_v42 }
 0x929   :  { %v5932_v17 = vrot.slane %v5918_v62, %v10133_v28  ;;  %v5948_v10 = vrot.slane %v5934_v11, %v10133_v28  ;;  %v6018_v40 = vcombine.high %v5993_v32, %v6009_v36  ;;  %v6000_v37 = vrot.slane %v5986_v5, %v10133_v28 }
 0x92a   :  { %9670 = vrot.lane.b32.xlu1 %v9669_v25, %s10017_s28  ;;  %v5950_v25 = vcombine.high %v5925_v51, %v5941_v18  ;;  %v6016_v48 = vrot.slane %v6002_v6, %v10133_v28  ;;  %v9684_v0 = vpack.i.bf16 %v5803_v35, %v5735_v54  ;;  %v13033_v63 = vrot.slane %v5949_v30, %v10150_v33 }
 0x92b   :  { %v13036_v3 = vrot.slane %v6017_v34, %v10150_v33  ;;  %v9699_v7 = vpack.i.bf16 %v5814_v20, %v5746_v9  ;;  %v6032_v51 = vrot.slane %v6018_v40, %v10150_v33  ;;  %v5965_v18 = vcombine.low %v5932_v17, %v5948_v10 }
 0x92c   :  { %9665 = vrot.lane.b32.xlu0 %v9664_v31, %s10020_s6  ;;  %15461 = vst [vmem:[#allocation73_spill] sm:$0xff] %v13033_v63  ;;  %v5964_v62 = vrot.slane %v5950_v25, %v10150_v33  ;;  %v6033_v32 = vcombine.low %v6000_v37, %v6016_v48  ;;  %v9694_v36 = vpack.i.bf16 %v5810_v56, %v5742_v23 }
 0x92d   :  { %15462 = vst [vmem:[#allocation59_spill] sm:$0xff] %v13036_v3  ;;  %v5981_v54 = vcombine.high %v13033_v63, %v15211_v42  ;;  %v6049_v35 = vcombine.high %v13036_v3, %v15211_v42  ;;  %v5966_v11 = vcombine.high %v5932_v17, %v5948_v10  ;;  %v6034_v6 = vcombine.high %v6000_v37, %v6016_v48 }
 0x92e   :  { %9680 = vrot.lane.b32.xlu1 %v9679_v26, %s10018_s29  ;;  %v9709_v31 = vpack.i.bf16 %v6032_v51, %v5964_v62  ;;  %v5973_v26 = vrot.slane %v5965_v18, %v10150_v33  ;;  %v6041_v5 = vrot.slane %v6033_v32, %v10150_v33  ;;  %v5982_v23 = vcombine.high %v5964_v62, %v15211_v42 }
 0x92f   :  { %v6050_v56 = vcombine.high %v6032_v51, %v15211_v42  ;;  %v5980_v30 = vrot.slane %v5966_v11, %v10150_v33  ;;  %v6048_v34 = vrot.slane %v6034_v6, %v10150_v33  ;;  %v9462_v62 = vunpack.i.l.bf16 %v12498_v53 }
 0x930   :  { %9675 = vrot.lane.b32.xlu0 %v9674_v60, %s10015_s26  ;;  %v9704_v60 = vpack.i.bf16 %v6049_v35, %v5981_v54  ;;  %v5983_v20 = vcombine.high %v5973_v26, %v15211_v42  ;;  %v6051_v17 = vcombine.high %v6041_v5, %v15211_v42  ;;  %v9533_v51 = vunpack.i.h.bf16 %v12585_v8 }
 0x931   :  { %v9714_v9 = vpack.i.bf16 %v6050_v56, %v5982_v23  ;;  %v9729_v10 = vpack.i.bf16 %v6048_v34, %v5980_v30  ;;  %v5984_v40 = vcombine.high %v5980_v30, %v15211_v42  ;;  %v6052_v37 = vcombine.high %v6048_v34, %v15211_v42 }
 0x932   :  { %9690 = vrot.lane.b32.xlu1 %v9689_v22, %s10019_s30  ;;  %v9719_v22 = vpack.i.bf16 %v6041_v5, %v5973_v26  ;;  %v9724_v25 = vpack.i.bf16 %v6051_v17, %v5983_v20  ;;  %v9532_v18 = vunpack.i.l.bf16 %v12585_v8  ;;  %v9467_v54 = vunpack.i.l.bf16 %v12496_v39 }
 0x933   :  { %v9734_v48 = vpack.i.bf16 %v6052_v37, %v5984_v40  ;;  %v9472_v26 = vunpack.i.l.bf16 %v12508_v4  ;;  %v4942_v8 = vsel %vm247_vm1, %v12539_v29, %v9533_v51  ;;  %v9542_v6 = vunpack.i.l.bf16 %v12589_v43  ;;  %v15470_v37 = vld [vmem:[#allocation34_spill] sm:$0xff] }
 0x934   :  { %9685 = vrot.lane.b32.xlu0 %v9684_v0, %s10014_s25  ;;  %v4935_v5 = vsel %vm247_vm1, %v12542_v49, %v9532_v18  ;;  %v9478_v23 = vunpack.i.h.bf16 %v12503_v2  ;;  %v9552_v20 = vunpack.i.l.bf16 %v12593_v1 }
 0x936   :  { %9700 = vrot.lane.b32.xlu1 %v9699_v7, %s10020_s6  ;;  %v9463_v7 = vunpack.i.h.bf16 %v12498_v53  ;;  %v9473_v53 = vunpack.i.h.bf16 %v12508_v4  ;;  %v9477_v4 = vunpack.i.l.bf16 %v12503_v2  ;;  %v9553_v2 = vunpack.i.h.bf16 %v12593_v1 }
 0x938   :  { %9695 = vrot.lane.b32.xlu0 %v9694_v36, %s10016_s27  ;;  %v9468_v36 = vunpack.i.h.bf16 %v12496_v39  ;;  %v4498_v11 = vsel %vm247_vm1, %v12391_v14, %v9463_v7  ;;  %v9543_v39 = vunpack.i.h.bf16 %v12589_v43  ;;  %v9538_v14 = vunpack.i.h.bf16 %v12583_v44 }
 0x939   :  { %v9547_v7 = vunpack.i.l.bf16 %v15470_v37 }
 0x93a   :  { %9710 = vrot.lane.b32.xlu1 %v9709_v31, %s10015_s26  ;;  %v4491_v31 = vsel %vm247_vm1, %v12384_v15, %v9462_v62  ;;  %v9537_v15 = vunpack.i.l.bf16 %v12583_v44  ;;  %v4499_v29 = vsel %vm249_vm2, %v4498_v11, %v9468_v36  ;;  %v4943_v34 = vsel %vm249_vm2, %v4942_v8, %v9538_v14  ;;  %v15471_v62 = vld [vmem:[#allocation18_spill] sm:$0xff]  ;;  %v15472_v8 = vld [vmem:[#allocation25_spill] sm:$0xff] }
 0x93b   :  { %v4492_v56 = vsel %vm249_vm2, %v4491_v31, %v9467_v54  ;;  %v4500_v43 = vsel %vm251_vm3, %v4499_v29, %v9473_v53  ;;  %v9488_v51 = vunpack.i.h.bf16 %v15471_v62 }
 0x93c   :  { %9705 = vrot.lane.b32.xlu0 %v9704_v60, %s10017_s28  ;;  %v4493_v49 = vsel %vm251_vm3, %v4492_v56, %v9472_v26  ;;  %v4936_v30 = vsel %vm249_vm2, %v4935_v5, %v9537_v15  ;;  %v4501_v31 = vsel %vm253_vm4, %v4500_v43, %v9478_v23  ;;  %v9603_v5 = vunpack.i.h.bf16 %v15472_v8  ;;  %v15474_v15 = vld [vmem:[#allocation31_spill] sm:$0xff]  ;;  %v15475_v23 = vld [vmem:[#allocation14_spill] sm:$0xff] }
 0x93d   :  { %v4937_v44 = vsel %vm251_vm3, %v4936_v30, %v9542_v6  ;;  %v4494_v54 = vsel %vm253_vm4, %v4493_v49, %v9477_v4  ;;  %v9558_v4 = vunpack.i.h.bf16 %v15474_v15  ;;  %v9557_v56 = vunpack.i.l.bf16 %v15474_v15 }
 0x93e   :  { %9720 = vrot.lane.b32.xlu1 %v9719_v22, %s10014_s25  ;;  %v4938_v11 = vsel %vm253_vm4, %v4937_v44, %v9547_v7  ;;  %v9563_v49 = vunpack.i.h.bf16 %v15475_v23  ;;  %v9562_v43 = vunpack.i.l.bf16 %v15475_v23 }
 0x93f   :  { %v4939_v53 = vsel %vm255_vm5, %v4938_v11, %v9552_v20 }
 0x940   :  { %9715 = vrot.lane.b32.xlu0 %v9714_v9, %s10018_s29  ;;  %v4944_v9 = vsel %vm251_vm3, %v4943_v34, %v9543_v39  ;;  %v9602_v39 = vunpack.i.l.bf16 %v15472_v8 }
 0x942   :  { %9730 = vrot.lane.b32.xlu1 %v9729_v10, %s10016_s27  ;;  %v15469_v10 = vld [vmem:[#allocation30_spill] sm:$0xff] }
 0x943   :  { %v9482_v40 = vunpack.i.l.bf16 %v15469_v10 }
 0x944   :  { %9725 = vrot.lane.b32.xlu0 %v9724_v25, %s10019_s30  ;;  %v9483_v25 = vunpack.i.h.bf16 %v15469_v10 }
 0x945   :  { %v13142_v14 = vsel %vm255_vm5, %v4494_v54, %v9482_v40  ;;  %v4940_v40 = vsel %vm257_vm6, %v4939_v53, %v9557_v56  ;;  %v15479_v54 = vld [vmem:[#allocation38_spill] sm:$0xff] }
 0x946   :  { %6123 = vrot.lane.b32.xlu1 %v12788_v50, %s10021_s7  ;;  %v13147_v29 = vsel %vm255_vm5, %v4501_v31, %v9483_v25  ;;  %v15478_v25 = vld [vmem:[#allocation51_spill] sm:$0xff]  ;;  %v9613_v11 = vunpack.i.h.bf16 %v15479_v54  ;;  %v15480_v31 = vld [vmem:[#allocation57_spill] sm:$0xff]  ;;  %v4941_v56 = vsel %vm259_vm7, %v4940_v40, %v9562_v43  ;;  %v15483_v40 = vld [vmem:[#allocation56_spill] sm:$0xff] }
 0x947   :  { %v5403_v7 = vsel %vm247_vm1, %v15478_v25, %v9602_v39  ;;  %v9608_v8 = vunpack.i.h.bf16 %v15480_v31  ;;  %v9607_v15 = vunpack.i.l.bf16 %v15480_v31 }
 0x948   :  { %9735 = vrot.lane.b32.xlu0 %v9734_v48, %s10020_s6  ;;  %v9548_v48 = vunpack.i.h.bf16 %v15470_v37  ;;  %v15477_v37 = vld [vmem:[#allocation50_spill] sm:$0xff] }
 0x94a   :  { %6127 = vrot.lane.b32.xlu1 %v12794_v47, %s10021_s7  ;;  %v4945_v1 = vsel %vm253_vm4, %v4944_v9, %v9548_v48  ;;  %v15476_v9 = vld [vmem:[#allocation22_spill] sm:$0xff]  ;;  %v5410_v48 = vsel %vm247_vm1, %v15477_v37, %v9603_v5  ;;  %v5404_v37 = vsel %vm249_vm2, %v5403_v7, %v9607_v15  ;;  %v9618_v7 = vunpack.i.h.bf16 %v15483_v40 }
 0x94b   :  { %v4946_v26 = vsel %vm255_vm5, %v4945_v1, %v9553_v2  ;;  %v9612_v1 = vunpack.i.l.bf16 %v15479_v54  ;;  %v5411_v25 = vsel %vm249_vm2, %v5410_v48, %v9608_v8  ;;  %v9617_v48 = vunpack.i.l.bf16 %v15483_v40 }
 0x94c   :  { %6125 = vrot.lane.b32.xlu0 %v12791_v61, %s10021_s7  ;;  %v4947_v10 = vsel %vm257_vm6, %v4946_v26, %v9558_v4  ;;  %v15481_v26 = vld [vmem:[#allocation43_spill] sm:$0xff] }
 0x94d   :  { %v4948_v39 = vsel %vm259_vm7, %v4947_v10, %v9563_v49 }
 0x94e   :  { %6131 = vrot.lane.b32.xlu1 %v12802_v24, %s10021_s7  ;;  %v8434_v15 = vrot.slane %v4948_v39, 4 }
 0x950   :  { %6129 = vrot.lane.b32.xlu0 %v12797_v27, %s10021_s7 }
 0x952   :  { %6135 = vrot.lane.b32.xlu1 %v12808_v57, %s10021_s7 }
 0x954   :  { %6133 = vrot.lane.b32.xlu0 %v12805_v12, %s10021_s7 }
 0x958   :  { %6137 = vrot.lane.b32.xlu0 %v12811_v16, %s10021_s7 }
 0x990   :  { %v13081_v0 = vpop.permute.xlu1 %9640 }
 0x991   :  { %15463 = vst [vmem:[#allocation61_spill] sm:$0xff] %v13081_v0 }
 0x992   :  { %v13087_v32 = vpop.permute.xlu0 %9635 }
 0x993   :  { %15464 = vst [vmem:[#allocation63_spill] sm:$0xff] %v13087_v32 }
 0x994   :  { %v13091_v35 = vpop.permute.xlu1 %9650 }
 0x995   :  { %15465 = vst [vmem:[#allocation65_spill] sm:$0xff] %v13091_v35 }
 0x996   :  { %v13105_v60 = vpop.permute.xlu0 %9645 }
 0x997   :  { %15466 = vst [vmem:[#allocation9_spill] sm:$0xff] %v13105_v60 }
 0x998   :  { %v13113_v22 = vpop.permute.xlu1 %9660 }
 0x999   :  { %15467 = vst [vmem:[#allocation72_spill] sm:$0xff] %v13113_v22 }
 0x99a   :  { %v13123_v17 = vpop.permute.xlu0 %9655 }
 0x99b   :  { %15468 = vst [vmem:[#allocation75_spill] sm:$0xff] %v13123_v17 }
 0x99c   :  { %v9671_v36 = vpop.permute.xlu1 %9670 }
 0x99d   :  { %v9673_v30 = vunpack.i.h.bf16 %v9671_v36  ;;  %v9672_v34 = vunpack.i.l.bf16 %v9671_v36 }
 0x99e   :  { %v13139_v6 = vpop.permute.xlu0 %9665 }
 0x99f   :  { %15473 = vst [vmem:[#allocation64_spill] sm:$0xff] %v13139_v6  ;;  %v5878_v53 = vsel %vm247_vm1, %v12840_v38, %v9673_v30  ;;  %v5871_v5 = vsel %vm247_vm1, %v15481_v26, %v9672_v34  ;;  %v5412_v38 = vsel %vm251_vm3, %v5411_v25, %v9613_v11  ;;  %v15482_v26 = vld [vmem:[#allocation49_spill] sm:$0xff] }
 0x9a0   :  { %v9681_v44 = vpop.permute.xlu1 %9680  ;;  %v9623_v18 = vunpack.i.h.bf16 %v15482_v26  ;;  %v9622_v49 = vunpack.i.l.bf16 %v15482_v26 }
 0x9a1   :  { %v9683_v30 = vunpack.i.h.bf16 %v9681_v44  ;;  %v9682_v2 = vunpack.i.l.bf16 %v9681_v44 }
 0x9a2   :  { %v9676_v36 = vpop.permute.xlu0 %9675 }
 0x9a3   :  { %v9678_v23 = vunpack.i.h.bf16 %v9676_v36  ;;  %v9677_v20 = vunpack.i.l.bf16 %v9676_v36  ;;  %v5405_v36 = vsel %vm251_vm3, %v5404_v37, %v9612_v1 }
 0x9a4   :  { %v9691_v4 = vpop.permute.xlu1 %9690 }
 0x9a5   :  { %v5879_v54 = vsel %vm249_vm2, %v5878_v53, %v9678_v23  ;;  %v5872_v31 = vsel %vm249_vm2, %v5871_v5, %v9677_v20  ;;  %v8433_v23 = vrot.slane %v4941_v56, 4  ;;  %v5406_v53 = vsel %vm253_vm4, %v5405_v36, %v9617_v48  ;;  %v15485_v56 = vld [vmem:[#allocation41_spill] sm:$0xff] }
 0x9a6   :  { %v9686_v34 = vpop.permute.xlu0 %9685  ;;  %v5873_v8 = vsel %vm251_vm3, %v5872_v31, %v9682_v2  ;;  %v5880_v20 = vsel %vm251_vm3, %v5879_v54, %v9683_v30  ;;  %v9693_v5 = vunpack.i.h.bf16 %v9691_v4  ;;  %v9692_v37 = vunpack.i.l.bf16 %v9691_v4 }
 0x9a7   :  { %v9688_v43 = vunpack.i.h.bf16 %v9686_v34  ;;  %v9687_v10 = vunpack.i.l.bf16 %v9686_v34  ;;  %v5413_v34 = vsel %vm253_vm4, %v5412_v38, %v9618_v7  ;;  %v5407_v26 = vsel %vm255_vm5, %v5406_v53, %v9622_v49  ;;  %v15486_v7 = vld [vmem:[#allocation47_spill] sm:$0xff] }
 0x9a8   :  { %v9701_v1 = vpop.permute.xlu1 %9700  ;;  %v5414_v54 = vsel %vm255_vm5, %v5413_v34, %v9623_v18  ;;  %v9633_v36 = vunpack.i.h.bf16 %v15485_v56  ;;  %v9632_v4 = vunpack.i.l.bf16 %v15485_v56  ;;  %v9628_v48 = vunpack.i.h.bf16 %v15486_v7 }
 0x9a9   :  { %v5874_v11 = vsel %vm253_vm4, %v5873_v8, %v9687_v10  ;;  %v5881_v44 = vsel %vm253_vm4, %v5880_v20, %v9688_v43  ;;  %v9703_v31 = vunpack.i.h.bf16 %v9701_v1  ;;  %v9702_v30 = vunpack.i.l.bf16 %v9701_v1 }
 0x9aa   :  { %v9696_v25 = vpop.permute.xlu0 %9695  ;;  %v5875_v10 = vsel %vm255_vm5, %v5874_v11, %v9692_v37  ;;  %v5882_v39 = vsel %vm255_vm5, %v5881_v44, %v9693_v5  ;;  %v9627_v18 = vunpack.i.l.bf16 %v15486_v7  ;;  %v4503_v44 = vsel %vm257_vm6, %v13147_v29, %v9488_v51 }
 0x9ab   :  { %v9698_v40 = vunpack.i.h.bf16 %v9696_v25  ;;  %v9697_v2 = vunpack.i.l.bf16 %v9696_v25  ;;  %v5415_v5 = vsel %vm257_vm6, %v5414_v54, %v9628_v48  ;;  %v15488_v37 = vunpack.i.l.bf16 %v15471_v62 }
 0x9ac   :  { %v13188_v43 = vpop.permute.xlu1 %9710  ;;  %v5408_v34 = vsel %vm257_vm6, %v5407_v26, %v9627_v18 }
 0x9ad   :  { %15484 = vst [vmem:[#allocation67_spill] sm:$0xff] %v13188_v43  ;;  %v5876_v38 = vsel %vm257_vm6, %v5875_v10, %v9697_v2  ;;  %v5883_v49 = vsel %vm257_vm6, %v5882_v39, %v9698_v40  ;;  %v4496_v25 = vsel %vm257_vm6, %v13142_v14, %v15488_v37  ;;  %v15489_v40 = vunpack.i.h.bf16 %v15476_v9 }
 0x9ae   :  { %v5884_v8 = vsel %vm259_vm7, %v5883_v49, %v9703_v31  ;;  %v5877_v20 = vsel %vm259_vm7, %v5876_v38, %v9702_v30  ;;  %v5416_v31 = vsel %vm259_vm7, %v5415_v5, %v9633_v36  ;;  %v15490_v30 = vunpack.i.l.bf16 %v15476_v9 }
 0x9af   :  { %v8440_v1 = vrot.slane %v5884_v8, 4  ;;  %v8439_v11 = vrot.slane %v5877_v20, 4  ;;  %v4504_v2 = vsel %vm259_vm7, %v4503_v44, %v15489_v40  ;;  %v5409_v51 = vsel %vm259_vm7, %v5408_v34, %v9632_v4 }
 0x9b0   :  { %v13199_v53 = vpop.permute.xlu1 %9720  ;;  %v4497_v10 = vsel %vm259_vm7, %v4496_v25, %v15490_v30  ;;  %v8456_v29 = vsel %vm4220_vm8, %v4504_v2, %v8434_v15 }
 0x9b1   :  { %15487 = vst [vmem:[#allocation74_spill] sm:$0xff] %v13199_v53  ;;  %v8458_v62 = vsel %vm4220_vm8, %v5416_v31, %v8440_v1  ;;  %v8455_v14 = vsel %vm4220_vm8, %v4497_v10, %v8433_v23  ;;  %v8457_v26 = vsel %vm4220_vm8, %v5409_v51, %v8439_v11  ;;  %v15495_v31 = vld [vmem:[#allocation58_spill] sm:$0xff] }
 0x9b2   :  { %v8903_v54 = vpack.c.bf16 %v8458_v62, %v8456_v29  ;;  %v8905_v39 = vpack.c.bf16 %v8457_v26, %v8455_v14  ;;  %v7051_v30 = vrot.slane %v15495_v31, 2  ;;  %v15496_v10 = vld [vmem:[#allocation6_spill] sm:$0xff]  ;;  %v15497_v29 = vld [vmem:[#allocation13_spill] sm:$0xff]  ;;  %v7285_v31 = vrot.slane %v12738_v46, 2 }
 0x9b3   :  { %v7049_v51 = vrot.slane %v15496_v10, 2  ;;  %v7046_v62 = vrot.slane %v15497_v29, 2  ;;  %v15498_v26 = vld [vmem:[#allocation5_spill] sm:$0xff] }
 0x9b4   :  { %v13223_v56 = vpop.permute.xlu1 %9730  ;;  %8904 = vmatprep.subr.bf16.mxu1 %v8903_v54  ;;  %v7044_v54 = vrot.slane %v15498_v26, 2  ;;  %v15511_v26 = vld [vmem:[#allocation10_spill] sm:$0xff] }
 0x9b5   :  { %15491 = vst [vmem:[#allocation77_spill] sm:$0xff] %v13223_v56  ;;  %8906 = vmatpush1.bf16.msra.mxu1 %v8905_v39  ;;  %v13262_v14 = vsel %vm2807_vm9, %v7049_v51, %v7051_v30  ;;  %v15499_v39 = vld [vmem:[#allocation24_spill] sm:$0xff]  ;;  %v15508_v30 = vld [vmem:[#allocation7_spill] sm:$0xff] }
 0x9b6   :  { %v7278_v10 = vrot.slane %v15508_v30, 2 }
 0x9b8   :  { %v6124_v36 = vpop.permute.xlu1 %6123 }
 0x9bc   :  { %v6128_v9 = vpop.permute.xlu1 %6127 }
 0x9c0   :  { %v6132_v38 = vpop.permute.xlu1 %6131 }
 0x9c1   :  { %v6147_v49 = vcombine.low %v6124_v36, %v6132_v38  ;;  %v6148_v7 = vcombine.high %v6124_v36, %v6132_v38  ;;  %v7061_v36 = vrot.slane %v15499_v39, 2  ;;  %v15501_v38 = vld [vmem:[#allocation46_spill] sm:$0xff]  ;;  %v7295_v39 = vrot.slane %v12751_v52, 2 }
 0x9c3   :  { %v6155_v18 = vrot.slane %v6147_v49, %v10133_v28  ;;  %v13227_v23 = vrot.slane %v6148_v7, %v10133_v28  ;;  %v7056_v49 = vrot.slane %v15501_v38, 2  ;;  %v15502_v7 = vld [vmem:[#allocation15_spill] sm:$0xff] }
 0x9c4   :  { %v6136_v4 = vpop.permute.xlu1 %6135 }
 0x9c5   :  { %v6163_v48 = vcombine.low %v6128_v9, %v6136_v4  ;;  %v6164_v15 = vcombine.high %v6128_v9, %v6136_v4  ;;  %15492 = vst [vmem:[#allocation66_spill] sm:$0xff] %v13227_v23  ;;  %v7054_v4 = vrot.slane %v15502_v7, 2  ;;  %v15516_v7 = vld [vmem:[#allocation60_spill] sm:$0xff] }
 0x9c7   :  { %v6171_v8 = vrot.slane %v6163_v48, %v10133_v28  ;;  %v13231_v20 = vrot.slane %v6164_v15, %v10133_v28  ;;  %v15503_v48 = vld [vmem:[#allocation4_spill] sm:$0xff] }
 0x9c8   :  { %v7048_v15 = vrot.slane %v15503_v48, 2  ;;  %v15517_v48 = vld [vmem:[#allocation44_spill] sm:$0xff] }
 0x9c9   :  { %15493 = vst [vmem:[#allocation69_spill] sm:$0xff] %v13231_v20  ;;  %v6179_v1 = vcombine.low %v6155_v18, %v6171_v8  ;;  %v6180_v11 = vcombine.high %v6155_v18, %v6171_v8  ;;  %v6195_v5 = vcombine.low %v13227_v23, %v13231_v20  ;;  %v15504_v18 = vld [vmem:[#allocation3_spill] sm:$0xff] }
 0x9ca   :  { %v7043_v8 = vrot.slane %v15504_v18, 2 }
 0x9cb   :  { %v6194_v37 = vrot.slane %v6180_v11, %v10150_v33  ;;  %v13239_v25 = vrot.slane %v6179_v1, %v10150_v33  ;;  %v13246_v40 = vrot.slane %v6195_v5, %v10150_v33  ;;  %v13299_v1 = vsel %vm2807_vm9, %v7048_v15, %v7049_v51  ;;  %v15505_v11 = vld [vmem:[#allocation16_spill] sm:$0xff] }
 0x9cc   :  { %v7058_v5 = vrot.slane %v15505_v11, 2  ;;  %v15509_v51 = vld [vmem:[#allocation28_spill] sm:$0xff]  ;;  %v7277_v15 = vrot.slane %v15517_v48, 2 }
 0x9cd   :  { %15494 = vst [vmem:[#allocation76_spill] sm:$0xff] %v13239_v25  ;;  %6288 = vrot.lane.b32.xlu0 %v6194_v37, %s10015_s26  ;;  %v6211_v34 = vcombine.high %v13239_v25, %v15211_v42  ;;  %v6212_v2 = vcombine.high %v6194_v37, %v15211_v42  ;;  %v7280_v29 = vrot.slane %v15509_v51, 2 }
 0x9cf   :  { %6284 = vrot.lane.b32.xlu1 %v6211_v34, %s10017_s28  ;;  %v15507_v34 = vld [vmem:[#allocation40_spill] sm:$0xff]  ;;  %v13338_v46 = vsel %vm2807_vm9, %v7278_v10, %v7280_v29 }
 0x9d0   :  { %15512 = vst [vmem:[#allocation71_spill] sm:$0xff] %v13338_v46 }
 0x9d1   :  { %6296 = vrot.lane.b32.xlu0 %v13246_v40, %s10014_s25 }
 0x9d3   :  { %6292 = vrot.lane.b32.xlu1 %v6212_v2, %s10018_s29  ;;  %v7283_v2 = vrot.slane %v15507_v34, 2 }
 0x9d5   :  { %6589 = vrot.lane.b32.xlu0 %v12797_v27, %s10022_s8  ;;  %v13269_v27 = vsel %vm2807_vm9, %v7044_v54, %v7046_v62  ;;  %v13331_v62 = vsel %vm2807_vm9, %v7283_v2, %v7285_v31  ;;  %v13386_v31 = vpop.permute.xlu0 %9705 }
 0x9d6   :  { %15510 = vst [vmem:[#allocation68_spill] sm:$0xff] %v13331_v62  ;;  %15522 = vst [vmem:[#allocation25_spill] sm:$0xff] %v13386_v31 }
 0x9d7   :  { %6585 = vrot.lane.b32.xlu1 %v12791_v61, %s10022_s8  ;;  %v15500_v61 = vld [vmem:[#allocation12_spill] sm:$0xff] }
 0x9d8   :  { %v7059_v9 = vrot.slane %v15500_v61, 2 }
 0x9d9   :  { %6597 = vrot.lane.b32.xlu0 %v12811_v16, %s10022_s8  ;;  %v13394_v30 = vpop.permute.xlu0 %9715 }
 0x9da   :  { %v13276_v16 = vsel %vm2807_vm9, %v7059_v9, %v7061_v36  ;;  %v15513_v36 = vld [vmem:[#allocation42_spill] sm:$0xff]  ;;  %15523 = vst [vmem:[#allocation31_spill] sm:$0xff] %v13394_v30 }
 0x9db   :  { %6593 = vrot.lane.b32.xlu1 %v12805_v12, %s10022_s8  ;;  %v13282_v12 = vsel %vm2807_vm9, %v7054_v4, %v7056_v49  ;;  %v7288_v61 = vrot.slane %v15513_v36, 2  ;;  %v7155_v0 = vcombine.low %v13262_v14, %v13276_v16 }
 0x9dd   :  { %7517 = vrot.lane.b32.xlu0 %v13262_v14, %s10021_s7 }
 0x9df   :  { %7513 = vrot.lane.b32.xlu1 %v13269_v27, %s10021_s7 }
 0x9e1   :  { %7525 = vrot.lane.b32.xlu0 %v13276_v16, %s10021_s7 }
 0x9e3   :  { %7521 = vrot.lane.b32.xlu1 %v13282_v12, %s10021_s7 }
 0x9e5   :  { %6587 = vrot.lane.b32.xlu0 %v12794_v47, %s10022_s8  ;;  %v15506_v47 = vld [vmem:[#allocation39_spill] sm:$0xff] }
 0x9e6   :  { %v7053_v37 = vrot.slane %v15506_v47, 2  ;;  %v15520_v47 = vld [vmem:[#allocation8_spill] sm:$0xff] }
 0x9e7   :  { %6583 = vrot.lane.b32.xlu1 %v12788_v50, %s10022_s8  ;;  %v13305_v50 = vsel %vm2807_vm9, %v7043_v8, %v7044_v54  ;;  %v7293_v54 = vrot.slane %v15511_v26, 2  ;;  %v15518_v8 = vld [vmem:[#allocation70_spill] sm:$0xff] }
 0x9e8   :  { %v7292_v11 = vrot.slane %v15518_v8, 2 }
 0x9e9   :  { %6595 = vrot.lane.b32.xlu0 %v12808_v57, %s10022_s8  ;;  %v13311_v57 = vsel %vm2807_vm9, %v7058_v5, %v7059_v9  ;;  %v15514_v9 = vld [vmem:[#allocation26_spill] sm:$0xff]  ;;  %v13345_v49 = vsel %vm2807_vm9, %v7293_v54, %v7295_v39  ;;  %v13371_v5 = vsel %vm2807_vm9, %v7277_v15, %v7278_v10  ;;  %v13402_v10 = vpop.permute.xlu0 %9725 }
 0x9ea   :  { %v7290_v38 = vrot.slane %v15514_v9, 2  ;;  %15519 = vst [vmem:[#allocation34_spill] sm:$0xff] %v13371_v5  ;;  %v13377_v34 = vsel %vm2807_vm9, %v7292_v11, %v7293_v54  ;;  %15524 = vst [vmem:[#allocation14_spill] sm:$0xff] %v13402_v10 }
 0x9eb   :  { %6591 = vrot.lane.b32.xlu1 %v12802_v24, %s10022_s8  ;;  %v13316_v24 = vsel %vm2807_vm9, %v7053_v37, %v7054_v4  ;;  %v7282_v4 = vrot.slane %v15516_v7, 2  ;;  %v7287_v37 = vrot.slane %v15520_v47, 2 }
 0x9ec   :  { %v13350_v52 = vsel %vm2807_vm9, %v7288_v61, %v7290_v38 }
 0x9ed   :  { %7515 = vrot.lane.b32.xlu0 %v13299_v1, %s10021_s7  ;;  %15515 = vst [vmem:[#allocation30_spill] sm:$0xff] %v13350_v52  ;;  %v13365_v18 = vsel %vm2807_vm9, %v7282_v4, %v7283_v2  ;;  %v13382_v2 = vsel %vm2807_vm9, %v7287_v37, %v7288_v61  ;;  %v13410_v51 = vpop.permute.xlu0 %9735 }
 0x9ee   :  { %15521 = vst [vmem:[#allocation18_spill] sm:$0xff] %v13382_v2  ;;  %15525 = vst [vmem:[#allocation22_spill] sm:$0xff] %v13410_v51 }
 0x9ef   :  { %7511 = vrot.lane.b32.xlu1 %v13305_v50, %s10021_s7 }
 0x9f1   :  { %7523 = vrot.lane.b32.xlu0 %v13311_v57, %s10021_s7 }
 0x9f3   :  { %7519 = vrot.lane.b32.xlu1 %v13316_v24, %s10021_s7 }
 0x9f5   :  { %6819 = vrot.lane.b32.xlu0 %v12966_v55, %s10022_s8 }
 0x9f7   :  { %6815 = vrot.lane.b32.xlu1 %v12963_v19, %s10022_s8 }
 0x9f9   :  { %6827 = vrot.lane.b32.xlu0 %v12972_v13, %s10022_s8 }
 0x9fb   :  { %6823 = vrot.lane.b32.xlu1 %v12969_v58, %s10022_s8 }
 0x9fd   :  { %7747 = vrot.lane.b32.xlu0 %v13331_v62, %s10021_s7 }
 0x9ff   :  { %7743 = vrot.lane.b32.xlu1 %v13338_v46, %s10021_s7 }
 0xa01   :  { %7755 = vrot.lane.b32.xlu0 %v13345_v49, %s10021_s7 }
 0xa03   :  { %7751 = vrot.lane.b32.xlu1 %v13350_v52, %s10021_s7 }
 0xa05   :  { %6817 = vrot.lane.b32.xlu0 %v12951_v21, %s10022_s8 }
 0xa07   :  { %6813 = vrot.lane.b32.xlu1 %v12948_v41, %s10022_s8 }
 0xa09   :  { %6825 = vrot.lane.b32.xlu0 %v12960_v59, %s10022_s8 }
 0xa0b   :  { %6821 = vrot.lane.b32.xlu1 %v12954_v45, %s10022_s8 }
 0xa0d   :  { %7745 = vrot.lane.b32.xlu0 %v13365_v18, %s10021_s7 }
 0xa0f   :  { %7741 = vrot.lane.b32.xlu1 %v13371_v5, %s10021_s7 }
 0xa11   :  { %7753 = vrot.lane.b32.xlu0 %v13377_v34, %s10021_s7 }
 0xa13   :  { %7749 = vrot.lane.b32.xlu1 %v13382_v2, %s10021_s7 }
 0xa15   :  { %7977 = vrot.lane.b32.xlu0 %v13262_v14, %s10022_s8 }
 0xa17   :  { %7973 = vrot.lane.b32.xlu1 %v13269_v27, %s10022_s8 }
 0xa19   :  { %7985 = vrot.lane.b32.xlu0 %v13276_v16, %s10022_s8 }
 0xa1b   :  { %7981 = vrot.lane.b32.xlu1 %v13282_v12, %s10022_s8 }
 0xa1d   :  { %6359 = vrot.lane.b32.xlu0 %v12966_v55, %s10021_s7  ;;  %v13416_v55 = vpop.permute.xlu0 %6125 }
 0xa1f   :  { %6355 = vrot.lane.b32.xlu1 %v12963_v19, %s10021_s7 }
 0xa21   :  { %6367 = vrot.lane.b32.xlu0 %v12972_v13, %s10021_s7  ;;  %v13424_v19 = vpop.permute.xlu0 %6129 }
 0xa23   :  { %6363 = vrot.lane.b32.xlu1 %v12969_v58, %s10021_s7 }
 0xa25   :  { %7975 = vrot.lane.b32.xlu0 %v13299_v1, %s10022_s8  ;;  %v13432_v58 = vpop.permute.xlu0 %6133 }
 0xa27   :  { %7971 = vrot.lane.b32.xlu1 %v13305_v50, %s10022_s8 }
 0xa29   :  { %7983 = vrot.lane.b32.xlu0 %v13311_v57, %s10022_s8 }
 0xa2b   :  { %7979 = vrot.lane.b32.xlu1 %v13316_v24, %s10022_s8 }
 0xa2d   :  { %6357 = vrot.lane.b32.xlu0 %v12951_v21, %s10021_s7  ;;  %v13440_v21 = vpop.permute.xlu0 %6137 }
 0xa2f   :  { %6353 = vrot.lane.b32.xlu1 %v12948_v41, %s10021_s7 }
 0xa31   :  { %6365 = vrot.lane.b32.xlu0 %v12960_v59, %s10021_s7 }
 0xa33   :  { %6361 = vrot.lane.b32.xlu1 %v12954_v45, %s10021_s7 }
 0xa35   :  { %8207 = vrot.lane.b32.xlu0 %v13331_v62, %s10022_s8 }
 0xa37   :  { %8203 = vrot.lane.b32.xlu1 %v13338_v46, %s10022_s8 }
 0xa39   :  { %8215 = vrot.lane.b32.xlu0 %v13345_v49, %s10022_s8 }
 0xa3b   :  { %8211 = vrot.lane.b32.xlu1 %v13350_v52, %s10022_s8 }
 0xa3d   :  { %8205 = vrot.lane.b32.xlu0 %v13365_v18, %s10022_s8 }
 0xa3f   :  { %v13446_v45 = vpop.permute.xlu0 %6288  ;;  %8201 = vrot.lane.b32.xlu1 %v13371_v5, %s10022_s8 }
 0xa40   :  { %15526 = vst [vmem:[#allocation50_spill] sm:$0xff] %v13446_v45 }
 0xa41   :  { %v13450_v41 = vpop.permute.xlu1 %6284  ;;  %8213 = vrot.lane.b32.xlu0 %v13377_v34, %s10022_s8 }
 0xa42   :  { %15527 = vst [vmem:[#allocation51_spill] sm:$0xff] %v13450_v41 }
 0xa43   :  { %v13454_v59 = vpop.permute.xlu0 %6296  ;;  %8209 = vrot.lane.b32.xlu1 %v13382_v2, %s10022_s8 }
 0xa44   :  { %15528 = vst [vmem:[#allocation38_spill] sm:$0xff] %v13454_v59 }
 0xa45   :  { %v13458_v13 = vpop.permute.xlu1 %6292 }
 0xa46   :  { %15529 = vst [vmem:[#allocation57_spill] sm:$0xff] %v13458_v13 }
 0xa47   :  { %v13460_v29 = vpop.permute.xlu0 %6589 }
 0xa49   :  { %v13462_v26 = vpop.permute.xlu1 %6585 }
 0xa4b   :  { %v13464_v54 = vpop.permute.xlu0 %6597 }
 0xa4c   :  { %v6691_v9 = vcombine.low %v13460_v29, %v13464_v54 }
 0xa4d   :  { %v13466_v39 = vpop.permute.xlu1 %6593 }
 0xa4e   :  { %v6675_v36 = vcombine.low %v13462_v26, %v13466_v39  ;;  %v6699_v15 = vrot.slane %v6691_v9, %v10133_v28 }
 0xa4f   :  { %v13470_v61 = vpop.permute.xlu0 %7517 }
 0xa50   :  { %v6683_v7 = vrot.slane %v6675_v36, %v10133_v28 }
 0xa51   :  { %v13474_v38 = vpop.permute.xlu1 %7513 }
 0xa52   :  { %v6707_v47 = vcombine.low %v6683_v7, %v6699_v15  ;;  %v6708_v60 = vcombine.high %v6683_v7, %v6699_v15  ;;  %v7163_v7 = vrot.slane %v7155_v0, %v10133_v28 }
 0xa53   :  { %v13477_v4 = vpop.permute.xlu0 %7525 }
 0xa54   :  { %v7619_v48 = vcombine.low %v13470_v61, %v13477_v4  ;;  %v13490_v35 = vrot.slane %v6707_v47, %v10150_v33  ;;  %v6231_v47 = vcombine.low %v13424_v19, %v13440_v21  ;;  %v13531_v13 = vrot.slane %v6708_v60, %v10150_v33 }
 0xa55   :  { %v7522_v8 = vpop.permute.xlu1 %7521  ;;  %v6676_v60 = vcombine.high %v13462_v26, %v13466_v39 }
 0xa56   :  { %v7603_v11 = vcombine.low %v13474_v38, %v7522_v8  ;;  %v7627_v44 = vrot.slane %v7619_v48, %v10133_v28  ;;  %15530 = vst [vmem:[#allocation43_spill] sm:$0xff] %v13490_v35  ;;  %v7139_v48 = vcombine.low %v13269_v27, %v13282_v12  ;;  %v6239_v3 = vrot.slane %v6231_v47, %v10133_v28 }
 0xa57   :  { %v13483_v37 = vpop.permute.xlu0 %6587 }
 0xa58   :  { %v7611_v22 = vrot.slane %v7603_v11, %v10133_v28  ;;  %v6215_v11 = vcombine.low %v13416_v55, %v13432_v58  ;;  %v7147_v15 = vrot.slane %v7139_v48, %v10133_v28 }
 0xa59   :  { %v13487_v6 = vpop.permute.xlu1 %6583 }
 0xa5a   :  { %v7635_v36 = vcombine.low %v7611_v22, %v7627_v44  ;;  %v7636_v56 = vcombine.high %v7611_v22, %v7627_v44  ;;  %v6739_v22 = vcombine.high %v13490_v35, %v15211_v42  ;;  %v6223_v63 = vrot.slane %v6215_v11, %v10133_v28 }
 0xa5b   :  { %v13492_v17 = vpop.permute.xlu0 %6595  ;;  %v7172_v23 = vcombine.high %v7147_v15, %v7163_v7 }
 0xa5c   :  { %v13495_v9 = vrot.slane %v7635_v36, %v10150_v33  ;;  %v6623_v10 = vcombine.low %v13483_v37, %v13492_v17  ;;  %v13520_v30 = vrot.slane %v7636_v56, %v10150_v33  ;;  %v7087_v56 = vcombine.low %v13299_v1, %v13311_v57 }
 0xa5d   :  { %v13497_v51 = vpop.permute.xlu1 %6591  ;;  %v6247_v45 = vcombine.low %v6223_v63, %v6239_v3 }
 0xa5e   :  { %15531 = vst [vmem:[#allocation49_spill] sm:$0xff] %v13495_v9  ;;  %v6607_v36 = vcombine.low %v13487_v6, %v13497_v51  ;;  %v7667_v44 = vcombine.high %v13495_v9, %v15211_v42  ;;  %v6631_v48 = vrot.slane %v6623_v10, %v10133_v28  ;;  %v9749_v47 = vpack.i.bf16 %v13520_v30, %v13531_v13 }
 0xa5f   :  { %v13509_v53 = vpop.permute.xlu0 %7515  ;;  %v7071_v10 = vcombine.low %v13305_v50, %v13316_v24  ;;  %v13553_v35 = vrot.slane %v7087_v56, %v10133_v28 }
 0xa60   :  { %v9739_v43 = vpack.i.bf16 %v7667_v44, %v6739_v22  ;;  %v6615_v31 = vrot.slane %v6607_v36, %v10133_v28  ;;  %v7604_v36 = vcombine.high %v13474_v38, %v7522_v8  ;;  %v7171_v44 = vcombine.low %v7147_v15, %v7163_v7 }
 0xa61   :  { %v13517_v32 = vpop.permute.xlu1 %7511  ;;  %v6248_v8 = vcombine.high %v6223_v63, %v6239_v3  ;;  %v13586_v7 = vrot.slane %v6676_v60, %v10133_v28 }
 0xa62   :  { %9740 = vrot.lane.b32.xlu1 %v9739_v43, %s10017_s28  ;;  %v7156_v43 = vcombine.high %v13262_v14, %v13276_v16  ;;  %v6639_v25 = vcombine.low %v6615_v31, %v6631_v48  ;;  %v7620_v14 = vcombine.high %v13470_v61, %v13477_v4  ;;  %v6640_v9 = vcombine.high %v6615_v31, %v6631_v48 }
 0xa63   :  { %v13528_v59 = vpop.permute.xlu0 %7523  ;;  %v13564_v56 = vrot.slane %v7604_v36, %v10133_v28  ;;  %v13567_v61 = vrot.slane %v7071_v10, %v10133_v28  ;;  %v13570_v4 = vrot.slane %v6247_v45, %v10150_v33  ;;  %v13576_v31 = vrot.slane %v7171_v44, %v10150_v33 }
 0xa64   :  { %v7551_v0 = vcombine.low %v13509_v53, %v13528_v59  ;;  %v13573_v63 = vrot.slane %v6639_v25, %v10150_v33  ;;  %v13589_v25 = vrot.slane %v6640_v9, %v10150_v33  ;;  %v6262_v15 = vrot.slane %v6248_v8, %v10150_v33 }
 0xa65   :  { %v13538_v11 = vpop.permute.xlu1 %7519  ;;  %15532 = vst [vmem:[#allocation56_spill] sm:$0xff] %v13570_v4  ;;  %15534 = vst [vmem:[#allocation47_spill] sm:$0xff] %v13576_v31 }
 0xa66   :  { %v7535_v22 = vcombine.low %v13517_v32, %v13538_v11  ;;  %9750 = vrot.lane.b32.xlu1 %v9749_v47, %s10015_s26  ;;  %v7559_v16 = vrot.slane %v7551_v0, %v10133_v28  ;;  %v6692_v47 = vcombine.high %v13460_v29, %v13464_v54  ;;  %15533 = vst [vmem:[#allocation41_spill] sm:$0xff] %v13573_v63 }
 0xa67   :  { %v6820_v41 = vpop.permute.xlu0 %6819  ;;  %v13579_v29 = vrot.slane %v7620_v14, %v10133_v28  ;;  %v7186_v0 = vrot.slane %v7172_v23, %v10150_v33  ;;  %v6671_v9 = vcombine.high %v13573_v63, %v15211_v42 }
 0xa68   :  { %v7543_v38 = vrot.slane %v7535_v22, %v10133_v28  ;;  %v13594_v48 = vrot.slane %v6692_v47, %v10133_v28 }
 0xa69   :  { %v6816_v20 = vpop.permute.xlu1 %6815 }
 0xa6a   :  { %v7567_v5 = vcombine.low %v7543_v38, %v7559_v16  ;;  %v7568_v2 = vcombine.high %v7543_v38, %v7559_v16  ;;  %v6723_v16 = vcombine.low %v13586_v7, %v13594_v48 }
 0xa6b   :  { %v6828_v3 = vpop.permute.xlu0 %6827 }
 0xa6c   :  { %v13582_v26 = vrot.slane %v7567_v5, %v10150_v33  ;;  %v6922_v54 = vcombine.high %v6820_v41, %v6828_v3  ;;  %v7582_v39 = vrot.slane %v7568_v2, %v10150_v33  ;;  %v7651_v5 = vcombine.low %v13564_v56, %v13579_v29 }
 0xa6d   :  { %v6824_v45 = vpop.permute.xlu1 %6823  ;;  %v6921_v2 = vcombine.low %v6820_v41, %v6828_v3  ;;  %v7203_v41 = vcombine.high %v13576_v31, %v15211_v42  ;;  %v6216_v3 = vcombine.high %v13416_v55, %v13432_v58  ;;  %v15538_v55 = vcombine.high %v13269_v27, %v13282_v12 }
 0xa6e   :  { %15535 = vst [vmem:[#allocation58_spill] sm:$0xff] %v13582_v26  ;;  %v6905_v36 = vcombine.low %v6816_v20, %v6824_v45  ;;  %v6906_v22 = vcombine.high %v6816_v20, %v6824_v45  ;;  %v9759_v60 = vpack.i.bf16 %v7582_v39, %v13589_v25  ;;  %v7599_v10 = vcombine.high %v13582_v26, %v15211_v42 }
 0xa6f   :  { %v13598_v44 = vpop.permute.xlu0 %7747  ;;  %v13606_v23 = vrot.slane %v6922_v54, %v10133_v28  ;;  %v6279_v20 = vcombine.high %v13570_v4, %v15211_v42  ;;  %v6232_v54 = vcombine.high %v13424_v19, %v13440_v21  ;;  %v13643_v19 = vrot.slane %v15538_v55, %v10133_v28 }
 0xa70   :  { %v13609_v14 = vrot.slane %v6906_v22, %v10133_v28  ;;  %v13618_v38 = vrot.slane %v6905_v36, %v10133_v28  ;;  %9760 = vrot.lane.b32.xlu1 %v9759_v60, %s10015_s26  ;;  %v9744_v47 = vpack.i.bf16 %v7599_v10, %v6671_v9  ;;  %v13630_v22 = vrot.slane %v7156_v43, %v10133_v28 }
 0xa71   :  { %15536 = vst [vmem:[#allocation6_spill] sm:$0xff] %v13606_v23  ;;  %v13621_v8 = vpop.permute.xlu1 %7743  ;;  %v13633_v36 = vrot.slane %v6921_v2, %v10133_v28  ;;  %v9769_v9 = vpack.i.bf16 %v7186_v0, %v6262_v15  ;;  %v7659_v10 = vrot.slane %v7651_v5, %v10150_v33  ;;  %v7103_v58 = vcombine.low %v13567_v61, %v13553_v35 }
 0xa72   :  { %15537 = vst [vmem:[#allocation13_spill] sm:$0xff] %v13609_v14  ;;  %9745 = vrot.lane.b32.xlu0 %v9744_v47, %s10017_s28  ;;  %v9754_v21 = vpack.i.bf16 %v7203_v41, %v6279_v20  ;;  %v7204_v43 = vcombine.high %v7186_v0, %v15211_v42  ;;  %v7536_v2 = vcombine.high %v13517_v32, %v13538_v11 }
 0xa73   :  { %v13636_v60 = vpop.permute.xlu0 %7755  ;;  %v6937_v47 = vcombine.low %v13618_v38, %v13633_v36  ;;  %v6731_v27 = vrot.slane %v6723_v16, %v10150_v33  ;;  %v7668_v12 = vcombine.high %v13520_v30, %v15211_v42  ;;  %v13659_v55 = vrot.slane %v6216_v3, %v10133_v28 }
 0xa74   :  { %9770 = vrot.lane.b32.xlu1 %v9769_v9, %s10015_s26  ;;  %v13662_v0 = vrot.slane %v6232_v54, %v10133_v28  ;;  %v6608_v32 = vcombine.high %v13487_v6, %v13497_v51  ;;  %v6280_v11 = vcombine.high %v6262_v15, %v15211_v42  ;;  %v7552_v20 = vcombine.high %v13509_v53, %v13528_v59 }
 0xa75   :  { %v13653_v5 = vpop.permute.xlu1 %7751  ;;  %v9779_v16 = vpack.i.bf16 %v7659_v10, %v6731_v27  ;;  %v6740_v30 = vcombine.high %v13531_v13, %v15211_v42  ;;  %v6624_v3 = vcombine.high %v13483_v37, %v13492_v17  ;;  %v13677_v54 = vrot.slane %v7103_v58, %v10150_v33 }
 0xa76   :  { %9755 = vrot.lane.b32.xlu0 %v9754_v21, %s10017_s28  ;;  %v13680_v6 = vrot.slane %v7536_v2, %v10133_v28  ;;  %v13683_v51 = vrot.slane %v6937_v47, %v10150_v33  ;;  %v7600_v15 = vcombine.high %v7582_v39, %v15211_v42  ;;  %v6263_v13 = vcombine.low %v13659_v55, %v13662_v0 }
 0xa77   :  { %v13670_v41 = vpop.permute.xlu0 %6817  ;;  %15539 = vst [vmem:[#allocation5_spill] sm:$0xff] %v13677_v54  ;;  %v9764_v59 = vpack.i.bf16 %v7668_v12, %v6740_v30  ;;  %v13692_v17 = vrot.slane %v6608_v32, %v10133_v28  ;;  %v9789_v37 = vpack.i.bf16 %v7204_v43, %v6280_v11  ;;  %v7187_v9 = vcombine.low %v13643_v19, %v13630_v22 }
 0xa78   :  { %15540 = vst [vmem:[#allocation24_spill] sm:$0xff] %v13683_v51  ;;  %9780 = vrot.lane.b32.xlu1 %v9779_v16, %s10014_s25  ;;  %v13697_v58 = vrot.slane %v7552_v20, %v10133_v28  ;;  %v7833_v21 = vcombine.low %v13621_v8, %v13653_v5  ;;  %v6672_v39 = vcombine.high %v13589_v25, %v15211_v42 }
 0xa79   :  { %v13686_v53 = vpop.permute.xlu1 %6813  ;;  %v7669_v47 = vcombine.high %v7659_v10, %v15211_v42  ;;  %v6638_v43 = vrot.slane %v6624_v3, %v10133_v28  ;;  %v6741_v12 = vcombine.high %v6731_v27, %v15211_v42  ;;  %v7135_v32 = vcombine.high %v13677_v54, %v15211_v42 }
 0xa7a   :  { %9765 = vrot.lane.b32.xlu0 %v9764_v59, %s10018_s29  ;;  %v7583_v11 = vcombine.low %v13680_v6, %v13697_v58  ;;  %v7849_v20 = vcombine.low %v13598_v44, %v13636_v60  ;;  %v9774_v25 = vpack.i.bf16 %v7600_v15, %v6672_v39  ;;  %v6969_v10 = vcombine.high %v13683_v51, %v15211_v42 }
 0xa7b   :  { %v13702_v2 = vpop.permute.xlu0 %6825  ;;  %v13721_v30 = vrot.slane %v6263_v13, %v10150_v33  ;;  %v13724_v27 = vrot.slane %v7187_v9, %v10150_v33  ;;  %v7652_v3 = vcombine.high %v13564_v56, %v13579_v29  ;;  %v6655_v59 = vcombine.low %v13692_v17, %v6638_v43 }
 0xa7c   :  { %9790 = vrot.lane.b32.xlu1 %v9789_v37, %s10018_s29  ;;  %v13730_v45 = vrot.slane %v7833_v21, %v10133_v28  ;;  %v9799_v37 = vpack.i.bf16 %v7669_v47, %v6741_v12  ;;  %v6724_v13 = vcombine.high %v13586_v7, %v13594_v48  ;;  %v7104_v9 = vcombine.high %v13567_v61, %v13553_v35 }
 0xa7d   :  { %v13716_v16 = vpop.permute.xlu1 %6821  ;;  %v6938_v39 = vcombine.high %v13618_v38, %v13633_v36  ;;  %v13742_v56 = vrot.slane %v7849_v20, %v10133_v28  ;;  %v9784_v21 = vpack.i.bf16 %v6969_v10, %v7135_v32  ;;  %v9809_v35 = vpack.i.bf16 %v13724_v27, %v13721_v30 }
 0xa7e   :  { %9775 = vrot.lane.b32.xlu0 %v9774_v25, %s10018_s29  ;;  %v7591_v25 = vrot.slane %v7583_v11, %v10150_v33  ;;  %v6663_v61 = vrot.slane %v6655_v59, %v10150_v33  ;;  %v7666_v48 = vrot.slane %v7652_v3, %v10150_v33  ;;  %v6738_v12 = vrot.slane %v6724_v13, %v10150_v33 }
 0xa7f   :  { %v13733_v15 = vpop.permute.xlu0 %7745  ;;  %v7865_v47 = vcombine.low %v13730_v45, %v13742_v56  ;;  %v6952_v32 = vrot.slane %v6938_v39, %v10150_v33  ;;  %v7118_v11 = vrot.slane %v7104_v9, %v10150_v33  ;;  %v7584_v20 = vcombine.high %v13680_v6, %v13697_v58 }
 0xa80   :  { %9800 = vrot.lane.b32.xlu1 %v9799_v37, %s10019_s30  ;;  %v9794_v36 = vpack.i.bf16 %v7591_v25, %v6663_v61  ;;  %v6837_v10 = vcombine.low %v13686_v53, %v13716_v16  ;;  %v9819_v59 = vpack.i.bf16 %v7666_v48, %v6738_v12  ;;  %v6656_v13 = vcombine.high %v13692_v17, %v6638_v43 }
 0xa81   :  { %v13745_v29 = vpop.permute.xlu1 %7741  ;;  %v13771_v37 = vrot.slane %v7865_v47, %v10150_v33  ;;  %v6853_v39 = vcombine.low %v13670_v41, %v13702_v2  ;;  %v9804_v6 = vpack.i.bf16 %v6952_v32, %v7118_v11  ;;  %v7601_v58 = vcombine.high %v7591_v25, %v15211_v42 }
 0xa82   :  { %9785 = vrot.lane.b32.xlu0 %v9784_v21, %s10017_s28  ;;  %v7088_v21 = vcombine.high %v13299_v1, %v13311_v57  ;;  %v13785_v47 = vrot.slane %v6837_v10, %v10133_v28  ;;  %v13794_v25 = vrot.slane %v7584_v20, %v10150_v33  ;;  %v7136_v57 = vcombine.high %v7118_v11, %v15211_v42 }
 0xa83   :  { %v13751_v7 = vpop.permute.xlu0 %7753  ;;  %15541 = vst [vmem:[#allocation12_spill] sm:$0xff] %v13771_v37  ;;  %v7897_v43 = vcombine.high %v13771_v37, %v15211_v42  ;;  %v7205_v31 = vcombine.high %v13724_v27, %v15211_v42  ;;  %v7670_v27 = vcombine.high %v7666_v48, %v15211_v42 }
 0xa84   :  { %9810 = vrot.lane.b32.xlu1 %v9809_v35, %s10014_s25  ;;  %v7072_v35 = vcombine.high %v13305_v50, %v13316_v24  ;;  %v13799_v50 = vrot.slane %v6656_v13, %v10150_v33  ;;  %v13803_v24 = vrot.slane %v6853_v39, %v10133_v28 }
 0xa85   :  { %v13758_v38 = vpop.permute.xlu1 %7749 }
 0xa86   :  { %9795 = vrot.lane.b32.xlu0 %v9794_v36, %s10014_s25  ;;  %v6673_v36 = vcombine.high %v6663_v61, %v15211_v42  ;;  %v7765_v10 = vcombine.low %v13745_v29, %v13758_v38  ;;  %v13815_v13 = vrot.slane %v7072_v35, %v10133_v28  ;;  %v6869_v39 = vcombine.low %v13785_v47, %v13803_v24 }
 0xa87   :  { %v13768_v3 = vpop.permute.xlu0 %7977 }
 0xa88   :  { %9820 = vrot.lane.b32.xlu1 %v9819_v59, %s10016_s27  ;;  %v9814_v20 = vpack.i.bf16 %v7601_v58, %v6673_v36  ;;  %v6970_v59 = vcombine.high %v6952_v32, %v15211_v42  ;;  %v9834_v32 = vpack.i.bf16 %v13794_v25, %v13799_v50  ;;  %v13835_v36 = vrot.slane %v7765_v10, %v10133_v28 }
 0xa89   :  { %v13777_v9 = vpop.permute.xlu1 %7973  ;;  %v13849_v10 = vrot.slane %v6869_v39, %v10150_v33 }
 0xa8a   :  { %9805 = vrot.lane.b32.xlu0 %v9804_v6, %s10015_s26  ;;  %v13812_v6 = vrot.slane %v7088_v21, %v10133_v28  ;;  %v9824_v4 = vpack.i.bf16 %v6970_v59, %v7136_v57  ;;  %v6953_v59 = vcombine.low %v13609_v14, %v13606_v23 }
 0xa8b   :  { %v13788_v17 = vpop.permute.xlu0 %7985  ;;  %15542 = vst [vmem:[#allocation46_spill] sm:$0xff] %v13849_v10  ;;  %v6901_v48 = vcombine.high %v13849_v10, %v15211_v42  ;;  %v7389_v10 = vcombine.low %v13331_v62, %v13345_v49 }
 0xa8c   :  { %v8079_v1 = vcombine.low %v13768_v3, %v13788_v17  ;;  %7930 = vrot.lane.b32.xlu1 %v7897_v43, %s10017_s28  ;;  %v7781_v43 = vcombine.low %v13733_v15, %v13751_v7 }
 0xa8d   :  { %v13808_v61 = vpop.permute.xlu1 %7981 }
 0xa8e   :  { %v8063_v11 = vcombine.low %v13777_v9, %v13808_v61  ;;  %9815 = vrot.lane.b32.xlu0 %v9814_v20, %s10019_s30  ;;  %v13829_v21 = vrot.slane %v8079_v1, %v10133_v28  ;;  %v6281_v20 = vcombine.high %v13721_v30, %v15211_v42 }
 0xa8f   :  { %v13824_v58 = vpop.permute.xlu0 %6359 }
 0xa90   :  { %v13832_v35 = vrot.slane %v8063_v11, %v10133_v28  ;;  %9835 = vrot.lane.b32.xlu1 %v9834_v32, %s10016_s27  ;;  %v7119_v11 = vcombine.low %v13815_v13, %v13812_v6  ;;  %v13852_v32 = vrot.slane %v7781_v43, %v10133_v28  ;;  %v9829_v51 = vpack.i.bf16 %v7205_v31, %v6281_v20 }
 0xa91   :  { %v13838_v54 = vpop.permute.xlu1 %6355  ;;  %v6742_v43 = vcombine.high %v6738_v12, %v15211_v42 }
 0xa92   :  { %v8095_v1 = vcombine.low %v13832_v35, %v13829_v21  ;;  %9825 = vrot.lane.b32.xlu0 %v9824_v4, %s10018_s29  ;;  %v7797_v37 = vcombine.low %v13835_v36, %v13852_v32  ;;  %v7127_v4 = vrot.slane %v7119_v11, %v10150_v33  ;;  %v13883_v11 = vrot.slane %v6953_v59, %v10150_v33 }
 0xa93   :  { %v13855_v57 = vpop.permute.xlu0 %6367  ;;  %v9839_v23 = vpack.i.bf16 %v7670_v27, %v6742_v43  ;;  %v7373_v27 = vcombine.low %v13338_v46, %v13350_v52 }
 0xa94   :  { %v13858_v30 = vrot.slane %v8095_v1, %v10150_v33  ;;  %v6461_v31 = vcombine.low %v13824_v58, %v13855_v57  ;;  %v7137_v14 = vcombine.high %v7127_v4, %v15211_v42  ;;  %v9849_v46 = vpack.i.bf16 %v13883_v11, %v7127_v4 }
 0xa95   :  { %v13865_v39 = vpop.permute.xlu1 %6363 }
 0xa96   :  { %15543 = vst [vmem:[#allocation15_spill] sm:$0xff] %v13858_v30  ;;  %v6445_v63 = vcombine.low %v13838_v54, %v13865_v39  ;;  %9830 = vrot.lane.b32.xlu0 %v9829_v51, %s10019_s30  ;;  %v8127_v26 = vcombine.high %v13858_v30, %v15211_v42  ;;  %v13886_v51 = vrot.slane %v7797_v37, %v10150_v33 }
 0xa97   :  { %v13872_v1 = vpop.permute.xlu0 %7975  ;;  %v6264_v37 = vcombine.high %v13659_v55, %v13662_v0  ;;  %v7188_v30 = vcombine.high %v13643_v19, %v13630_v22  ;;  %v13924_v22 = vrot.slane %v7373_v27, %v10133_v28 }
 0xa98   :  { %v9844_v20 = vpack.i.bf16 %v8127_v26, %v6901_v48  ;;  %15544 = vst [vmem:[#allocation4_spill] sm:$0xff] %v13886_v51  ;;  %v13894_v43 = vrot.slane %v6445_v63, %v10133_v28  ;;  %v6213_v48 = vcombine.high %v13246_v40, %v15211_v42  ;;  %v7866_v63 = vcombine.high %v13730_v45, %v13742_v56 }
 0xa99   :  { %v13880_v12 = vpop.permute.xlu1 %7971  ;;  %v7829_v55 = vcombine.high %v13886_v51, %v15211_v42  ;;  %v13921_v40 = vrot.slane %v7389_v10, %v10133_v28  ;;  %v6278_v10 = vrot.slane %v6264_v37, %v10150_v33  ;;  %v7202_v51 = vrot.slane %v7188_v30, %v10150_v33 }
 0xa9a   :  { %9840 = vrot.lane.b32.xlu0 %v9839_v23, %s10020_s6  ;;  %9845 = vrot.lane.b32.xlu1 %v9844_v20, %s10017_s28  ;;  %v13911_v23 = vrot.slane %v6461_v31, %v10133_v28  ;;  %v7880_v4 = vrot.slane %v7866_v63, %v10150_v33  ;;  %v9854_v31 = vpack.i.bf16 %v7137_v14, %v6213_v48 }
 0xa9b   :  { %v13898_v26 = vpop.permute.xlu0 %7983  ;;  %v7602_v30 = vcombine.high %v13794_v25, %v15211_v42  ;;  %v8096_v37 = vcombine.high %v13832_v35, %v13829_v21  ;;  %v9859_v48 = vpack.i.bf16 %v7202_v51, %v6278_v10  ;;  %v6674_v63 = vcombine.high %v13799_v50, %v15211_v42 }
 0xa9c   :  { %v8011_v59 = vcombine.low %v13872_v1, %v13898_v26  ;;  %v6477_v45 = vcombine.low %v13894_v43, %v13911_v23 }
 0xa9d   :  { %v13913_v20 = vpop.permute.xlu1 %7979  ;;  %v9869_v35 = vpack.i.bf16 %v7602_v30, %v6674_v63 }
 0xa9e   :  { %v7995_v0 = vcombine.low %v13880_v12, %v13913_v20  ;;  %9850 = vrot.lane.b32.xlu0 %v9849_v46, %s10014_s25  ;;  %7902 = vrot.lane.b32.xlu1 %v7829_v55, %s10017_s28  ;;  %v8019_v19 = vrot.slane %v8011_v59, %v10133_v28  ;;  %v13940_v46 = vrot.slane %v6477_v45, %v10150_v33 }
 0xa9f   :  { %v13937_v62 = vpop.permute.xlu0 %6357  ;;  %v7405_v59 = vcombine.low %v13924_v22, %v13921_v40  ;;  %v6870_v55 = vcombine.high %v13785_v47, %v13803_v24 }
 0xaa0   :  { %v8003_v56 = vrot.slane %v7995_v0, %v10133_v28  ;;  %15545 = vst [vmem:[#allocation3_spill] sm:$0xff] %v13940_v46  ;;  %v6509_v0 = vcombine.high %v13940_v46, %v15211_v42  ;;  %v15548_v46 = vld [vmem:[#allocation18_spill] sm:$0xff] }
 0xaa1   :  { %v13935_v52 = vpop.permute.xlu1 %6353  ;;  %v13963_v25 = vrot.slane %v7405_v59, %v10150_v33  ;;  %v15549_v59 = vld [vmem:[#allocation34_spill] sm:$0xff]  ;;  %v6884_v63 = vrot.slane %v6870_v55, %v10150_v33 }
 0xaa2   :  { %v8027_v27 = vcombine.low %v8003_v56, %v8019_v19  ;;  %7934 = vrot.lane.b32.xlu0 %v7880_v4, %s10015_s26  ;;  %9855 = vrot.lane.b32.xlu1 %v9854_v31, %s10019_s30 }
 0xaa3   :  { %15547 = vst [vmem:[#allocation39_spill] sm:$0xff] %v13963_v25  ;;  %v13967_v21 = vpop.permute.xlu0 %6365  ;;  %v7437_v30 = vcombine.high %v13963_v25, %v15211_v42 }
 0xaa4   :  { %v13947_v14 = vrot.slane %v8027_v27, %v10150_v33  ;;  %v6393_v47 = vcombine.low %v13937_v62, %v13967_v21  ;;  %v8110_v27 = vrot.slane %v8096_v37, %v10150_v33  ;;  %v7798_v37 = vcombine.high %v13835_v36, %v13852_v32  ;;  %v15550_v36 = vld [vmem:[#allocation66_spill] sm:$0xff]  ;;  %v15551_v32 = vld [vmem:[#allocation69_spill] sm:$0xff] }
 0xaa5   :  { %v13965_v31 = vpop.permute.xlu1 %6361  ;;  %v15552_v55 = vcombine.high %v15550_v36, %v15551_v32  ;;  %v6854_v36 = vcombine.high %v13670_v41, %v13702_v2  ;;  %v8064_v2 = vcombine.high %v13777_v9, %v13808_v61 }
 0xaa6   :  { %15546 = vst [vmem:[#allocation16_spill] sm:$0xff] %v13947_v14  ;;  %9860 = vrot.lane.b32.xlu0 %v9859_v48, %s10016_s27  ;;  %v8059_v45 = vcombine.high %v13947_v14, %v15211_v42  ;;  %v6377_v50 = vcombine.low %v13935_v52, %v13965_v31  ;;  %v7321_v48 = vcombine.low %v13365_v18, %v13377_v34 }
 0xaa7   :  { %v7305_v14 = vcombine.low %v15549_v59, %v15548_v46  ;;  %v13991_v59 = vrot.slane %v6393_v47, %v10133_v28  ;;  %v7898_v46 = vcombine.high %v7880_v4, %v15211_v42 }
 0xaa8   :  { %v9864_v24 = vpack.i.bf16 %v8059_v45, %v6509_v0  ;;  %v7120_v0 = vcombine.high %v13815_v13, %v13812_v6  ;;  %v13988_v45 = vrot.slane %v6377_v50, %v10133_v28  ;;  %v6282_v6 = vcombine.high %v6278_v10, %v15211_v42 }
 0xaa9   :  { %v13997_v25 = vrot.slane %v7305_v14, %v10133_v28  ;;  %v7206_v13 = vcombine.high %v7202_v51, %v15211_v42  ;;  %v6210_v50 = vrot.slane %v15552_v55, %v10150_v33  ;;  %v6478_v51 = vcombine.high %v13894_v43, %v13911_v23 }
 0xaaa   :  { %9870 = vrot.lane.b32.xlu0 %v9869_v35, %s10020_s6  ;;  %9865 = vrot.lane.b32.xlu1 %v9864_v24, %s10017_s28  ;;  %v9874_v35 = vpack.i.bf16 %v8110_v27, %v6884_v63  ;;  %v13994_v24 = vrot.slane %v7321_v48, %v10133_v28  ;;  %v7134_v47 = vrot.slane %v7120_v0, %v10150_v33 }
 0xaab   :  { %v8028_v48 = vcombine.high %v8003_v56, %v8019_v19  ;;  %v6409_v14 = vcombine.low %v13988_v45, %v13991_v59  ;;  %v6492_v43 = vrot.slane %v6478_v51, %v10150_v33  ;;  %v6838_v23 = vcombine.high %v13686_v53, %v13716_v16 }
 0xaac   :  { %v7337_v10 = vcombine.low %v13997_v25, %v13994_v24  ;;  %v9879_v0 = vpack.i.bf16 %v7134_v47, %v6210_v50  ;;  %v7850_v55 = vcombine.high %v13598_v44, %v13636_v60  ;;  %v14055_v44 = vrot.slane %v6854_v36, %v10133_v28 }
 0xaad   :  { %v8042_v19 = vrot.slane %v8028_v48, %v10150_v33  ;;  %v14020_v56 = vrot.slane %v6409_v14, %v10150_v33  ;;  %v14047_v53 = vrot.slane %v6838_v23, %v10133_v28  ;;  %v6214_v9 = vcombine.high %v6210_v50, %v15211_v42 }
 0xaae   :  { %7470 = vrot.lane.b32.xlu0 %v7437_v30, %s10017_s28  ;;  %9875 = vrot.lane.b32.xlu1 %v9874_v35, %s10015_s26  ;;  %v7812_v30 = vrot.slane %v7798_v37, %v10150_v33  ;;  %v9884_v35 = vpack.i.bf16 %v7206_v13, %v6282_v6  ;;  %v14023_v4 = vrot.slane %v7337_v10, %v10150_v33 }
 0xaaf   :  { %v9889_v37 = vpack.i.bf16 %v8042_v19, %v6492_v43  ;;  %v6441_v6 = vcombine.high %v14020_v56, %v15211_v42  ;;  %v8128_v13 = vcombine.high %v8110_v27, %v15211_v42  ;;  %v14058_v60 = vrot.slane %v7850_v55, %v10133_v28 }
 0xab0   :  { %v7369_v32 = vcombine.high %v14023_v4, %v15211_v42  ;;  %v8080_v27 = vcombine.high %v13768_v3, %v13788_v17  ;;  %v7138_v61 = vcombine.high %v7134_v47, %v15211_v42  ;;  %v14072_v48 = vrot.slane %v8064_v2, %v10133_v28  ;;  %v14075_v17 = vpop.permute.xlu1 %8203  ;;  %v15554_v2 = vld [vmem:[#allocation30_spill] sm:$0xff] }
 0xab1   :  { %v7830_v3 = vcombine.high %v7812_v30, %v15211_v42  ;;  %v6410_v51 = vcombine.high %v13988_v45, %v13991_v59  ;;  %v6510_v23 = vcombine.high %v6492_v43, %v15211_v42  ;;  %v7996_v59 = vcombine.high %v13880_v12, %v13913_v20 }
 0xab2   :  { %7938 = vrot.lane.b32.xlu0 %v7898_v46, %s10018_s29  ;;  %7906 = vrot.lane.b32.xlu1 %v7812_v30, %s10015_s26  ;;  %v7834_v46 = vcombine.high %v13621_v8, %v13653_v5  ;;  %v6902_v8 = vcombine.high %v6884_v63, %v15211_v42  ;;  %v7406_v5 = vcombine.high %v13924_v22, %v13921_v40 }
 0xab3   :  { %v6885_v22 = vcombine.low %v14047_v53, %v14055_v44  ;;  %v14078_v14 = vrot.slane %v8080_v27, %v10133_v28  ;;  %v9899_v47 = vpack.i.bf16 %v7138_v61, %v6214_v9  ;;  %v7338_v43 = vcombine.high %v13997_v25, %v13994_v24 }
 0xab4   :  { %v14050_v41 = vrot.slane %v7834_v46, %v10133_v28  ;;  %v9894_v16 = vpack.i.bf16 %v8128_v13, %v6902_v8  ;;  %v7420_v40 = vrot.slane %v7406_v5, %v10150_v33  ;;  %v7766_v46 = vcombine.high %v13745_v29, %v13758_v38  ;;  %v15553_v8 = vld [vmem:[#allocation68_spill] sm:$0xff] }
 0xab5   :  { %v6893_v50 = vrot.slane %v6885_v22, %v10150_v33  ;;  %v8111_v10 = vcombine.low %v14072_v48, %v14078_v14  ;;  %v6971_v13 = vcombine.high %v13883_v11, %v15211_v42  ;;  %v7782_v29 = vcombine.high %v13733_v15, %v13751_v7 }
 0xab6   :  { %9885 = vrot.lane.b32.xlu0 %v9884_v35, %s10020_s6  ;;  %9880 = vrot.lane.b32.xlu1 %v9879_v0, %s10016_s27  ;;  %v7881_v63 = vcombine.low %v14050_v41, %v14058_v60  ;;  %v8060_v35 = vcombine.high %v8042_v19, %v15211_v42  ;;  %v14091_v0 = vpop.permute.xlu1 %8211  ;;  %v6446_v38 = vcombine.high %v13838_v54, %v13865_v39 }
 0xab7   :  { %v14101_v19 = vrot.slane %v8111_v10, %v10150_v33  ;;  %v8012_v12 = vcombine.high %v13872_v1, %v13898_v26  ;;  %v14116_v20 = vrot.slane %v7766_v46, %v10133_v28  ;;  %v6462_v11 = vcombine.high %v13824_v58, %v13855_v57  ;;  %v14139_v57 = vpop.permute.xlu0 %8207  ;;  %v15556_v46 = vld [vmem:[#allocation13_spill] sm:$0xff] }
 0xab8   :  { %v7889_v30 = vrot.slane %v7881_v63, %v10150_v33  ;;  %v9904_v45 = vpack.i.bf16 %v8060_v35, %v6510_v23  ;;  %v14121_v25 = vrot.slane %v7996_v59, %v10133_v28  ;;  %v7438_v39 = vcombine.high %v7420_v40, %v15211_v42 }
 0xab9   :  { %v9909_v54 = vpack.i.bf16 %v14101_v19, %v6893_v50  ;;  %v7352_v1 = vrot.slane %v7338_v43, %v10150_v33  ;;  %v14129_v26 = vrot.slane %v7782_v29, %v10133_v28  ;;  %v14132_v24 = vrot.slane %v6446_v38, %v10133_v28 }
 0xaba   :  { %9890 = vrot.lane.b32.xlu0 %v9889_v37, %s10015_s26  ;;  %6514 = vrot.lane.b32.xlu1 %v6441_v6, %s10017_s28  ;;  %v6903_v37 = vcombine.high %v6893_v50, %v15211_v42  ;;  %v6424_v6 = vrot.slane %v6410_v51, %v10150_v33  ;;  %v14123_v15 = vpop.permute.xlu1 %8201  ;;  %v14135_v58 = vrot.slane %v8012_v12, %v10133_v28  ;;  %v15559_v12 = vld [vmem:[#allocation18_spill] sm:$0xff] }
 0xabb   :  { %v7813_v36 = vcombine.low %v14116_v20, %v14129_v26  ;;  %v7390_v5 = vcombine.high %v15553_v8, %v13345_v49  ;;  %v6886_v9 = vcombine.high %v14047_v53, %v14055_v44  ;;  %v14160_v61 = vpop.permute.xlu0 %8215  ;;  %v7899_v63 = vcombine.high %v7889_v30, %v15211_v42 }
 0xabc   :  { %v9914_v7 = vpack.i.bf16 %v6903_v37, %v6971_v13  ;;  %v8043_v55 = vcombine.low %v14121_v25, %v14135_v58  ;;  %v6442_v51 = vcombine.high %v6424_v6, %v15211_v42  ;;  %v7370_v23 = vcombine.high %v7352_v1, %v15211_v42  ;;  %v15557_v37 = vld [vmem:[#allocation6_spill] sm:$0xff] }
 0xabd   :  { %v7821_v49 = vrot.slane %v7813_v36, %v10150_v33  ;;  %v14168_v50 = vrot.slane %v7390_v5, %v10133_v28  ;;  %v15558_v59 = vcombine.high %v15556_v46, %v15557_v37  ;;  %v6394_v43 = vcombine.high %v13937_v62, %v13967_v21 }
 0xabe   :  { %7442 = vrot.lane.b32.xlu0 %v7369_v32, %s10017_s28  ;;  %9895 = vrot.lane.b32.xlu1 %v9894_v16, %s10018_s29  ;;  %v14144_v32 = vrot.slane %v6462_v11, %v10133_v28  ;;  %v15555_v16 = vld [vmem:[#allocation71_spill] sm:$0xff]  ;;  %v14154_v22 = vpop.permute.xlu1 %8209  ;;  %v7322_v38 = vcombine.high %v13365_v18, %v13377_v34  ;;  %v15560_v11 = vld [vmem:[#allocation34_spill] sm:$0xff] }
 0xabf   :  { %v7374_v27 = vcombine.high %v15555_v16, %v15554_v2  ;;  %v14181_v35 = vpop.permute.xlu0 %8205  ;;  %v7831_v34 = vcombine.high %v7821_v49, %v15211_v42 }
 0xac2   :  { %7910 = vrot.lane.b32.xlu0 %v7830_v3, %s10018_s29  ;;  %7474 = vrot.lane.b32.xlu1 %v7420_v40, %s10015_s26  ;;  %v6493_v40 = vcombine.low %v14132_v24, %v14144_v32  ;;  %v14165_v3 = vrot.slane %v8043_v55, %v10150_v33 }
 0xac3   :  { %v14213_v18 = vpop.permute.xlu0 %8213 }
 0xac4   :  { %v6501_v53 = vrot.slane %v6493_v40, %v10150_v33 }
 0xac6   :  { %9900 = vrot.lane.b32.xlu0 %v9899_v47, %s10020_s6  ;;  %7942 = vrot.lane.b32.xlu1 %v7889_v30, %s10014_s25  ;;  %v14171_v47 = vrot.slane %v7374_v27, %v10133_v28  ;;  %v9919_v10 = vpack.i.bf16 %v14165_v3, %v6501_v53  ;;  %v6900_v30 = vrot.slane %v6886_v9, %v10150_v33 }
 0xac7   :  { %v6511_v21 = vcombine.high %v6501_v53, %v15211_v42 }
 0xac8   :  { %v7421_v13 = vcombine.low %v14171_v47, %v14168_v50  ;;  %v6904_v16 = vcombine.high %v6900_v30, %v15211_v42 }
 0xaca   :  { %9905 = vrot.lane.b32.xlu0 %v9904_v45, %s10018_s29  ;;  %6518 = vrot.lane.b32.xlu1 %v6424_v6, %s10015_s26  ;;  %v6968_v45 = vrot.slane %v15558_v59, %v10150_v33  ;;  %v6378_v6 = vcombine.high %v13935_v52, %v13965_v31  ;;  %v7882_v52 = vcombine.high %v14050_v41, %v14058_v60 }
 0xacb   :  { %v14211_v31 = vrot.slane %v6394_v43, %v10133_v28  ;;  %v8129_v41 = vcombine.high %v14101_v19, %v15211_v42 }
 0xacc   :  { %v9924_v29 = vpack.i.bf16 %v6900_v30, %v6968_v45  ;;  %v14208_v62 = vrot.slane %v6378_v6, %v10133_v28  ;;  %v7896_v2 = vrot.slane %v7882_v52, %v10150_v33  ;;  %v6972_v19 = vcombine.high %v6968_v45, %v15211_v42 }
 0xacd   :  { %v9929_v5 = vpack.i.bf16 %v6511_v21, %v8129_v41  ;;  %v7422_v41 = vcombine.high %v14171_v47, %v14168_v50 }
 0xace   :  { %9915 = vrot.lane.b32.xlu0 %v9914_v7, %s10019_s30  ;;  %9910 = vrot.lane.b32.xlu1 %v9909_v54, %s10014_s25  ;;  %v7306_v7 = vcombine.high %v15560_v11, %v15559_v12  ;;  %v6425_v60 = vcombine.low %v14208_v62, %v14211_v31  ;;  %v9934_v37 = vpack.i.bf16 %v6904_v16, %v6972_v19 }
 0xacf   :  { %v6494_v12 = vcombine.high %v14132_v24, %v14144_v32  ;;  %v7436_v50 = vrot.slane %v7422_v41, %v10150_v33 }
 0xad0   :  { %v14221_v36 = vrot.slane %v7306_v7, %v10133_v28  ;;  %v6433_v59 = vrot.slane %v6425_v60, %v10150_v33  ;;  %v8112_v7 = vcombine.high %v14072_v48, %v14078_v14  ;;  %v8061_v14 = vcombine.high %v14165_v3, %v15211_v42 }
 0xad2   :  { %7478 = vrot.lane.b32.xlu0 %v7438_v39, %s10018_s29  ;;  %7446 = vrot.lane.b32.xlu1 %v7352_v1, %s10015_s26  ;;  %v7429_v39 = vrot.slane %v7421_v13, %v10150_v33  ;;  %v14218_v1 = vrot.slane %v7322_v38, %v10133_v28  ;;  %v7814_v38 = vcombine.high %v14116_v20, %v14129_v26 }
 0xad3   :  { %v6508_v20 = vrot.slane %v6494_v12, %v10150_v33  ;;  %v6443_v26 = vcombine.high %v6433_v59, %v15211_v42  ;;  %v8126_v48 = vrot.slane %v8112_v7, %v10150_v33 }
 0xad4   :  { %v14176_v44 = vpop.permute.xlu1 %9740  ;;  %v7353_v53 = vcombine.low %v14221_v36, %v14218_v1  ;;  %v7439_v45 = vcombine.high %v7429_v39, %v15211_v42  ;;  %v7828_v21 = vrot.slane %v7814_v38, %v10150_v33  ;;  %v7354_v19 = vcombine.high %v14221_v36, %v14218_v1 }
 0xad5   :  { %v9944_v16 = vpack.i.bf16 %v6508_v20, %v8126_v48  ;;  %v8130_v36 = vcombine.high %v8126_v48, %v15211_v42  ;;  %v7440_v48 = vcombine.high %v7436_v50, %v15211_v42 }
 0xad6   :  { %7946 = vrot.lane.b32.xlu0 %v7899_v63, %s10019_s30  ;;  %7914 = vrot.lane.b32.xlu1 %v7821_v49, %s10014_s25  ;;  %v7368_v38 = vrot.slane %v7354_v19, %v10150_v33 }
 0xad8   :  { %v14200_v54 = vpop.permute.xlu1 %9750 }
 0xada   :  { %9920 = vrot.lane.b32.xlu0 %v9919_v10, %s10014_s25  ;;  %6522 = vrot.lane.b32.xlu1 %v6442_v51, %s10018_s29  ;;  %v15561_v10 = vld [vmem:[#allocation58_spill] sm:$0xff] }
 0xade   :  { %7450 = vrot.lane.b32.xlu0 %v7370_v23, %s10018_s29  ;;  %9925 = vrot.lane.b32.xlu1 %v9924_v29, %s10016_s27  ;;  %v15562_v23 = vld [vmem:[#allocation41_spill] sm:$0xff]  ;;  %v7361_v29 = vrot.slane %v7353_v53, %v10150_v33 }
 0xae0   :  { %v7371_v47 = vcombine.high %v7361_v29, %v15211_v42 }
 0xae2   :  { %v9761_v55 = vpop.permute.xlu1 %9760  ;;  %7918 = vrot.lane.b32.xlu0 %v7831_v34, %s10019_s30  ;;  %7482 = vrot.lane.b32.xlu1 %v7429_v39, %s10014_s25  ;;  %v7900_v34 = vcombine.high %v7896_v2, %v15211_v42 }
 0xae3   :  { %v9763_v9 = vunpack.i.h.bf16 %v9761_v55  ;;  %v9762_v63 = vunpack.i.l.bf16 %v9761_v55 }
 0xae4   :  { %v9746_v8 = vpop.permute.xlu0 %9745 }
 0xae5   :  { %v9748_v27 = vunpack.i.h.bf16 %v9746_v8  ;;  %v9747_v40 = vunpack.i.l.bf16 %v9746_v8 }
 0xae6   :  { %v14231_v49 = vpop.permute.xlu1 %9770  ;;  %9930 = vrot.lane.b32.xlu0 %v9929_v5, %s10019_s30  ;;  %7950 = vrot.lane.b32.xlu1 %v7896_v2, %s10016_s27  ;;  %v6426_v5 = vcombine.high %v14208_v62, %v14211_v31  ;;  %v8309_v62 = vcombine.low %v14139_v57, %v14160_v61  ;;  %v8293_v31 = vcombine.low %v14075_v17, %v14091_v0 }
 0xae7   :  { %v7727_v51 = vsel %vm247_vm1, %v15561_v10, %v9748_v27  ;;  %v6799_v30 = vsel %vm247_vm1, %v15562_v23, %v9747_v40  ;;  %v9939_v27 = vpack.i.bf16 %v6443_v26, %v8061_v14  ;;  %v8044_v40 = vcombine.high %v14121_v25, %v14135_v58 }
 0xae8   :  { %v14242_v46 = vpop.permute.xlu0 %9755  ;;  %v6800_v13 = vsel %vm249_vm2, %v6799_v30, %v9762_v63  ;;  %v7728_v6 = vsel %vm249_vm2, %v7727_v51, %v9763_v9  ;;  %v6440_v25 = vrot.slane %v6426_v5, %v10150_v33  ;;  %v8317_v53 = vrot.slane %v8309_v62, %v10133_v28 }
 0xae9   :  { %v8058_v63 = vrot.slane %v8044_v40, %v10150_v33  ;;  %v7832_v10 = vcombine.high %v7828_v21, %v15211_v42  ;;  %v6512_v51 = vcombine.high %v6508_v20, %v15211_v42  ;;  %v8301_v23 = vrot.slane %v8293_v31, %v10133_v28 }
 0xaea   :  { %v14247_v43 = vpop.permute.xlu1 %9780  ;;  %9935 = vrot.lane.b32.xlu0 %v9934_v37, %s10020_s6  ;;  %6526 = vrot.lane.b32.xlu1 %v6433_v59, %s10014_s25  ;;  %v8225_v30 = vcombine.low %v14123_v15, %v14154_v22  ;;  %v8241_v37 = vcombine.low %v14181_v35, %v14213_v18  ;;  %v6444_v26 = vcombine.high %v6440_v25, %v15211_v42 }
 0xaeb   :  { %v9954_v7 = vpack.i.bf16 %v6512_v51, %v8130_v36  ;;  %v7372_v40 = vcombine.high %v7368_v38, %v15211_v42  ;;  %v8294_v62 = vcombine.high %v14075_v17, %v14091_v0  ;;  %v8326_v31 = vcombine.high %v8301_v23, %v8317_v53 }
 0xaec   :  { %v14257_v11 = vpop.permute.xlu0 %9765  ;;  %v8226_v17 = vcombine.high %v14123_v15, %v14154_v22  ;;  %v8242_v0 = vcombine.high %v14181_v35, %v14213_v18  ;;  %v14387_v35 = vld [vmem:[%s14987_s2 + $0x8] sm:$0x1] }
 0xaed   :  { %v8340_v15 = vrot.slane %v8326_v31, %v10150_v33  ;;  %15564 = vst [vmem:[#allocation40_spill] sm:$0xff] %v14387_v35 }
 0xaee   :  { %v14261_v52 = vpop.permute.xlu1 %9790  ;;  %7486 = vrot.lane.b32.xlu0 %v7439_v45, %s10019_s30  ;;  %7454 = vrot.lane.b32.xlu1 %v7361_v29, %s10014_s25  ;;  %v15563_v45 = vld [vmem:[#allocation24_spill] sm:$0xff]  ;;  %v8240_v18 = vrot.slane %v8226_v17, %v10133_v28  ;;  %v15566_v17 = vld [vmem:[#allocation49_spill] sm:$0xff] }
 0xaf0   :  { %v9776_v39 = vpop.permute.xlu0 %9775 }
 0xaf1   :  { %v9778_v24 = vunpack.i.h.bf16 %v9776_v39  ;;  %v9777_v32 = vunpack.i.l.bf16 %v9776_v39  ;;  %v8233_v39 = vrot.slane %v8225_v30, %v10133_v28  ;;  %v8256_v30 = vrot.slane %v8242_v0, %v10133_v28 }
 0xaf2   :  { %v14269_v55 = vpop.permute.xlu1 %9800  ;;  %7954 = vrot.lane.b32.xlu0 %v7900_v34, %s10020_s6  ;;  %7922 = vrot.lane.b32.xlu1 %v7828_v21, %s10016_s27  ;;  %v8325_v34 = vcombine.low %v8301_v23, %v8317_v53  ;;  %v8249_v21 = vrot.slane %v8241_v37, %v10133_v28  ;;  %v8308_v53 = vrot.slane %v8294_v62, %v10133_v28  ;;  %v9767_v62 = vunpack.i.l.bf16 %v14257_v11 }
 0xaf3   :  { %v14279_v60 = vsel %vm251_vm3, %v6800_v13, %v9777_v32  ;;  %v14282_v8 = vsel %vm251_vm3, %v7728_v6, %v9778_v24  ;;  %v9949_v6 = vpack.i.bf16 %v6440_v25, %v8058_v63  ;;  %v8062_v32 = vcombine.high %v8058_v63, %v15211_v42 }
 0xaf4   :  { %v14286_v2 = vpop.permute.xlu0 %9785  ;;  %v14339_v14 = vrot.slane %v8325_v34, %v10150_v33  ;;  %v8257_v41 = vcombine.low %v8233_v39, %v8249_v21 }
 0xaf5   :  { %v9788_v58 = vunpack.i.h.bf16 %v14286_v2 }
 0xaf6   :  { %v14290_v3 = vpop.permute.xlu1 %9810  ;;  %9945 = vrot.lane.b32.xlu0 %v9944_v16, %s10016_s27  ;;  %9940 = vrot.lane.b32.xlu1 %v9939_v27, %s10019_s30  ;;  %v9959_v16 = vpack.i.bf16 %v6444_v26, %v8062_v32  ;;  %v14353_v25 = vrot.slane %v8257_v41, %v10150_v33  ;;  %v8357_v19 = vcombine.high %v14339_v14, %v15211_v42  ;;  %v9743_v32 = vunpack.i.h.bf16 %v14176_v44 }
 0xaf7   :  { %v7036_v29 = vsel %vm247_vm1, %v15563_v45, %v9788_v58  ;;  %v8274_v41 = vcombine.high %v8240_v18, %v8256_v30 }
 0xaf8   :  { %v14300_v9 = vpop.permute.xlu0 %9795  ;;  %v8289_v22 = vcombine.high %v14353_v25, %v15211_v42  ;;  %v7734_v0 = vsel %vm247_vm1, %v15566_v17, %v9743_v32  ;;  %v9782_v32 = vunpack.i.l.bf16 %v14247_v43 }
 0xafa   :  { %7490 = vrot.lane.b32.xlu0 %v7436_v50, %s10016_s27  ;;  %7458 = vrot.lane.b32.xlu1 %v7371_v47, %s10019_s30  ;;  %v14317_v59 = vpop.permute.xlu1 %9820  ;;  %v8310_v47 = vcombine.high %v14139_v57, %v14160_v61  ;;  %v14364_v57 = vld [vmem:[%s14987_s2] sm:$0xff] }
 0xafb   :  { %8880 = vmatmul.mubr.msk.f32.vlgmr.msra.gmra.mrb[0].mxu0 %vm8577_vm10, %v14364_v57 }
 0xafc   :  { %v14319_v13 = vpop.permute.xlu0 %9805  ;;  %v8324_v61 = vrot.slane %v8310_v47, %v10133_v28  ;;  %8654 = vmatprep.mubr.f32.mxu0 %v15211_v42  ;;  %v9758_v47 = vunpack.i.h.bf16 %v14242_v46 }
 0xafd   :  { %v9808_v1 = vunpack.i.h.bf16 %v14319_v13 }
 0xafe   :  { %9950 = vrot.lane.b32.xlu0 %v9949_v6, %s10016_s27  ;;  %7926 = vrot.lane.b32.xlu1 %v7832_v10, %s10020_s6  ;;  %v7931_v24 = vpop.permute.xlu1 %7930  ;;  %v8258_v10 = vcombine.high %v8233_v39, %v8249_v21  ;;  %v8341_v37 = vcombine.low %v8308_v53, %v8324_v61 }
 0xaff   :  { %v7037_v12 = vsel %vm249_vm2, %v7036_v29, %v9808_v1  ;;  %8881 = vmatmul.mubr.msk.f32.gmra.mrb[2].mxu0 %vm8577_vm10, %v14387_v35  ;;  %v8358_v1 = vcombine.high %v8340_v15, %v15211_v42  ;;  %v8273_v29 = vcombine.low %v8240_v18, %v8256_v30  ;;  %v15568_v30 = vld [vmem:[#allocation47_spill] sm:$0xff] }
 0xb00   :  { %v14331_v20 = vpop.permute.xlu0 %9815  ;;  %v8272_v36 = vrot.slane %v8258_v10, %v10150_v33  ;;  %v8349_v21 = vrot.slane %v8341_v37, %v10150_v33  ;;  %v7270_v37 = vsel %vm247_vm1, %v15568_v30, %v9758_v47  ;;  %v9812_v30 = vunpack.i.l.bf16 %v14290_v3 }
 0xb02   :  { %7462 = vrot.lane.b32.xlu0 %v7368_v38, %s10016_s27  ;;  %9955 = vrot.lane.b32.xlu1 %v9954_v7, %s10020_s6  ;;  %v14355_v58 = vpop.permute.xlu1 %9835  ;;  %v15565_v7 = vld [vmem:[#allocation12_spill] sm:$0xff]  ;;  %v8290_v26 = vcombine.high %v8272_v36, %v15211_v42 }
 0xb03   :  { %v7964_v39 = vsel %vm247_vm1, %v15565_v7, %v7931_v24  ;;  %v8281_v24 = vrot.slane %v8273_v29, %v10150_v33  ;;  %v9772_v29 = vunpack.i.l.bf16 %v14231_v49 }
 0xb04   :  { %v14341_v5 = vpop.permute.xlu0 %9825 }
 0xb05   :  { %v9828_v27 = vunpack.i.h.bf16 %v14341_v5  ;;  %v8291_v18 = vcombine.high %v8281_v24, %v15211_v42 }
 0xb06   :  { %9960 = vrot.lane.b32.xlu0 %v9959_v16, %s10020_s6  ;;  %7494 = vrot.lane.b32.xlu1 %v7440_v48, %s10020_s6  ;;  %v9742_v48 = vunpack.i.l.bf16 %v14176_v44  ;;  %v9768_v44 = vunpack.i.h.bf16 %v14257_v11 }
 0xb07   :  { %v7038_v50 = vsel %vm251_vm3, %v7037_v12, %v9828_v27  ;;  %v8342_v12 = vcombine.high %v8308_v53, %v8324_v61  ;;  %v9753_v27 = vunpack.i.h.bf16 %v14200_v54  ;;  %v15567_v61 = vld [vmem:[#allocation43_spill] sm:$0xff] }
 0xb08   :  { %v14357_v63 = vpop.permute.xlu0 %9830  ;;  %v6806_v53 = vsel %vm247_vm1, %v15567_v61, %v9742_v48 }
 0xb09   :  { %v8356_v10 = vrot.slane %v8342_v12, %v10150_v33  ;;  %v7735_v11 = vsel %vm249_vm2, %v7734_v0, %v9753_v27 }
 0xb0a   :  { %7466 = vrot.lane.b32.xlu1 %v7372_v40, %s10020_s6  ;;  %8390 = vrot.lane.b32.xlu0 %v8357_v19, %s10017_s28  ;;  %v9752_v40 = vunpack.i.l.bf16 %v14200_v54  ;;  %v8359_v54 = vcombine.high %v8349_v21, %v15211_v42  ;;  %v7736_v12 = vsel %vm251_vm3, %v7735_v11, %v9768_v44  ;;  %v9803_v44 = vunpack.i.h.bf16 %v14269_v55  ;;  %v15570_v11 = vld [vmem:[#allocation15_spill] sm:$0xff] }
 0xb0b   :  { %v8360_v48 = vcombine.high %v8356_v10, %v15211_v42 }
 0xb0c   :  { %v14376_v51 = vpop.permute.xlu1 %9845  ;;  %v14378_v23 = vpop.permute.xlu0 %9840 }
 0xb0d   :  { %v9848_v27 = vunpack.i.h.bf16 %v14376_v51  ;;  %v9843_v61 = vunpack.i.h.bf16 %v14378_v23 }
 0xb0e   :  { %8394 = vrot.lane.b32.xlu0 %v8340_v15, %s10015_s26  ;;  %8362 = vrot.lane.b32.xlu1 %v8289_v22, %s10017_s28  ;;  %v6807_v15 = vsel %vm249_vm2, %v6806_v53, %v9752_v40  ;;  %v9773_v22 = vunpack.i.h.bf16 %v14231_v49  ;;  %v9847_v40 = vunpack.i.l.bf16 %v14376_v51  ;;  %v9822_v51 = vunpack.i.l.bf16 %v14317_v59 }
 0xb0f   :  { %v6808_v7 = vsel %vm251_vm3, %v6807_v15, %v9767_v62  ;;  %v9842_v53 = vunpack.i.l.bf16 %v14378_v23 }
 0xb10   :  { %v14395_v6 = vpop.permute.xlu0 %9850  ;;  %v14400_v38 = vpop.permute.xlu1 %7902  ;;  %v6809_v47 = vsel %vm253_vm4, %v6808_v7, %v9782_v32 }
 0xb11   :  { %v9853_v45 = vunpack.i.h.bf16 %v14395_v6 }
 0xb12   :  { %8398 = vrot.lane.b32.xlu0 %v8358_v1, %s10018_s29  ;;  %8366 = vrot.lane.b32.xlu1 %v8272_v36, %s10015_s26  ;;  %v15569_v1 = vld [vmem:[#allocation56_spill] sm:$0xff] }
 0xb13   :  { %v14405_v28 = vsel %vm253_vm4, %v7038_v50, %v9853_v45  ;;  %v9757_v50 = vunpack.i.l.bf16 %v14242_v46  ;;  %v8288_v46 = vrot.slane %v8274_v41, %v10150_v33  ;;  %v9793_v33 = vunpack.i.h.bf16 %v14261_v52 }
 0xb14   :  { %v7935_v34 = vpop.permute.xlu0 %7934  ;;  %v14425_v31 = vpop.permute.xlu1 %9855  ;;  %v9792_v45 = vunpack.i.l.bf16 %v14261_v52  ;;  %v7271_v41 = vsel %vm249_vm2, %v7270_v37, %v9773_v22  ;;  %v8194_v22 = vsel %vm247_vm1, %v15570_v11, %v9848_v27  ;;  %v9787_v11 = vunpack.i.l.bf16 %v14286_v2 }
 0xb15   :  { %v14414_v16 = vsel %vm249_vm2, %v7964_v39, %v7935_v34  ;;  %v6346_v36 = vsel %vm247_vm1, %v15569_v1, %v9757_v50  ;;  %v9802_v39 = vunpack.i.l.bf16 %v14269_v55  ;;  %v8292_v52 = vcombine.high %v8288_v46, %v15211_v42 }
 0xb16   :  { %8402 = vrot.lane.b32.xlu0 %v8349_v21, %s10014_s25  ;;  %8370 = vrot.lane.b32.xlu1 %v8290_v26, %s10018_s29  ;;  %v9783_v26 = vunpack.i.h.bf16 %v14247_v43  ;;  %v6347_v49 = vsel %vm249_vm2, %v6346_v36, %v9772_v29  ;;  %v7272_v43 = vsel %vm251_vm3, %v7271_v41, %v9793_v33  ;;  %v10023_v1 = vmov 0   ;;  %v8738_v36 = vld [vmem:[%s14988_s3] sm:$0xff]  ;;  %v15572_v29 = vld [vmem:[#allocation4_spill] sm:$0xff] }
 0xb17   :  { %v6810_v62 = vsel %vm255_vm5, %v6809_v47, %v9802_v39  ;;  %9964 = vset.pattern.permute.xlu0 %v10023_v1  ;;  %v10024_v33 = vmov 1  }
 0xb18   :  { %v14427_v19 = vpop.permute.xlu0 %9860  ;;  %v7737_v50 = vsel %vm253_vm4, %v7736_v12, %v9783_v26  ;;  %9965 = vset.pattern.permute.xlu1 %v10024_v33  ;;  %v7957_v12 = vsel %vm247_vm1, %v15572_v29, %v14400_v38  ;;  %v6811_v26 = vsel %vm257_vm6, %v6810_v62, %v9822_v51  ;;  %v15575_v29 = vld [vmem:[#allocation16_spill] sm:$0xff] }
 0xb19   :  { %v6812_v41 = vsel %vm259_vm7, %v6811_v26, %v9842_v53  ;;  %v9863_v27 = vunpack.i.h.bf16 %v14427_v19  ;;  %v9862_v38 = vunpack.i.l.bf16 %v14427_v19 }
 0xb1a   :  { %8406 = vrot.lane.b32.xlu0 %v8359_v54, %s10019_s30  ;;  %8374 = vrot.lane.b32.xlu1 %v8281_v24, %s10014_s25  ;;  %v6348_v24 = vsel %vm251_vm3, %v6347_v49, %v9792_v45  ;;  %v9823_v54 = vunpack.i.h.bf16 %v14317_v59  ;;  %v9813_v59 = vunpack.i.h.bf16 %v14290_v3  ;;  %v9833_v45 = vunpack.i.h.bf16 %v14357_v63 }
 0xb1b   :  { %v9832_v3 = vunpack.i.l.bf16 %v14357_v63 }
 0xb1c   :  { %v14452_v34 = vpop.permute.xlu1 %9865  ;;  %v14454_v21 = vpop.permute.xlu0 %9870  ;;  %v7273_v47 = vsel %vm253_vm4, %v7272_v43, %v9813_v59  ;;  %v15573_v43 = vld [vmem:[#allocation51_spill] sm:$0xff]  ;;  %v9797_v59 = vunpack.i.l.bf16 %v14300_v9 }
 0xb1d   :  { %v9868_v53 = vunpack.i.h.bf16 %v14452_v34 }
 0xb1e   :  { %8410 = vrot.lane.b32.xlu0 %v8356_v10, %s10016_s27  ;;  %8378 = vrot.lane.b32.xlu1 %v8291_v18, %s10019_s30  ;;  %v15571_v18 = vld [vmem:[#allocation46_spill] sm:$0xff] }
 0xb1f   :  { %v7029_v55 = vsel %vm247_vm1, %v15571_v18, %v9847_v40  ;;  %v6349_v40 = vsel %vm253_vm4, %v6348_v24, %v9812_v30  ;;  %v9867_v24 = vunpack.i.l.bf16 %v14452_v34 }
 0xb20   :  { %v9876_v17 = vpop.permute.xlu1 %9875  ;;  %v14474_v0 = vpop.permute.xlu0 %7470 }
 0xb21   :  { %v9878_v10 = vunpack.i.h.bf16 %v9876_v17  ;;  %v9877_v15 = vunpack.i.l.bf16 %v9876_v17 }
 0xb22   :  { %8414 = vrot.lane.b32.xlu0 %v8360_v48, %s10020_s6  ;;  %8382 = vrot.lane.b32.xlu1 %v8288_v46, %s10016_s27  ;;  %v7738_v46 = vsel %vm255_vm5, %v7737_v50, %v9803_v44  ;;  %v6350_v50 = vsel %vm255_vm5, %v6349_v40, %v9832_v3  ;;  %v9818_v3 = vunpack.i.h.bf16 %v14331_v20 }
 0xb23   :  { %v14487_v37 = vsel %vm249_vm2, %v8194_v22, %v9878_v10  ;;  %v14490_v23 = vsel %vm249_vm2, %v7029_v55, %v9877_v15  ;;  %v7739_v32 = vsel %vm257_vm6, %v7738_v46, %v9823_v54  ;;  %v8446_v54 = vrot.slane %v6812_v41, 4  ;;  %v15574_v10 = vld [vmem:[#allocation76_spill] sm:$0xff] }
 0xb24   :  { %v7907_v7 = vpop.permute.xlu1 %7906  ;;  %v7939_v39 = vpop.permute.xlu0 %7938  ;;  %v7740_v63 = vsel %vm259_vm7, %v7739_v32, %v9843_v61  ;;  %v6351_v19 = vsel %vm257_vm6, %v6350_v50, %v9862_v38  ;;  %v6339_v15 = vsel %vm247_vm1, %v15574_v10, %v15573_v43  ;;  %v9798_v55 = vunpack.i.h.bf16 %v14300_v9  ;;  %v15577_v32 = vld [vmem:[#allocation50_spill] sm:$0xff] }
 0xb25   :  { %v14504_v48 = vsel %vm249_vm2, %v7957_v12, %v7907_v7  ;;  %v14508_v49 = vsel %vm251_vm3, %v14414_v16, %v7939_v39  ;;  %v7274_v16 = vsel %vm255_vm5, %v7273_v47, %v9833_v45  ;;  %v8452_v51 = vrot.slane %v7740_v63, 4  ;;  %v15576_v7 = vld [vmem:[#allocation3_spill] sm:$0xff]  ;;  %v15578_v63 = vld [vmem:[#allocation5_spill] sm:$0xff] }
 0xb26   :  { %8386 = vrot.lane.b32.xlu1 %v8292_v52, %s10020_s6  ;;  %8741 = vperm.xlu0 %9964, %v8738_v36   ;;  %v7275_v52 = vsel %vm257_vm6, %v7274_v16, %v9863_v27  ;;  %v8187_v12 = vsel %vm247_vm1, %v15575_v29, %v9868_v53  ;;  %v6576_v9 = vsel %vm247_vm1, %v15576_v7, %v9867_v24  ;;  %v9807_v38 = vunpack.i.l.bf16 %v14319_v13  ;;  %v15579_v53 = vld [vmem:[#allocation57_spill] sm:$0xff] }
 0xb27   :  { %v6340_v41 = vsel %vm249_vm2, %v6339_v15, %v15577_v32  ;;  %v7263_v27 = vsel %vm247_vm1, %v15578_v63, %v9787_v11  ;;  %v7730_v50 = vsel %vm253_vm4, %v14282_v8, %v9798_v55  ;;  %v9873_v13 = vunpack.i.h.bf16 %v14454_v21 }
 0xb28   :  { %v14519_v44 = vpop.permute.xlu1 %9880  ;;  %v9886_v62 = vpop.permute.xlu0 %9885  ;;  %v6341_v24 = vsel %vm251_vm3, %v6340_v41, %v15579_v53  ;;  %v7264_v43 = vsel %vm249_vm2, %v7263_v27, %v9807_v38  ;;  %v9857_v11 = vunpack.i.l.bf16 %v14425_v31  ;;  %v15585_v53 = vld [vmem:[#allocation17_spill] sm:$0xff] }
 0xb29   :  { %v9888_v17 = vunpack.i.h.bf16 %v9886_v62  ;;  %v9887_v61 = vunpack.i.l.bf16 %v9886_v62  ;;  %v9883_v55 = vunpack.i.h.bf16 %v14519_v44 }
 0xb2a   :  { %8793 = vperm.xlu1 %9965, %v8738_v36   ;;  %9966 = vset.pattern.permute.xlu0 %v10024_v33  ;;  %v9817_v33 = vunpack.i.l.bf16 %v14331_v20  ;;  %v6802_v20 = vsel %vm253_vm4, %v14279_v60, %v9797_v59  ;;  %v9827_v60 = vunpack.i.l.bf16 %v14341_v5  ;;  %v15580_v5 = vld [vmem:[#allocation39_spill] sm:$0xff] }
 0xb2b   :  { %v6352_v22 = vsel %vm259_vm7, %v6351_v19, %v9887_v61  ;;  %v7276_v18 = vsel %vm259_vm7, %v7275_v52, %v9888_v17  ;;  %v9838_v17 = vunpack.i.h.bf16 %v14355_v58  ;;  %v9837_v61 = vunpack.i.l.bf16 %v14355_v58 }
 0xb2c   :  { %v14533_v30 = vpop.permute.xlu1 %6514  ;;  %v9891_v1 = vpop.permute.xlu0 %9890  ;;  %v8460_v34 = vsel %vm4220_vm8, %v6352_v22, %v8446_v54  ;;  %v8462_v36 = vsel %vm4220_vm8, %v7276_v18, %v8452_v51  ;;  %v6803_v16 = vsel %vm255_vm5, %v6802_v20, %v9817_v33  ;;  %v7731_v51 = vsel %vm255_vm5, %v7730_v50, %v9818_v3  ;;  %v15582_v50 = vld [vmem:[#allocation19_spill] sm:$0xff] }
 0xb2d   :  { %v9893_v46 = vunpack.i.h.bf16 %v9891_v1  ;;  %v9892_v45 = vunpack.i.l.bf16 %v9891_v1  ;;  %v8907_v2 = vpack.c.bf16 %v8462_v36, %v8460_v34  ;;  %v9872_v19 = vunpack.i.l.bf16 %v14454_v21  ;;  %v15581_v34 = vld [vmem:[#allocation38_spill] sm:$0xff] }
 0xb2e   :  { %v9852_v58 = vunpack.i.l.bf16 %v14395_v6  ;;  %v7504_v10 = vsel %vm247_vm1, %v15580_v5, %v14474_v0  ;;  %v6804_v18 = vsel %vm257_vm6, %v6803_v16, %v9837_v61  ;;  %v7732_v6 = vsel %vm257_vm6, %v7731_v51, %v9838_v17  ;;  %v15583_v17 = vld [vmem:[#allocation32_spill] sm:$0xff] }
 0xb2f   :  { %v14544_v39 = vsel %vm249_vm2, %v8187_v12, %v9893_v46  ;;  %v14547_v26 = vsel %vm249_vm2, %v6576_v9, %v9892_v45  ;;  %8908 = vmatprep.subr.bf16.mxu1 %v8907_v2  ;;  %v9882_v0 = vunpack.i.l.bf16 %v14519_v44  ;;  %v7265_v59 = vsel %vm251_vm3, %v7264_v43, %v9827_v60  ;;  %v15586_v43 = vld [vmem:[#allocation23_spill] sm:$0xff] }
 0xb30   :  { %v9896_v40 = vpop.permute.xlu1 %9895  ;;  %v14556_v47 = vpop.permute.xlu0 %7442  ;;  %v6805_v1 = vsel %vm259_vm7, %v6804_v18, %v9872_v19  ;;  %v6342_v36 = vsel %vm253_vm4, %v6341_v24, %v15581_v34  ;;  %v9498_v16 = vunpack.i.h.bf16 %v15582_v50  ;;  %v9503_v61 = vunpack.i.h.bf16 %v15583_v17 }
 0xb31   :  { %v9898_v62 = vunpack.i.h.bf16 %v9896_v40  ;;  %v9897_v54 = vunpack.i.l.bf16 %v9896_v40  ;;  %v6343_v45 = vsel %vm255_vm5, %v6342_v36, %v9857_v11  ;;  %v8445_v29 = vrot.slane %v6805_v1, 4  ;;  %v15587_v11 = vld [vmem:[#allocation20_spill] sm:$0xff]  ;;  %v15589_v1 = vld [vmem:[#allocation29_spill] sm:$0xff] }
 0xb32   :  { %v6344_v7 = vsel %vm257_vm6, %v6343_v45, %v9882_v0  ;;  %v9502_v60 = vunpack.i.l.bf16 %v15583_v17  ;;  %v9507_v5 = vunpack.i.l.bf16 %v15586_v43  ;;  %v9513_v18 = vunpack.i.h.bf16 %v15587_v11  ;;  %v15595_v17 = vld [vmem:[#allocation21_spill] sm:$0xff] }
 0xb33   :  { %v14569_v52 = vsel %vm251_vm3, %v14487_v37, %v9898_v62  ;;  %v14573_v8 = vsel %vm251_vm3, %v14490_v23, %v9897_v54  ;;  %v9858_v37 = vunpack.i.h.bf16 %v14425_v31  ;;  %v7733_v31 = vsel %vm259_vm7, %v7732_v6, %v9873_v13  ;;  %v15584_v13 = vld [vmem:[#allocation11_spill] sm:$0xff] }
 0xb34   :  { %v7475_v21 = vpop.permute.xlu1 %7474  ;;  %v7911_v15 = vpop.permute.xlu0 %7910  ;;  %v8451_v12 = vrot.slane %v7733_v31, 4  ;;  %v9497_v62 = vunpack.i.l.bf16 %v15582_v50  ;;  %v4704_v19 = vsel %vm247_vm1, %v15584_v13, %v9498_v16  ;;  %v9512_v6 = vunpack.i.l.bf16 %v15587_v11  ;;  %v15594_v50 = vld [vmem:[#allocation25_spill] sm:$0xff] }
 0xb35   :  { %v14585_v23 = vsel %vm249_vm2, %v7504_v10, %v7475_v21  ;;  %v14589_v22 = vsel %vm251_vm3, %v14504_v48, %v7911_v15  ;;  %v7266_v48 = vsel %vm253_vm4, %v7265_v59, %v9852_v58  ;;  %v9508_v58 = vunpack.i.h.bf16 %v15586_v43  ;;  %v15596_v43 = vld [vmem:[#allocation55_spill] sm:$0xff] }
 0xb36   :  { %v7267_v2 = vsel %vm255_vm5, %v7266_v48, %v9858_v37  ;;  %v4697_v24 = vsel %vm247_vm1, %v15585_v53, %v9497_v62  ;;  %v4705_v37 = vsel %vm249_vm2, %v4704_v19, %v9503_v61  ;;  %v9518_v31 = vunpack.i.h.bf16 %v15589_v1 }
 0xb37   :  { %v7268_v9 = vsel %vm257_vm6, %v7267_v2, %v9883_v55  ;;  %v4698_v15 = vsel %vm249_vm2, %v4697_v24, %v9502_v60  ;;  %v15588_v55 = vld [vmem:[#allocation33_spill] sm:$0xff]  ;;  %v9517_v34 = vunpack.i.l.bf16 %v15589_v1  ;;  %v4706_v48 = vsel %vm251_vm3, %v4705_v37, %v9508_v58 }
 0xb38   :  { %v14601_v33 = vpop.permute.xlu1 %7942  ;;  %v9901_v46 = vpop.permute.xlu0 %9900  ;;  %v9568_v0 = vunpack.i.h.bf16 %v15588_v55  ;;  %v9567_v59 = vunpack.i.l.bf16 %v15588_v55  ;;  %v4699_v36 = vsel %vm251_vm3, %v4698_v15, %v9507_v5  ;;  %v9708_v16 = vunpack.i.h.bf16 %v15594_v50  ;;  %v15612_v60 = vld [vmem:[#allocation77_spill] sm:$0xff] }
 0xb39   :  { %v9903_v3 = vunpack.i.h.bf16 %v9901_v46  ;;  %v9902_v44 = vunpack.i.l.bf16 %v9901_v46  ;;  %v4700_v2 = vsel %vm253_vm4, %v4699_v36, %v9512_v6  ;;  %v9707_v62 = vunpack.i.l.bf16 %v15594_v50  ;;  %v15597_v6 = vld [vmem:[#allocation35_spill] sm:$0xff] }
 0xb3a   :  { %v14662_v13 = vsel %vm255_vm5, %v4700_v2, %v9517_v34  ;;  %v9583_v58 = vunpack.i.h.bf16 %v15596_v43  ;;  %v9582_v5 = vunpack.i.l.bf16 %v15596_v43  ;;  %v9588_v55 = vunpack.i.h.bf16 %v15597_v6  ;;  %v15600_v36 = vld [vmem:[#allocation31_spill] sm:$0xff] }
 0xb3b   :  { %v6345_v32 = vsel %vm259_vm7, %v6344_v7, %v9902_v44  ;;  %v7269_v41 = vsel %vm259_vm7, %v7268_v9, %v9903_v3  ;;  %v4707_v3 = vsel %vm253_vm4, %v4706_v48, %v9513_v18  ;;  %v15590_v44 = vld [vmem:[#allocation52_spill] sm:$0xff]  ;;  %v15592_v9 = vld [vmem:[#allocation45_spill] sm:$0xff]  ;;  %v9718_v48 = vunpack.i.h.bf16 %v15600_v36 }
 0xb3c   :  { %v14609_v63 = vpop.permute.xlu1 %6518  ;;  %v14611_v27 = vpop.permute.xlu0 %9905  ;;  %v8459_v20 = vsel %vm4220_vm8, %v6345_v32, %v8445_v29  ;;  %v8461_v38 = vsel %vm4220_vm8, %v7269_v41, %v8451_v12  ;;  %v5180_v29 = vsel %vm247_vm1, %v15590_v44, %v9568_v0  ;;  %v15591_v12 = vld [vmem:[#allocation53_spill] sm:$0xff]  ;;  %v9578_v32 = vunpack.i.h.bf16 %v15592_v9 }
 0xb3d   :  { %v8909_v40 = vpack.c.bf16 %v8461_v38, %v8459_v20  ;;  %v5173_v7 = vsel %vm247_vm1, %v15591_v12, %v9567_v59  ;;  %v9577_v41 = vunpack.i.l.bf16 %v15592_v9  ;;  %v15593_v20 = vld [vmem:[#allocation27_spill] sm:$0xff]  ;;  %v14665_v19 = vsel %vm255_vm5, %v4707_v3, %v9518_v31  ;;  %v15599_v31 = vld [vmem:[#allocation73_spill] sm:$0xff]  ;;  %v15601_v3 = vld [vmem:[#allocation36_spill] sm:$0xff] }
 0xb3e   :  { %v9573_v38 = vunpack.i.h.bf16 %v15593_v20  ;;  %v9587_v0 = vunpack.i.l.bf16 %v15597_v6  ;;  %v15598_v59 = vld [vmem:[#allocation59_spill] sm:$0xff]  ;;  %v6109_v34 = vsel %vm247_vm1, %v15599_v31, %v9707_v62  ;;  %v9717_v2 = vunpack.i.l.bf16 %v15600_v36  ;;  %v15604_v31 = vld [vmem:[#allocation14_spill] sm:$0xff] }
 0xb3f   :  { %8910 = vmatpush1.bf16.msra.mxu1 %v8909_v40  ;;  %v9572_v40 = vunpack.i.l.bf16 %v15593_v20  ;;  %v6116_v1 = vsel %vm247_vm1, %v15598_v59, %v9708_v16  ;;  %v9593_v44 = vunpack.i.h.bf16 %v15601_v3  ;;  %v15602_v12 = vld [vmem:[#allocation67_spill] sm:$0xff]  ;;  %v9733_v35 = vunpack.i.h.bf16 %v15612_v60 }
 0xb40   :  { %v14617_v54 = vpop.permute.xlu1 %9910  ;;  %v14619_v51 = vpop.permute.xlu0 %9915  ;;  %v5181_v37 = vsel %vm249_vm2, %v5180_v29, %v9573_v38  ;;  %v9592_v29 = vunpack.i.l.bf16 %v15601_v3  ;;  %v9712_v9 = vunpack.i.l.bf16 %v15602_v12  ;;  %v15606_v3 = vld [vmem:[#allocation74_spill] sm:$0xff] }
 0xb41   :  { %v5174_v15 = vsel %vm249_vm2, %v5173_v7, %v9572_v40  ;;  %v5182_v18 = vsel %vm251_vm3, %v5181_v37, %v9578_v32  ;;  %v9713_v7 = vunpack.i.h.bf16 %v15602_v12  ;;  %v15603_v40 = vld [vmem:[#allocation63_spill] sm:$0xff] }
 0xb42   :  { %v5175_v11 = vsel %vm251_vm3, %v5174_v15, %v9577_v41  ;;  %v5183_v38 = vsel %vm253_vm4, %v5182_v18, %v9583_v58  ;;  %v9638_v50 = vunpack.i.h.bf16 %v15603_v40  ;;  %v9637_v16 = vunpack.i.l.bf16 %v15603_v40  ;;  %v15610_v40 = vld [vmem:[#allocation61_spill] sm:$0xff] }
 0xb43   :  { %v5176_v20 = vsel %vm253_vm4, %v5175_v11, %v9582_v5  ;;  %v5184_v43 = vsel %vm255_vm5, %v5183_v38, %v9588_v55  ;;  %v6110_v15 = vsel %vm249_vm2, %v6109_v34, %v9712_v9  ;;  %v6117_v37 = vsel %vm249_vm2, %v6116_v1, %v9713_v7  ;;  %v15605_v11 = vld [vmem:[#allocation54_spill] sm:$0xff]  ;;  %v15609_v9 = vld [vmem:[#allocation9_spill] sm:$0xff] }
 0xb44   :  { %v14629_v10 = vpop.permute.xlu1 %7446  ;;  %v14631_v21 = vpop.permute.xlu0 %7478  ;;  %v5177_v62 = vsel %vm255_vm5, %v5176_v20, %v9587_v0  ;;  %v6111_v6 = vsel %vm251_vm3, %v6110_v15, %v9717_v2  ;;  %v6118_v59 = vsel %vm251_vm3, %v6117_v37, %v9718_v48  ;;  %v9728_v5 = vunpack.i.h.bf16 %v15604_v31  ;;  %v15607_v1 = vld [vmem:[#allocation62_spill] sm:$0xff]  ;;  %v15608_v48 = vld [vmem:[#allocation48_spill] sm:$0xff] }
 0xb45   :  { %v9727_v58 = vunpack.i.l.bf16 %v15604_v31  ;;  %v9598_v18 = vunpack.i.h.bf16 %v15605_v11  ;;  %v9597_v36 = vunpack.i.l.bf16 %v15605_v11  ;;  %v9723_v0 = vunpack.i.h.bf16 %v15606_v3 }
 0xb46   :  { %v9722_v55 = vunpack.i.l.bf16 %v15606_v3  ;;  %v5640_v2 = vsel %vm247_vm1, %v15607_v1, %v9638_v50  ;;  %v5633_v7 = vsel %vm247_vm1, %v15608_v48, %v9637_v16  ;;  %v9648_v20 = vunpack.i.h.bf16 %v15609_v9  ;;  %v15611_v50 = vld [vmem:[#allocation22_spill] sm:$0xff] }
 0xb47   :  { %v9647_v38 = vunpack.i.l.bf16 %v15609_v9  ;;  %v9643_v15 = vunpack.i.h.bf16 %v15610_v40  ;;  %v9642_v37 = vunpack.i.l.bf16 %v15610_v40  ;;  %v6119_v11 = vsel %vm253_vm4, %v6118_v59, %v9723_v0 }
 0xb48   :  { %v14643_v46 = vpop.permute.xlu1 %7914  ;;  %v14645_v45 = vpop.permute.xlu0 %7946  ;;  %v6112_v31 = vsel %vm253_vm4, %v6111_v6, %v9722_v55  ;;  %v6120_v61 = vsel %vm255_vm5, %v6119_v11, %v9728_v5  ;;  %v9738_v1 = vunpack.i.h.bf16 %v15611_v50  ;;  %v9737_v16 = vunpack.i.l.bf16 %v15611_v50 }
 0xb49   :  { %v6113_v3 = vsel %vm255_vm5, %v6112_v31, %v9727_v58  ;;  %v5634_v48 = vsel %vm249_vm2, %v5633_v7, %v9642_v37  ;;  %v5641_v9 = vsel %vm249_vm2, %v5640_v2, %v9643_v15  ;;  %v9732_v40 = vunpack.i.l.bf16 %v15612_v60  ;;  %v15613_v58 = vld [vmem:[#allocation75_spill] sm:$0xff]  ;;  %v15614_v31 = vld [vmem:[#allocation65_spill] sm:$0xff] }
 0xb4a   :  { %v5635_v59 = vsel %vm251_vm3, %v5634_v48, %v9647_v38  ;;  %v5642_v5 = vsel %vm251_vm3, %v5641_v9, %v9648_v20  ;;  %v9658_v0 = vunpack.i.h.bf16 %v15613_v58  ;;  %v9657_v55 = vunpack.i.l.bf16 %v15613_v58 }
 0xb4b   :  { %v9653_v7 = vunpack.i.h.bf16 %v15614_v31  ;;  %v9652_v2 = vunpack.i.l.bf16 %v15614_v31  ;;  %v6114_v15 = vsel %vm257_vm6, %v6113_v3, %v9732_v40  ;;  %v6121_v60 = vsel %vm257_vm6, %v6120_v61, %v9733_v35  ;;  %v15617_v40 = vld [vmem:[#allocation37_spill] sm:$0xff] }
 0xb4c   :  { %v14667_v53 = vpop.permute.xlu1 %6522  ;;  %v14669_v24 = vpop.permute.xlu0 %9920  ;;  %v5178_v37 = vsel %vm257_vm6, %v5177_v62, %v9592_v29  ;;  %v5185_v11 = vsel %vm257_vm6, %v5184_v43, %v9593_v44  ;;  %v6115_v38 = vsel %vm259_vm7, %v6114_v15, %v9737_v16  ;;  %v6122_v20 = vsel %vm259_vm7, %v6121_v60, %v9738_v1  ;;  %v15615_v44 = vld [vmem:[#allocation64_spill] sm:$0xff] }
 0xb4d   :  { %v5179_v50 = vsel %vm259_vm7, %v5178_v37, %v9597_v36  ;;  %v5186_v48 = vsel %vm259_vm7, %v5185_v11, %v9598_v18  ;;  %v5636_v9 = vsel %vm253_vm4, %v5635_v59, %v9652_v2  ;;  %v5643_v58 = vsel %vm253_vm4, %v5642_v5, %v9653_v7  ;;  %v15616_v43 = vld [vmem:[#allocation72_spill] sm:$0xff] }
 0xb4e   :  { %v5637_v35 = vsel %vm255_vm5, %v5636_v9, %v9657_v55  ;;  %v5644_v61 = vsel %vm255_vm5, %v5643_v58, %v9658_v0  ;;  %v9668_v29 = vunpack.i.h.bf16 %v15615_v44  ;;  %v9667_v62 = vunpack.i.l.bf16 %v15615_v44 }
 0xb4f   :  { %v9663_v36 = vunpack.i.h.bf16 %v15616_v43  ;;  %v9662_v18 = vunpack.i.l.bf16 %v15616_v43  ;;  %v8471_v1 = vrot.slane %v6115_v38, 4  ;;  %v8472_v16 = vrot.slane %v6122_v20, 4 }
 0xb50   :  { %v14689_v32 = vpop.permute.xlu1 %9925  ;;  %v14691_v41 = vpop.permute.xlu0 %7450  ;;  %v9528_v59 = vunpack.i.h.bf16 %v15617_v40  ;;  %v9527_v5 = vunpack.i.l.bf16 %v15617_v40  ;;  %v15618_v7 = vunpack.i.l.bf16 %v15595_v17  ;;  %v15619_v0 = vunpack.i.h.bf16 %v15595_v17 }
 0xb51   :  { %v8465_v15 = vrot.slane %v5179_v50, 4  ;;  %v8466_v60 = vrot.slane %v5186_v48, 4  ;;  %v5638_v37 = vsel %vm257_vm6, %v5637_v35, %v9662_v18  ;;  %v5645_v11 = vsel %vm257_vm6, %v5644_v61, %v9663_v36 }
 0xb52   :  { %v4702_v55 = vsel %vm257_vm6, %v14662_v13, %v15618_v7  ;;  %v4709_v2 = vsel %vm257_vm6, %v14665_v19, %v15619_v0  ;;  %v5639_v9 = vsel %vm259_vm7, %v5638_v37, %v9667_v62  ;;  %v5646_v58 = vsel %vm259_vm7, %v5645_v11, %v9668_v29 }
 0xb53   :  { %v14780_v13 = vsel %vm4220_vm8, %v5646_v58, %v8472_v16  ;;  %v14783_v17 = vsel %vm4220_vm8, %v5639_v9, %v8471_v1  ;;  %v4703_v19 = vsel %vm259_vm7, %v4702_v55, %v9527_v5  ;;  %v4710_v50 = vsel %vm259_vm7, %v4709_v2, %v9528_v59 }
 0xb54   :  { %v14709_v12 = vpop.permute.xlu1 %7482  ;;  %v14711_v34 = vpop.permute.xlu0 %7918  ;;  %v14790_v61 = vsel %vm4220_vm8, %v4710_v50, %v8466_v60  ;;  %v14793_v44 = vsel %vm4220_vm8, %v4703_v19, %v8465_v15  ;;  %v8525_v29 = vrot.slane %v14780_v13, 4  ;;  %v8523_v62 = vrot.slane %v14783_v17, 4 }
 0xb55   :  { %v9912_v43 = vunpack.i.l.bf16 %v14617_v54  ;;  %v9908_v36 = vunpack.i.h.bf16 %v14611_v27  ;;  %v9907_v18 = vunpack.i.l.bf16 %v14611_v27  ;;  %v8518_v1 = vrot.slane %v14790_v61, 4 }
 0xb56   :  { %v8517_v16 = vrot.slane %v14793_v44, 4  ;;  %v9913_v40 = vunpack.i.h.bf16 %v14617_v54  ;;  %v9917_v59 = vunpack.i.l.bf16 %v14619_v51  ;;  %v6569_v55 = vsel %vm247_vm1, %v14020_v56, %v14533_v30 }
 0xb57   :  { %v9918_v0 = vunpack.i.h.bf16 %v14619_v51  ;;  %v14817_v27 = vsel %vm4220_vm8, %v8518_v1, %v8525_v29  ;;  %v7497_v56 = vsel %vm247_vm1, %v14023_v4, %v14556_v47  ;;  %v7967_v30 = vsel %vm253_vm4, %v14508_v49, %v14601_v33 }
 0xb58   :  { %v14731_v42 = vpop.permute.xlu1 %7950  ;;  %v14733_v6 = vpop.permute.xlu0 %9930  ;;  %v14824_v54 = vsel %vm4220_vm8, %v8517_v16, %v8523_v62  ;;  %v6570_v51 = vsel %vm249_vm2, %v6569_v55, %v14609_v63  ;;  %v7032_v2 = vsel %vm253_vm4, %v14573_v8, %v9912_v43  ;;  %v6578_v15 = vsel %vm251_vm3, %v14547_v26, %v9907_v18 }
 0xb59   :  { %v8189_v60 = vsel %vm251_vm3, %v14544_v39, %v9908_v36  ;;  %v9923_v37 = vunpack.i.h.bf16 %v14669_v24  ;;  %v9922_v4 = vunpack.i.l.bf16 %v14669_v24  ;;  %v8197_v47 = vsel %vm253_vm4, %v14569_v52, %v9913_v40 }
 0xb5a   :  { %v7040_v49 = vsel %vm255_vm5, %v14405_v28, %v9917_v59  ;;  %v9928_v33 = vunpack.i.h.bf16 %v14689_v32  ;;  %v9927_v8 = vunpack.i.l.bf16 %v14689_v32  ;;  %v7033_v11 = vsel %vm255_vm5, %v7032_v2, %v9918_v0 }
 0xb5b   :  { %v7498_v39 = vsel %vm249_vm2, %v7497_v56, %v14629_v10  ;;  %v7506_v28 = vsel %vm251_vm3, %v14585_v23, %v14631_v21  ;;  %v7960_v52 = vsel %vm253_vm4, %v14589_v22, %v14643_v46  ;;  %v9933_v32 = vunpack.i.h.bf16 %v14733_v6 }
 0xb5c   :  { %v14751_v31 = vpop.permute.xlu1 %6526  ;;  %v14753_v3 = vpop.permute.xlu0 %9935  ;;  %v9932_v58 = vunpack.i.l.bf16 %v14733_v6  ;;  %v7968_v19 = vsel %vm255_vm5, %v7967_v30, %v14645_v45  ;;  %v6571_v10 = vsel %vm251_vm3, %v6570_v51, %v14667_v53  ;;  %v8190_v50 = vsel %vm253_vm4, %v8189_v60, %v9923_v37 }
 0xb5d   :  { %v9938_v24 = vunpack.i.h.bf16 %v14753_v3  ;;  %v9937_v9 = vunpack.i.l.bf16 %v14753_v3  ;;  %v6579_v3 = vsel %vm253_vm4, %v6578_v15, %v9922_v4  ;;  %v7034_v23 = vsel %vm257_vm6, %v7033_v11, %v9928_v33 }
 0xb5e   :  { %v7041_v21 = vsel %vm257_vm6, %v7040_v49, %v9927_v8  ;;  %v7499_v22 = vsel %vm251_vm3, %v7498_v39, %v14691_v41  ;;  %v7507_v46 = vsel %vm253_vm4, %v7506_v28, %v14709_v12  ;;  %v7961_v45 = vsel %vm255_vm5, %v7960_v52, %v14711_v34 }
 0xb5f   :  { %v7969_v53 = vsel %vm257_vm6, %v7968_v19, %v14731_v42  ;;  %v7035_v36 = vsel %vm259_vm7, %v7034_v23, %v9938_v24  ;;  %v7042_v18 = vsel %vm259_vm7, %v7041_v21, %v9937_v9  ;;  %v6580_v40 = vsel %vm255_vm5, %v6579_v3, %v9933_v32 }
 0xb60   :  { %v14773_v38 = vpop.permute.xlu1 %7454  ;;  %v14775_v20 = vpop.permute.xlu0 %7486  ;;  %v8198_v59 = vsel %vm255_vm5, %v8197_v47, %v9932_v58  ;;  %v6572_v55 = vsel %vm253_vm4, %v6571_v10, %v14751_v31  ;;  %v8477_v56 = vrot.slane %v7035_v36, 4  ;;  %v8478_v30 = vrot.slane %v7042_v18, 4 }
 0xb61   :  { %v7500_v51 = vsel %vm253_vm4, %v7499_v22, %v14773_v38  ;;  %v7508_v2 = vsel %vm255_vm5, %v7507_v46, %v14775_v20 }
 0xb64   :  { %v14787_v48 = vpop.permute.xlu1 %7922  ;;  %v7955_v35 = vpop.permute.xlu0 %7954 }
 0xb65   :  { %v7970_v34 = vsel %vm259_vm7, %v7969_v53, %v7955_v35 }
 0xb66   :  { %v8484_v4 = vrot.slane %v7970_v34, 4 }
 0xb68   :  { %v14804_v5 = vpop.permute.xlu1 %9940  ;;  %v14806_v7 = vpop.permute.xlu0 %9945 }
 0xb69   :  { %v9948_v41 = vunpack.i.h.bf16 %v14806_v7  ;;  %v9947_v12 = vunpack.i.l.bf16 %v14806_v7  ;;  %v9943_v0 = vunpack.i.h.bf16 %v14804_v5  ;;  %v9942_v42 = vunpack.i.l.bf16 %v14804_v5 }
 0xb6a   :  { %v7962_v7 = vsel %vm257_vm6, %v7961_v45, %v14787_v48 }
 0xb6b   :  { %v6581_v47 = vsel %vm257_vm6, %v6580_v40, %v9948_v41  ;;  %v8199_v5 = vsel %vm257_vm6, %v8198_v59, %v9947_v12  ;;  %v6573_v33 = vsel %vm255_vm5, %v6572_v55, %v9943_v0  ;;  %v8191_v38 = vsel %vm255_vm5, %v8190_v50, %v9942_v42 }
 0xb6c   :  { %v14848_v63 = vpop.permute.xlu1 %7458  ;;  %v7491_v26 = vpop.permute.xlu0 %7490 }
 0xb6d   :  { %v7509_v11 = vsel %vm257_vm6, %v7508_v2, %v7491_v26  ;;  %v7501_v23 = vsel %vm255_vm5, %v7500_v51, %v14848_v63 }
 0xb70   :  { %v7927_v6 = vpop.permute.xlu1 %7926  ;;  %v9951_v43 = vpop.permute.xlu0 %9950 }
 0xb71   :  { %v9953_v31 = vunpack.i.h.bf16 %v9951_v43  ;;  %v9952_v49 = vunpack.i.l.bf16 %v9951_v43  ;;  %v7963_v48 = vsel %vm259_vm7, %v7962_v7, %v7927_v6 }
 0xb72   :  { %v8483_v22 = vrot.slane %v7963_v48, 4 }
 0xb73   :  { %v6574_v52 = vsel %vm257_vm6, %v6573_v33, %v9953_v31  ;;  %v8192_v10 = vsel %vm257_vm6, %v8191_v38, %v9952_v49 }
 0xb74   :  { %v9956_v15 = vpop.permute.xlu1 %9955  ;;  %v7463_v60 = vpop.permute.xlu0 %7462 }
 0xb75   :  { %v9958_v37 = vunpack.i.h.bf16 %v9956_v15  ;;  %v9957_v35 = vunpack.i.l.bf16 %v9956_v15  ;;  %v7502_v46 = vsel %vm257_vm6, %v7501_v23, %v7463_v60 }
 0xb77   :  { %v6582_v20 = vsel %vm259_vm7, %v6581_v47, %v9958_v37  ;;  %v8200_v8 = vsel %vm259_vm7, %v8199_v5, %v9957_v35 }
 0xb78   :  { %v8492_v39 = vsel %vm4220_vm8, %v6582_v20, %v8478_v30  ;;  %v7495_v24 = vpop.permute.xlu1 %7494  ;;  %v9961_v9 = vpop.permute.xlu0 %9960  ;;  %v8574_v28 = vsel %vm4220_vm8, %v8200_v8, %v8518_v1 }
 0xb79   :  { %v7510_v32 = vsel %vm259_vm7, %v7509_v11, %v7495_v24  ;;  %v9963_v58 = vunpack.i.h.bf16 %v9961_v9  ;;  %v9962_v19 = vunpack.i.l.bf16 %v9961_v9  ;;  %v8533_v3 = vrot.slane %v8492_v39, 4  ;;  %v15621_v9 = vld [vmem:[#allocation40_spill] sm:$0xff] }
 0xb7a   :  { %v8494_v26 = vsel %vm4220_vm8, %v7510_v32, %v8484_v4  ;;  %v8911_v50 = vpack.c.bf16 %v14817_v27, %v8574_v28  ;;  %v15620_v24 = vmov 0.0  }
 0xb7b   :  { %v8541_v21 = vrot.slane %v8494_v26, 4  ;;  %v6575_v61 = vsel %vm259_vm7, %v6574_v52, %v9963_v58  ;;  %v8193_v1 = vsel %vm259_vm7, %v8192_v10, %v9962_v19  ;;  %v8534_v40 = vsel %vm4220_vm8, %v8525_v29, %v8533_v3 }
 0xb7c   :  { %v8491_v6 = vsel %vm4220_vm8, %v6575_v61, %v8477_v56  ;;  %8912 = vmatprep.subr.bf16.mxu1 %v8911_v50  ;;  %v7467_v43 = vpop.permute.xlu1 %7466  ;;  %v8391_v45 = vpop.permute.xlu0 %8390  ;;  %v8573_v27 = vsel %vm4220_vm8, %v8193_v1, %v8517_v16  ;;  %v10025_v52 = vmov 1966171168  }
 0xb7d   :  { %v8531_v53 = vrot.slane %v8491_v6, 4  ;;  %v7503_v63 = vsel %vm259_vm7, %v7502_v46, %v7467_v43  ;;  %v8913_v36 = vpack.c.bf16 %v14824_v54, %v8573_v27  ;;  %v8542_v59 = vsel %vm4220_vm8, %v8533_v3, %v8541_v21 }
 0xb7e   :  { %v8493_v18 = vsel %vm4220_vm8, %v7503_v63, %v8483_v22  ;;  %v8915_v12 = vpack.c.bf16 %v8542_v59, %v8534_v40  ;;  %v8424_v51 = vsel %vm247_vm1, %v14339_v14, %v8391_v45  ;;  %v8806_v32 = vunpack.c.l.s4 %v10025_v52 }
 0xb7f   :  { %v8539_v41 = vrot.slane %v8493_v18, 4  ;;  %8914 = vmatpush1.bf16.msra.mxu1 %v8913_v36  ;;  %v8532_v16 = vsel %vm4220_vm8, %v8523_v62, %v8531_v53  ;;  %v15623_v43 = vlaneseq }
 0xb80   :  { %v8363_v55 = vpop.permute.xlu1 %8362  ;;  %v8395_v44 = vpop.permute.xlu0 %8394  ;;  %8916 = vmatprep.subr.bf16.mxu1 %v8915_v12  ;;  %v8807_v10 = vunpack.c.0.s8 %v8806_v32 }
 0xb81   :  { %v8540_v54 = vsel %vm4220_vm8, %v8531_v53, %v8539_v41  ;;  %v8425_v2 = vsel %vm249_vm2, %v8424_v51, %v8395_v44  ;;  %v8417_v7 = vsel %vm247_vm1, %v14353_v25, %v8363_v55  ;;  %vm14958_vm11 = vcmp.lt.s32.totalorder %v15623_v43, 256 }
 0xb82   :  { %v8917_v34 = vpack.c.bf16 %v8540_v54, %v8532_v16 }
 0xb84   :  { %v8367_v0 = vpop.permute.xlu1 %8366  ;;  %v8399_v42 = vpop.permute.xlu0 %8398  ;;  %8918 = vmatpush1.bf16.msra.mxu1 %v8917_v34 }
 0xb85   :  { %v8426_v17 = vsel %vm251_vm3, %v8425_v2, %v8399_v42  ;;  %v8418_v37 = vsel %vm249_vm2, %v8417_v7, %v8367_v0 }
 0xb88   :  { %v8371_v13 = vpop.permute.xlu1 %8370  ;;  %v8403_v29 = vpop.permute.xlu0 %8402 }
 0xb89   :  { %v8427_v62 = vsel %vm253_vm4, %v8426_v17, %v8403_v29  ;;  %v8419_v14 = vsel %vm251_vm3, %v8418_v37, %v8371_v13 }
 0xb8c   :  { %v8375_v56 = vpop.permute.xlu1 %8374  ;;  %v8407_v30 = vpop.permute.xlu0 %8406 }
 0xb8d   :  { %v8428_v31 = vsel %vm255_vm5, %v8427_v62, %v8407_v30  ;;  %v8420_v49 = vsel %vm253_vm4, %v8419_v14, %v8375_v56 }
 0xb90   :  { %v8379_v15 = vpop.permute.xlu1 %8378  ;;  %v8411_v60 = vpop.permute.xlu0 %8410 }
 0xb91   :  { %v8429_v35 = vsel %vm257_vm6, %v8428_v31, %v8411_v60  ;;  %v8421_v38 = vsel %vm255_vm5, %v8420_v49, %v8379_v15 }
 0xb94   :  { %v8383_v4 = vpop.permute.xlu1 %8382  ;;  %v8415_v47 = vpop.permute.xlu0 %8414 }
 0xb95   :  { %v8430_v5 = vsel %vm259_vm7, %v8429_v35, %v8415_v47  ;;  %v8422_v20 = vsel %vm257_vm6, %v8421_v38, %v8383_v4 }
 0xb96   :  { %v8549_v33 = vrot.slane %v8430_v5, 4 }
 0xb98   :  { %v8387_v25 = vpop.permute.xlu1 %8386  ;;  %v8550_v8 = vsel %vm4220_vm8, %v8541_v21, %v8549_v33 }
 0xb99   :  { %v8423_v11 = vsel %vm259_vm7, %v8422_v20, %v8387_v25  ;;  %8677 = vmatprep.subr.mxu1 %v8550_v8 }
 0xb9a   :  { %v8547_v48 = vrot.slane %v8423_v11, 4 }
 0xb9c   :  { %v8548_v39 = vsel %vm4220_vm8, %v8539_v41, %v8547_v48 }
 0xb9d   :  { %8678 = vmatpush1.msra.mxu1 %v8548_v39 }
 0xb9e   :  { %8882 = vmatmul.mubr.msk.f32.vlgmr.msra.gmra.mrb[0].mxu1 %vm8577_vm10, %v14364_v57  ;;  %v15622_v57 = vld [vmem:[#allocation2_spill] sm:$0xff] }
 0xb9f   :  { %8731 = vmatprep.mubr.f32.mxu1 %v15620_v24  ;;  %v8810_v22 = vsub.s32 %v8807_v10, %v15622_v57  ;;  %v8774_v40 = vsub.s32 0, %v15622_v57 }
 0xba2   :  { %8883 = vmatmul.mubr.msk.f32.gmra.mrb[2].mxu1 %vm8577_vm10, %v15621_v9 }
 0xba5   :  { %v8742_v63 = vpop.permute.xlu0 %8741 }
 0xba9   :  { %v8794_v34 = vpop.permute.xlu1 %8793 }
 0xbce   :  { %v8650_v28 = vpop.f32.mrb[0].mxu0 }
 0xbcf   :  { %v8652_v58 = vpop.f32.mrb[1].mxu0  ;;  %v8744_v12 = vadd.f32 %v8742_v63, %v8650_v28 }
 0xbd0   :  { %v8745_v44 = vadd.f32 %v8742_v63, %v8652_v58 }
 0xbd2   :  { %v8656_v19 = vpop.f32.mrb[2].mxu0 }
 0xbd3   :  { %v8748_v3 = vmax.f32 %v8656_v19, 0.0  ;;  %v8756_v26 = vadd.f32 1e-08, %v8656_v19  ;;  %v8658_v50 = vpop.f32.mrb[3].mxu0 }
 0xbd4   :  { %v8749_v23 = vmax.f32 %v8658_v50, 0.0  ;;  %v8757_v21 = vadd.f32 1e-08, %v8658_v50 }
 0xbd5   :  { %9983 = vrcp.f32 %v8756_v26  ;;  %v8752_v61 = vmin.f32 %v8748_v3, 1.0 }
 0xbd6   :  { %v8753_v1 = vmin.f32 %v8749_v23, 1.0  ;;  %9985 = vrcp.f32 %v8757_v21 }
 0xbd8   :  { %v8804_v46 = vcombine.low %v8752_v61, %v8753_v1 }
 0xbda   :  { %v8811_v6 = vrot.slane %v8804_v46, %v8810_v22 }
 0xbdc   :  { %v8818_v27 = vrot.slane %v8811_v6, %v8810_v22 }
 0xbde   :  { %8824 = vst.msk [vmem:[%s14989_s5] sm:$0x3] %vm14958_vm11, %v8818_v27 }
 0xbdf   :  { %v9984_v53 = vpop.eup %9983 }
 0xbe0   :  { %v9986_v36 = vpop.eup %9985  ;;  %v8761_v18 = vmul.f32 9.0, %v9984_v53 }
 0xbe1   :  { %v8763_v59 = vmul.f32 9.0, %v9986_v36 }
 0xbe2   :  { %v8768_v41 = vmul.f32 %v8761_v18, %v8752_v61 }
 0xbe3   :  { %v8769_v55 = vmul.f32 %v8763_v59, %v8753_v1 }
 0xbe4   :  { %v8775_v16 = vrot.slane %v8768_v41, %v8774_v40 }
 0xbe5   :  { %v8779_v54 = vrot.slane %v8769_v55, %v8774_v40 }
 0xbe6   :  { %v8788_v0 = vmul.f32 %v8775_v16, %v8744_v12 }
 0xbe7   :  { %v8789_v42 = vmul.f32 %v8779_v54, %v8745_v44 }
 0xbe8   :  { %v8796_v13 = vadd.f32 %v8794_v34, %v8788_v0 }
 0xbe9   :  { %v8797_v29 = vadd.f32 %v8794_v34, %v8789_v42 }
 0xbea   :  { %8800 = vst [vmem:[%s14990_s4] sm:$0xff] %v8796_v13 }
 0xbeb   :  { %8801 = vst [vmem:[%s14990_s4 + $0x8] sm:$0xff] %v8797_v29 }
 0xc71   :  { %v8727_v56 = vpop.f32.mrb[0].mxu1 }
 0xc72   :  { %v8729_v30 = vpop.f32.mrb[1].mxu1  ;;  %v8746_v20 = vadd.f32 %v8742_v63, %v8727_v56 }
 0xc73   :  { %v8747_v8 = vadd.f32 %v8742_v63, %v8729_v30 }
 0xc75   :  { %v8733_v51 = vpop.f32.mrb[2].mxu1 }
 0xc76   :  { %v8750_v2 = vmax.f32 %v8733_v51, 0.0  ;;  %v8758_v15 = vadd.f32 1e-08, %v8733_v51  ;;  %v8735_v60 = vpop.f32.mrb[3].mxu1 }
 0xc77   :  { %v8751_v17 = vmax.f32 %v8735_v60, 0.0  ;;  %v8759_v62 = vadd.f32 1e-08, %v8735_v60 }
 0xc78   :  { %v8754_v7 = vmin.f32 %v8750_v2, 1.0  ;;  %9987 = vrcp.f32 %v8758_v15 }
 0xc79   :  { %v8755_v31 = vmin.f32 %v8751_v17, 1.0  ;;  %9989 = vrcp.f32 %v8759_v62 }
 0xc7b   :  { %v8830_v37 = vcombine.low %v8754_v7, %v8755_v31 }
 0xc7d   :  { %v8837_v35 = vrot.slane %v8830_v37, %v8810_v22 }
 0xc7f   :  { %v8844_v4 = vrot.slane %v8837_v35, %v8810_v22 }
 0xc81   :  { %8886 = vst.msk [vmem:[%s14989_s5 + $0x2] sm:$0x3] %vm14958_vm11, %v8844_v4 }
 0xc82   :  { %v9988_v47 = vpop.eup %9987 }
 0xc83   :  { %v9990_v14 = vpop.eup %9989  ;;  %v8765_v5 = vmul.f32 9.0, %v9988_v47 }
 0xc84   :  { %v8767_v49 = vmul.f32 9.0, %v9990_v14 }
 0xc85   :  { %v8770_v33 = vmul.f32 %v8765_v5, %v8754_v7 }
 0xc86   :  { %v8771_v38 = vmul.f32 %v8767_v49, %v8755_v31 }
 0xc87   :  { %v8783_v25 = vrot.slane %v8770_v33, %v8774_v40 }
 0xc88   :  { %v8787_v11 = vrot.slane %v8771_v38, %v8774_v40 }
 0xc89   :  { %v8790_v48 = vmul.f32 %v8783_v25, %v8746_v20 }
 0xc8a   :  { %v8791_v39 = vmul.f32 %v8787_v11, %v8747_v8 }
 0xc8b   :  { %v8798_v24 = vadd.f32 %v8794_v34, %v8790_v48 }
 0xc8c   :  { %v8799_v9 = vadd.f32 %v8794_v34, %v8791_v39 }
 0xc8d   :  { %8884 = vst [vmem:[%s14990_s4 + $0x10] sm:$0xff] %v8798_v24 }
 0xc8e   :  { %8885 = vst [vmem:[%s14990_s4 + $0x18] sm:$0xff] %v8799_v9 }

</bundles_post_ra>
